<compile_context>
chip_gen: v6e
topology: v6e:2x2x1
jax: 0.10.0
libtpu: 0.0.40
codegen_flags: <defaults>
</compile_context>

<pallas_src>
import functools

import jax
import jax.numpy as jnp
from jax.experimental import pallas as pl
from jax.experimental.pallas import tpu as pltpu

_S3 = 7 * 7        # conv3 output spatial size (4x4 input -> 5 -> 6 -> 7)
_BP = 8            # batch padded to one sublane tile


def _conv_stage(x_bf16, w_ref, b_ref, out_ref, h, w):
    """Conv2d(kernel=2, stride=1, padding=1) + ReLU, tap-accumulated on the MXU.

    x_bf16 : (h*w*8, Cin) bf16 activation, rows = (y*w + x)*8 + b
    w_ref  : (4, Cin, Cout) bf16 tap weights, tap index t = dy*2 + dx
    b_ref  : (1, Cout) f32 bias
    out_ref: ((h+1)*(w+1)*8, Cout) f32 VMEM scratch, written in place
    """
    ho, wo = h + 1, w + 1
    del ho  # (documented: output spatial = (h+1, w+1))
    out_ref[...] = jnp.broadcast_to(b_ref[...], out_ref.shape)
    for dy in range(2):
        for dx in range(2):
            tap = jnp.dot(x_bf16, w_ref[dy * 2 + dx],
                          preferred_element_type=jnp.float32)
            oy0, ox0 = 1 - dy, 1 - dx            # output coord hit by input (0, 0)
            for iy in range(h):                  # one 8-aligned slab per input row
                src = iy * w * _BP
                dst = ((iy + oy0) * wo + ox0) * _BP
                out_ref[dst:dst + w * _BP, :] += tap[src:src + w * _BP, :]
    out_ref[...] = jnp.maximum(out_ref[...], 0.0)


def _pursuit_kernel(x_ref, w1_ref, b1_ref, w2_ref, b2_ref, w3_ref, b3_ref,
                    wfc_ref, bfc_ref, wh_ref, bh_ref,
                    out_ref, a1_ref, a2_ref, a3_ref):
    _conv_stage(x_ref[...], w1_ref, b1_ref, a1_ref, 4, 4)                          # (200, 32)
    _conv_stage(a1_ref[...].astype(jnp.bfloat16), w2_ref, b2_ref, a2_ref, 5, 5)    # (288, 64)
    _conv_stage(a2_ref[...].astype(jnp.bfloat16), w3_ref, b3_ref, a3_ref, 6, 6)    # (392, 64)

    # Flatten (49 spatial, 8 batch, 64 ch) -> (8, 3136) with column index (s, c);
    # the matching NCHW-flatten permutation is pre-folded into wfc offline.
    flat = jnp.concatenate(
        [a3_ref[s * _BP:(s + 1) * _BP, :] for s in range(_S3)], axis=1)
    mo = jnp.dot(flat.astype(jnp.bfloat16), wfc_ref[...],
                 preferred_element_type=jnp.float32) + bfc_ref[...]
    mo = jnp.maximum(mo, 0.0)                                                      # (8, 512)
    head = jnp.dot(mo.astype(jnp.bfloat16), wh_ref[...],
                   preferred_element_type=jnp.float32) + bh_ref[...]               # (8, 128)
    out_ref[...] = head


def _fused_forward(x_rows, p):
    nh = p["wh"].shape[1]
    vmem = lambda: pl.BlockSpec(memory_space=pltpu.MemorySpace.VMEM)
    return pl.pallas_call(
        _pursuit_kernel,
        out_shape=jax.ShapeDtypeStruct((_BP, nh), jnp.float32),
        in_specs=[vmem() for _ in range(11)],
        out_specs=vmem(),
        scratch_shapes=[
            pltpu.VMEM((25 * _BP, 32), jnp.float32),   # conv1 activation
            pltpu.VMEM((36 * _BP, 64), jnp.float32),   # conv2 activation
            pltpu.VMEM((_S3 * _BP, 64), jnp.float32),  # conv3 activation
        ],
        cost_estimate=pl.CostEstimate(flops=40_000_000, transcendentals=0,
                                      bytes_accessed=3_600_000),
    )(x_rows, p["w1"], p["b1"], p["w2"], p["b2"], p["w3"], p["b3"],
      p["wfc"], p["bfc"], p["wh"], p["bh"])


def prepare_params(raw):
    """One-time offline repack of torch-layout weights into kernel layout (bf16)."""
    def taps(w):  # (Cout, Cin, 2, 2) -> (4, Cin, Cout), tap t = dy*2 + dx
        cout, cin = w.shape[0], w.shape[1]
        return jnp.transpose(w, (2, 3, 1, 0)).reshape(4, cin, cout).astype(jnp.bfloat16)

    wfc = raw["wfc"]                                              # (512, 3136), col = c*49 + s
    wfc = jnp.transpose(wfc.reshape(512, 64, _S3), (2, 1, 0))     # (s, c, n)
    wfc = wfc.reshape(_S3 * 64, 512).astype(jnp.bfloat16)         # row = s*64 + c

    a = raw["wp"].shape[0]
    nh = pl.cdiv(a + 1, 128) * 128                                # lane-padded fused head
    wh = jnp.zeros((512, nh), jnp.float32)
    wh = wh.at[:, :a].set(raw["wp"].T).at[:, a].set(raw["wv"][0])
    bh = jnp.zeros((nh,), jnp.float32).at[:a].set(raw["bp"]).at[a].set(raw["bv"][0])

    return dict(
        w1=taps(raw["w1"]), b1=raw["b1"].reshape(1, -1),
        w2=taps(raw["w2"]), b2=raw["b2"].reshape(1, -1),
        w3=taps(raw["w3"]), b3=raw["b3"].reshape(1, -1),
        wfc=wfc, bfc=raw["bfc"].reshape(1, -1),
        wh=wh.astype(jnp.bfloat16), bh=bh.reshape(1, -1),
    )


def pursuit_cnn_forward(params, obs_nhwc, *, num_outputs):
    """Returns (policy_logits, value) == (policy_fn(model_out), value_function())."""
    B, H, W, C = obs_nhwc.shape
    assert (H, W, C) == (4, 4, 3) and B <= _BP, obs_nhwc.shape
    # Tiny input prep (<= 1.5 KB): NHWC -> rows (y*W + x)*8 + b, bf16.
    x = obs_nhwc.reshape(B, H * W, C).transpose(1, 0, 2)          # (16, B, 3)
    x = jnp.pad(x, ((0, 0), (0, _BP - B), (0, 0)))
    x = x.reshape(H * W * _BP, C).astype(jnp.bfloat16)
    head = _fused_forward(x, params)                              # (8, 128) f32
    logits = head[:B, :num_outputs]
    value = head[:B, num_outputs]                                 # value_function() flattens
    return logits, value


def init_params(key, num_outputs):
    """Deterministic synthetic init with torch-style (out, in, ...) layouts."""
    def u(k, shape, fan_in):
        bound = 1.0 / jnp.sqrt(jnp.float32(fan_in))
        return jax.random.uniform(k, shape, jnp.float32, -bound, bound)

    ks = jax.random.split(key, 12)
    return dict(
        w1=u(ks[0], (32, 3, 2, 2), 3 * 4),    b1=u(ks[1], (32,), 3 * 4),
        w2=u(ks[2], (64, 32, 2, 2), 32 * 4),  b2=u(ks[3], (64,), 32 * 4),
        w3=u(ks[4], (64, 64, 2, 2), 64 * 4),  b3=u(ks[5], (64,), 64 * 4),
        wfc=u(ks[6], (512, 3136), 3136),      bfc=u(ks[7], (512,), 3136),
        # TODO(synk): the reference declares policy_fn/value_fn with
        # in_features=3136, but forward() feeds them the 512-dim model output;
        # heads are built with in_features=512 so the declared forward runs.
        wp=u(ks[8], (num_outputs, 512), 512), bp=u(ks[9], (num_outputs,), 512),
        wv=u(ks[10], (1, 512), 512),          bv=u(ks[11], (1,), 512),
    )


def _reference_forward(raw, obs):
    """Pure-JAX f32 reference with torch semantics (independent of the kernel path)."""
    def conv(x, w, b):
        y = jax.lax.conv_general_dilated(
            x, jnp.transpose(w, (2, 3, 1, 0)), (1, 1), ((1, 1), (1, 1)),
            dimension_numbers=("NHWC", "HWIO", "NHWC"))
        return jax.nn.relu(y + b)

    h = conv(obs, raw["w1"], raw["b1"])
    h = conv(h, raw["w2"], raw["b2"])
    h = conv(h, raw["w3"], raw["b3"])
    flat = jnp.transpose(h, (0, 3, 1, 2)).reshape(obs.shape[0], -1)   # NCHW flatten
    mo = jax.nn.relu(flat @ raw["wfc"].T + raw["bfc"])
    logits = mo @ raw["wp"].T + raw["bp"]
    value = (mo @ raw["wv"].T + raw["bv"]).reshape(-1)
    return logits, value


if __name__ == "__main__":
    import numpy as np

    key = jax.random.PRNGKey(0)
    pkey, okey = jax.random.split(key)

    num_outputs = 5                                       # pursuit action space
    raw = init_params(pkey, num_outputs)
    params = prepare_params(raw)                          # one-time weight repack
    obs = jax.random.uniform(okey, (2, 4, 4, 3), jnp.float32)  # NHWC, 4x4 -> 3136 feats

    fwd = jax.jit(functools.partial(pursuit_cnn_forward, num_outputs=num_outputs))
    logits, value = fwd(params, obs)
    jax.block_until_ready((logits, value))

    assert logits.shape == (2, num_outputs), logits.shape
    assert value.shape == (2,), value.shape
    assert bool(jnp.all(jnp.isfinite(logits))) and bool(jnp.all(jnp.isfinite(value)))

    ref_logits, ref_value = _reference_forward(raw, obs)
    np.testing.assert_allclose(np.asarray(logits), np.asarray(ref_logits),
                               rtol=5e-2, atol=1e-2)
    np.testing.assert_allclose(np.asarray(value), np.asarray(ref_value),
                               rtol=5e-2, atol=1e-2)
    print("KERNEL_OK")
</pallas_src>

<mosaic_0001>
module attributes {stable_mosaic.version = 11 : i64} {
  func.func @_pursuit_kernel(%arg0: memref<128x3xbf16, #tpu.memory_space<vmem>>, %arg1: memref<4x3x32xbf16, #tpu.memory_space<vmem>>, %arg2: memref<1x32xf32, #tpu.memory_space<vmem>>, %arg3: memref<4x32x64xbf16, #tpu.memory_space<vmem>>, %arg4: memref<1x64xf32, #tpu.memory_space<vmem>>, %arg5: memref<4x64x64xbf16, #tpu.memory_space<vmem>>, %arg6: memref<1x64xf32, #tpu.memory_space<vmem>>, %arg7: memref<3136x512xbf16, #tpu.memory_space<vmem>>, %arg8: memref<1x512xf32, #tpu.memory_space<vmem>>, %arg9: memref<512x128xbf16, #tpu.memory_space<vmem>>, %arg10: memref<1x128xf32, #tpu.memory_space<vmem>>, %arg11: memref<8x128xf32, #tpu.memory_space<vmem>>, %arg12: memref<200x32xf32, #tpu.memory_space<vmem>>, %arg13: memref<288x64xf32, #tpu.memory_space<vmem>>, %arg14: memref<392x64xf32, #tpu.memory_space<vmem>>) attributes {dimension_semantics = [], scalar_prefetch = 0 : i64, scratch_operands = 3 : i64, tpu.core_type = #tpu.core_type<tc>} {
    %c0 = arith.constant 0 : index
    %c0_0 = arith.constant 0 : index
    %0 = vector.load %arg0[%c0, %c0_0] : memref<128x3xbf16, #tpu.memory_space<vmem>>, vector<128x3xbf16>
    %c0_1 = arith.constant 0 : index
    %c0_2 = arith.constant 0 : index
    %1 = vector.load %arg2[%c0_1, %c0_2] : memref<1x32xf32, #tpu.memory_space<vmem>>, vector<1x32xf32>
    %2 = vector.shape_cast %1 : vector<1x32xf32> to vector<1x32xf32>
    %3 = vector.broadcast %2 : vector<1x32xf32> to vector<200x32xf32>
    %c0_3 = arith.constant 0 : index
    %c0_4 = arith.constant 0 : index
    %4 = vector.load %arg12[%c0_3, %c0_4] : memref<200x32xf32, #tpu.memory_space<vmem>>, vector<200x32xf32>
    tpu.vector_store %arg12[%c0_3, %c0_4], %3 {strides = array<i32>} : memref<200x32xf32, #tpu.memory_space<vmem>>, vector<200x32xf32>,
    %c0_5 = arith.constant 0 : index
    %c0_6 = arith.constant 0 : index
    %c0_7 = arith.constant 0 : index
    %5 = vector.load %arg1[%c0_5, %c0_6, %c0_7] : memref<4x3x32xbf16, #tpu.memory_space<vmem>>, vector<1x3x32xbf16>
    %6 = vector.shape_cast %5 : vector<1x3x32xbf16> to vector<3x32xbf16>
    %cst = arith.constant dense<0.000000e+00> : vector<128x32xf32>
    %7 = tpu.matmul %0, %6, %cst {dimension_numbers = #tpu.dot_dimension_numbers<[1], [0], [0], [1], [0, 0, 1, 1], [], []>} : vector<128x3xbf16>, vector<3x32xbf16>, vector<128x32xf32> -> vector<128x32xf32>
    %c48 = arith.constant 48 : index
    %c0_8 = arith.constant 0 : index
    %8 = vector.load %arg12[%c48, %c0_8] : memref<200x32xf32, #tpu.memory_space<vmem>>, vector<32x32xf32>
    %9 = vector.extract_strided_slice %7 {offsets = [0, 0], sizes = [32, 32], strides = [1, 1]} : vector<128x32xf32> to vector<32x32xf32>
    %10 = arith.addf %8, %9 : vector<32x32xf32>
    %c48_9 = arith.constant 48 : index
    %c0_10 = arith.constant 0 : index
    %11 = vector.load %arg12[%c48_9, %c0_10] : memref<200x32xf32, #tpu.memory_space<vmem>>, vector<32x32xf32>
    tpu.vector_store %arg12[%c48_9, %c0_10], %10 {strides = array<i32>} : memref<200x32xf32, #tpu.memory_space<vmem>>, vector<32x32xf32>,
    %c88 = arith.constant 88 : index
    %c0_11 = arith.constant 0 : index
    %12 = vector.load %arg12[%c88, %c0_11] : memref<200x32xf32, #tpu.memory_space<vmem>>, vector<32x32xf32>
    %13 = vector.extract_strided_slice %7 {offsets = [32, 0], sizes = [32, 32], strides = [1, 1]} : vector<128x32xf32> to vector<32x32xf32>
    %14 = arith.addf %12, %13 : vector<32x32xf32>
    %c88_12 = arith.constant 88 : index
    %c0_13 = arith.constant 0 : index
    %15 = vector.load %arg12[%c88_12, %c0_13] : memref<200x32xf32, #tpu.memory_space<vmem>>, vector<32x32xf32>
    tpu.vector_store %arg12[%c88_12, %c0_13], %14 {strides = array<i32>} : memref<200x32xf32, #tpu.memory_space<vmem>>, vector<32x32xf32>,
    %c128 = arith.constant 128 : index
    %c0_14 = arith.constant 0 : index
    %16 = vector.load %arg12[%c128, %c0_14] : memref<200x32xf32, #tpu.memory_space<vmem>>, vector<32x32xf32>
    %17 = vector.extract_strided_slice %7 {offsets = [64, 0], sizes = [32, 32], strides = [1, 1]} : vector<128x32xf32> to vector<32x32xf32>
    %18 = arith.addf %16, %17 : vector<32x32xf32>
    %c128_15 = arith.constant 128 : index
    %c0_16 = arith.constant 0 : index
    %19 = vector.load %arg12[%c128_15, %c0_16] : memref<200x32xf32, #tpu.memory_space<vmem>>, vector<32x32xf32>
    tpu.vector_store %arg12[%c128_15, %c0_16], %18 {strides = array<i32>} : memref<200x32xf32, #tpu.memory_space<vmem>>, vector<32x32xf32>,
    %c168 = arith.constant 168 : index
    %c0_17 = arith.constant 0 : index
    %20 = vector.load %arg12[%c168, %c0_17] : memref<200x32xf32, #tpu.memory_space<vmem>>, vector<32x32xf32>
    %21 = vector.extract_strided_slice %7 {offsets = [96, 0], sizes = [32, 32], strides = [1, 1]} : vector<128x32xf32> to vector<32x32xf32>
    %22 = arith.addf %20, %21 : vector<32x32xf32>
    %c168_18 = arith.constant 168 : index
    %c0_19 = arith.constant 0 : index
    %23 = vector.load %arg12[%c168_18, %c0_19] : memref<200x32xf32, #tpu.memory_space<vmem>>, vector<32x32xf32>
    tpu.vector_store %arg12[%c168_18, %c0_19], %22 {strides = array<i32>} : memref<200x32xf32, #tpu.memory_space<vmem>>, vector<32x32xf32>,
    %c1 = arith.constant 1 : index
    %c0_20 = arith.constant 0 : index
    %c0_21 = arith.constant 0 : index
    %24 = vector.load %arg1[%c1, %c0_20, %c0_21] : memref<4x3x32xbf16, #tpu.memory_space<vmem>>, vector<1x3x32xbf16>
    %25 = vector.shape_cast %24 : vector<1x3x32xbf16> to vector<3x32xbf16>
    %cst_22 = arith.constant dense<0.000000e+00> : vector<128x32xf32>
    %26 = tpu.matmul %0, %25, %cst_22 {dimension_numbers = #tpu.dot_dimension_numbers<[1], [0], [0], [1], [0, 0, 1, 1], [], []>} : vector<128x3xbf16>, vector<3x32xbf16>, vector<128x32xf32> -> vector<128x32xf32>
    %c40 = arith.constant 40 : index
    %c0_23 = arith.constant 0 : index
    %27 = vector.load %arg12[%c40, %c0_23] : memref<200x32xf32, #tpu.memory_space<vmem>>, vector<32x32xf32>
    %28 = vector.extract_strided_slice %26 {offsets = [0, 0], sizes = [32, 32], strides = [1, 1]} : vector<128x32xf32> to vector<32x32xf32>
    %29 = arith.addf %27, %28 : vector<32x32xf32>
    %c40_24 = arith.constant 40 : index
    %c0_25 = arith.constant 0 : index
    %30 = vector.load %arg12[%c40_24, %c0_25] : memref<200x32xf32, #tpu.memory_space<vmem>>, vector<32x32xf32>
    tpu.vector_store %arg12[%c40_24, %c0_25], %29 {strides = array<i32>} : memref<200x32xf32, #tpu.memory_space<vmem>>, vector<32x32xf32>,
    %c80 = arith.constant 80 : index
    %c0_26 = arith.constant 0 : index
    %31 = vector.load %arg12[%c80, %c0_26] : memref<200x32xf32, #tpu.memory_space<vmem>>, vector<32x32xf32>
    %32 = vector.extract_strided_slice %26 {offsets = [32, 0], sizes = [32, 32], strides = [1, 1]} : vector<128x32xf32> to vector<32x32xf32>
    %33 = arith.addf %31, %32 : vector<32x32xf32>
    %c80_27 = arith.constant 80 : index
    %c0_28 = arith.constant 0 : index
    %34 = vector.load %arg12[%c80_27, %c0_28] : memref<200x32xf32, #tpu.memory_space<vmem>>, vector<32x32xf32>
    tpu.vector_store %arg12[%c80_27, %c0_28], %33 {strides = array<i32>} : memref<200x32xf32, #tpu.memory_space<vmem>>, vector<32x32xf32>,
    %c120 = arith.constant 120 : index
    %c0_29 = arith.constant 0 : index
    %35 = vector.load %arg12[%c120, %c0_29] : memref<200x32xf32, #tpu.memory_space<vmem>>, vector<32x32xf32>
    %36 = vector.extract_strided_slice %26 {offsets = [64, 0], sizes = [32, 32], strides = [1, 1]} : vector<128x32xf32> to vector<32x32xf32>
    %37 = arith.addf %35, %36 : vector<32x32xf32>
    %c120_30 = arith.constant 120 : index
    %c0_31 = arith.constant 0 : index
    %38 = vector.load %arg12[%c120_30, %c0_31] : memref<200x32xf32, #tpu.memory_space<vmem>>, vector<32x32xf32>
    tpu.vector_store %arg12[%c120_30, %c0_31], %37 {strides = array<i32>} : memref<200x32xf32, #tpu.memory_space<vmem>>, vector<32x32xf32>,
    %c160 = arith.constant 160 : index
    %c0_32 = arith.constant 0 : index
    %39 = vector.load %arg12[%c160, %c0_32] : memref<200x32xf32, #tpu.memory_space<vmem>>, vector<32x32xf32>
    %40 = vector.extract_strided_slice %26 {offsets = [96, 0], sizes = [32, 32], strides = [1, 1]} : vector<128x32xf32> to vector<32x32xf32>
    %41 = arith.addf %39, %40 : vector<32x32xf32>
    %c160_33 = arith.constant 160 : index
    %c0_34 = arith.constant 0 : index
    %42 = vector.load %arg12[%c160_33, %c0_34] : memref<200x32xf32, #tpu.memory_space<vmem>>, vector<32x32xf32>
    tpu.vector_store %arg12[%c160_33, %c0_34], %41 {strides = array<i32>} : memref<200x32xf32, #tpu.memory_space<vmem>>, vector<32x32xf32>,
    %c2 = arith.constant 2 : index
    %c0_35 = arith.constant 0 : index
    %c0_36 = arith.constant 0 : index
    %43 = vector.load %arg1[%c2, %c0_35, %c0_36] : memref<4x3x32xbf16, #tpu.memory_space<vmem>>, vector<1x3x32xbf16>
    %44 = vector.shape_cast %43 : vector<1x3x32xbf16> to vector<3x32xbf16>
    %cst_37 = arith.constant dense<0.000000e+00> : vector<128x32xf32>
    %45 = tpu.matmul %0, %44, %cst_37 {dimension_numbers = #tpu.dot_dimension_numbers<[1], [0], [0], [1], [0, 0, 1, 1], [], []>} : vector<128x3xbf16>, vector<3x32xbf16>, vector<128x32xf32> -> vector<128x32xf32>
    %c8 = arith.constant 8 : index
    %c0_38 = arith.constant 0 : index
    %46 = vector.load %arg12[%c8, %c0_38] : memref<200x32xf32, #tpu.memory_space<vmem>>, vector<32x32xf32>
    %47 = vector.extract_strided_slice %45 {offsets = [0, 0], sizes = [32, 32], strides = [1, 1]} : vector<128x32xf32> to vector<32x32xf32>
    %48 = arith.addf %46, %47 : vector<32x32xf32>
    %c8_39 = arith.constant 8 : index
    %c0_40 = arith.constant 0 : index
    %49 = vector.load %arg12[%c8_39, %c0_40] : memref<200x32xf32, #tpu.memory_space<vmem>>, vector<32x32xf32>
    tpu.vector_store %arg12[%c8_39, %c0_40], %48 {strides = array<i32>} : memref<200x32xf32, #tpu.memory_space<vmem>>, vector<32x32xf32>,
    %c48_41 = arith.constant 48 : index
    %c0_42 = arith.constant 0 : index
    %50 = vector.load %arg12[%c48_41, %c0_42] : memref<200x32xf32, #tpu.memory_space<vmem>>, vector<32x32xf32>
    %51 = vector.extract_strided_slice %45 {offsets = [32, 0], sizes = [32, 32], strides = [1, 1]} : vector<128x32xf32> to vector<32x32xf32>
    %52 = arith.addf %50, %51 : vector<32x32xf32>
    %c48_43 = arith.constant 48 : index
    %c0_44 = arith.constant 0 : index
    %53 = vector.load %arg12[%c48_43, %c0_44] : memref<200x32xf32, #tpu.memory_space<vmem>>, vector<32x32xf32>
    tpu.vector_store %arg12[%c48_43, %c0_44], %52 {strides = array<i32>} : memref<200x32xf32, #tpu.memory_space<vmem>>, vector<32x32xf32>,
    %c88_45 = arith.constant 88 : index
    %c0_46 = arith.constant 0 : index
    %54 = vector.load %arg12[%c88_45, %c0_46] : memref<200x32xf32, #tpu.memory_space<vmem>>, vector<32x32xf32>
    %55 = vector.extract_strided_slice %45 {offsets = [64, 0], sizes = [32, 32], strides = [1, 1]} : vector<128x32xf32> to vector<32x32xf32>
    %56 = arith.addf %54, %55 : vector<32x32xf32>
    %c88_47 = arith.constant 88 : index
    %c0_48 = arith.constant 0 : index
    %57 = vector.load %arg12[%c88_47, %c0_48] : memref<200x32xf32, #tpu.memory_space<vmem>>, vector<32x32xf32>
    tpu.vector_store %arg12[%c88_47, %c0_48], %56 {strides = array<i32>} : memref<200x32xf32, #tpu.memory_space<vmem>>, vector<32x32xf32>,
    %c128_49 = arith.constant 128 : index
    %c0_50 = arith.constant 0 : index
    %58 = vector.load %arg12[%c128_49, %c0_50] : memref<200x32xf32, #tpu.memory_space<vmem>>, vector<32x32xf32>
    %59 = vector.extract_strided_slice %45 {offsets = [96, 0], sizes = [32, 32], strides = [1, 1]} : vector<128x32xf32> to vector<32x32xf32>
    %60 = arith.addf %58, %59 : vector<32x32xf32>
    %c128_51 = arith.constant 128 : index
    %c0_52 = arith.constant 0 : index
    %61 = vector.load %arg12[%c128_51, %c0_52] : memref<200x32xf32, #tpu.memory_space<vmem>>, vector<32x32xf32>
    tpu.vector_store %arg12[%c128_51, %c0_52], %60 {strides = array<i32>} : memref<200x32xf32, #tpu.memory_space<vmem>>, vector<32x32xf32>,
    %c3 = arith.constant 3 : index
    %c0_53 = arith.constant 0 : index
    %c0_54 = arith.constant 0 : index
    %62 = vector.load %arg1[%c3, %c0_53, %c0_54] : memref<4x3x32xbf16, #tpu.memory_space<vmem>>, vector<1x3x32xbf16>
    %63 = vector.shape_cast %62 : vector<1x3x32xbf16> to vector<3x32xbf16>
    %cst_55 = arith.constant dense<0.000000e+00> : vector<128x32xf32>
    %64 = tpu.matmul %0, %63, %cst_55 {dimension_numbers = #tpu.dot_dimension_numbers<[1], [0], [0], [1], [0, 0, 1, 1], [], []>} : vector<128x3xbf16>, vector<3x32xbf16>, vector<128x32xf32> -> vector<128x32xf32>
    %c0_56 = arith.constant 0 : index
    %c0_57 = arith.constant 0 : index
    %65 = vector.load %arg12[%c0_56, %c0_57] : memref<200x32xf32, #tpu.memory_space<vmem>>, vector<32x32xf32>
    %66 = vector.extract_strided_slice %64 {offsets = [0, 0], sizes = [32, 32], strides = [1, 1]} : vector<128x32xf32> to vector<32x32xf32>
    %67 = arith.addf %65, %66 : vector<32x32xf32>
    %c0_58 = arith.constant 0 : index
    %c0_59 = arith.constant 0 : index
    %68 = vector.load %arg12[%c0_58, %c0_59] : memref<200x32xf32, #tpu.memory_space<vmem>>, vector<32x32xf32>
    tpu.vector_store %arg12[%c0_58, %c0_59], %67 {strides = array<i32>} : memref<200x32xf32, #tpu.memory_space<vmem>>, vector<32x32xf32>,
    %c40_60 = arith.constant 40 : index
    %c0_61 = arith.constant 0 : index
    %69 = vector.load %arg12[%c40_60, %c0_61] : memref<200x32xf32, #tpu.memory_space<vmem>>, vector<32x32xf32>
    %70 = vector.extract_strided_slice %64 {offsets = [32, 0], sizes = [32, 32], strides = [1, 1]} : vector<128x32xf32> to vector<32x32xf32>
    %71 = arith.addf %69, %70 : vector<32x32xf32>
    %c40_62 = arith.constant 40 : index
    %c0_63 = arith.constant 0 : index
    %72 = vector.load %arg12[%c40_62, %c0_63] : memref<200x32xf32, #tpu.memory_space<vmem>>, vector<32x32xf32>
    tpu.vector_store %arg12[%c40_62, %c0_63], %71 {strides = array<i32>} : memref<200x32xf32, #tpu.memory_space<vmem>>, vector<32x32xf32>,
    %c80_64 = arith.constant 80 : index
    %c0_65 = arith.constant 0 : index
    %73 = vector.load %arg12[%c80_64, %c0_65] : memref<200x32xf32, #tpu.memory_space<vmem>>, vector<32x32xf32>
    %74 = vector.extract_strided_slice %64 {offsets = [64, 0], sizes = [32, 32], strides = [1, 1]} : vector<128x32xf32> to vector<32x32xf32>
    %75 = arith.addf %73, %74 : vector<32x32xf32>
    %c80_66 = arith.constant 80 : index
    %c0_67 = arith.constant 0 : index
    %76 = vector.load %arg12[%c80_66, %c0_67] : memref<200x32xf32, #tpu.memory_space<vmem>>, vector<32x32xf32>
    tpu.vector_store %arg12[%c80_66, %c0_67], %75 {strides = array<i32>} : memref<200x32xf32, #tpu.memory_space<vmem>>, vector<32x32xf32>,
    %c120_68 = arith.constant 120 : index
    %c0_69 = arith.constant 0 : index
    %77 = vector.load %arg12[%c120_68, %c0_69] : memref<200x32xf32, #tpu.memory_space<vmem>>, vector<32x32xf32>
    %78 = vector.extract_strided_slice %64 {offsets = [96, 0], sizes = [32, 32], strides = [1, 1]} : vector<128x32xf32> to vector<32x32xf32>
    %79 = arith.addf %77, %78 : vector<32x32xf32>
    %c120_70 = arith.constant 120 : index
    %c0_71 = arith.constant 0 : index
    %80 = vector.load %arg12[%c120_70, %c0_71] : memref<200x32xf32, #tpu.memory_space<vmem>>, vector<32x32xf32>
    tpu.vector_store %arg12[%c120_70, %c0_71], %79 {strides = array<i32>} : memref<200x32xf32, #tpu.memory_space<vmem>>, vector<32x32xf32>,
    %c0_72 = arith.constant 0 : index
    %c0_73 = arith.constant 0 : index
    %81 = vector.load %arg12[%c0_72, %c0_73] : memref<200x32xf32, #tpu.memory_space<vmem>>, vector<200x32xf32>
    %cst_74 = arith.constant 0.000000e+00 : f32
    %82 = vector.broadcast %cst_74 : f32 to vector<200x32xf32>
    %83 = arith.maximumf %81, %82 : vector<200x32xf32>
    %c0_75 = arith.constant 0 : index
    %c0_76 = arith.constant 0 : index
    %84 = vector.load %arg12[%c0_75, %c0_76] : memref<200x32xf32, #tpu.memory_space<vmem>>, vector<200x32xf32>
    tpu.vector_store %arg12[%c0_75, %c0_76], %83 {strides = array<i32>} : memref<200x32xf32, #tpu.memory_space<vmem>>, vector<200x32xf32>,
    %c0_77 = arith.constant 0 : index
    %c0_78 = arith.constant 0 : index
    %85 = vector.load %arg12[%c0_77, %c0_78] : memref<200x32xf32, #tpu.memory_space<vmem>>, vector<200x32xf32>
    %86 = arith.truncf %85 : vector<200x32xf32> to vector<200x32xbf16>
    %c0_79 = arith.constant 0 : index
    %c0_80 = arith.constant 0 : index
    %87 = vector.load %arg4[%c0_79, %c0_80] : memref<1x64xf32, #tpu.memory_space<vmem>>, vector<1x64xf32>
    %88 = vector.shape_cast %87 : vector<1x64xf32> to vector<1x64xf32>
    %89 = vector.broadcast %88 : vector<1x64xf32> to vector<288x64xf32>
    %c0_81 = arith.constant 0 : index
    %c0_82 = arith.constant 0 : index
    %90 = vector.load %arg13[%c0_81, %c0_82] : memref<288x64xf32, #tpu.memory_space<vmem>>, vector<288x64xf32>
    tpu.vector_store %arg13[%c0_81, %c0_82], %89 {strides = array<i32>} : memref<288x64xf32, #tpu.memory_space<vmem>>, vector<288x64xf32>,
    %c0_83 = arith.constant 0 : index
    %c0_84 = arith.constant 0 : index
    %c0_85 = arith.constant 0 : index
    %91 = vector.load %arg3[%c0_83, %c0_84, %c0_85] : memref<4x32x64xbf16, #tpu.memory_space<vmem>>, vector<1x32x64xbf16>
    %92 = vector.shape_cast %91 : vector<1x32x64xbf16> to vector<32x64xbf16>
    %cst_86 = arith.constant dense<0.000000e+00> : vector<200x64xf32>
    %93 = tpu.matmul %86, %92, %cst_86 {dimension_numbers = #tpu.dot_dimension_numbers<[1], [0], [0], [1], [0, 0, 1, 1], [], []>} : vector<200x32xbf16>, vector<32x64xbf16>, vector<200x64xf32> -> vector<200x64xf32>
    %c56 = arith.constant 56 : index
    %c0_87 = arith.constant 0 : index
    %94 = vector.load %arg13[%c56, %c0_87] : memref<288x64xf32, #tpu.memory_space<vmem>>, vector<40x64xf32>
    %95 = vector.extract_strided_slice %93 {offsets = [0, 0], sizes = [40, 64], strides = [1, 1]} : vector<200x64xf32> to vector<40x64xf32>
    %96 = arith.addf %94, %95 : vector<40x64xf32>
    %c56_88 = arith.constant 56 : index
    %c0_89 = arith.constant 0 : index
    %97 = vector.load %arg13[%c56_88, %c0_89] : memref<288x64xf32, #tpu.memory_space<vmem>>, vector<40x64xf32>
    tpu.vector_store %arg13[%c56_88, %c0_89], %96 {strides = array<i32>} : memref<288x64xf32, #tpu.memory_space<vmem>>, vector<40x64xf32>,
    %c104 = arith.constant 104 : index
    %c0_90 = arith.constant 0 : index
    %98 = vector.load %arg13[%c104, %c0_90] : memref<288x64xf32, #tpu.memory_space<vmem>>, vector<40x64xf32>
    %99 = vector.extract_strided_slice %93 {offsets = [40, 0], sizes = [40, 64], strides = [1, 1]} : vector<200x64xf32> to vector<40x64xf32>
    %100 = arith.addf %98, %99 : vector<40x64xf32>
    %c104_91 = arith.constant 104 : index
    %c0_92 = arith.constant 0 : index
    %101 = vector.load %arg13[%c104_91, %c0_92] : memref<288x64xf32, #tpu.memory_space<vmem>>, vector<40x64xf32>
    tpu.vector_store %arg13[%c104_91, %c0_92], %100 {strides = array<i32>} : memref<288x64xf32, #tpu.memory_space<vmem>>, vector<40x64xf32>,
    %c152 = arith.constant 152 : index
    %c0_93 = arith.constant 0 : index
    %102 = vector.load %arg13[%c152, %c0_93] : memref<288x64xf32, #tpu.memory_space<vmem>>, vector<40x64xf32>
    %103 = vector.extract_strided_slice %93 {offsets = [80, 0], sizes = [40, 64], strides = [1, 1]} : vector<200x64xf32> to vector<40x64xf32>
    %104 = arith.addf %102, %103 : vector<40x64xf32>
    %c152_94 = arith.constant 152 : index
    %c0_95 = arith.constant 0 : index
    %105 = vector.load %arg13[%c152_94, %c0_95] : memref<288x64xf32, #tpu.memory_space<vmem>>, vector<40x64xf32>
    tpu.vector_store %arg13[%c152_94, %c0_95], %104 {strides = array<i32>} : memref<288x64xf32, #tpu.memory_space<vmem>>, vector<40x64xf32>,
    %c200 = arith.constant 200 : index
    %c0_96 = arith.constant 0 : index
    %106 = vector.load %arg13[%c200, %c0_96] : memref<288x64xf32, #tpu.memory_space<vmem>>, vector<40x64xf32>
    %107 = vector.extract_strided_slice %93 {offsets = [120, 0], sizes = [40, 64], strides = [1, 1]} : vector<200x64xf32> to vector<40x64xf32>
    %108 = arith.addf %106, %107 : vector<40x64xf32>
    %c200_97 = arith.constant 200 : index
    %c0_98 = arith.constant 0 : index
    %109 = vector.load %arg13[%c200_97, %c0_98] : memref<288x64xf32, #tpu.memory_space<vmem>>, vector<40x64xf32>
    tpu.vector_store %arg13[%c200_97, %c0_98], %108 {strides = array<i32>} : memref<288x64xf32, #tpu.memory_space<vmem>>, vector<40x64xf32>,
    %c248 = arith.constant 248 : index
    %c0_99 = arith.constant 0 : index
    %110 = vector.load %arg13[%c248, %c0_99] : memref<288x64xf32, #tpu.memory_space<vmem>>, vector<40x64xf32>
    %111 = vector.extract_strided_slice %93 {offsets = [160, 0], sizes = [40, 64], strides = [1, 1]} : vector<200x64xf32> to vector<40x64xf32>
    %112 = arith.addf %110, %111 : vector<40x64xf32>
    %c248_100 = arith.constant 248 : index
    %c0_101 = arith.constant 0 : index
    %113 = vector.load %arg13[%c248_100, %c0_101] : memref<288x64xf32, #tpu.memory_space<vmem>>, vector<40x64xf32>
    tpu.vector_store %arg13[%c248_100, %c0_101], %112 {strides = array<i32>} : memref<288x64xf32, #tpu.memory_space<vmem>>, vector<40x64xf32>,
    %c1_102 = arith.constant 1 : index
    %c0_103 = arith.constant 0 : index
    %c0_104 = arith.constant 0 : index
    %114 = vector.load %arg3[%c1_102, %c0_103, %c0_104] : memref<4x32x64xbf16, #tpu.memory_space<vmem>>, vector<1x32x64xbf16>
    %115 = vector.shape_cast %114 : vector<1x32x64xbf16> to vector<32x64xbf16>
    %cst_105 = arith.constant dense<0.000000e+00> : vector<200x64xf32>
    %116 = tpu.matmul %86, %115, %cst_105 {dimension_numbers = #tpu.dot_dimension_numbers<[1], [0], [0], [1], [0, 0, 1, 1], [], []>} : vector<200x32xbf16>, vector<32x64xbf16>, vector<200x64xf32> -> vector<200x64xf32>
    %c48_106 = arith.constant 48 : index
    %c0_107 = arith.constant 0 : index
    %117 = vector.load %arg13[%c48_106, %c0_107] : memref<288x64xf32, #tpu.memory_space<vmem>>, vector<40x64xf32>
    %118 = vector.extract_strided_slice %116 {offsets = [0, 0], sizes = [40, 64], strides = [1, 1]} : vector<200x64xf32> to vector<40x64xf32>
    %119 = arith.addf %117, %118 : vector<40x64xf32>
    %c48_108 = arith.constant 48 : index
    %c0_109 = arith.constant 0 : index
    %120 = vector.load %arg13[%c48_108, %c0_109] : memref<288x64xf32, #tpu.memory_space<vmem>>, vector<40x64xf32>
    tpu.vector_store %arg13[%c48_108, %c0_109], %119 {strides = array<i32>} : memref<288x64xf32, #tpu.memory_space<vmem>>, vector<40x64xf32>,
    %c96 = arith.constant 96 : index
    %c0_110 = arith.constant 0 : index
    %121 = vector.load %arg13[%c96, %c0_110] : memref<288x64xf32, #tpu.memory_space<vmem>>, vector<40x64xf32>
    %122 = vector.extract_strided_slice %116 {offsets = [40, 0], sizes = [40, 64], strides = [1, 1]} : vector<200x64xf32> to vector<40x64xf32>
    %123 = arith.addf %121, %122 : vector<40x64xf32>
    %c96_111 = arith.constant 96 : index
    %c0_112 = arith.constant 0 : index
    %124 = vector.load %arg13[%c96_111, %c0_112] : memref<288x64xf32, #tpu.memory_space<vmem>>, vector<40x64xf32>
    tpu.vector_store %arg13[%c96_111, %c0_112], %123 {strides = array<i32>} : memref<288x64xf32, #tpu.memory_space<vmem>>, vector<40x64xf32>,
    %c144 = arith.constant 144 : index
    %c0_113 = arith.constant 0 : index
    %125 = vector.load %arg13[%c144, %c0_113] : memref<288x64xf32, #tpu.memory_space<vmem>>, vector<40x64xf32>
    %126 = vector.extract_strided_slice %116 {offsets = [80, 0], sizes = [40, 64], strides = [1, 1]} : vector<200x64xf32> to vector<40x64xf32>
    %127 = arith.addf %125, %126 : vector<40x64xf32>
    %c144_114 = arith.constant 144 : index
    %c0_115 = arith.constant 0 : index
    %128 = vector.load %arg13[%c144_114, %c0_115] : memref<288x64xf32, #tpu.memory_space<vmem>>, vector<40x64xf32>
    tpu.vector_store %arg13[%c144_114, %c0_115], %127 {strides = array<i32>} : memref<288x64xf32, #tpu.memory_space<vmem>>, vector<40x64xf32>,
    %c192 = arith.constant 192 : index
    %c0_116 = arith.constant 0 : index
    %129 = vector.load %arg13[%c192, %c0_116] : memref<288x64xf32, #tpu.memory_space<vmem>>, vector<40x64xf32>
    %130 = vector.extract_strided_slice %116 {offsets = [120, 0], sizes = [40, 64], strides = [1, 1]} : vector<200x64xf32> to vector<40x64xf32>
    %131 = arith.addf %129, %130 : vector<40x64xf32>
    %c192_117 = arith.constant 192 : index
    %c0_118 = arith.constant 0 : index
    %132 = vector.load %arg13[%c192_117, %c0_118] : memref<288x64xf32, #tpu.memory_space<vmem>>, vector<40x64xf32>
    tpu.vector_store %arg13[%c192_117, %c0_118], %131 {strides = array<i32>} : memref<288x64xf32, #tpu.memory_space<vmem>>, vector<40x64xf32>,
    %c240 = arith.constant 240 : index
    %c0_119 = arith.constant 0 : index
    %133 = vector.load %arg13[%c240, %c0_119] : memref<288x64xf32, #tpu.memory_space<vmem>>, vector<40x64xf32>
    %134 = vector.extract_strided_slice %116 {offsets = [160, 0], sizes = [40, 64], strides = [1, 1]} : vector<200x64xf32> to vector<40x64xf32>
    %135 = arith.addf %133, %134 : vector<40x64xf32>
    %c240_120 = arith.constant 240 : index
    %c0_121 = arith.constant 0 : index
    %136 = vector.load %arg13[%c240_120, %c0_121] : memref<288x64xf32, #tpu.memory_space<vmem>>, vector<40x64xf32>
    tpu.vector_store %arg13[%c240_120, %c0_121], %135 {strides = array<i32>} : memref<288x64xf32, #tpu.memory_space<vmem>>, vector<40x64xf32>,
    %c2_122 = arith.constant 2 : index
    %c0_123 = arith.constant 0 : index
    %c0_124 = arith.constant 0 : index
    %137 = vector.load %arg3[%c2_122, %c0_123, %c0_124] : memref<4x32x64xbf16, #tpu.memory_space<vmem>>, vector<1x32x64xbf16>
    %138 = vector.shape_cast %137 : vector<1x32x64xbf16> to vector<32x64xbf16>
    %cst_125 = arith.constant dense<0.000000e+00> : vector<200x64xf32>
    %139 = tpu.matmul %86, %138, %cst_125 {dimension_numbers = #tpu.dot_dimension_numbers<[1], [0], [0], [1], [0, 0, 1, 1], [], []>} : vector<200x32xbf16>, vector<32x64xbf16>, vector<200x64xf32> -> vector<200x64xf32>
    %c8_126 = arith.constant 8 : index
    %c0_127 = arith.constant 0 : index
    %140 = vector.load %arg13[%c8_126, %c0_127] : memref<288x64xf32, #tpu.memory_space<vmem>>, vector<40x64xf32>
    %141 = vector.extract_strided_slice %139 {offsets = [0, 0], sizes = [40, 64], strides = [1, 1]} : vector<200x64xf32> to vector<40x64xf32>
    %142 = arith.addf %140, %141 : vector<40x64xf32>
    %c8_128 = arith.constant 8 : index
    %c0_129 = arith.constant 0 : index
    %143 = vector.load %arg13[%c8_128, %c0_129] : memref<288x64xf32, #tpu.memory_space<vmem>>, vector<40x64xf32>
    tpu.vector_store %arg13[%c8_128, %c0_129], %142 {strides = array<i32>} : memref<288x64xf32, #tpu.memory_space<vmem>>, vector<40x64xf32>,
    %c56_130 = arith.constant 56 : index
    %c0_131 = arith.constant 0 : index
    %144 = vector.load %arg13[%c56_130, %c0_131] : memref<288x64xf32, #tpu.memory_space<vmem>>, vector<40x64xf32>
    %145 = vector.extract_strided_slice %139 {offsets = [40, 0], sizes = [40, 64], strides = [1, 1]} : vector<200x64xf32> to vector<40x64xf32>
    %146 = arith.addf %144, %145 : vector<40x64xf32>
    %c56_132 = arith.constant 56 : index
    %c0_133 = arith.constant 0 : index
    %147 = vector.load %arg13[%c56_132, %c0_133] : memref<288x64xf32, #tpu.memory_space<vmem>>, vector<40x64xf32>
    tpu.vector_store %arg13[%c56_132, %c0_133], %146 {strides = array<i32>} : memref<288x64xf32, #tpu.memory_space<vmem>>, vector<40x64xf32>,
    %c104_134 = arith.constant 104 : index
    %c0_135 = arith.constant 0 : index
    %148 = vector.load %arg13[%c104_134, %c0_135] : memref<288x64xf32, #tpu.memory_space<vmem>>, vector<40x64xf32>
    %149 = vector.extract_strided_slice %139 {offsets = [80, 0], sizes = [40, 64], strides = [1, 1]} : vector<200x64xf32> to vector<40x64xf32>
    %150 = arith.addf %148, %149 : vector<40x64xf32>
    %c104_136 = arith.constant 104 : index
    %c0_137 = arith.constant 0 : index
    %151 = vector.load %arg13[%c104_136, %c0_137] : memref<288x64xf32, #tpu.memory_space<vmem>>, vector<40x64xf32>
    tpu.vector_store %arg13[%c104_136, %c0_137], %150 {strides = array<i32>} : memref<288x64xf32, #tpu.memory_space<vmem>>, vector<40x64xf32>,
    %c152_138 = arith.constant 152 : index
    %c0_139 = arith.constant 0 : index
    %152 = vector.load %arg13[%c152_138, %c0_139] : memref<288x64xf32, #tpu.memory_space<vmem>>, vector<40x64xf32>
    %153 = vector.extract_strided_slice %139 {offsets = [120, 0], sizes = [40, 64], strides = [1, 1]} : vector<200x64xf32> to vector<40x64xf32>
    %154 = arith.addf %152, %153 : vector<40x64xf32>
    %c152_140 = arith.constant 152 : index
    %c0_141 = arith.constant 0 : index
    %155 = vector.load %arg13[%c152_140, %c0_141] : memref<288x64xf32, #tpu.memory_space<vmem>>, vector<40x64xf32>
    tpu.vector_store %arg13[%c152_140, %c0_141], %154 {strides = array<i32>} : memref<288x64xf32, #tpu.memory_space<vmem>>, vector<40x64xf32>,
    %c200_142 = arith.constant 200 : index
    %c0_143 = arith.constant 0 : index
    %156 = vector.load %arg13[%c200_142, %c0_143] : memref<288x64xf32, #tpu.memory_space<vmem>>, vector<40x64xf32>
    %157 = vector.extract_strided_slice %139 {offsets = [160, 0], sizes = [40, 64], strides = [1, 1]} : vector<200x64xf32> to vector<40x64xf32>
    %158 = arith.addf %156, %157 : vector<40x64xf32>
    %c200_144 = arith.constant 200 : index
    %c0_145 = arith.constant 0 : index
    %159 = vector.load %arg13[%c200_144, %c0_145] : memref<288x64xf32, #tpu.memory_space<vmem>>, vector<40x64xf32>
    tpu.vector_store %arg13[%c200_144, %c0_145], %158 {strides = array<i32>} : memref<288x64xf32, #tpu.memory_space<vmem>>, vector<40x64xf32>,
    %c3_146 = arith.constant 3 : index
    %c0_147 = arith.constant 0 : index
    %c0_148 = arith.constant 0 : index
    %160 = vector.load %arg3[%c3_146, %c0_147, %c0_148] : memref<4x32x64xbf16, #tpu.memory_space<vmem>>, vector<1x32x64xbf16>
    %161 = vector.shape_cast %160 : vector<1x32x64xbf16> to vector<32x64xbf16>
    %cst_149 = arith.constant dense<0.000000e+00> : vector<200x64xf32>
    %162 = tpu.matmul %86, %161, %cst_149 {dimension_numbers = #tpu.dot_dimension_numbers<[1], [0], [0], [1], [0, 0, 1, 1], [], []>} : vector<200x32xbf16>, vector<32x64xbf16>, vector<200x64xf32> -> vector<200x64xf32>
    %c0_150 = arith.constant 0 : index
    %c0_151 = arith.constant 0 : index
    %163 = vector.load %arg13[%c0_150, %c0_151] : memref<288x64xf32, #tpu.memory_space<vmem>>, vector<40x64xf32>
    %164 = vector.extract_strided_slice %162 {offsets = [0, 0], sizes = [40, 64], strides = [1, 1]} : vector<200x64xf32> to vector<40x64xf32>
    %165 = arith.addf %163, %164 : vector<40x64xf32>
    %c0_152 = arith.constant 0 : index
    %c0_153 = arith.constant 0 : index
    %166 = vector.load %arg13[%c0_152, %c0_153] : memref<288x64xf32, #tpu.memory_space<vmem>>, vector<40x64xf32>
    tpu.vector_store %arg13[%c0_152, %c0_153], %165 {strides = array<i32>} : memref<288x64xf32, #tpu.memory_space<vmem>>, vector<40x64xf32>,
    %c48_154 = arith.constant 48 : index
    %c0_155 = arith.constant 0 : index
    %167 = vector.load %arg13[%c48_154, %c0_155] : memref<288x64xf32, #tpu.memory_space<vmem>>, vector<40x64xf32>
    %168 = vector.extract_strided_slice %162 {offsets = [40, 0], sizes = [40, 64], strides = [1, 1]} : vector<200x64xf32> to vector<40x64xf32>
    %169 = arith.addf %167, %168 : vector<40x64xf32>
    %c48_156 = arith.constant 48 : index
    %c0_157 = arith.constant 0 : index
    %170 = vector.load %arg13[%c48_156, %c0_157] : memref<288x64xf32, #tpu.memory_space<vmem>>, vector<40x64xf32>
    tpu.vector_store %arg13[%c48_156, %c0_157], %169 {strides = array<i32>} : memref<288x64xf32, #tpu.memory_space<vmem>>, vector<40x64xf32>,
    %c96_158 = arith.constant 96 : index
    %c0_159 = arith.constant 0 : index
    %171 = vector.load %arg13[%c96_158, %c0_159] : memref<288x64xf32, #tpu.memory_space<vmem>>, vector<40x64xf32>
    %172 = vector.extract_strided_slice %162 {offsets = [80, 0], sizes = [40, 64], strides = [1, 1]} : vector<200x64xf32> to vector<40x64xf32>
    %173 = arith.addf %171, %172 : vector<40x64xf32>
    %c96_160 = arith.constant 96 : index
    %c0_161 = arith.constant 0 : index
    %174 = vector.load %arg13[%c96_160, %c0_161] : memref<288x64xf32, #tpu.memory_space<vmem>>, vector<40x64xf32>
    tpu.vector_store %arg13[%c96_160, %c0_161], %173 {strides = array<i32>} : memref<288x64xf32, #tpu.memory_space<vmem>>, vector<40x64xf32>,
    %c144_162 = arith.constant 144 : index
    %c0_163 = arith.constant 0 : index
    %175 = vector.load %arg13[%c144_162, %c0_163] : memref<288x64xf32, #tpu.memory_space<vmem>>, vector<40x64xf32>
    %176 = vector.extract_strided_slice %162 {offsets = [120, 0], sizes = [40, 64], strides = [1, 1]} : vector<200x64xf32> to vector<40x64xf32>
    %177 = arith.addf %175, %176 : vector<40x64xf32>
    %c144_164 = arith.constant 144 : index
    %c0_165 = arith.constant 0 : index
    %178 = vector.load %arg13[%c144_164, %c0_165] : memref<288x64xf32, #tpu.memory_space<vmem>>, vector<40x64xf32>
    tpu.vector_store %arg13[%c144_164, %c0_165], %177 {strides = array<i32>} : memref<288x64xf32, #tpu.memory_space<vmem>>, vector<40x64xf32>,
    %c192_166 = arith.constant 192 : index
    %c0_167 = arith.constant 0 : index
    %179 = vector.load %arg13[%c192_166, %c0_167] : memref<288x64xf32, #tpu.memory_space<vmem>>, vector<40x64xf32>
    %180 = vector.extract_strided_slice %162 {offsets = [160, 0], sizes = [40, 64], strides = [1, 1]} : vector<200x64xf32> to vector<40x64xf32>
    %181 = arith.addf %179, %180 : vector<40x64xf32>
    %c192_168 = arith.constant 192 : index
    %c0_169 = arith.constant 0 : index
    %182 = vector.load %arg13[%c192_168, %c0_169] : memref<288x64xf32, #tpu.memory_space<vmem>>, vector<40x64xf32>
    tpu.vector_store %arg13[%c192_168, %c0_169], %181 {strides = array<i32>} : memref<288x64xf32, #tpu.memory_space<vmem>>, vector<40x64xf32>,
    %c0_170 = arith.constant 0 : index
    %c0_171 = arith.constant 0 : index
    %183 = vector.load %arg13[%c0_170, %c0_171] : memref<288x64xf32, #tpu.memory_space<vmem>>, vector<288x64xf32>
    %cst_172 = arith.constant 0.000000e+00 : f32
    %184 = vector.broadcast %cst_172 : f32 to vector<288x64xf32>
    %185 = arith.maximumf %183, %184 : vector<288x64xf32>
    %c0_173 = arith.constant 0 : index
    %c0_174 = arith.constant 0 : index
    %186 = vector.load %arg13[%c0_173, %c0_174] : memref<288x64xf32, #tpu.memory_space<vmem>>, vector<288x64xf32>
    tpu.vector_store %arg13[%c0_173, %c0_174], %185 {strides = array<i32>} : memref<288x64xf32, #tpu.memory_space<vmem>>, vector<288x64xf32>,
    %c0_175 = arith.constant 0 : index
    %c0_176 = arith.constant 0 : index
    %187 = vector.load %arg13[%c0_175, %c0_176] : memref<288x64xf32, #tpu.memory_space<vmem>>, vector<288x64xf32>
    %188 = arith.truncf %187 : vector<288x64xf32> to vector<288x64xbf16>
    %c0_177 = arith.constant 0 : index
    %c0_178 = arith.constant 0 : index
    %189 = vector.load %arg6[%c0_177, %c0_178] : memref<1x64xf32, #tpu.memory_space<vmem>>, vector<1x64xf32>
    %190 = vector.shape_cast %189 : vector<1x64xf32> to vector<1x64xf32>
    %191 = vector.broadcast %190 : vector<1x64xf32> to vector<392x64xf32>
    %c0_179 = arith.constant 0 : index
    %c0_180 = arith.constant 0 : index
    %192 = vector.load %arg14[%c0_179, %c0_180] : memref<392x64xf32, #tpu.memory_space<vmem>>, vector<392x64xf32>
    tpu.vector_store %arg14[%c0_179, %c0_180], %191 {strides = array<i32>} : memref<392x64xf32, #tpu.memory_space<vmem>>, vector<392x64xf32>,
    %c0_181 = arith.constant 0 : index
    %c0_182 = arith.constant 0 : index
    %c0_183 = arith.constant 0 : index
    %193 = vector.load %arg5[%c0_181, %c0_182, %c0_183] : memref<4x64x64xbf16, #tpu.memory_space<vmem>>, vector<1x64x64xbf16>
    %194 = vector.shape_cast %193 : vector<1x64x64xbf16> to vector<64x64xbf16>
    %cst_184 = arith.constant dense<0.000000e+00> : vector<288x64xf32>
    %195 = tpu.matmul %188, %194, %cst_184 {dimension_numbers = #tpu.dot_dimension_numbers<[1], [0], [0], [1], [0, 0, 1, 1], [], []>} : vector<288x64xbf16>, vector<64x64xbf16>, vector<288x64xf32> -> vector<288x64xf32>
    %c64 = arith.constant 64 : index
    %c0_185 = arith.constant 0 : index
    %196 = vector.load %arg14[%c64, %c0_185] : memref<392x64xf32, #tpu.memory_space<vmem>>, vector<48x64xf32>
    %197 = vector.extract_strided_slice %195 {offsets = [0, 0], sizes = [48, 64], strides = [1, 1]} : vector<288x64xf32> to vector<48x64xf32>
    %198 = arith.addf %196, %197 : vector<48x64xf32>
    %c64_186 = arith.constant 64 : index
    %c0_187 = arith.constant 0 : index
    %199 = vector.load %arg14[%c64_186, %c0_187] : memref<392x64xf32, #tpu.memory_space<vmem>>, vector<48x64xf32>
    tpu.vector_store %arg14[%c64_186, %c0_187], %198 {strides = array<i32>} : memref<392x64xf32, #tpu.memory_space<vmem>>, vector<48x64xf32>,
    %c120_188 = arith.constant 120 : index
    %c0_189 = arith.constant 0 : index
    %200 = vector.load %arg14[%c120_188, %c0_189] : memref<392x64xf32, #tpu.memory_space<vmem>>, vector<48x64xf32>
    %201 = vector.extract_strided_slice %195 {offsets = [48, 0], sizes = [48, 64], strides = [1, 1]} : vector<288x64xf32> to vector<48x64xf32>
    %202 = arith.addf %200, %201 : vector<48x64xf32>
    %c120_190 = arith.constant 120 : index
    %c0_191 = arith.constant 0 : index
    %203 = vector.load %arg14[%c120_190, %c0_191] : memref<392x64xf32, #tpu.memory_space<vmem>>, vector<48x64xf32>
    tpu.vector_store %arg14[%c120_190, %c0_191], %202 {strides = array<i32>} : memref<392x64xf32, #tpu.memory_space<vmem>>, vector<48x64xf32>,
    %c176 = arith.constant 176 : index
    %c0_192 = arith.constant 0 : index
    %204 = vector.load %arg14[%c176, %c0_192] : memref<392x64xf32, #tpu.memory_space<vmem>>, vector<48x64xf32>
    %205 = vector.extract_strided_slice %195 {offsets = [96, 0], sizes = [48, 64], strides = [1, 1]} : vector<288x64xf32> to vector<48x64xf32>
    %206 = arith.addf %204, %205 : vector<48x64xf32>
    %c176_193 = arith.constant 176 : index
    %c0_194 = arith.constant 0 : index
    %207 = vector.load %arg14[%c176_193, %c0_194] : memref<392x64xf32, #tpu.memory_space<vmem>>, vector<48x64xf32>
    tpu.vector_store %arg14[%c176_193, %c0_194], %206 {strides = array<i32>} : memref<392x64xf32, #tpu.memory_space<vmem>>, vector<48x64xf32>,
    %c232 = arith.constant 232 : index
    %c0_195 = arith.constant 0 : index
    %208 = vector.load %arg14[%c232, %c0_195] : memref<392x64xf32, #tpu.memory_space<vmem>>, vector<48x64xf32>
    %209 = vector.extract_strided_slice %195 {offsets = [144, 0], sizes = [48, 64], strides = [1, 1]} : vector<288x64xf32> to vector<48x64xf32>
    %210 = arith.addf %208, %209 : vector<48x64xf32>
    %c232_196 = arith.constant 232 : index
    %c0_197 = arith.constant 0 : index
    %211 = vector.load %arg14[%c232_196, %c0_197] : memref<392x64xf32, #tpu.memory_space<vmem>>, vector<48x64xf32>
    tpu.vector_store %arg14[%c232_196, %c0_197], %210 {strides = array<i32>} : memref<392x64xf32, #tpu.memory_space<vmem>>, vector<48x64xf32>,
    %c288 = arith.constant 288 : index
    %c0_198 = arith.constant 0 : index
    %212 = vector.load %arg14[%c288, %c0_198] : memref<392x64xf32, #tpu.memory_space<vmem>>, vector<48x64xf32>
    %213 = vector.extract_strided_slice %195 {offsets = [192, 0], sizes = [48, 64], strides = [1, 1]} : vector<288x64xf32> to vector<48x64xf32>
    %214 = arith.addf %212, %213 : vector<48x64xf32>
    %c288_199 = arith.constant 288 : index
    %c0_200 = arith.constant 0 : index
    %215 = vector.load %arg14[%c288_199, %c0_200] : memref<392x64xf32, #tpu.memory_space<vmem>>, vector<48x64xf32>
    tpu.vector_store %arg14[%c288_199, %c0_200], %214 {strides = array<i32>} : memref<392x64xf32, #tpu.memory_space<vmem>>, vector<48x64xf32>,
    %c344 = arith.constant 344 : index
    %c0_201 = arith.constant 0 : index
    %216 = vector.load %arg14[%c344, %c0_201] : memref<392x64xf32, #tpu.memory_space<vmem>>, vector<48x64xf32>
    %217 = vector.extract_strided_slice %195 {offsets = [240, 0], sizes = [48, 64], strides = [1, 1]} : vector<288x64xf32> to vector<48x64xf32>
    %218 = arith.addf %216, %217 : vector<48x64xf32>
    %c344_202 = arith.constant 344 : index
    %c0_203 = arith.constant 0 : index
    %219 = vector.load %arg14[%c344_202, %c0_203] : memref<392x64xf32, #tpu.memory_space<vmem>>, vector<48x64xf32>
    tpu.vector_store %arg14[%c344_202, %c0_203], %218 {strides = array<i32>} : memref<392x64xf32, #tpu.memory_space<vmem>>, vector<48x64xf32>,
    %c1_204 = arith.constant 1 : index
    %c0_205 = arith.constant 0 : index
    %c0_206 = arith.constant 0 : index
    %220 = vector.load %arg5[%c1_204, %c0_205, %c0_206] : memref<4x64x64xbf16, #tpu.memory_space<vmem>>, vector<1x64x64xbf16>
    %221 = vector.shape_cast %220 : vector<1x64x64xbf16> to vector<64x64xbf16>
    %cst_207 = arith.constant dense<0.000000e+00> : vector<288x64xf32>
    %222 = tpu.matmul %188, %221, %cst_207 {dimension_numbers = #tpu.dot_dimension_numbers<[1], [0], [0], [1], [0, 0, 1, 1], [], []>} : vector<288x64xbf16>, vector<64x64xbf16>, vector<288x64xf32> -> vector<288x64xf32>
    %c56_208 = arith.constant 56 : index
    %c0_209 = arith.constant 0 : index
    %223 = vector.load %arg14[%c56_208, %c0_209] : memref<392x64xf32, #tpu.memory_space<vmem>>, vector<48x64xf32>
    %224 = vector.extract_strided_slice %222 {offsets = [0, 0], sizes = [48, 64], strides = [1, 1]} : vector<288x64xf32> to vector<48x64xf32>
    %225 = arith.addf %223, %224 : vector<48x64xf32>
    %c56_210 = arith.constant 56 : index
    %c0_211 = arith.constant 0 : index
    %226 = vector.load %arg14[%c56_210, %c0_211] : memref<392x64xf32, #tpu.memory_space<vmem>>, vector<48x64xf32>
    tpu.vector_store %arg14[%c56_210, %c0_211], %225 {strides = array<i32>} : memref<392x64xf32, #tpu.memory_space<vmem>>, vector<48x64xf32>,
    %c112 = arith.constant 112 : index
    %c0_212 = arith.constant 0 : index
    %227 = vector.load %arg14[%c112, %c0_212] : memref<392x64xf32, #tpu.memory_space<vmem>>, vector<48x64xf32>
    %228 = vector.extract_strided_slice %222 {offsets = [48, 0], sizes = [48, 64], strides = [1, 1]} : vector<288x64xf32> to vector<48x64xf32>
    %229 = arith.addf %227, %228 : vector<48x64xf32>
    %c112_213 = arith.constant 112 : index
    %c0_214 = arith.constant 0 : index
    %230 = vector.load %arg14[%c112_213, %c0_214] : memref<392x64xf32, #tpu.memory_space<vmem>>, vector<48x64xf32>
    tpu.vector_store %arg14[%c112_213, %c0_214], %229 {strides = array<i32>} : memref<392x64xf32, #tpu.memory_space<vmem>>, vector<48x64xf32>,
    %c168_215 = arith.constant 168 : index
    %c0_216 = arith.constant 0 : index
    %231 = vector.load %arg14[%c168_215, %c0_216] : memref<392x64xf32, #tpu.memory_space<vmem>>, vector<48x64xf32>
    %232 = vector.extract_strided_slice %222 {offsets = [96, 0], sizes = [48, 64], strides = [1, 1]} : vector<288x64xf32> to vector<48x64xf32>
    %233 = arith.addf %231, %232 : vector<48x64xf32>
    %c168_217 = arith.constant 168 : index
    %c0_218 = arith.constant 0 : index
    %234 = vector.load %arg14[%c168_217, %c0_218] : memref<392x64xf32, #tpu.memory_space<vmem>>, vector<48x64xf32>
    tpu.vector_store %arg14[%c168_217, %c0_218], %233 {strides = array<i32>} : memref<392x64xf32, #tpu.memory_space<vmem>>, vector<48x64xf32>,
    %c224 = arith.constant 224 : index
    %c0_219 = arith.constant 0 : index
    %235 = vector.load %arg14[%c224, %c0_219] : memref<392x64xf32, #tpu.memory_space<vmem>>, vector<48x64xf32>
    %236 = vector.extract_strided_slice %222 {offsets = [144, 0], sizes = [48, 64], strides = [1, 1]} : vector<288x64xf32> to vector<48x64xf32>
    %237 = arith.addf %235, %236 : vector<48x64xf32>
    %c224_220 = arith.constant 224 : index
    %c0_221 = arith.constant 0 : index
    %238 = vector.load %arg14[%c224_220, %c0_221] : memref<392x64xf32, #tpu.memory_space<vmem>>, vector<48x64xf32>
    tpu.vector_store %arg14[%c224_220, %c0_221], %237 {strides = array<i32>} : memref<392x64xf32, #tpu.memory_space<vmem>>, vector<48x64xf32>,
    %c280 = arith.constant 280 : index
    %c0_222 = arith.constant 0 : index
    %239 = vector.load %arg14[%c280, %c0_222] : memref<392x64xf32, #tpu.memory_space<vmem>>, vector<48x64xf32>
    %240 = vector.extract_strided_slice %222 {offsets = [192, 0], sizes = [48, 64], strides = [1, 1]} : vector<288x64xf32> to vector<48x64xf32>
    %241 = arith.addf %239, %240 : vector<48x64xf32>
    %c280_223 = arith.constant 280 : index
    %c0_224 = arith.constant 0 : index
    %242 = vector.load %arg14[%c280_223, %c0_224] : memref<392x64xf32, #tpu.memory_space<vmem>>, vector<48x64xf32>
    tpu.vector_store %arg14[%c280_223, %c0_224], %241 {strides = array<i32>} : memref<392x64xf32, #tpu.memory_space<vmem>>, vector<48x64xf32>,
    %c336 = arith.constant 336 : index
    %c0_225 = arith.constant 0 : index
    %243 = vector.load %arg14[%c336, %c0_225] : memref<392x64xf32, #tpu.memory_space<vmem>>, vector<48x64xf32>
    %244 = vector.extract_strided_slice %222 {offsets = [240, 0], sizes = [48, 64], strides = [1, 1]} : vector<288x64xf32> to vector<48x64xf32>
    %245 = arith.addf %243, %244 : vector<48x64xf32>
    %c336_226 = arith.constant 336 : index
    %c0_227 = arith.constant 0 : index
    %246 = vector.load %arg14[%c336_226, %c0_227] : memref<392x64xf32, #tpu.memory_space<vmem>>, vector<48x64xf32>
    tpu.vector_store %arg14[%c336_226, %c0_227], %245 {strides = array<i32>} : memref<392x64xf32, #tpu.memory_space<vmem>>, vector<48x64xf32>,
    %c2_228 = arith.constant 2 : index
    %c0_229 = arith.constant 0 : index
    %c0_230 = arith.constant 0 : index
    %247 = vector.load %arg5[%c2_228, %c0_229, %c0_230] : memref<4x64x64xbf16, #tpu.memory_space<vmem>>, vector<1x64x64xbf16>
    %248 = vector.shape_cast %247 : vector<1x64x64xbf16> to vector<64x64xbf16>
    %cst_231 = arith.constant dense<0.000000e+00> : vector<288x64xf32>
    %249 = tpu.matmul %188, %248, %cst_231 {dimension_numbers = #tpu.dot_dimension_numbers<[1], [0], [0], [1], [0, 0, 1, 1], [], []>} : vector<288x64xbf16>, vector<64x64xbf16>, vector<288x64xf32> -> vector<288x64xf32>
    %c8_232 = arith.constant 8 : index
    %c0_233 = arith.constant 0 : index
    %250 = vector.load %arg14[%c8_232, %c0_233] : memref<392x64xf32, #tpu.memory_space<vmem>>, vector<48x64xf32>
    %251 = vector.extract_strided_slice %249 {offsets = [0, 0], sizes = [48, 64], strides = [1, 1]} : vector<288x64xf32> to vector<48x64xf32>
    %252 = arith.addf %250, %251 : vector<48x64xf32>
    %c8_234 = arith.constant 8 : index
    %c0_235 = arith.constant 0 : index
    %253 = vector.load %arg14[%c8_234, %c0_235] : memref<392x64xf32, #tpu.memory_space<vmem>>, vector<48x64xf32>
    tpu.vector_store %arg14[%c8_234, %c0_235], %252 {strides = array<i32>} : memref<392x64xf32, #tpu.memory_space<vmem>>, vector<48x64xf32>,
    %c64_236 = arith.constant 64 : index
    %c0_237 = arith.constant 0 : index
    %254 = vector.load %arg14[%c64_236, %c0_237] : memref<392x64xf32, #tpu.memory_space<vmem>>, vector<48x64xf32>
    %255 = vector.extract_strided_slice %249 {offsets = [48, 0], sizes = [48, 64], strides = [1, 1]} : vector<288x64xf32> to vector<48x64xf32>
    %256 = arith.addf %254, %255 : vector<48x64xf32>
    %c64_238 = arith.constant 64 : index
    %c0_239 = arith.constant 0 : index
    %257 = vector.load %arg14[%c64_238, %c0_239] : memref<392x64xf32, #tpu.memory_space<vmem>>, vector<48x64xf32>
    tpu.vector_store %arg14[%c64_238, %c0_239], %256 {strides = array<i32>} : memref<392x64xf32, #tpu.memory_space<vmem>>, vector<48x64xf32>,
    %c120_240 = arith.constant 120 : index
    %c0_241 = arith.constant 0 : index
    %258 = vector.load %arg14[%c120_240, %c0_241] : memref<392x64xf32, #tpu.memory_space<vmem>>, vector<48x64xf32>
    %259 = vector.extract_strided_slice %249 {offsets = [96, 0], sizes = [48, 64], strides = [1, 1]} : vector<288x64xf32> to vector<48x64xf32>
    %260 = arith.addf %258, %259 : vector<48x64xf32>
    %c120_242 = arith.constant 120 : index
    %c0_243 = arith.constant 0 : index
    %261 = vector.load %arg14[%c120_242, %c0_243] : memref<392x64xf32, #tpu.memory_space<vmem>>, vector<48x64xf32>
    tpu.vector_store %arg14[%c120_242, %c0_243], %260 {strides = array<i32>} : memref<392x64xf32, #tpu.memory_space<vmem>>, vector<48x64xf32>,
    %c176_244 = arith.constant 176 : index
    %c0_245 = arith.constant 0 : index
    %262 = vector.load %arg14[%c176_244, %c0_245] : memref<392x64xf32, #tpu.memory_space<vmem>>, vector<48x64xf32>
    %263 = vector.extract_strided_slice %249 {offsets = [144, 0], sizes = [48, 64], strides = [1, 1]} : vector<288x64xf32> to vector<48x64xf32>
    %264 = arith.addf %262, %263 : vector<48x64xf32>
    %c176_246 = arith.constant 176 : index
    %c0_247 = arith.constant 0 : index
    %265 = vector.load %arg14[%c176_246, %c0_247] : memref<392x64xf32, #tpu.memory_space<vmem>>, vector<48x64xf32>
    tpu.vector_store %arg14[%c176_246, %c0_247], %264 {strides = array<i32>} : memref<392x64xf32, #tpu.memory_space<vmem>>, vector<48x64xf32>,
    %c232_248 = arith.constant 232 : index
    %c0_249 = arith.constant 0 : index
    %266 = vector.load %arg14[%c232_248, %c0_249] : memref<392x64xf32, #tpu.memory_space<vmem>>, vector<48x64xf32>
    %267 = vector.extract_strided_slice %249 {offsets = [192, 0], sizes = [48, 64], strides = [1, 1]} : vector<288x64xf32> to vector<48x64xf32>
    %268 = arith.addf %266, %267 : vector<48x64xf32>
    %c232_250 = arith.constant 232 : index
    %c0_251 = arith.constant 0 : index
    %269 = vector.load %arg14[%c232_250, %c0_251] : memref<392x64xf32, #tpu.memory_space<vmem>>, vector<48x64xf32>
    tpu.vector_store %arg14[%c232_250, %c0_251], %268 {strides = array<i32>} : memref<392x64xf32, #tpu.memory_space<vmem>>, vector<48x64xf32>,
    %c288_252 = arith.constant 288 : index
    %c0_253 = arith.constant 0 : index
    %270 = vector.load %arg14[%c288_252, %c0_253] : memref<392x64xf32, #tpu.memory_space<vmem>>, vector<48x64xf32>
    %271 = vector.extract_strided_slice %249 {offsets = [240, 0], sizes = [48, 64], strides = [1, 1]} : vector<288x64xf32> to vector<48x64xf32>
    %272 = arith.addf %270, %271 : vector<48x64xf32>
    %c288_254 = arith.constant 288 : index
    %c0_255 = arith.constant 0 : index
    %273 = vector.load %arg14[%c288_254, %c0_255] : memref<392x64xf32, #tpu.memory_space<vmem>>, vector<48x64xf32>
    tpu.vector_store %arg14[%c288_254, %c0_255], %272 {strides = array<i32>} : memref<392x64xf32, #tpu.memory_space<vmem>>, vector<48x64xf32>,
    %c3_256 = arith.constant 3 : index
    %c0_257 = arith.constant 0 : index
    %c0_258 = arith.constant 0 : index
    %274 = vector.load %arg5[%c3_256, %c0_257, %c0_258] : memref<4x64x64xbf16, #tpu.memory_space<vmem>>, vector<1x64x64xbf16>
    %275 = vector.shape_cast %274 : vector<1x64x64xbf16> to vector<64x64xbf16>
    %cst_259 = arith.constant dense<0.000000e+00> : vector<288x64xf32>
    %276 = tpu.matmul %188, %275, %cst_259 {dimension_numbers = #tpu.dot_dimension_numbers<[1], [0], [0], [1], [0, 0, 1, 1], [], []>} : vector<288x64xbf16>, vector<64x64xbf16>, vector<288x64xf32> -> vector<288x64xf32>
    %c0_260 = arith.constant 0 : index
    %c0_261 = arith.constant 0 : index
    %277 = vector.load %arg14[%c0_260, %c0_261] : memref<392x64xf32, #tpu.memory_space<vmem>>, vector<48x64xf32>
    %278 = vector.extract_strided_slice %276 {offsets = [0, 0], sizes = [48, 64], strides = [1, 1]} : vector<288x64xf32> to vector<48x64xf32>
    %279 = arith.addf %277, %278 : vector<48x64xf32>
    %c0_262 = arith.constant 0 : index
    %c0_263 = arith.constant 0 : index
    %280 = vector.load %arg14[%c0_262, %c0_263] : memref<392x64xf32, #tpu.memory_space<vmem>>, vector<48x64xf32>
    tpu.vector_store %arg14[%c0_262, %c0_263], %279 {strides = array<i32>} : memref<392x64xf32, #tpu.memory_space<vmem>>, vector<48x64xf32>,
    %c56_264 = arith.constant 56 : index
    %c0_265 = arith.constant 0 : index
    %281 = vector.load %arg14[%c56_264, %c0_265] : memref<392x64xf32, #tpu.memory_space<vmem>>, vector<48x64xf32>
    %282 = vector.extract_strided_slice %276 {offsets = [48, 0], sizes = [48, 64], strides = [1, 1]} : vector<288x64xf32> to vector<48x64xf32>
    %283 = arith.addf %281, %282 : vector<48x64xf32>
    %c56_266 = arith.constant 56 : index
    %c0_267 = arith.constant 0 : index
    %284 = vector.load %arg14[%c56_266, %c0_267] : memref<392x64xf32, #tpu.memory_space<vmem>>, vector<48x64xf32>
    tpu.vector_store %arg14[%c56_266, %c0_267], %283 {strides = array<i32>} : memref<392x64xf32, #tpu.memory_space<vmem>>, vector<48x64xf32>,
    %c112_268 = arith.constant 112 : index
    %c0_269 = arith.constant 0 : index
    %285 = vector.load %arg14[%c112_268, %c0_269] : memref<392x64xf32, #tpu.memory_space<vmem>>, vector<48x64xf32>
    %286 = vector.extract_strided_slice %276 {offsets = [96, 0], sizes = [48, 64], strides = [1, 1]} : vector<288x64xf32> to vector<48x64xf32>
    %287 = arith.addf %285, %286 : vector<48x64xf32>
    %c112_270 = arith.constant 112 : index
    %c0_271 = arith.constant 0 : index
    %288 = vector.load %arg14[%c112_270, %c0_271] : memref<392x64xf32, #tpu.memory_space<vmem>>, vector<48x64xf32>
    tpu.vector_store %arg14[%c112_270, %c0_271], %287 {strides = array<i32>} : memref<392x64xf32, #tpu.memory_space<vmem>>, vector<48x64xf32>,
    %c168_272 = arith.constant 168 : index
    %c0_273 = arith.constant 0 : index
    %289 = vector.load %arg14[%c168_272, %c0_273] : memref<392x64xf32, #tpu.memory_space<vmem>>, vector<48x64xf32>
    %290 = vector.extract_strided_slice %276 {offsets = [144, 0], sizes = [48, 64], strides = [1, 1]} : vector<288x64xf32> to vector<48x64xf32>
    %291 = arith.addf %289, %290 : vector<48x64xf32>
    %c168_274 = arith.constant 168 : index
    %c0_275 = arith.constant 0 : index
    %292 = vector.load %arg14[%c168_274, %c0_275] : memref<392x64xf32, #tpu.memory_space<vmem>>, vector<48x64xf32>
    tpu.vector_store %arg14[%c168_274, %c0_275], %291 {strides = array<i32>} : memref<392x64xf32, #tpu.memory_space<vmem>>, vector<48x64xf32>,
    %c224_276 = arith.constant 224 : index
    %c0_277 = arith.constant 0 : index
    %293 = vector.load %arg14[%c224_276, %c0_277] : memref<392x64xf32, #tpu.memory_space<vmem>>, vector<48x64xf32>
    %294 = vector.extract_strided_slice %276 {offsets = [192, 0], sizes = [48, 64], strides = [1, 1]} : vector<288x64xf32> to vector<48x64xf32>
    %295 = arith.addf %293, %294 : vector<48x64xf32>
    %c224_278 = arith.constant 224 : index
    %c0_279 = arith.constant 0 : index
    %296 = vector.load %arg14[%c224_278, %c0_279] : memref<392x64xf32, #tpu.memory_space<vmem>>, vector<48x64xf32>
    tpu.vector_store %arg14[%c224_278, %c0_279], %295 {strides = array<i32>} : memref<392x64xf32, #tpu.memory_space<vmem>>, vector<48x64xf32>,
    %c280_280 = arith.constant 280 : index
    %c0_281 = arith.constant 0 : index
    %297 = vector.load %arg14[%c280_280, %c0_281] : memref<392x64xf32, #tpu.memory_space<vmem>>, vector<48x64xf32>
    %298 = vector.extract_strided_slice %276 {offsets = [240, 0], sizes = [48, 64], strides = [1, 1]} : vector<288x64xf32> to vector<48x64xf32>
    %299 = arith.addf %297, %298 : vector<48x64xf32>
    %c280_282 = arith.constant 280 : index
    %c0_283 = arith.constant 0 : index
    %300 = vector.load %arg14[%c280_282, %c0_283] : memref<392x64xf32, #tpu.memory_space<vmem>>, vector<48x64xf32>
    tpu.vector_store %arg14[%c280_282, %c0_283], %299 {strides = array<i32>} : memref<392x64xf32, #tpu.memory_space<vmem>>, vector<48x64xf32>,
    %c0_284 = arith.constant 0 : index
    %c0_285 = arith.constant 0 : index
    %301 = vector.load %arg14[%c0_284, %c0_285] : memref<392x64xf32, #tpu.memory_space<vmem>>, vector<392x64xf32>
    %cst_286 = arith.constant 0.000000e+00 : f32
    %302 = vector.broadcast %cst_286 : f32 to vector<392x64xf32>
    %303 = arith.maximumf %301, %302 : vector<392x64xf32>
    %c0_287 = arith.constant 0 : index
    %c0_288 = arith.constant 0 : index
    %304 = vector.load %arg14[%c0_287, %c0_288] : memref<392x64xf32, #tpu.memory_space<vmem>>, vector<392x64xf32>
    tpu.vector_store %arg14[%c0_287, %c0_288], %303 {strides = array<i32>} : memref<392x64xf32, #tpu.memory_space<vmem>>, vector<392x64xf32>,
    %c0_289 = arith.constant 0 : index
    %c0_290 = arith.constant 0 : index
    %305 = vector.load %arg14[%c0_289, %c0_290] : memref<392x64xf32, #tpu.memory_space<vmem>>, vector<8x64xf32>
    %c8_291 = arith.constant 8 : index
    %c0_292 = arith.constant 0 : index
    %306 = vector.load %arg14[%c8_291, %c0_292] : memref<392x64xf32, #tpu.memory_space<vmem>>, vector<8x64xf32>
    %c16 = arith.constant 16 : index
    %c0_293 = arith.constant 0 : index
    %307 = vector.load %arg14[%c16, %c0_293] : memref<392x64xf32, #tpu.memory_space<vmem>>, vector<8x64xf32>
    %c24 = arith.constant 24 : index
    %c0_294 = arith.constant 0 : index
    %308 = vector.load %arg14[%c24, %c0_294] : memref<392x64xf32, #tpu.memory_space<vmem>>, vector<8x64xf32>
    %c32 = arith.constant 32 : index
    %c0_295 = arith.constant 0 : index
    %309 = vector.load %arg14[%c32, %c0_295] : memref<392x64xf32, #tpu.memory_space<vmem>>, vector<8x64xf32>
    %c40_296 = arith.constant 40 : index
    %c0_297 = arith.constant 0 : index
    %310 = vector.load %arg14[%c40_296, %c0_297] : memref<392x64xf32, #tpu.memory_space<vmem>>, vector<8x64xf32>
    %c48_298 = arith.constant 48 : index
    %c0_299 = arith.constant 0 : index
    %311 = vector.load %arg14[%c48_298, %c0_299] : memref<392x64xf32, #tpu.memory_space<vmem>>, vector<8x64xf32>
    %c56_300 = arith.constant 56 : index
    %c0_301 = arith.constant 0 : index
    %312 = vector.load %arg14[%c56_300, %c0_301] : memref<392x64xf32, #tpu.memory_space<vmem>>, vector<8x64xf32>
    %c64_302 = arith.constant 64 : index
    %c0_303 = arith.constant 0 : index
    %313 = vector.load %arg14[%c64_302, %c0_303] : memref<392x64xf32, #tpu.memory_space<vmem>>, vector<8x64xf32>
    %c72 = arith.constant 72 : index
    %c0_304 = arith.constant 0 : index
    %314 = vector.load %arg14[%c72, %c0_304] : memref<392x64xf32, #tpu.memory_space<vmem>>, vector<8x64xf32>
    %c80_305 = arith.constant 80 : index
    %c0_306 = arith.constant 0 : index
    %315 = vector.load %arg14[%c80_305, %c0_306] : memref<392x64xf32, #tpu.memory_space<vmem>>, vector<8x64xf32>
    %c88_307 = arith.constant 88 : index
    %c0_308 = arith.constant 0 : index
    %316 = vector.load %arg14[%c88_307, %c0_308] : memref<392x64xf32, #tpu.memory_space<vmem>>, vector<8x64xf32>
    %c96_309 = arith.constant 96 : index
    %c0_310 = arith.constant 0 : index
    %317 = vector.load %arg14[%c96_309, %c0_310] : memref<392x64xf32, #tpu.memory_space<vmem>>, vector<8x64xf32>
    %c104_311 = arith.constant 104 : index
    %c0_312 = arith.constant 0 : index
    %318 = vector.load %arg14[%c104_311, %c0_312] : memref<392x64xf32, #tpu.memory_space<vmem>>, vector<8x64xf32>
    %c112_313 = arith.constant 112 : index
    %c0_314 = arith.constant 0 : index
    %319 = vector.load %arg14[%c112_313, %c0_314] : memref<392x64xf32, #tpu.memory_space<vmem>>, vector<8x64xf32>
    %c120_315 = arith.constant 120 : index
    %c0_316 = arith.constant 0 : index
    %320 = vector.load %arg14[%c120_315, %c0_316] : memref<392x64xf32, #tpu.memory_space<vmem>>, vector<8x64xf32>
    %c128_317 = arith.constant 128 : index
    %c0_318 = arith.constant 0 : index
    %321 = vector.load %arg14[%c128_317, %c0_318] : memref<392x64xf32, #tpu.memory_space<vmem>>, vector<8x64xf32>
    %c136 = arith.constant 136 : index
    %c0_319 = arith.constant 0 : index
    %322 = vector.load %arg14[%c136, %c0_319] : memref<392x64xf32, #tpu.memory_space<vmem>>, vector<8x64xf32>
    %c144_320 = arith.constant 144 : index
    %c0_321 = arith.constant 0 : index
    %323 = vector.load %arg14[%c144_320, %c0_321] : memref<392x64xf32, #tpu.memory_space<vmem>>, vector<8x64xf32>
    %c152_322 = arith.constant 152 : index
    %c0_323 = arith.constant 0 : index
    %324 = vector.load %arg14[%c152_322, %c0_323] : memref<392x64xf32, #tpu.memory_space<vmem>>, vector<8x64xf32>
    %c160_324 = arith.constant 160 : index
    %c0_325 = arith.constant 0 : index
    %325 = vector.load %arg14[%c160_324, %c0_325] : memref<392x64xf32, #tpu.memory_space<vmem>>, vector<8x64xf32>
    %c168_326 = arith.constant 168 : index
    %c0_327 = arith.constant 0 : index
    %326 = vector.load %arg14[%c168_326, %c0_327] : memref<392x64xf32, #tpu.memory_space<vmem>>, vector<8x64xf32>
    %c176_328 = arith.constant 176 : index
    %c0_329 = arith.constant 0 : index
    %327 = vector.load %arg14[%c176_328, %c0_329] : memref<392x64xf32, #tpu.memory_space<vmem>>, vector<8x64xf32>
    %c184 = arith.constant 184 : index
    %c0_330 = arith.constant 0 : index
    %328 = vector.load %arg14[%c184, %c0_330] : memref<392x64xf32, #tpu.memory_space<vmem>>, vector<8x64xf32>
    %c192_331 = arith.constant 192 : index
    %c0_332 = arith.constant 0 : index
    %329 = vector.load %arg14[%c192_331, %c0_332] : memref<392x64xf32, #tpu.memory_space<vmem>>, vector<8x64xf32>
    %c200_333 = arith.constant 200 : index
    %c0_334 = arith.constant 0 : index
    %330 = vector.load %arg14[%c200_333, %c0_334] : memref<392x64xf32, #tpu.memory_space<vmem>>, vector<8x64xf32>
    %c208 = arith.constant 208 : index
    %c0_335 = arith.constant 0 : index
    %331 = vector.load %arg14[%c208, %c0_335] : memref<392x64xf32, #tpu.memory_space<vmem>>, vector<8x64xf32>
    %c216 = arith.constant 216 : index
    %c0_336 = arith.constant 0 : index
    %332 = vector.load %arg14[%c216, %c0_336] : memref<392x64xf32, #tpu.memory_space<vmem>>, vector<8x64xf32>
    %c224_337 = arith.constant 224 : index
    %c0_338 = arith.constant 0 : index
    %333 = vector.load %arg14[%c224_337, %c0_338] : memref<392x64xf32, #tpu.memory_space<vmem>>, vector<8x64xf32>
    %c232_339 = arith.constant 232 : index
    %c0_340 = arith.constant 0 : index
    %334 = vector.load %arg14[%c232_339, %c0_340] : memref<392x64xf32, #tpu.memory_space<vmem>>, vector<8x64xf32>
    %c240_341 = arith.constant 240 : index
    %c0_342 = arith.constant 0 : index
    %335 = vector.load %arg14[%c240_341, %c0_342] : memref<392x64xf32, #tpu.memory_space<vmem>>, vector<8x64xf32>
    %c248_343 = arith.constant 248 : index
    %c0_344 = arith.constant 0 : index
    %336 = vector.load %arg14[%c248_343, %c0_344] : memref<392x64xf32, #tpu.memory_space<vmem>>, vector<8x64xf32>
    %c256 = arith.constant 256 : index
    %c0_345 = arith.constant 0 : index
    %337 = vector.load %arg14[%c256, %c0_345] : memref<392x64xf32, #tpu.memory_space<vmem>>, vector<8x64xf32>
    %c264 = arith.constant 264 : index
    %c0_346 = arith.constant 0 : index
    %338 = vector.load %arg14[%c264, %c0_346] : memref<392x64xf32, #tpu.memory_space<vmem>>, vector<8x64xf32>
    %c272 = arith.constant 272 : index
    %c0_347 = arith.constant 0 : index
    %339 = vector.load %arg14[%c272, %c0_347] : memref<392x64xf32, #tpu.memory_space<vmem>>, vector<8x64xf32>
    %c280_348 = arith.constant 280 : index
    %c0_349 = arith.constant 0 : index
    %340 = vector.load %arg14[%c280_348, %c0_349] : memref<392x64xf32, #tpu.memory_space<vmem>>, vector<8x64xf32>
    %c288_350 = arith.constant 288 : index
    %c0_351 = arith.constant 0 : index
    %341 = vector.load %arg14[%c288_350, %c0_351] : memref<392x64xf32, #tpu.memory_space<vmem>>, vector<8x64xf32>
    %c296 = arith.constant 296 : index
    %c0_352 = arith.constant 0 : index
    %342 = vector.load %arg14[%c296, %c0_352] : memref<392x64xf32, #tpu.memory_space<vmem>>, vector<8x64xf32>
    %c304 = arith.constant 304 : index
    %c0_353 = arith.constant 0 : index
    %343 = vector.load %arg14[%c304, %c0_353] : memref<392x64xf32, #tpu.memory_space<vmem>>, vector<8x64xf32>
    %c312 = arith.constant 312 : index
    %c0_354 = arith.constant 0 : index
    %344 = vector.load %arg14[%c312, %c0_354] : memref<392x64xf32, #tpu.memory_space<vmem>>, vector<8x64xf32>
    %c320 = arith.constant 320 : index
    %c0_355 = arith.constant 0 : index
    %345 = vector.load %arg14[%c320, %c0_355] : memref<392x64xf32, #tpu.memory_space<vmem>>, vector<8x64xf32>
    %c328 = arith.constant 328 : index
    %c0_356 = arith.constant 0 : index
    %346 = vector.load %arg14[%c328, %c0_356] : memref<392x64xf32, #tpu.memory_space<vmem>>, vector<8x64xf32>
    %c336_357 = arith.constant 336 : index
    %c0_358 = arith.constant 0 : index
    %347 = vector.load %arg14[%c336_357, %c0_358] : memref<392x64xf32, #tpu.memory_space<vmem>>, vector<8x64xf32>
    %c344_359 = arith.constant 344 : index
    %c0_360 = arith.constant 0 : index
    %348 = vector.load %arg14[%c344_359, %c0_360] : memref<392x64xf32, #tpu.memory_space<vmem>>, vector<8x64xf32>
    %c352 = arith.constant 352 : index
    %c0_361 = arith.constant 0 : index
    %349 = vector.load %arg14[%c352, %c0_361] : memref<392x64xf32, #tpu.memory_space<vmem>>, vector<8x64xf32>
    %c360 = arith.constant 360 : index
    %c0_362 = arith.constant 0 : index
    %350 = vector.load %arg14[%c360, %c0_362] : memref<392x64xf32, #tpu.memory_space<vmem>>, vector<8x64xf32>
    %c368 = arith.constant 368 : index
    %c0_363 = arith.constant 0 : index
    %351 = vector.load %arg14[%c368, %c0_363] : memref<392x64xf32, #tpu.memory_space<vmem>>, vector<8x64xf32>
    %c376 = arith.constant 376 : index
    %c0_364 = arith.constant 0 : index
    %352 = vector.load %arg14[%c376, %c0_364] : memref<392x64xf32, #tpu.memory_space<vmem>>, vector<8x64xf32>
    %c384 = arith.constant 384 : index
    %c0_365 = arith.constant 0 : index
    %353 = vector.load %arg14[%c384, %c0_365] : memref<392x64xf32, #tpu.memory_space<vmem>>, vector<8x64xf32>
    %354 = tpu.concatenate %305, %306, %307, %308, %309, %310, %311, %312, %313, %314, %315, %316, %317, %318, %319, %320 in 1 : vector<8x64xf32>, vector<8x64xf32>, vector<8x64xf32>, vector<8x64xf32>, vector<8x64xf32>, vector<8x64xf32>, vector<8x64xf32>, vector<8x64xf32>, vector<8x64xf32>, vector<8x64xf32>, vector<8x64xf32>, vector<8x64xf32>, vector<8x64xf32>, vector<8x64xf32>, vector<8x64xf32>, vector<8x64xf32> -> vector<8x1024xf32>
    %355 = tpu.concatenate %321, %322, %323, %324, %325, %326, %327, %328, %329, %330, %331, %332, %333, %334, %335, %336 in 1 : vector<8x64xf32>, vector<8x64xf32>, vector<8x64xf32>, vector<8x64xf32>, vector<8x64xf32>, vector<8x64xf32>, vector<8x64xf32>, vector<8x64xf32>, vector<8x64xf32>, vector<8x64xf32>, vector<8x64xf32>, vector<8x64xf32>, vector<8x64xf32>, vector<8x64xf32>, vector<8x64xf32>, vector<8x64xf32> -> vector<8x1024xf32>
    %356 = tpu.concatenate %337, %338, %339, %340, %341, %342, %343, %344, %345, %346, %347, %348, %349, %350, %351, %352 in 1 : vector<8x64xf32>, vector<8x64xf32>, vector<8x64xf32>, vector<8x64xf32>, vector<8x64xf32>, vector<8x64xf32>, vector<8x64xf32>, vector<8x64xf32>, vector<8x64xf32>, vector<8x64xf32>, vector<8x64xf32>, vector<8x64xf32>, vector<8x64xf32>, vector<8x64xf32>, vector<8x64xf32>, vector<8x64xf32> -> vector<8x1024xf32>
    %357 = tpu.concatenate %354, %355, %356, %353 in 1 : vector<8x1024xf32>, vector<8x1024xf32>, vector<8x1024xf32>, vector<8x64xf32> -> vector<8x3136xf32>
    %358 = arith.truncf %357 : vector<8x3136xf32> to vector<8x3136xbf16>
    %c0_366 = arith.constant 0 : index
    %c0_367 = arith.constant 0 : index
    %359 = vector.load %arg7[%c0_366, %c0_367] : memref<3136x512xbf16, #tpu.memory_space<vmem>>, vector<3136x512xbf16>
    %cst_368 = arith.constant dense<0.000000e+00> : vector<8x512xf32>
    %360 = tpu.matmul %358, %359, %cst_368 {dimension_numbers = #tpu.dot_dimension_numbers<[1], [0], [0], [1], [0, 0, 1, 1], [], []>} : vector<8x3136xbf16>, vector<3136x512xbf16>, vector<8x512xf32> -> vector<8x512xf32>
    %c0_369 = arith.constant 0 : index
    %c0_370 = arith.constant 0 : index
    %361 = vector.load %arg8[%c0_369, %c0_370] : memref<1x512xf32, #tpu.memory_space<vmem>>, vector<1x512xf32>
    %362 = vector.broadcast %361 : vector<1x512xf32> to vector<8x512xf32>
    %363 = arith.addf %360, %362 : vector<8x512xf32>
    %cst_371 = arith.constant 0.000000e+00 : f32
    %364 = vector.broadcast %cst_371 : f32 to vector<8x512xf32>
    %365 = arith.maximumf %363, %364 : vector<8x512xf32>
    %366 = arith.truncf %365 : vector<8x512xf32> to vector<8x512xbf16>
    %c0_372 = arith.constant 0 : index
    %c0_373 = arith.constant 0 : index
    %367 = vector.load %arg9[%c0_372, %c0_373] : memref<512x128xbf16, #tpu.memory_space<vmem>>, vector<512x128xbf16>
    %cst_374 = arith.constant dense<0.000000e+00> : vector<8x128xf32>
    %368 = tpu.matmul %366, %367, %cst_374 {dimension_numbers = #tpu.dot_dimension_numbers<[1], [0], [0], [1], [0, 0, 1, 1], [], []>} : vector<8x512xbf16>, vector<512x128xbf16>, vector<8x128xf32> -> vector<8x128xf32>
    %c0_375 = arith.constant 0 : index
    %c0_376 = arith.constant 0 : index
    %369 = vector.load %arg10[%c0_375, %c0_376] : memref<1x128xf32, #tpu.memory_space<vmem>>, vector<1x128xf32>
    %370 = vector.broadcast %369 : vector<1x128xf32> to vector<8x128xf32>
    %371 = arith.addf %368, %370 : vector<8x128xf32>
    %c0_377 = arith.constant 0 : index
    %c0_378 = arith.constant 0 : index
    %372 = vector.load %arg11[%c0_377, %c0_378] : memref<8x128xf32, #tpu.memory_space<vmem>>, vector<8x128xf32>
    tpu.vector_store %arg11[%c0_377, %c0_378], %371 {strides = array<i32>} : memref<8x128xf32, #tpu.memory_space<vmem>>, vector<8x128xf32>,
    return
  }
}

</mosaic_0001>

<bundles_post_ra>
// kernel: pursuit_cnn_forward.1
= control target key start
LH: loop header
LB: loop body
LE: loop exit
PB: predicated region body
PF: predicated region fallthrough
CT: control target
= control target key end

     0   :  { %16 = vsyncpa [#allocation6], 0  ;;  %s14642_s0 = inlined_call_operand.vmem [shape: bf16[128,3], index: 0, kind: input, shape index: {}]   ;;  %s14643_s1 = inlined_call_operand.vmem [shape: bf16[4,3,32], index: 1, kind: input, shape index: {}]   ;;  %s14644_s2 = inlined_call_operand.hbm [shape: f32[1,32], index: 2, kind: input, shape index: {}]   ;;  %s14645_s3 = inlined_call_operand.hbm [shape: bf16[4,32,64], index: 3, kind: input, shape index: {}]   ;;  %s14646_s4 = inlined_call_operand.hbm [shape: f32[1,64], index: 4, kind: input, shape index: {}]   ;;  %s14647_s5 = inlined_call_operand.hbm [shape: bf16[4,64,64], index: 5, kind: input, shape index: {}]   ;;  %s14648_s6 = inlined_call_operand.hbm [shape: f32[1,64], index: 6, kind: input, shape index: {}]   ;;  %s14649_s7 = inlined_call_operand.hbm [shape: bf16[3136,512], index: 7, kind: input, shape index: {}]   ;;  %s14650_s8 = inlined_call_operand.hbm [shape: f32[1,512], index: 8, kind: input, shape index: {}]   ;;  %s14651_s9 = inlined_call_operand.hbm [shape: bf16[512,128], index: 9, kind: input, shape index: {}]   ;;  %s14652_s10 = inlined_call_operand.hbm [shape: f32[1,128], index: 10, kind: input, shape index: {}]   ;;  %s14653_s11 = inlined_call_operand.vmem [shape: f32[8,128], index: 11, kind: output, shape index: {}]  }
   0x1   :  { %17 = vsyncpa [#allocation8], 0 }
   0x2   :  { %18 = vsyncpa [#allocation11], 0 }
   0x3   :  { %19 = vsyncpa [#allocation14], 0 }
   0x4   :  { %20 = vsyncpa [#allocation17], 0  ;;  %s13236_s17 = smov [#allocation7]  }
   0x5   :  { %s40_s18 = sshll.u32 %s13236_s17, 4  ;;  %s41_s18 = int_to_ptr.vmem [resolvable:$true] %s40_s18 }
   0x6   :  { %s13054_s19 = scalar_lea.vmem %s41_s18, 1024  ;;  %p13059_p1 = scmp.lt.s32.totalorder %s41_s18, %s41_s18 }
   0x7   :  { %p13055_p0 = scmp.ne.s32.totalorder %s41_s18, %s13054_s19  ;;  %p13060_p2 = scmp.lt.s32.totalorder %s13054_s19, %s13054_s19 }
   0x9   :  { %p13061_p3 = por %p13060_p2, %p13059_p1 }
   0xb   :  { %p13062_p4 = pnand %p13061_p3, %p13055_p0 }
   0xd   :  { %13065 = shalt.err (!%p13062_p4)
}
   0xe   :  { %s13237_s20 = smov 64   ;;  %s13238_s21 = smov 4  }
   0xf   :  { %46 = dma.hbm_to_vmem [thread:$0]  %s14645_s3, 1024, %s41_s18, [#allocation8], %s13237_s20, %s13237_s20, %s13238_s21  }
  0x10   :  { %s13239_s24 = smov [#allocation10]   ;;  %s13240_s26 = smov [#allocation13]  }
  0x11   :  { %s62_s25 = sshll.u32 %s13239_s24, 4  ;;  %s84_s27 = sshll.u32 %s13240_s26, 4  ;;  %s63_s25 = int_to_ptr.vmem [resolvable:$true] %s62_s25  ;;  %s85_s27 = int_to_ptr.vmem [resolvable:$true] %s84_s27 }
  0x12   :  { %s13074_s28 = scalar_lea.vmem %s63_s25, 2048  ;;  %p13079_p6 = scmp.lt.s32.totalorder %s63_s25, %s63_s25 }
  0x13   :  { %p13075_p5 = scmp.ne.s32.totalorder %s63_s25, %s13074_s28  ;;  %p13080_p7 = scmp.lt.s32.totalorder %s13074_s28, %s13074_s28 }
  0x15   :  { %p13081_p8 = por %p13080_p7, %p13079_p6 }
  0x17   :  { %p13082_p9 = pnand %p13081_p8, %p13075_p5 }
  0x19   :  { %13085 = shalt.err (!%p13082_p9)
}
  0x1a   :  { %68 = dma.hbm_to_vmem [thread:$0]  %s14647_s5, 2048, %s63_s25, [#allocation11], %s13237_s20, %s13237_s20, %s13238_s21  }
  0x1b   :  { %s13094_s3 = scalar_lea.vmem %s85_s27, 100352  ;;  %p13099_p11 = scmp.lt.s32.totalorder %s85_s27, %s85_s27 }
  0x1c   :  { %p13095_p10 = scmp.ne.s32.totalorder %s85_s27, %s13094_s3  ;;  %p13100_p12 = scmp.lt.s32.totalorder %s13094_s3, %s13094_s3 }
  0x1e   :  { %p13101_p13 = por %p13100_p12, %p13099_p11 }
  0x20   :  { %p13102_p0 = pnand %p13101_p13, %p13095_p10 }
  0x22   :  { %13105 = shalt.err (!%p13102_p0)
}
  0x23   :  { %s13241_s12 = smov 256   ;;  %s13242_s13 = smov 16  }
  0x24   :  { %90 = dma.hbm_to_vmem [thread:$0]  %s14649_s7, 100352, %s85_s27, [#allocation14], %s13241_s12, %s13241_s12, %s13242_s13  }
  0x25   :  { %s13243_s16 = smov [#allocation16]   ;;  %s13244_s18 = smov [#allocation5]  }
  0x26   :  { %s106_s17 = sshll.u32 %s13243_s16, 4  ;;  %s31_s19 = sshll.u32 %s13244_s18, 4  ;;  %s107_s17 = int_to_ptr.vmem [resolvable:$true] %s106_s17  ;;  %s32_s19 = int_to_ptr.vmem [resolvable:$true] %s31_s19 }
  0x27   :  { %s13114_s5 = scalar_lea.vmem %s107_s17, 4096  ;;  %p13119_p2 = scmp.lt.s32.totalorder %s107_s17, %s107_s17 }
  0x28   :  { %p13115_p1 = scmp.ne.s32.totalorder %s107_s17, %s13114_s5  ;;  %p13120_p3 = scmp.lt.s32.totalorder %s13114_s5, %s13114_s5 }
  0x2a   :  { %p13121_p4 = por %p13120_p3, %p13119_p2 }
  0x2c   :  { %p13122_p5 = pnand %p13121_p4, %p13115_p1 }
  0x2e   :  { %13125 = shalt.err (!%p13122_p5)
}
  0x2f   :  { %112 = dma.hbm_to_vmem [thread:$0]  %s14651_s9, 4096, %s107_s17, [#allocation17], %s13237_s20, %s13237_s20, %s13238_s21  }
  0x30   :  { %s13134_s7 = scalar_lea.vmem %s32_s19, 16  ;;  %s13138_s24 = scalar_lea.vmem %s32_s19, 32 }
  0x31   :  { %p13135_p6 = scmp.ne.s32.totalorder %s32_s19, %s13134_s7  ;;  %p13139_p7 = scmp.lt.s32.totalorder %s32_s19, %s32_s19 }
  0x32   :  { %p13140_p8 = scmp.lt.s32.totalorder %s13138_s24, %s13134_s7 }
  0x34   :  { %p13141_p9 = por %p13140_p8, %p13139_p7 }
  0x36   :  { %p13142_p10 = pnand %p13141_p9, %p13135_p6 }
  0x38   :  { %13145 = shalt.err (!%p13142_p10)
}
  0x39   :  { %34 = dma.hbm_to_vmem [thread:$0]  %s14644_s2, 16, %s32_s19, [#allocation6]  }
  0x3a   :  { %s13245_s27 = smov [#allocation9]   ;;  %s13246_s29 = smov [#allocation12]  }
  0x3b   :  { %s53_s28 = sshll.u32 %s13245_s27, 4  ;;  %s75_s30 = sshll.u32 %s13246_s29, 4  ;;  %s54_s28 = int_to_ptr.vmem [resolvable:$true] %s53_s28  ;;  %s76_s30 = int_to_ptr.vmem [resolvable:$true] %s75_s30 }
  0x3c   :  { %s13154_s3 = scalar_lea.vmem %s54_s28, 16  ;;  %s13158_s9 = scalar_lea.vmem %s54_s28, 32 }
  0x3d   :  { %p13155_p11 = scmp.ne.s32.totalorder %s54_s28, %s13154_s3  ;;  %p13159_p12 = scmp.lt.s32.totalorder %s54_s28, %s54_s28 }
  0x3e   :  { %p13160_p13 = scmp.lt.s32.totalorder %s13158_s9, %s13154_s3 }
  0x40   :  { %p13161_p0 = por %p13160_p13, %p13159_p12 }
  0x42   :  { %p13162_p1 = pnand %p13161_p0, %p13155_p11 }
  0x44   :  { %13165 = shalt.err (!%p13162_p1)
}
  0x45   :  { %56 = dma.hbm_to_vmem [thread:$0]  %s14646_s4, 16, %s54_s28, [#allocation8]  }
  0x46   :  { %s13174_s13 = scalar_lea.vmem %s76_s30, 16  ;;  %s13178_s2 = scalar_lea.vmem %s76_s30, 32 }
  0x47   :  { %p13175_p2 = scmp.ne.s32.totalorder %s76_s30, %s13174_s13  ;;  %p13179_p3 = scmp.lt.s32.totalorder %s76_s30, %s76_s30 }
  0x48   :  { %p13180_p4 = scmp.lt.s32.totalorder %s13178_s2, %s13174_s13 }
  0x4a   :  { %p13181_p5 = por %p13180_p4, %p13179_p3 }
  0x4c   :  { %p13182_p6 = pnand %p13181_p5, %p13175_p2 }
  0x4e   :  { %13185 = shalt.err (!%p13182_p6)
}
  0x4f   :  { %78 = dma.hbm_to_vmem [thread:$0]  %s14648_s6, 16, %s76_s30, [#allocation11]  }
  0x50   :  { %s13247_s16 = smov [#allocation15]   ;;  %s13248_s18 = smov [#allocation18]  }
  0x51   :  { %s97_s17 = sshll.u32 %s13247_s16, 4  ;;  %s119_s19 = sshll.u32 %s13248_s18, 4  ;;  %s98_s17 = int_to_ptr.vmem [resolvable:$true] %s97_s17  ;;  %s120_s19 = int_to_ptr.vmem [resolvable:$true] %s119_s19 }
  0x52   :  { %s13194_s5 = scalar_lea.vmem %s98_s17, 64  ;;  %p13199_p8 = scmp.lt.s32.totalorder %s98_s17, %s98_s17 }
  0x53   :  { %p13195_p7 = scmp.ne.s32.totalorder %s98_s17, %s13194_s5  ;;  %p13200_p9 = scmp.lt.s32.totalorder %s13194_s5, %s13194_s5 }
  0x55   :  { %p13201_p10 = por %p13200_p9, %p13199_p8 }
  0x57   :  { %p13202_p11 = pnand %p13201_p10, %p13195_p7 }
  0x59   :  { %13205 = shalt.err (!%p13202_p11)
}
  0x5a   :  { %100 = dma.hbm_to_vmem [thread:$0]  %s14650_s8, 64, %s98_s17, [#allocation14]  }
  0x5b   :  { %s13214_s23 = scalar_lea.vmem %s120_s19, 16  ;;  %s13218_s6 = scalar_lea.vmem %s120_s19, 32 }
  0x5c   :  { %p13215_p12 = scmp.ne.s32.totalorder %s120_s19, %s13214_s23  ;;  %p13219_p13 = scmp.lt.s32.totalorder %s120_s19, %s120_s19 }
  0x5d   :  { %p13220_p0 = scmp.lt.s32.totalorder %s13218_s6, %s13214_s23 }
  0x5f   :  { %p13221_p1 = por %p13220_p0, %p13219_p13 }
  0x61   :  { %p13222_p2 = pnand %p13221_p1, %p13215_p12 }
  0x63   :  { %13225 = shalt.err (!%p13222_p2)
}
  0x64   :  { %122 = dma.hbm_to_vmem [thread:$0]  %s14652_s10, 16, %s120_s19, [#allocation17]  }
  0x65   :  { %13226 = dma.done.wait [#allocation6], 16  }
  0x66   :  { %13227 = vsyncadd [#allocation6], 4294967280 }
  0x67   :  { %13228 = dma.done.wait [#allocation8], 1040  }
  0x68   :  { %13229 = vsyncadd [#allocation8], 4294966256 }
  0x69   :  { %13230 = dma.done.wait [#allocation11], 2064  }
  0x6a   :  { %13231 = vsyncadd [#allocation11], 4294965232 }
  0x6b   :  { %13232 = dma.done.wait [#allocation14], 100416  }
  0x6c   :  { %13233 = vsyncadd [#allocation14], 4294866880 }
  0x6d   :  { %13234 = dma.done.wait [#allocation17], 4112  }
  0x6e   :  { %13235 = vsyncadd [#allocation17], 4294963184  ;;  %vm266_vm0 = vcmask 1040384   ;;  %vm267_vm1 = vcmask 1041408   ;;  %v13249_v0 = vmov 65535   ;;  %v13358_v7 = vld [vmem:[%s14642_s0] sm:$0xff]  }
  0x6f   :  { %v268_v1 = vsel %vm266_vm0, 4294967295, %v13249_v0  ;;  %v200_v3 = vld [vmem:[%s14643_s1] sm:$0x3]  ;;  %v10032_v4 = vld [vmem:[%s14643_s1 + $0x2] sm:$0x3]  ;;  %vm241_vm2 = vcmask 23552  }
  0x70   :  { %v269_v2 = vsel %vm267_vm1, %v268_v1, 0  ;;  %v13363_v8 = vld [vmem:[%s14642_s0 + $0x8] sm:$0xff]   ;;  %v10041_v9 = vld [vmem:[%s14643_s1 + $0x4] sm:$0x3]  ;;  %v10050_v11 = vld [vmem:[%s14643_s1 + $0x6] sm:$0x3]  ;;  %11258 = vmatprep.mubr.msk.bf16.mxu0 %vm241_vm2, %v13358_v7  ;;  %11276 = vmatprep.mubr.msk.bf16.mxu1 %vm241_vm2, %v13358_v7 }
  0x71   :  { %v271_v5 = vand.u32 %v269_v2, %v200_v3  ;;  %v421_v6 = vand.u32 %v10032_v4, %v269_v2  ;;  %v571_v10 = vand.u32 %v10041_v9, %v269_v2  ;;  %v721_v12 = vand.u32 %v10050_v11, %v269_v2  ;;  %v11807_v13 = vld [vmem:[%s14642_s0 + $0x10] sm:$0xff]   ;;  %v11808_v14 = vld [vmem:[%s14642_s0 + $0x18] sm:$0xff]   ;;  %v11809_v16 = vld [vmem:[%s14642_s0 + $0x20] sm:$0xff]  }
  0x72   :  { %vm174_vm3 = vcmask 261120   ;;  %v10015_v15 = vld [vmem:[#allocation5] ss:$0 sm:$0xff]  ;;  %v11810_v17 = vld [vmem:[%s14642_s0 + $0x28] sm:$0xff]   ;;  %v11812_v19 = vld [vmem:[%s14642_s0 + $0x38] sm:$0xff]   ;;  %v13250_v20 = vmov 0.0  }
  0x73   :  { %11256 = vmatprep.subr.bf16.mxu0 %v271_v5  ;;  %11274 = vmatprep.subr.bf16.mxu1 %v421_v6  ;;  %183 = vst.msk [vmem:[#allocation2 + $0x40] sm:$0xff] %vm174_vm3, %v10015_v15  ;;  %175 = vst.msk [vmem:[#allocation2] sm:$0xff] %vm174_vm3, %v10015_v15  ;;  %v11811_v18 = vld [vmem:[%s14642_s0 + $0x30] sm:$0xff]   ;;  %v11813_v21 = vld [vmem:[#allocation7 + $0x8] sm:$0xff]   ;;  %vm13251_vm4 = vmmov 0   ;;  %vm988_vm5 = vcmask 523264  }
  0x74   :  { %11257 = vmatpush3.bf16.msra.mxu0 %v271_v5  ;;  %11275 = vmatpush3.bf16.msra.mxu1 %v421_v6  ;;  %176 = vst.msk [vmem:[#allocation2 + $0x8] sm:$0xff] %vm174_vm3, %v10015_v15  ;;  %177 = vst.msk [vmem:[#allocation2 + $0x10] sm:$0xff] %vm174_vm3, %v10015_v15  ;;  %v11814_v22 = vld [vmem:[#allocation7 + $0x18] sm:$0xff]   ;;  %v11815_v23 = vld [vmem:[#allocation7] sm:$0xff]  }
  0x75   :  { %11292 = vmatprep.subr.bf16.mxu0 %v571_v10  ;;  %11310 = vmatprep.subr.bf16.mxu1 %v721_v12  ;;  %178 = vst.msk [vmem:[#allocation2 + $0x18] sm:$0xff] %vm174_vm3, %v10015_v15  ;;  %179 = vst.msk [vmem:[#allocation2 + $0x20] sm:$0xff] %vm174_vm3, %v10015_v15  ;;  %v11816_v24 = vld [vmem:[#allocation7 + $0x10] sm:$0xff]  }
  0x76   :  { %180 = vst.msk [vmem:[#allocation2 + $0x28] sm:$0xff] %vm174_vm3, %v10015_v15  ;;  %181 = vst.msk [vmem:[#allocation2 + $0x30] sm:$0xff] %vm174_vm3, %v10015_v15 }
  0x77   :  { %11259 = vmatmul.mubr.msk.bf16.vlgmr.msra.gmra.mxu0 %vm241_vm2, %v13363_v8  ;;  %11277 = vmatmul.mubr.msk.bf16.vlgmr.msra.gmra.mxu1 %vm241_vm2, %v13363_v8  ;;  %182 = vst.msk [vmem:[#allocation2 + $0x38] sm:$0xff] %vm174_vm3, %v10015_v15  ;;  %184 = vst.msk [vmem:[#allocation2 + $0x48] sm:$0xff] %vm174_vm3, %v10015_v15 }
  0x78   :  { %11293 = vmatpush3.bf16.msra.mxu0 %v571_v10  ;;  %11262 = vmatprep.mubr.msk.bf16.mxu0 %vm241_vm2, %v11807_v13  ;;  %185 = vst.msk [vmem:[#allocation2 + $0x50] sm:$0xff] %vm174_vm3, %v10015_v15  ;;  %186 = vst.msk [vmem:[#allocation2 + $0x58] sm:$0xff] %vm174_vm3, %v10015_v15 }
  0x79   :  { %11280 = vmatprep.mubr.msk.bf16.mxu1 %vm241_vm2, %v11807_v13  ;;  %11311 = vmatpush3.bf16.msra.mxu1 %v721_v12  ;;  %187 = vst.msk [vmem:[#allocation2 + $0x60] sm:$0xff] %vm174_vm3, %v10015_v15  ;;  %188 = vst.msk [vmem:[#allocation2 + $0x68] sm:$0xff] %vm174_vm3, %v10015_v15 }
  0x7a   :  { %189 = vst.msk [vmem:[#allocation2 + $0x70] sm:$0xff] %vm174_vm3, %v10015_v15  ;;  %190 = vst.msk [vmem:[#allocation2 + $0x78] sm:$0xff] %vm174_vm3, %v10015_v15  ;;  %11328 = vmatprep.subr.bf16.mxu0 %v13250_v20  ;;  %11384 = vmatprep.subr.bf16.mxu1 %v13250_v20  ;;  %v372_v25 = vld [vmem:[#allocation2 + $0x40] sm:$0xff] }
  0x7b   :  { %191 = vst.msk [vmem:[#allocation2 + $0x80] sm:$0xff] %vm174_vm3, %v10015_v15  ;;  %192 = vst.msk [vmem:[#allocation2 + $0x88] sm:$0xff] %vm174_vm3, %v10015_v15 }
  0x7c   :  { %193 = vst.msk [vmem:[#allocation2 + $0x90] sm:$0xff] %vm174_vm3, %v10015_v15  ;;  %194 = vst.msk [vmem:[#allocation2 + $0x98] sm:$0xff] %vm174_vm3, %v10015_v15 }
  0x7d   :  { %195 = vst.msk [vmem:[#allocation2 + $0xa0] sm:$0xff] %vm174_vm3, %v10015_v15  ;;  %196 = vst.msk [vmem:[#allocation2 + $0xa8] sm:$0xff] %vm174_vm3, %v10015_v15  ;;  %v370_v26 = vld [vmem:[#allocation2 + $0x30] sm:$0xff]  ;;  %v520_v27 = vld [vmem:[#allocation2 + $0x28] sm:$0xff] }
  0x7e   :  { %197 = vst.msk [vmem:[#allocation2 + $0xb0] sm:$0xff] %vm174_vm3, %v10015_v15  ;;  %198 = vst.msk [vmem:[#allocation2 + $0xb8] sm:$0xff] %vm174_vm3, %v10015_v15  ;;  %v373_v30 = vld [vmem:[#allocation2 + $0x48] sm:$0xff]  ;;  %v371_v34 = vld [vmem:[#allocation2 + $0x38] sm:$0xff] }
  0x7f   :  { %199 = vst.msk [vmem:[#allocation2 + $0xc0] sm:$0xff] %vm174_vm3, %v10015_v15  ;;  %11263 = vmatmul.mubr.msk.bf16.gmra.mxu0 %vm241_vm2, %v11808_v14  ;;  %11281 = vmatmul.mubr.msk.bf16.gmra.mxu1 %vm241_vm2, %v11808_v14  ;;  %v382_v43 = vld [vmem:[#allocation2 + $0x58] sm:$0xff]  ;;  %v532_v44 = vld [vmem:[#allocation2 + $0x50] sm:$0xff] }
  0x80   :  { %11266 = vmatprep.mubr.msk.bf16.mxu0 %vm241_vm2, %v11809_v16  ;;  %11284 = vmatprep.mubr.msk.bf16.mxu1 %vm241_vm2, %v11809_v16  ;;  %v384_v39 = vld [vmem:[#allocation2 + $0x68] sm:$0xff]  ;;  %v383_v53 = vld [vmem:[#allocation2 + $0x60] sm:$0xff] }
  0x81   :  { %v385_v48 = vld [vmem:[#allocation2 + $0x70] sm:$0xff]  ;;  %v544_v2 = vld [vmem:[#allocation2 + $0x78] sm:$0xff] }
  0x82   :  { %v394_v1 = vld [vmem:[#allocation2 + $0x80] sm:$0xff] }
  0x83   :  { %v396_v60 = vld [vmem:[#allocation2 + $0x90] sm:$0xff]  ;;  %v397_v6 = vld [vmem:[#allocation2 + $0x98] sm:$0xff] }
  0x87   :  { %11267 = vmatmul.mubr.msk.bf16.gmra.mxu0 %vm241_vm2, %v11810_v17  ;;  %11285 = vmatmul.mubr.msk.bf16.gmra.mxu1 %vm241_vm2, %v11810_v17 }
  0x88   :  { %11270 = vmatprep.mubr.msk.bf16.mxu0 %vm241_vm2, %v11811_v18  ;;  %11288 = vmatprep.mubr.msk.bf16.mxu1 %vm241_vm2, %v11811_v18 }
  0x8f   :  { %11271 = vmatmul.mubr.msk.bf16.gmra.mxu0 %vm241_vm2, %v11812_v19  ;;  %11289 = vmatmul.mubr.msk.bf16.gmra.mxu1 %vm241_vm2, %v11812_v19 }
  0x90   :  { %11294 = vmatprep.mubr.msk.bf16.mxu0 %vm241_vm2, %v13358_v7  ;;  %11312 = vmatprep.mubr.msk.bf16.mxu1 %vm241_vm2, %v13358_v7 }
  0x97   :  { %11295 = vmatmul.mubr.msk.bf16.vlgmr.msra.gmra.mxu0 %vm241_vm2, %v13363_v8  ;;  %11313 = vmatmul.mubr.msk.bf16.vlgmr.msra.gmra.mxu1 %vm241_vm2, %v13363_v8 }
  0x98   :  { %11298 = vmatprep.mubr.msk.bf16.mxu0 %vm241_vm2, %v11807_v13  ;;  %11316 = vmatprep.mubr.msk.bf16.mxu1 %vm241_vm2, %v11807_v13 }
  0x99   :  { %11329 = vmatpush3.bf16.msra.mxu0 %v11813_v21  ;;  %11385 = vmatpush3.bf16.msra.mxu1 %v11814_v22  ;;  %v408_v21 = vld [vmem:[#allocation2 + $0xb8] sm:$0xff] }
  0x9a   :  { %11330 = vmatprep.subr.bf16.mxu0 %v13250_v20  ;;  %11386 = vmatprep.subr.bf16.mxu1 %v13250_v20 }
  0x9d   :  { %11331 = vmatpush3.bf16.msra.mxu0 %v11815_v23  ;;  %11387 = vmatpush3.bf16.msra.mxu1 %v11816_v24 }
  0x9e   :  { %11440 = vmatprep.subr.bf16.mxu0 %v13250_v20  ;;  %11496 = vmatprep.subr.bf16.mxu1 %v13250_v20 }
  0x9f   :  { %11299 = vmatmul.mubr.msk.bf16.gmra.mxu0 %vm241_vm2, %v11808_v14  ;;  %11317 = vmatmul.mubr.msk.bf16.gmra.mxu1 %vm241_vm2, %v11808_v14 }
  0xa0   :  { %11302 = vmatprep.mubr.msk.bf16.mxu0 %vm241_vm2, %v11809_v16  ;;  %11320 = vmatprep.mubr.msk.bf16.mxu1 %vm241_vm2, %v11809_v16 }
  0xa7   :  { %11303 = vmatmul.mubr.msk.bf16.gmra.mxu0 %vm241_vm2, %v11810_v17  ;;  %11321 = vmatmul.mubr.msk.bf16.gmra.mxu1 %vm241_vm2, %v11810_v17 }
  0xa8   :  { %11306 = vmatprep.mubr.msk.bf16.mxu0 %vm241_vm2, %v11811_v18  ;;  %11324 = vmatprep.mubr.msk.bf16.mxu1 %vm241_vm2, %v11811_v18 }
  0xaf   :  { %11307 = vmatmul.mubr.msk.bf16.gmra.mxu0 %vm241_vm2, %v11812_v19  ;;  %11325 = vmatmul.mubr.msk.bf16.gmra.mxu1 %vm241_vm2, %v11812_v19  ;;  %v395_v19 = vld [vmem:[#allocation2 + $0x88] sm:$0xff] }
  0xb0   :  { %11332 = vmatprep.mubr.msk.bf16.mxu0 %vm13251_vm4, %v13250_v20  ;;  %11388 = vmatprep.mubr.msk.bf16.mxu1 %vm13251_vm4, %v13250_v20 }
 0x137   :  { %v11260_v28 = vpop.f32.mrf.mxu0  ;;  %v11278_v29 = vpop.f32.mrf.mxu1 }
 0x138   :  { %v376_v31 = vadd.f32 %v11260_v28, %v372_v25 }
 0x139   :  { %v307_v32 = vpop.f32.mrf.mxu0  ;;  %v457_v33 = vpop.f32.mrf.mxu1 }
 0x13a   :  { %380 = vst.msk [vmem:[#allocation2 + $0x40] sm:$0xff] %vm174_vm3, %v376_v31  ;;  %v374_v35 = vadd.f32 %v370_v26, %v307_v32  ;;  %v524_v36 = vadd.f32 %v520_v27, %v457_v33  ;;  %v406_v26 = vld [vmem:[#allocation2 + $0xa8] sm:$0xff]  ;;  %v556_v27 = vld [vmem:[#allocation2 + $0xa0] sm:$0xff] }
 0x13b   :  { %v11261_v37 = vpop.f32.mrf.mxu0  ;;  %v11279_v38 = vpop.f32.mrf.mxu1 }
 0x13c   :  { %378 = vst.msk [vmem:[#allocation2 + $0x30] sm:$0xff] %vm174_vm3, %v374_v35  ;;  %528 = vst.msk [vmem:[#allocation2 + $0x28] sm:$0xff] %vm174_vm3, %v524_v36  ;;  %v377_v40 = vadd.f32 %v11261_v37, %v373_v30  ;;  %v409_v37 = vld [vmem:[#allocation2 + $0xc0] sm:$0xff] }
 0x13d   :  { %v310_v41 = vpop.f32.mrf.mxu0  ;;  %v460_v42 = vpop.f32.mrf.mxu1 }
 0x13e   :  { %381 = vst.msk [vmem:[#allocation2 + $0x48] sm:$0xff] %vm174_vm3, %v377_v40  ;;  %v375_v45 = vadd.f32 %v371_v34, %v310_v41 }
 0x13f   :  { %v11264_v46 = vpop.f32.mrf.mxu0  ;;  %v13468_v47 = vpop.f32.mrf.mxu1 }
 0x140   :  { %379 = vst.msk [vmem:[#allocation2 + $0x38] sm:$0xff] %vm174_vm3, %v375_v45  ;;  %v388_v49 = vadd.f32 %v11264_v46, %v384_v39  ;;  %v672_v45 = vld [vmem:[#allocation2 + $0x18] sm:$0xff] }
 0x141   :  { %v523_v50 = vld [vmem:[#allocation2 + $0x40] sm:$0xff]  ;;  %v323_v51 = vpop.f32.mrf.mxu0  ;;  %v473_v52 = vpop.f32.mrf.mxu1 }
 0x142   :  { %v527_v54 = vadd.f32 %v11279_v38, %v523_v50  ;;  %392 = vst.msk [vmem:[#allocation2 + $0x68] sm:$0xff] %vm174_vm3, %v388_v49  ;;  %v386_v55 = vadd.f32 %v382_v43, %v323_v51  ;;  %v536_v56 = vadd.f32 %v532_v44, %v473_v52  ;;  %v407_v44 = vld [vmem:[#allocation2 + $0xb0] sm:$0xff]  ;;  %v670_v50 = vld [vmem:[#allocation2 + $0x8] sm:$0xff]  ;;  %v820_v51 = vld [vmem:[#allocation2] sm:$0xff] }
 0x143   :  { %v521_v57 = vld [vmem:[#allocation2 + $0x30] sm:$0xff]  ;;  %v11265_v58 = vpop.f32.mrf.mxu0  ;;  %v11283_v59 = vpop.f32.mrf.mxu1 }
 0x144   :  { %531 = vst.msk [vmem:[#allocation2 + $0x40] sm:$0xff] %vm174_vm3, %v527_v54  ;;  %v525_v61 = vadd.f32 %v521_v57, %v460_v42  ;;  %390 = vst.msk [vmem:[#allocation2 + $0x58] sm:$0xff] %vm174_vm3, %v386_v55  ;;  %v389_v62 = vadd.f32 %v11265_v58, %v385_v48 }
 0x145   :  { %540 = vst.msk [vmem:[#allocation2 + $0x50] sm:$0xff] %vm174_vm3, %v536_v56  ;;  %v326_v63 = vpop.f32.mrf.mxu0  ;;  %v476_v0 = vpop.f32.mrf.mxu1 }
 0x146   :  { %529 = vst.msk [vmem:[#allocation2 + $0x30] sm:$0xff] %vm174_vm3, %v525_v61  ;;  %393 = vst.msk [vmem:[#allocation2 + $0x70] sm:$0xff] %vm174_vm3, %v389_v62  ;;  %v387_v3 = vadd.f32 %v383_v53, %v326_v63  ;;  %v673_v61 = vld [vmem:[#allocation2 + $0x20] sm:$0xff] }
 0x147   :  { %v11268_v4 = vpop.f32.mrf.mxu0  ;;  %v13477_v5 = vpop.f32.mrf.mxu1  ;;  %v522_v7 = vld [vmem:[#allocation2 + $0x38] sm:$0xff] }
 0x148   :  { %391 = vst.msk [vmem:[#allocation2 + $0x60] sm:$0xff] %vm174_vm3, %v387_v3  ;;  %v400_v8 = vadd.f32 %v11268_v4, %v396_v60  ;;  %v526_v9 = vadd.f32 %v11278_v29, %v522_v7 }
 0x149   :  { %v535_v10 = vld [vmem:[#allocation2 + $0x68] sm:$0xff]  ;;  %v339_v11 = vpop.f32.mrf.mxu0  ;;  %v489_v12 = vpop.f32.mrf.mxu1 }
 0x14a   :  { %v539_v13 = vadd.f32 %v11283_v59, %v535_v10  ;;  %404 = vst.msk [vmem:[#allocation2 + $0x90] sm:$0xff] %vm174_vm3, %v400_v8  ;;  %v398_v14 = vadd.f32 %v394_v1, %v339_v11  ;;  %v548_v15 = vadd.f32 %v544_v2, %v489_v12  ;;  %530 = vst.msk [vmem:[#allocation2 + $0x38] sm:$0xff] %vm174_vm3, %v526_v9 }
 0x14b   :  { %v533_v16 = vld [vmem:[#allocation2 + $0x58] sm:$0xff]  ;;  %v11269_v17 = vpop.f32.mrf.mxu0  ;;  %v11287_v18 = vpop.f32.mrf.mxu1  ;;  %v684_v12 = vld [vmem:[#allocation2 + $0x40] sm:$0xff] }
 0x14c   :  { %543 = vst.msk [vmem:[#allocation2 + $0x68] sm:$0xff] %vm174_vm3, %v539_v13  ;;  %v537_v22 = vadd.f32 %v533_v16, %v476_v0  ;;  %402 = vst.msk [vmem:[#allocation2 + $0x80] sm:$0xff] %vm174_vm3, %v398_v14  ;;  %v401_v23 = vadd.f32 %v11269_v17, %v397_v6  ;;  %v671_v6 = vld [vmem:[#allocation2 + $0x10] sm:$0xff] }
 0x14d   :  { %552 = vst.msk [vmem:[#allocation2 + $0x78] sm:$0xff] %vm174_vm3, %v548_v15  ;;  %v342_v24 = vpop.f32.mrf.mxu0  ;;  %v492_v25 = vpop.f32.mrf.mxu1 }
 0x14e   :  { %541 = vst.msk [vmem:[#allocation2 + $0x58] sm:$0xff] %vm174_vm3, %v537_v22  ;;  %405 = vst.msk [vmem:[#allocation2 + $0x98] sm:$0xff] %vm174_vm3, %v401_v23  ;;  %v399_v28 = vadd.f32 %v395_v19, %v342_v24  ;;  %v682_v24 = vld [vmem:[#allocation2 + $0x30] sm:$0xff] }
 0x14f   :  { %v11272_v29 = vpop.f32.mrf.mxu0  ;;  %v13487_v30 = vpop.f32.mrf.mxu1  ;;  %v534_v31 = vld [vmem:[#allocation2 + $0x60] sm:$0xff] }
 0x150   :  { %403 = vst.msk [vmem:[#allocation2 + $0x88] sm:$0xff] %vm174_vm3, %v399_v28  ;;  %v412_v32 = vadd.f32 %v11272_v29, %v408_v21  ;;  %v538_v33 = vadd.f32 %v13468_v47, %v534_v31 }
 0x151   :  { %v547_v34 = vld [vmem:[#allocation2 + $0x90] sm:$0xff]  ;;  %v355_v35 = vpop.f32.mrf.mxu0  ;;  %v505_v36 = vpop.f32.mrf.mxu1 }
 0x152   :  { %v551_v38 = vadd.f32 %v11287_v18, %v547_v34  ;;  %416 = vst.msk [vmem:[#allocation2 + $0xb8] sm:$0xff] %vm174_vm3, %v412_v32  ;;  %v410_v39 = vadd.f32 %v406_v26, %v355_v35  ;;  %v560_v40 = vadd.f32 %v556_v27, %v505_v36  ;;  %542 = vst.msk [vmem:[#allocation2 + $0x60] sm:$0xff] %vm174_vm3, %v538_v33  ;;  %v832_v18 = vld [vmem:[#allocation2 + $0x28] sm:$0xff]  ;;  %v683_v35 = vld [vmem:[#allocation2 + $0x38] sm:$0xff] }
 0x153   :  { %v545_v41 = vld [vmem:[#allocation2 + $0x80] sm:$0xff]  ;;  %v11273_v42 = vpop.f32.mrf.mxu0  ;;  %v11291_v43 = vpop.f32.mrf.mxu1  ;;  %v685_v26 = vld [vmem:[#allocation2 + $0x48] sm:$0xff] }
 0x154   :  { %555 = vst.msk [vmem:[#allocation2 + $0x90] sm:$0xff] %vm174_vm3, %v551_v38  ;;  %v549_v46 = vadd.f32 %v545_v41, %v492_v25  ;;  %414 = vst.msk [vmem:[#allocation2 + $0xa8] sm:$0xff] %vm174_vm3, %v410_v39  ;;  %v413_v47 = vadd.f32 %v11273_v42, %v409_v37 }
 0x155   :  { %564 = vst.msk [vmem:[#allocation2 + $0xa0] sm:$0xff] %vm174_vm3, %v560_v40  ;;  %v358_v48 = vpop.f32.mrf.mxu0  ;;  %v508_v49 = vpop.f32.mrf.mxu1 }
 0x156   :  { %553 = vst.msk [vmem:[#allocation2 + $0x80] sm:$0xff] %vm174_vm3, %v549_v46  ;;  %417 = vst.msk [vmem:[#allocation2 + $0xc0] sm:$0xff] %vm174_vm3, %v413_v47  ;;  %v411_v52 = vadd.f32 %v407_v44, %v358_v48  ;;  %v696_v44 = vld [vmem:[#allocation2 + $0x68] sm:$0xff] }
 0x157   :  { %v11296_v53 = vpop.f32.mrf.mxu0  ;;  %v13498_v54 = vpop.f32.mrf.mxu1  ;;  %v546_v55 = vld [vmem:[#allocation2 + $0x88] sm:$0xff] }
 0x158   :  { %415 = vst.msk [vmem:[#allocation2 + $0xb0] sm:$0xff] %vm174_vm3, %v411_v52  ;;  %v676_v56 = vadd.f32 %v11296_v53, %v672_v45  ;;  %v550_v57 = vadd.f32 %v13477_v5, %v546_v55  ;;  %v844_v52 = vld [vmem:[#allocation2 + $0x50] sm:$0xff] }
 0x159   :  { %v559_v58 = vld [vmem:[#allocation2 + $0xb8] sm:$0xff]  ;;  %v607_v59 = vpop.f32.mrf.mxu0  ;;  %v757_v60 = vpop.f32.mrf.mxu1 }
 0x15a   :  { %v563_v62 = vadd.f32 %v11291_v43, %v559_v58  ;;  %680 = vst.msk [vmem:[#allocation2 + $0x18] sm:$0xff] %vm174_vm3, %v676_v56  ;;  %v674_v63 = vadd.f32 %v670_v50, %v607_v59  ;;  %v824_v0 = vadd.f32 %v820_v51, %v757_v60  ;;  %554 = vst.msk [vmem:[#allocation2 + $0x88] sm:$0xff] %vm174_vm3, %v550_v57  ;;  %v694_v51 = vld [vmem:[#allocation2 + $0x58] sm:$0xff]  ;;  %v697_v60 = vld [vmem:[#allocation2 + $0x70] sm:$0xff] }
 0x15b   :  { %v557_v2 = vld [vmem:[#allocation2 + $0xa8] sm:$0xff]  ;;  %v11297_v3 = vpop.f32.mrf.mxu0  ;;  %v11315_v4 = vpop.f32.mrf.mxu1 }
 0x15c   :  { %v888_v1 = vld [vmem:[#allocation2 + $0xa0] sm:$0xff]  ;;  %567 = vst.msk [vmem:[#allocation2 + $0xb8] sm:$0xff] %vm174_vm3, %v563_v62  ;;  %v561_v5 = vadd.f32 %v557_v2, %v508_v49  ;;  %678 = vst.msk [vmem:[#allocation2 + $0x8] sm:$0xff] %vm174_vm3, %v674_v63  ;;  %v677_v8 = vadd.f32 %v11297_v3, %v673_v61 }
 0x15d   :  { %v913_v7 = vmax.f32 %v888_v1, 0.0  ;;  %828 = vst.msk [vmem:[#allocation2] sm:$0xff] %vm174_vm3, %v824_v0  ;;  %v892_v9 = vld [vmem:[#allocation2 + $0xc0] sm:$0xff]  ;;  %v610_v10 = vpop.f32.mrf.mxu0  ;;  %v760_v11 = vpop.f32.mrf.mxu1 }
 0x15e   :  { %v917_v13 = vmax.f32 %v892_v9, 0.0  ;;  %565 = vst.msk [vmem:[#allocation2 + $0xa8] sm:$0xff] %vm174_vm3, %v561_v5  ;;  %681 = vst.msk [vmem:[#allocation2 + $0x20] sm:$0xff] %vm174_vm3, %v677_v8  ;;  %v675_v14 = vadd.f32 %v671_v6, %v610_v10 }
 0x15f   :  { %938 = vst.msk [vmem:[#allocation2 + $0xa0] sm:$0xff] %vm174_vm3, %v913_v7  ;;  %v558_v15 = vld [vmem:[#allocation2 + $0xb0] sm:$0xff]  ;;  %v11300_v16 = vpop.f32.mrf.mxu0  ;;  %v13510_v17 = vpop.f32.mrf.mxu1 }
 0x160   :  { %942 = vst.msk [vmem:[#allocation2 + $0xc0] sm:$0xff] %vm174_vm3, %v917_v13  ;;  %v562_v19 = vadd.f32 %v13487_v30, %v558_v15  ;;  %679 = vst.msk [vmem:[#allocation2 + $0x10] sm:$0xff] %vm174_vm3, %v675_v14  ;;  %v688_v21 = vadd.f32 %v11300_v16, %v684_v12  ;;  %v695_v12 = vld [vmem:[#allocation2 + $0x60] sm:$0xff] }
 0x161   :  { %v823_v22 = vld [vmem:[#allocation2 + $0x18] sm:$0xff]  ;;  %v623_v23 = vpop.f32.mrf.mxu0  ;;  %v773_v25 = vpop.f32.mrf.mxu1 }
 0x162   :  { %566 = vst.msk [vmem:[#allocation2 + $0xb0] sm:$0xff] %vm174_vm3, %v562_v19  ;;  %v827_v27 = vadd.f32 %v11315_v4, %v823_v22  ;;  %692 = vst.msk [vmem:[#allocation2 + $0x40] sm:$0xff] %vm174_vm3, %v688_v21  ;;  %v686_v28 = vadd.f32 %v682_v24, %v623_v23  ;;  %v836_v29 = vadd.f32 %v832_v18, %v773_v25  ;;  %v708_v21 = vld [vmem:[#allocation2 + $0x90] sm:$0xff]  ;;  %v706_v23 = vld [vmem:[#allocation2 + $0x80] sm:$0xff] }
 0x163   :  { %v891_v31 = vld [vmem:[#allocation2 + $0xb8] sm:$0xff]  ;;  %v821_v33 = vld [vmem:[#allocation2 + $0x8] sm:$0xff]  ;;  %v11301_v34 = vpop.f32.mrf.mxu0  ;;  %v11319_v30 = vpop.f32.mrf.mxu1 }
 0x164   :  { %v868_v32 = vld [vmem:[#allocation2] sm:$0xff]  ;;  %v916_v36 = vmax.f32 %v891_v31, 0.0  ;;  %831 = vst.msk [vmem:[#allocation2 + $0x18] sm:$0xff] %vm174_vm3, %v827_v27  ;;  %v825_v38 = vadd.f32 %v821_v33, %v760_v11  ;;  %690 = vst.msk [vmem:[#allocation2 + $0x30] sm:$0xff] %vm174_vm3, %v686_v28  ;;  %v689_v39 = vadd.f32 %v11301_v34, %v685_v26  ;;  %v856_v24 = vld [vmem:[#allocation2 + $0x78] sm:$0xff] }
 0x165   :  { %v893_v37 = vmax.f32 %v868_v32, 0.0  ;;  %840 = vst.msk [vmem:[#allocation2 + $0x28] sm:$0xff] %vm174_vm3, %v836_v29  ;;  %v889_v40 = vld [vmem:[#allocation2 + $0xa8] sm:$0xff]  ;;  %v872_v41 = vld [vmem:[#allocation2 + $0x20] sm:$0xff]  ;;  %v626_v42 = vpop.f32.mrf.mxu0  ;;  %v776_v43 = vpop.f32.mrf.mxu1  ;;  %v709_v32 = vld [vmem:[#allocation2 + $0x98] sm:$0xff] }
 0x166   :  { %941 = vst.msk [vmem:[#allocation2 + $0xb8] sm:$0xff] %vm174_vm3, %v916_v36  ;;  %v914_v45 = vmax.f32 %v889_v40, 0.0  ;;  %v897_v46 = vmax.f32 %v872_v41, 0.0  ;;  %829 = vst.msk [vmem:[#allocation2 + $0x8] sm:$0xff] %vm174_vm3, %v825_v38  ;;  %v687_v47 = vadd.f32 %v683_v35, %v626_v42 }
 0x167   :  { %918 = vst.msk [vmem:[#allocation2] sm:$0xff] %vm174_vm3, %v893_v37  ;;  %693 = vst.msk [vmem:[#allocation2 + $0x48] sm:$0xff] %vm174_vm3, %v689_v39  ;;  %v822_v48 = vld [vmem:[#allocation2 + $0x10] sm:$0xff]  ;;  %v11304_v49 = vpop.f32.mrf.mxu0  ;;  %v13524_v50 = vpop.f32.mrf.mxu1 }
 0x168   :  { %939 = vst.msk [vmem:[#allocation2 + $0xa8] sm:$0xff] %vm174_vm3, %v914_v45  ;;  %922 = vst.msk [vmem:[#allocation2 + $0x20] sm:$0xff] %vm174_vm3, %v897_v46  ;;  %v826_v53 = vadd.f32 %v13498_v54, %v822_v48  ;;  %v700_v55 = vadd.f32 %v11304_v49, %v696_v44  ;;  %v707_v46 = vld [vmem:[#allocation2 + $0x88] sm:$0xff]  ;;  %v11817_v48 = vld [vmem:[#allocation7 + $0x28] sm:$0xff]  }
 0x169   :  { %691 = vst.msk [vmem:[#allocation2 + $0x38] sm:$0xff] %vm174_vm3, %v687_v47  ;;  %v890_v56 = vld [vmem:[#allocation2 + $0xb0] sm:$0xff]  ;;  %v835_v57 = vld [vmem:[#allocation2 + $0x40] sm:$0xff]  ;;  %v639_v58 = vpop.f32.mrf.mxu0  ;;  %v789_v59 = vpop.f32.mrf.mxu1 }
 0x16a   :  { %v915_v61 = vmax.f32 %v890_v56, 0.0  ;;  %830 = vst.msk [vmem:[#allocation2 + $0x10] sm:$0xff] %vm174_vm3, %v826_v53  ;;  %v839_v62 = vadd.f32 %v11319_v30, %v835_v57  ;;  %704 = vst.msk [vmem:[#allocation2 + $0x68] sm:$0xff] %vm174_vm3, %v700_v55  ;;  %v698_v63 = vadd.f32 %v694_v51, %v639_v58  ;;  %v848_v0 = vadd.f32 %v844_v52, %v789_v59  ;;  %v11818_v53 = vld [vmem:[#allocation7 + $0x38] sm:$0xff]  }
 0x16b   :  { %v871_v1 = vld [vmem:[#allocation2 + $0x18] sm:$0xff]  ;;  %v833_v3 = vld [vmem:[#allocation2 + $0x30] sm:$0xff]  ;;  %v11305_v54 = vpop.f32.mrf.mxu0  ;;  %v11323_v4 = vpop.f32.mrf.mxu1 }
 0x16c   :  { %v873_v2 = vld [vmem:[#allocation2 + $0x28] sm:$0xff]  ;;  %940 = vst.msk [vmem:[#allocation2 + $0xb0] sm:$0xff] %vm174_vm3, %v915_v61  ;;  %v896_v6 = vmax.f32 %v871_v1, 0.0  ;;  %843 = vst.msk [vmem:[#allocation2 + $0x40] sm:$0xff] %vm174_vm3, %v839_v62  ;;  %v837_v5 = vadd.f32 %v833_v3, %v776_v43  ;;  %v701_v8 = vadd.f32 %v11305_v54, %v697_v60 }
 0x16d   :  { %v898_v7 = vmax.f32 %v873_v2, 0.0  ;;  %702 = vst.msk [vmem:[#allocation2 + $0x58] sm:$0xff] %vm174_vm3, %v698_v63  ;;  %852 = vst.msk [vmem:[#allocation2 + $0x50] sm:$0xff] %vm174_vm3, %v848_v0  ;;  %v869_v9 = vld [vmem:[#allocation2 + $0x8] sm:$0xff]  ;;  %v642_v11 = vpop.f32.mrf.mxu0  ;;  %v792_v13 = vpop.f32.mrf.mxu1  ;;  %v11819_v63 = vld [vmem:[#allocation7 + $0x20] sm:$0xff]  }
 0x16e   :  { %v877_v10 = vld [vmem:[#allocation2 + $0x48] sm:$0xff]  ;;  %921 = vst.msk [vmem:[#allocation2 + $0x18] sm:$0xff] %vm174_vm3, %v896_v6  ;;  %v894_v14 = vmax.f32 %v869_v9, 0.0  ;;  %841 = vst.msk [vmem:[#allocation2 + $0x30] sm:$0xff] %vm174_vm3, %v837_v5  ;;  %v699_v16 = vadd.f32 %v695_v12, %v642_v11  ;;  %v943_v56 = vld [vmem:[#allocation2] sm:$0xff] }
 0x16f   :  { %923 = vst.msk [vmem:[#allocation2 + $0x28] sm:$0xff] %vm174_vm3, %v898_v7  ;;  %v902_v15 = vmax.f32 %v877_v10, 0.0  ;;  %705 = vst.msk [vmem:[#allocation2 + $0x70] sm:$0xff] %vm174_vm3, %v701_v8  ;;  %v11308_v19 = vpop.f32.mrf.mxu0  ;;  %v13540_v22 = vpop.f32.mrf.mxu1  ;;  %v11820_v7 = vld [vmem:[#allocation7 + $0x30] sm:$0xff]  }
 0x170   :  { %v834_v18 = vld [vmem:[#allocation2 + $0x38] sm:$0xff]  ;;  %919 = vst.msk [vmem:[#allocation2 + $0x8] sm:$0xff] %vm174_vm3, %v894_v14  ;;  %703 = vst.msk [vmem:[#allocation2 + $0x60] sm:$0xff] %vm174_vm3, %v699_v16  ;;  %v712_v26 = vadd.f32 %v11308_v19, %v708_v21 }
 0x171   :  { %927 = vst.msk [vmem:[#allocation2 + $0x48] sm:$0xff] %vm174_vm3, %v902_v15  ;;  %v838_v25 = vadd.f32 %v13510_v17, %v834_v18  ;;  %v870_v27 = vld [vmem:[#allocation2 + $0x10] sm:$0xff]  ;;  %v847_v28 = vld [vmem:[#allocation2 + $0x68] sm:$0xff]  ;;  %v655_v29 = vpop.f32.mrf.mxu0  ;;  %v805_v31 = vpop.f32.mrf.mxu1 }
 0x172   :  { %v895_v33 = vmax.f32 %v870_v27, 0.0  ;;  %v851_v34 = vadd.f32 %v11323_v4, %v847_v28  ;;  %716 = vst.msk [vmem:[#allocation2 + $0x90] sm:$0xff] %vm174_vm3, %v712_v26  ;;  %v710_v30 = vadd.f32 %v706_v23, %v655_v29  ;;  %v860_v35 = vadd.f32 %v856_v24, %v805_v31 }
 0x173   :  { %842 = vst.msk [vmem:[#allocation2 + $0x38] sm:$0xff] %vm174_vm3, %v838_v25  ;;  %v876_v36 = vld [vmem:[#allocation2 + $0x40] sm:$0xff]  ;;  %v11309_v17 = vpop.f32.mrf.mxu0  ;;  %v11327_v47 = vpop.f32.mrf.mxu1 }
 0x174   :  { %v878_v37 = vld [vmem:[#allocation2 + $0x50] sm:$0xff]  ;;  %v845_v38 = vld [vmem:[#allocation2 + $0x58] sm:$0xff]  ;;  %920 = vst.msk [vmem:[#allocation2 + $0x10] sm:$0xff] %vm174_vm3, %v895_v33  ;;  %v901_v39 = vmax.f32 %v876_v36, 0.0  ;;  %855 = vst.msk [vmem:[#allocation2 + $0x68] sm:$0xff] %vm174_vm3, %v851_v34  ;;  %v713_v42 = vadd.f32 %v11309_v17, %v709_v32 }
 0x175   :  { %v903_v40 = vmax.f32 %v878_v37, 0.0  ;;  %v849_v41 = vadd.f32 %v845_v38, %v792_v13  ;;  %714 = vst.msk [vmem:[#allocation2 + $0x80] sm:$0xff] %vm174_vm3, %v710_v30  ;;  %864 = vst.msk [vmem:[#allocation2 + $0x78] sm:$0xff] %vm174_vm3, %v860_v35  ;;  %v874_v43 = vld [vmem:[#allocation2 + $0x30] sm:$0xff]  ;;  %v658_v45 = vpop.f32.mrf.mxu0  ;;  %v808_v62 = vpop.f32.mrf.mxu1  ;;  %v946_v13 = vld [vmem:[#allocation2 + $0x18] sm:$0xff] }
 0x176   :  { %v882_v44 = vld [vmem:[#allocation2 + $0x70] sm:$0xff]  ;;  %926 = vst.msk [vmem:[#allocation2 + $0x40] sm:$0xff] %vm174_vm3, %v901_v39  ;;  %v899_v49 = vmax.f32 %v874_v43, 0.0  ;;  %717 = vst.msk [vmem:[#allocation2 + $0x98] sm:$0xff] %vm174_vm3, %v713_v42  ;;  %v711_v52 = vadd.f32 %v707_v46, %v658_v45  ;;  %v948_v23 = vld [vmem:[#allocation2 + $0x28] sm:$0xff] }
 0x177   :  { %928 = vst.msk [vmem:[#allocation2 + $0x50] sm:$0xff] %vm174_vm3, %v903_v40  ;;  %v907_v51 = vmax.f32 %v882_v44, 0.0  ;;  %853 = vst.msk [vmem:[#allocation2 + $0x58] sm:$0xff] %vm174_vm3, %v849_v41  ;;  %v846_v55 = vld [vmem:[#allocation2 + $0x60] sm:$0xff]  ;;  %v944_v57 = vld [vmem:[#allocation2 + $0x8] sm:$0xff] }
 0x178   :  { %924 = vst.msk [vmem:[#allocation2 + $0x30] sm:$0xff] %vm174_vm3, %v899_v49  ;;  %v850_v58 = vadd.f32 %v13524_v50, %v846_v55  ;;  %715 = vst.msk [vmem:[#allocation2 + $0x88] sm:$0xff] %vm174_vm3, %v711_v52  ;;  %v13560_v59 = vpack.c.bf16 %v944_v57, %v943_v56  ;;  %v947_v25 = vld [vmem:[#allocation2 + $0x20] sm:$0xff]  ;;  %v952_v34 = vld [vmem:[#allocation2 + $0x48] sm:$0xff] }
 0x179   :  { %932 = vst.msk [vmem:[#allocation2 + $0x70] sm:$0xff] %vm174_vm3, %v907_v51  ;;  %v859_v61 = vld [vmem:[#allocation2 + $0x90] sm:$0xff]  ;;  %v13595_v26 = vpack.c.bf16 %v948_v23, %v947_v25  ;;  %v964_v51 = vld [vmem:[#allocation2 + $0xa8] sm:$0xff]  ;;  %v963_v52 = vld [vmem:[#allocation2 + $0xa0] sm:$0xff] }
 0x17a   :  { %v875_v60 = vld [vmem:[#allocation2 + $0x38] sm:$0xff]  ;;  %854 = vst.msk [vmem:[#allocation2 + $0x60] sm:$0xff] %vm174_vm3, %v850_v58  ;;  %v863_v1 = vadd.f32 %v11327_v47, %v859_v61  ;;  %11333 = vmatmul.mubr.msk.bf16.vlgmr.msra.gmra.mxu0 %vm174_vm3, %v13560_v59  ;;  %11389 = vmatmul.mubr.msk.bf16.vlgmr.msra.gmra.mxu1 %vm174_vm3, %v13560_v59  ;;  %v10059_v44 = vld [vmem:[#allocation9] ss:$0 sm:$0xff]  ;;  %v967_v58 = vld [vmem:[#allocation2 + $0xc0] sm:$0xff] }
 0x17b   :  { %v900_v0 = vmax.f32 %v875_v60, 0.0  ;;  %v881_v2 = vld [vmem:[#allocation2 + $0x68] sm:$0xff]  ;;  %11441 = vmatpush3.bf16.msra.mxu0 %v11817_v48  ;;  %11336 = vmatprep.mubr.msk.bf16.mxu0 %vm13251_vm4, %v13250_v20  ;;  %v945_v9 = vld [vmem:[#allocation2 + $0x10] sm:$0xff]  ;;  %996 = vst.msk [vmem:[#allocation3 + $0x38] sm:$0xff] %vm988_vm5, %v10059_v44  ;;  %989 = vst.msk [vmem:[#allocation3] sm:$0xff] %vm988_vm5, %v10059_v44  ;;  %v13732_v60 = vpack.c.bf16 %v967_v58, %v967_v58 }
 0x17c   :  { %v883_v50 = vld [vmem:[#allocation2 + $0x78] sm:$0xff]  ;;  %v857_v3 = vld [vmem:[#allocation2 + $0x80] sm:$0xff]  ;;  %v906_v54 = vmax.f32 %v881_v2, 0.0  ;;  %867 = vst.msk [vmem:[#allocation2 + $0x90] sm:$0xff] %vm174_vm3, %v863_v1  ;;  %11392 = vmatprep.mubr.msk.bf16.mxu1 %vm13251_vm4, %v13250_v20  ;;  %11497 = vmatpush3.bf16.msra.mxu1 %v11818_v53  ;;  %v13581_v15 = vpack.c.bf16 %v946_v13, %v945_v9  ;;  %v13712_v53 = vpack.c.bf16 %v964_v51, %v963_v52  ;;  %v965_v55 = vld [vmem:[#allocation2 + $0xb0] sm:$0xff] }
 0x17d   :  { %925 = vst.msk [vmem:[#allocation2 + $0x38] sm:$0xff] %vm174_vm3, %v900_v0  ;;  %v908_v4 = vmax.f32 %v883_v50, 0.0  ;;  %v861_v6 = vadd.f32 %v857_v3, %v808_v62  ;;  %v887_v8 = vld [vmem:[#allocation2 + $0x98] sm:$0xff]  ;;  %11442 = vmatprep.subr.bf16.mxu0 %v13250_v20  ;;  %11498 = vmatprep.subr.bf16.mxu1 %v13250_v20  ;;  %v951_v33 = vld [vmem:[#allocation2 + $0x40] sm:$0xff]  ;;  %v11822_v61 = vld [vmem:[#allocation10 + $0x38] sm:$0xff]  }
 0x17e   :  { %v879_v5 = vld [vmem:[#allocation2 + $0x58] sm:$0xff]  ;;  %931 = vst.msk [vmem:[#allocation2 + $0x68] sm:$0xff] %vm174_vm3, %v906_v54  ;;  %v912_v11 = vmax.f32 %v887_v8, 0.0  ;;  %v13616_v30 = vpack.c.bf16 %v952_v34, %v951_v33  ;;  %v953_v36 = vld [vmem:[#allocation2 + $0x50] sm:$0xff]  ;;  %v11823_v62 = vld [vmem:[#allocation10 + $0x10] sm:$0xff]  }
 0x17f   :  { %v904_v10 = vmax.f32 %v879_v5, 0.0  ;;  %933 = vst.msk [vmem:[#allocation2 + $0x78] sm:$0xff] %vm174_vm3, %v908_v4  ;;  %865 = vst.msk [vmem:[#allocation2 + $0x80] sm:$0xff] %vm174_vm3, %v861_v6  ;;  %v858_v12 = vld [vmem:[#allocation2 + $0x88] sm:$0xff]  ;;  %11443 = vmatpush3.bf16.msra.mxu0 %v11819_v63  ;;  %v949_v31 = vld [vmem:[#allocation2 + $0x30] sm:$0xff] }
 0x180   :  { %937 = vst.msk [vmem:[#allocation2 + $0x98] sm:$0xff] %vm174_vm3, %v912_v11  ;;  %v862_v14 = vadd.f32 %v13540_v22, %v858_v12  ;;  %11499 = vmatpush3.bf16.msra.mxu1 %v11820_v7  ;;  %v957_v41 = vld [vmem:[#allocation2 + $0x70] sm:$0xff]  ;;  %v966_v56 = vld [vmem:[#allocation2 + $0xb8] sm:$0xff]  ;;  %v11824_v63 = vld [vmem:[#allocation10 + $0x30] sm:$0xff]  }
 0x181   :  { %929 = vst.msk [vmem:[#allocation2 + $0x58] sm:$0xff] %vm174_vm3, %v904_v10  ;;  %v880_v16 = vld [vmem:[#allocation2 + $0x60] sm:$0xff]  ;;  %v13722_v57 = vpack.c.bf16 %v966_v56, %v965_v55  ;;  %11596 = vmatprep.subr.bf16.mxu1 %v11822_v61 }
 0x182   :  { %v905_v18 = vmax.f32 %v880_v16, 0.0  ;;  %866 = vst.msk [vmem:[#allocation2 + $0x88] sm:$0xff] %vm174_vm3, %v862_v14  ;;  %11337 = vmatmul.mubr.msk.bf16.gmra.mxu0 %vm174_vm3, %v13581_v15  ;;  %11393 = vmatmul.mubr.msk.bf16.gmra.mxu1 %vm174_vm3, %v13581_v15  ;;  %v1216_v0 = vld [vmem:[#allocation3 + $0x38] sm:$0xff] }
 0x183   :  { %v886_v19 = vld [vmem:[#allocation2 + $0x90] sm:$0xff]  ;;  %11340 = vmatprep.mubr.msk.bf16.mxu0 %vm13251_vm4, %v13250_v20  ;;  %11396 = vmatprep.mubr.msk.bf16.mxu1 %vm13251_vm4, %v13250_v20  ;;  %990 = vst.msk [vmem:[#allocation3 + $0x8] sm:$0xff] %vm988_vm5, %v10059_v44  ;;  %991 = vst.msk [vmem:[#allocation3 + $0x10] sm:$0xff] %vm988_vm5, %v10059_v44 }
 0x184   :  { %930 = vst.msk [vmem:[#allocation2 + $0x60] sm:$0xff] %vm174_vm3, %v905_v18  ;;  %v911_v21 = vmax.f32 %v886_v19, 0.0  ;;  %v950_v29 = vld [vmem:[#allocation2 + $0x38] sm:$0xff] }
 0x185   :  { %v13606_v32 = vpack.c.bf16 %v950_v29, %v949_v31  ;;  %v956_v17 = vld [vmem:[#allocation2 + $0x68] sm:$0xff]  ;;  %992 = vst.msk [vmem:[#allocation3 + $0x18] sm:$0xff] %vm988_vm5, %v10059_v44  ;;  %993 = vst.msk [vmem:[#allocation3 + $0x20] sm:$0xff] %vm988_vm5, %v10059_v44 }
 0x186   :  { %v884_v22 = vld [vmem:[#allocation2 + $0x80] sm:$0xff]  ;;  %936 = vst.msk [vmem:[#allocation2 + $0x90] sm:$0xff] %vm174_vm3, %v911_v21  ;;  %v958_v40 = vld [vmem:[#allocation2 + $0x78] sm:$0xff] }
 0x187   :  { %v909_v24 = vmax.f32 %v884_v22, 0.0  ;;  %v13646_v42 = vpack.c.bf16 %v958_v40, %v957_v41  ;;  %994 = vst.msk [vmem:[#allocation3 + $0x28] sm:$0xff] %vm988_vm5, %v10059_v44  ;;  %995 = vst.msk [vmem:[#allocation3 + $0x30] sm:$0xff] %vm988_vm5, %v10059_v44  ;;  %v962_v48 = vld [vmem:[#allocation2 + $0x98] sm:$0xff] }
 0x188   :  { %v954_v35 = vld [vmem:[#allocation2 + $0x58] sm:$0xff]  ;;  %997 = vst.msk [vmem:[#allocation3 + $0x40] sm:$0xff] %vm988_vm5, %v10059_v44  ;;  %998 = vst.msk [vmem:[#allocation3 + $0x48] sm:$0xff] %vm988_vm5, %v10059_v44 }
 0x189   :  { %934 = vst.msk [vmem:[#allocation2 + $0x80] sm:$0xff] %vm174_vm3, %v909_v24  ;;  %v885_v27 = vld [vmem:[#allocation2 + $0x88] sm:$0xff]  ;;  %v13626_v37 = vpack.c.bf16 %v954_v35, %v953_v36 }
 0x18a   :  { %v910_v28 = vmax.f32 %v885_v27, 0.0  ;;  %11341 = vmatmul.mubr.msk.bf16.gmra.mxu0 %vm174_vm3, %v13595_v26  ;;  %11397 = vmatmul.mubr.msk.bf16.gmra.mxu1 %vm174_vm3, %v13595_v26  ;;  %999 = vst.msk [vmem:[#allocation3 + $0x50] sm:$0xff] %vm988_vm5, %v10059_v44  ;;  %1000 = vst.msk [vmem:[#allocation3 + $0x58] sm:$0xff] %vm988_vm5, %v10059_v44  ;;  %v11828_v27 = vld [vmem:[#allocation10 + $0x20] sm:$0xff]  }
 0x18b   :  { %11344 = vmatprep.mubr.msk.bf16.mxu0 %vm13251_vm4, %v13250_v20  ;;  %11400 = vmatprep.mubr.msk.bf16.mxu1 %vm13251_vm4, %v13250_v20  ;;  %v955_v38 = vld [vmem:[#allocation2 + $0x60] sm:$0xff]  ;;  %1001 = vst.msk [vmem:[#allocation3 + $0x60] sm:$0xff] %vm988_vm5, %v10059_v44  ;;  %1002 = vst.msk [vmem:[#allocation3 + $0x68] sm:$0xff] %vm988_vm5, %v10059_v44 }
 0x18c   :  { %935 = vst.msk [vmem:[#allocation2 + $0x88] sm:$0xff] %vm174_vm3, %v910_v28  ;;  %v13636_v39 = vpack.c.bf16 %v956_v17, %v955_v38 }
 0x18d   :  { %1003 = vst.msk [vmem:[#allocation3 + $0x70] sm:$0xff] %vm988_vm5, %v10059_v44  ;;  %1004 = vst.msk [vmem:[#allocation3 + $0x78] sm:$0xff] %vm988_vm5, %v10059_v44  ;;  %v961_v47 = vld [vmem:[#allocation2 + $0x90] sm:$0xff] }
 0x18e   :  { %1005 = vst.msk [vmem:[#allocation3 + $0x80] sm:$0xff] %vm988_vm5, %v10059_v44  ;;  %1006 = vst.msk [vmem:[#allocation3 + $0x88] sm:$0xff] %vm988_vm5, %v10059_v44  ;;  %v13702_v49 = vpack.c.bf16 %v962_v48, %v961_v47  ;;  %v1444_v1 = vld [vmem:[#allocation3 + $0x30] sm:$0xff] }
 0x18f   :  { %1007 = vst.msk [vmem:[#allocation3 + $0x90] sm:$0xff] %vm988_vm5, %v10059_v44  ;;  %1008 = vst.msk [vmem:[#allocation3 + $0x98] sm:$0xff] %vm988_vm5, %v10059_v44  ;;  %v1217_v7 = vld [vmem:[#allocation3 + $0x40] sm:$0xff]  ;;  %v1218_v12 = vld [vmem:[#allocation3 + $0x48] sm:$0xff] }
 0x190   :  { %1009 = vst.msk [vmem:[#allocation3 + $0xa0] sm:$0xff] %vm988_vm5, %v10059_v44  ;;  %1010 = vst.msk [vmem:[#allocation3 + $0xa8] sm:$0xff] %vm988_vm5, %v10059_v44  ;;  %v959_v45 = vld [vmem:[#allocation2 + $0x80] sm:$0xff] }
 0x191   :  { %1011 = vst.msk [vmem:[#allocation3 + $0xb0] sm:$0xff] %vm988_vm5, %v10059_v44  ;;  %1012 = vst.msk [vmem:[#allocation3 + $0xb8] sm:$0xff] %vm988_vm5, %v10059_v44  ;;  %v1219_v22 = vld [vmem:[#allocation3 + $0x50] sm:$0xff]  ;;  %v1220_v33 = vld [vmem:[#allocation3 + $0x58] sm:$0xff] }
 0x192   :  { %11345 = vmatmul.mubr.msk.bf16.gmra.mxu0 %vm174_vm3, %v13606_v32  ;;  %11401 = vmatmul.mubr.msk.bf16.gmra.mxu1 %vm174_vm3, %v13606_v32  ;;  %1013 = vst.msk [vmem:[#allocation3 + $0xc0] sm:$0xff] %vm988_vm5, %v10059_v44  ;;  %1014 = vst.msk [vmem:[#allocation3 + $0xc8] sm:$0xff] %vm988_vm5, %v10059_v44  ;;  %v1459_v40 = vld [vmem:[#allocation3 + $0x60] sm:$0xff] }
 0x193   :  { %11348 = vmatprep.mubr.msk.bf16.mxu0 %vm13251_vm4, %v13250_v20  ;;  %11404 = vmatprep.mubr.msk.bf16.mxu1 %vm13251_vm4, %v13250_v20  ;;  %v960_v43 = vld [vmem:[#allocation2 + $0x88] sm:$0xff]  ;;  %1015 = vst.msk [vmem:[#allocation3 + $0xd0] sm:$0xff] %vm988_vm5, %v10059_v44  ;;  %1016 = vst.msk [vmem:[#allocation3 + $0xd8] sm:$0xff] %vm988_vm5, %v10059_v44 }
 0x194   :  { %1017 = vst.msk [vmem:[#allocation3 + $0xe0] sm:$0xff] %vm988_vm5, %v10059_v44  ;;  %1018 = vst.msk [vmem:[#allocation3 + $0xe8] sm:$0xff] %vm988_vm5, %v10059_v44  ;;  %v13692_v46 = vpack.c.bf16 %v960_v43, %v959_v45  ;;  %v1233_v58 = vld [vmem:[#allocation3 + $0x78] sm:$0xff] }
 0x195   :  { %1019 = vst.msk [vmem:[#allocation3 + $0xf0] sm:$0xff] %vm988_vm5, %v10059_v44  ;;  %1020 = vst.msk [vmem:[#allocation3 + $0xf8] sm:$0xff] %vm988_vm5, %v10059_v44 }
 0x196   :  { %1021 = vst.msk [vmem:[#allocation3 + $0x100] sm:$0xff] %vm988_vm5, %v10059_v44  ;;  %1022 = vst.msk [vmem:[#allocation3 + $0x108] sm:$0xff] %vm988_vm5, %v10059_v44 }
 0x197   :  { %1023 = vst.msk [vmem:[#allocation3 + $0x110] sm:$0xff] %vm988_vm5, %v10059_v44  ;;  %1024 = vst.msk [vmem:[#allocation3 + $0x118] sm:$0xff] %vm988_vm5, %v10059_v44 }
 0x19a   :  { %11349 = vmatmul.mubr.msk.bf16.gmra.mxu0 %vm174_vm3, %v13616_v30  ;;  %11405 = vmatmul.mubr.msk.bf16.gmra.mxu1 %vm174_vm3, %v13616_v30 }
 0x19b   :  { %11352 = vmatprep.mubr.msk.bf16.mxu0 %vm13251_vm4, %v13250_v20  ;;  %11408 = vmatprep.mubr.msk.bf16.mxu1 %vm13251_vm4, %v13250_v20 }
 0x1a2   :  { %11353 = vmatmul.mubr.msk.bf16.gmra.mxu0 %vm174_vm3, %v13626_v37  ;;  %11409 = vmatmul.mubr.msk.bf16.gmra.mxu1 %vm174_vm3, %v13626_v37 }
 0x1a3   :  { %11356 = vmatprep.mubr.msk.bf16.mxu0 %vm13251_vm4, %v13250_v20  ;;  %11412 = vmatprep.mubr.msk.bf16.mxu1 %vm13251_vm4, %v13250_v20 }
 0x1aa   :  { %11357 = vmatmul.mubr.msk.bf16.gmra.mxu0 %vm174_vm3, %v13636_v39  ;;  %11413 = vmatmul.mubr.msk.bf16.gmra.mxu1 %vm174_vm3, %v13636_v39 }
 0x1ab   :  { %11360 = vmatprep.mubr.msk.bf16.mxu0 %vm13251_vm4, %v13250_v20  ;;  %11416 = vmatprep.mubr.msk.bf16.mxu1 %vm13251_vm4, %v13250_v20 }
 0x1b2   :  { %11361 = vmatmul.mubr.msk.bf16.gmra.mxu0 %vm174_vm3, %v13646_v42  ;;  %11417 = vmatmul.mubr.msk.bf16.gmra.mxu1 %vm174_vm3, %v13646_v42 }
 0x1b3   :  { %11364 = vmatprep.mubr.msk.bf16.mxu0 %vm13251_vm4, %v13250_v20  ;;  %11420 = vmatprep.mubr.msk.bf16.mxu1 %vm13251_vm4, %v13250_v20 }
 0x1ba   :  { %11365 = vmatmul.mubr.msk.bf16.gmra.mxu0 %vm174_vm3, %v13692_v46  ;;  %11421 = vmatmul.mubr.msk.bf16.gmra.mxu1 %vm174_vm3, %v13692_v46 }
 0x1bb   :  { %11368 = vmatprep.mubr.msk.bf16.mxu0 %vm13251_vm4, %v13250_v20  ;;  %11424 = vmatprep.mubr.msk.bf16.mxu1 %vm13251_vm4, %v13250_v20 }
 0x1c2   :  { %11369 = vmatmul.mubr.msk.bf16.gmra.mxu0 %vm174_vm3, %v13702_v49  ;;  %11425 = vmatmul.mubr.msk.bf16.gmra.mxu1 %vm174_vm3, %v13702_v49 }
 0x1c3   :  { %11372 = vmatprep.mubr.msk.bf16.mxu0 %vm13251_vm4, %v13250_v20  ;;  %11428 = vmatprep.mubr.msk.bf16.mxu1 %vm13251_vm4, %v13250_v20 }
 0x1ca   :  { %11373 = vmatmul.mubr.msk.bf16.gmra.mxu0 %vm174_vm3, %v13712_v53  ;;  %11429 = vmatmul.mubr.msk.bf16.gmra.mxu1 %vm174_vm3, %v13712_v53 }
 0x1cb   :  { %11376 = vmatprep.mubr.msk.bf16.mxu0 %vm13251_vm4, %v13250_v20  ;;  %11432 = vmatprep.mubr.msk.bf16.mxu1 %vm13251_vm4, %v13250_v20 }
 0x1d2   :  { %11377 = vmatmul.mubr.msk.bf16.gmra.mxu0 %vm174_vm3, %v13722_v57  ;;  %11433 = vmatmul.mubr.msk.bf16.gmra.mxu1 %vm174_vm3, %v13722_v57 }
 0x1d3   :  { %11380 = vmatprep.mubr.msk.bf16.mxu0 %vm13251_vm4, %v13250_v20  ;;  %11436 = vmatprep.mubr.msk.bf16.mxu1 %vm13251_vm4, %v13250_v20 }
 0x1da   :  { %11381 = vmatmul.mubr.msk.bf16.gmra.mxu0 %vm174_vm3, %v13732_v60  ;;  %11437 = vmatmul.mubr.msk.bf16.gmra.mxu1 %vm174_vm3, %v13732_v60 }
 0x1db   :  { %11444 = vmatprep.mubr.msk.bf16.mxu0 %vm13251_vm4, %v13250_v20  ;;  %11500 = vmatprep.mubr.msk.bf16.mxu1 %vm13251_vm4, %v13250_v20 }
 0x1e2   :  { %11445 = vmatmul.mubr.msk.bf16.vlgmr.msra.gmra.mxu0 %vm174_vm3, %v13560_v59  ;;  %11501 = vmatmul.mubr.msk.bf16.vlgmr.msra.gmra.mxu1 %vm174_vm3, %v13560_v59  ;;  %v11821_v59 = vld [vmem:[#allocation10 + $0x18] sm:$0xff]  }
 0x1e3   :  { %11448 = vmatprep.mubr.msk.bf16.mxu0 %vm13251_vm4, %v13250_v20  ;;  %11504 = vmatprep.mubr.msk.bf16.mxu1 %vm13251_vm4, %v13250_v20 }
 0x1e4   :  { %11552 = vmatprep.subr.bf16.mxu0 %v11821_v59  ;;  %11597 = vmatpush3.bf16.msra.mxu1 %v11822_v61 }
 0x1e5   :  { %11553 = vmatpush3.bf16.msra.mxu0 %v11821_v59  ;;  %11598 = vmatprep.subr.bf16.mxu1 %v11824_v63 }
 0x1e6   :  { %11554 = vmatprep.subr.bf16.mxu0 %v11823_v62 }
 0x1e8   :  { %11599 = vmatpush3.bf16.msra.mxu1 %v11824_v63 }
 0x1e9   :  { %11555 = vmatpush3.bf16.msra.mxu0 %v11823_v62 }
 0x1ea   :  { %11449 = vmatmul.mubr.msk.bf16.gmra.mxu0 %vm174_vm3, %v13581_v15  ;;  %11505 = vmatmul.mubr.msk.bf16.gmra.mxu1 %vm174_vm3, %v13581_v15  ;;  %v11826_v15 = vld [vmem:[#allocation10 + $0x28] sm:$0xff]  }
 0x1eb   :  { %11452 = vmatprep.mubr.msk.bf16.mxu0 %vm13251_vm4, %v13250_v20  ;;  %11508 = vmatprep.mubr.msk.bf16.mxu1 %vm13251_vm4, %v13250_v20 }
 0x1ec   :  { %11600 = vmatprep.subr.bf16.mxu1 %v11826_v15 }
 0x1ed   :  { %11601 = vmatpush3.bf16.msra.mxu1 %v11826_v15  ;;  %v1474_v15 = vld [vmem:[#allocation3 + $0x90] sm:$0xff] }
 0x1ee   :  { %11602 = vmatprep.subr.bf16.mxu1 %v11828_v27 }
 0x1f1   :  { %11603 = vmatpush3.bf16.msra.mxu1 %v11828_v27 }
 0x1f2   :  { %11453 = vmatmul.mubr.msk.bf16.gmra.mxu0 %vm174_vm3, %v13595_v26  ;;  %11509 = vmatmul.mubr.msk.bf16.gmra.mxu1 %vm174_vm3, %v13595_v26  ;;  %v11827_v26 = vld [vmem:[#allocation10] sm:$0xff]  }
 0x1f3   :  { %11456 = vmatprep.mubr.msk.bf16.mxu0 %vm13251_vm4, %v13250_v20  ;;  %11512 = vmatprep.mubr.msk.bf16.mxu1 %vm13251_vm4, %v13250_v20 }
 0x1fa   :  { %11457 = vmatmul.mubr.msk.bf16.gmra.mxu0 %vm174_vm3, %v13606_v32  ;;  %11513 = vmatmul.mubr.msk.bf16.gmra.mxu1 %vm174_vm3, %v13606_v32 }
 0x1fb   :  { %11460 = vmatprep.mubr.msk.bf16.mxu0 %vm13251_vm4, %v13250_v20  ;;  %11516 = vmatprep.mubr.msk.bf16.mxu1 %vm13251_vm4, %v13250_v20 }
 0x202   :  { %11461 = vmatmul.mubr.msk.bf16.gmra.mxu0 %vm174_vm3, %v13616_v30  ;;  %11517 = vmatmul.mubr.msk.bf16.gmra.mxu1 %vm174_vm3, %v13616_v30 }
 0x203   :  { %11464 = vmatprep.mubr.msk.bf16.mxu0 %vm13251_vm4, %v13250_v20  ;;  %11520 = vmatprep.mubr.msk.bf16.mxu1 %vm13251_vm4, %v13250_v20 }
 0x20a   :  { %11465 = vmatmul.mubr.msk.bf16.gmra.mxu0 %vm174_vm3, %v13626_v37  ;;  %11521 = vmatmul.mubr.msk.bf16.gmra.mxu1 %vm174_vm3, %v13626_v37 }
 0x20b   :  { %11468 = vmatprep.mubr.msk.bf16.mxu0 %vm13251_vm4, %v13250_v20  ;;  %11524 = vmatprep.mubr.msk.bf16.mxu1 %vm13251_vm4, %v13250_v20 }
 0x212   :  { %11469 = vmatmul.mubr.msk.bf16.gmra.mxu0 %vm174_vm3, %v13636_v39  ;;  %11525 = vmatmul.mubr.msk.bf16.gmra.mxu1 %vm174_vm3, %v13636_v39  ;;  %v1231_v39 = vld [vmem:[#allocation3 + $0x68] sm:$0xff] }
 0x213   :  { %11472 = vmatprep.mubr.msk.bf16.mxu0 %vm13251_vm4, %v13250_v20  ;;  %11528 = vmatprep.mubr.msk.bf16.mxu1 %vm13251_vm4, %v13250_v20 }
 0x21a   :  { %11473 = vmatmul.mubr.msk.bf16.gmra.mxu0 %vm174_vm3, %v13646_v42  ;;  %11529 = vmatmul.mubr.msk.bf16.gmra.mxu1 %vm174_vm3, %v13646_v42 }
 0x21b   :  { %11476 = vmatprep.mubr.msk.bf16.mxu0 %vm13251_vm4, %v13250_v20  ;;  %11532 = vmatprep.mubr.msk.bf16.mxu1 %vm13251_vm4, %v13250_v20 }
 0x222   :  { %11477 = vmatmul.mubr.msk.bf16.gmra.mxu0 %vm174_vm3, %v13692_v46  ;;  %11533 = vmatmul.mubr.msk.bf16.gmra.mxu1 %vm174_vm3, %v13692_v46 }
 0x223   :  { %11480 = vmatprep.mubr.msk.bf16.mxu0 %vm13251_vm4, %v13250_v20  ;;  %11536 = vmatprep.mubr.msk.bf16.mxu1 %vm13251_vm4, %v13250_v20 }
 0x22a   :  { %11481 = vmatmul.mubr.msk.bf16.gmra.mxu0 %vm174_vm3, %v13702_v49  ;;  %11537 = vmatmul.mubr.msk.bf16.gmra.mxu1 %vm174_vm3, %v13702_v49  ;;  %v1232_v49 = vld [vmem:[#allocation3 + $0x70] sm:$0xff] }
 0x22b   :  { %11484 = vmatprep.mubr.msk.bf16.mxu0 %vm13251_vm4, %v13250_v20  ;;  %11540 = vmatprep.mubr.msk.bf16.mxu1 %vm13251_vm4, %v13250_v20 }
 0x232   :  { %11485 = vmatmul.mubr.msk.bf16.gmra.mxu0 %vm174_vm3, %v13712_v53  ;;  %11541 = vmatmul.mubr.msk.bf16.gmra.mxu1 %vm174_vm3, %v13712_v53 }
 0x233   :  { %11488 = vmatprep.mubr.msk.bf16.mxu0 %vm13251_vm4, %v13250_v20  ;;  %11544 = vmatprep.mubr.msk.bf16.mxu1 %vm13251_vm4, %v13250_v20 }
 0x23a   :  { %v1114_v2 = vpop.f32.mrf.mxu0  ;;  %v1342_v50 = vpop.f32.mrf.mxu1  ;;  %11489 = vmatmul.mubr.msk.bf16.gmra.mxu0 %vm174_vm3, %v13722_v57  ;;  %11545 = vmatmul.mubr.msk.bf16.gmra.mxu1 %vm174_vm3, %v13722_v57 }
 0x23b   :  { %v1221_v3 = vadd.f32 %v1216_v0, %v1114_v2  ;;  %v1449_v54 = vadd.f32 %v1444_v1, %v1342_v50  ;;  %11492 = vmatprep.mubr.msk.bf16.mxu0 %vm13251_vm4, %v13250_v20  ;;  %11548 = vmatprep.mubr.msk.bf16.mxu1 %vm13251_vm4, %v13250_v20  ;;  %v11825_v20 = vld [vmem:[#allocation10 + $0x8] sm:$0xff]   ;;  %v1234_v1 = vld [vmem:[#allocation3 + $0x80] sm:$0xff] }
 0x23c   :  { %v11334_v4 = vpop.f32.mrf.mxu0  ;;  %v11390_v6 = vpop.f32.mrf.mxu1  ;;  %11556 = vmatprep.subr.bf16.mxu0 %v11825_v20 }
 0x23d   :  { %1226 = vst.msk [vmem:[#allocation3 + $0x38] sm:$0xff] %vm988_vm5, %v1221_v3  ;;  %1454 = vst.msk [vmem:[#allocation3 + $0x30] sm:$0xff] %vm988_vm5, %v1449_v54  ;;  %11557 = vmatpush3.bf16.msra.mxu0 %v11825_v20  ;;  %v1246_v20 = vld [vmem:[#allocation3 + $0x98] sm:$0xff] }
 0x23e   :  { %v1117_v5 = vpop.f32.mrf.mxu0  ;;  %v1345_v8 = vpop.f32.mrf.mxu1  ;;  %11558 = vmatprep.subr.bf16.mxu0 %v11827_v26 }
 0x23f   :  { %v1222_v9 = vadd.f32 %v1217_v7, %v1117_v5  ;;  %v1235_v5 = vld [vmem:[#allocation3 + $0x88] sm:$0xff] }
 0x240   :  { %v11335_v10 = vpop.f32.mrf.mxu0  ;;  %v11391_v11 = vpop.f32.mrf.mxu1 }
 0x241   :  { %1227 = vst.msk [vmem:[#allocation3 + $0x40] sm:$0xff] %vm988_vm5, %v1222_v9  ;;  %11559 = vmatpush3.bf16.msra.mxu0 %v11827_v26  ;;  %v1247_v26 = vld [vmem:[#allocation3 + $0xa0] sm:$0xff] }
 0x242   :  { %v1122_v13 = vpop.f32.mrf.mxu0  ;;  %v1350_v14 = vpop.f32.mrf.mxu1  ;;  %11493 = vmatmul.mubr.msk.bf16.gmra.mxu0 %vm174_vm3, %v13732_v60  ;;  %11549 = vmatmul.mubr.msk.bf16.gmra.mxu1 %vm174_vm3, %v13732_v60 }
 0x243   :  { %v1223_v16 = vadd.f32 %v1218_v12, %v1122_v13 }
 0x244   :  { %v1445_v18 = vld [vmem:[#allocation3 + $0x38] sm:$0xff]  ;;  %v11338_v19 = vpop.f32.mrf.mxu0  ;;  %v11394_v21 = vpop.f32.mrf.mxu1 }
 0x245   :  { %v1450_v23 = vadd.f32 %v1445_v18, %v1345_v8  ;;  %1228 = vst.msk [vmem:[#allocation3 + $0x48] sm:$0xff] %vm988_vm5, %v1223_v16 }
 0x246   :  { %v1125_v24 = vpop.f32.mrf.mxu0  ;;  %v1353_v25 = vpop.f32.mrf.mxu1 }
 0x247   :  { %1455 = vst.msk [vmem:[#allocation3 + $0x38] sm:$0xff] %vm988_vm5, %v1450_v23  ;;  %v1224_v28 = vadd.f32 %v1219_v22, %v1125_v24 }
 0x248   :  { %v1446_v29 = vld [vmem:[#allocation3 + $0x40] sm:$0xff]  ;;  %v11339_v31 = vpop.f32.mrf.mxu0  ;;  %v11395_v32 = vpop.f32.mrf.mxu1 }
 0x249   :  { %v1451_v34 = vadd.f32 %v1446_v29, %v1350_v14  ;;  %1229 = vst.msk [vmem:[#allocation3 + $0x50] sm:$0xff] %vm988_vm5, %v1224_v28 }
 0x24a   :  { %v1130_v30 = vpop.f32.mrf.mxu0  ;;  %v1358_v35 = vpop.f32.mrf.mxu1 }
 0x24b   :  { %1456 = vst.msk [vmem:[#allocation3 + $0x40] sm:$0xff] %vm988_vm5, %v1451_v34  ;;  %v1225_v36 = vadd.f32 %v1220_v33, %v1130_v30  ;;  %v1248_v34 = vld [vmem:[#allocation3 + $0xa8] sm:$0xff] }
 0x24c   :  { %v1447_v37 = vld [vmem:[#allocation3 + $0x48] sm:$0xff]  ;;  %v11342_v38 = vpop.f32.mrf.mxu0  ;;  %v11398_v17 = vpop.f32.mrf.mxu1 }
 0x24d   :  { %v1452_v41 = vadd.f32 %v1447_v37, %v1353_v25  ;;  %1230 = vst.msk [vmem:[#allocation3 + $0x58] sm:$0xff] %vm988_vm5, %v1225_v36 }
 0x24e   :  { %v1133_v42 = vpop.f32.mrf.mxu0  ;;  %v1361_v43 = vpop.f32.mrf.mxu1 }
 0x24f   :  { %1457 = vst.msk [vmem:[#allocation3 + $0x48] sm:$0xff] %vm988_vm5, %v1452_v41  ;;  %v1236_v44 = vadd.f32 %v1231_v39, %v1133_v42  ;;  %v1464_v45 = vadd.f32 %v1459_v40, %v1361_v43  ;;  %v1249_v39 = vld [vmem:[#allocation3 + $0xb0] sm:$0xff] }
 0x250   :  { %v1448_v46 = vld [vmem:[#allocation3 + $0x50] sm:$0xff]  ;;  %v11343_v47 = vpop.f32.mrf.mxu0  ;;  %v11399_v48 = vpop.f32.mrf.mxu1 }
 0x251   :  { %v1453_v51 = vadd.f32 %v1448_v46, %v1358_v35  ;;  %1241 = vst.msk [vmem:[#allocation3 + $0x68] sm:$0xff] %vm988_vm5, %v1236_v44  ;;  %1469 = vst.msk [vmem:[#allocation3 + $0x60] sm:$0xff] %vm988_vm5, %v1464_v45  ;;  %v1250_v47 = vld [vmem:[#allocation3 + $0xb8] sm:$0xff] }
 0x252   :  { %v1138_v52 = vpop.f32.mrf.mxu0  ;;  %v1366_v53 = vpop.f32.mrf.mxu1 }
 0x253   :  { %1458 = vst.msk [vmem:[#allocation3 + $0x50] sm:$0xff] %vm988_vm5, %v1453_v51  ;;  %v1237_v55 = vadd.f32 %v1232_v49, %v1138_v52 }
 0x254   :  { %v11346_v56 = vpop.f32.mrf.mxu0  ;;  %v11402_v57 = vpop.f32.mrf.mxu1 }
 0x255   :  { %1242 = vst.msk [vmem:[#allocation3 + $0x70] sm:$0xff] %vm988_vm5, %v1237_v55  ;;  %v1261_v57 = vld [vmem:[#allocation3 + $0xc8] sm:$0xff] }
 0x256   :  { %v1141_v60 = vpop.f32.mrf.mxu0  ;;  %v1369_v59 = vpop.f32.mrf.mxu1 }
 0x257   :  { %v1238_v61 = vadd.f32 %v1233_v58, %v1141_v60  ;;  %v1489_v58 = vld [vmem:[#allocation3 + $0xc0] sm:$0xff] }
 0x258   :  { %v1460_v62 = vld [vmem:[#allocation3 + $0x68] sm:$0xff]  ;;  %v11347_v63 = vpop.f32.mrf.mxu0  ;;  %v11403_v0 = vpop.f32.mrf.mxu1 }
 0x259   :  { %v1465_v2 = vadd.f32 %v1460_v62, %v1366_v53  ;;  %1243 = vst.msk [vmem:[#allocation3 + $0x78] sm:$0xff] %vm988_vm5, %v1238_v61 }
 0x25a   :  { %v1146_v50 = vpop.f32.mrf.mxu0  ;;  %v1374_v3 = vpop.f32.mrf.mxu1 }
 0x25b   :  { %1470 = vst.msk [vmem:[#allocation3 + $0x68] sm:$0xff] %vm988_vm5, %v1465_v2  ;;  %v1239_v54 = vadd.f32 %v1234_v1, %v1146_v50  ;;  %v1262_v50 = vld [vmem:[#allocation3 + $0xd0] sm:$0xff] }
 0x25c   :  { %v1461_v4 = vld [vmem:[#allocation3 + $0x70] sm:$0xff]  ;;  %v11350_v6 = vpop.f32.mrf.mxu0  ;;  %v11406_v7 = vpop.f32.mrf.mxu1 }
 0x25d   :  { %v1466_v8 = vadd.f32 %v1461_v4, %v1369_v59  ;;  %1244 = vst.msk [vmem:[#allocation3 + $0x80] sm:$0xff] %vm988_vm5, %v1239_v54 }
 0x25e   :  { %v1149_v9 = vpop.f32.mrf.mxu0  ;;  %v1377_v10 = vpop.f32.mrf.mxu1 }
 0x25f   :  { %1471 = vst.msk [vmem:[#allocation3 + $0x70] sm:$0xff] %vm988_vm5, %v1466_v8  ;;  %v1240_v11 = vadd.f32 %v1235_v5, %v1149_v9  ;;  %v1263_v8 = vld [vmem:[#allocation3 + $0xd8] sm:$0xff]  ;;  %v13875_v9 = vld [vmem:[#allocation10 + $0x58] sm:$0xff]  }
 0x260   :  { %v1462_v12 = vld [vmem:[#allocation3 + $0x78] sm:$0xff]  ;;  %v11351_v13 = vpop.f32.mrf.mxu0  ;;  %v11407_v14 = vpop.f32.mrf.mxu1  ;;  %11640 = vmatprep.subr.bf16.mxu0 %v13875_v9 }
 0x261   :  { %v1467_v16 = vadd.f32 %v1462_v12, %v1374_v3  ;;  %1245 = vst.msk [vmem:[#allocation3 + $0x88] sm:$0xff] %vm988_vm5, %v1240_v11 }
 0x262   :  { %v1154_v18 = vpop.f32.mrf.mxu0  ;;  %v1382_v19 = vpop.f32.mrf.mxu1 }
 0x263   :  { %1472 = vst.msk [vmem:[#allocation3 + $0x78] sm:$0xff] %vm988_vm5, %v1467_v16  ;;  %v1251_v21 = vadd.f32 %v1246_v20, %v1154_v18  ;;  %v1479_v22 = vadd.f32 %v1474_v15, %v1382_v19  ;;  %v1264_v15 = vld [vmem:[#allocation3 + $0xe0] sm:$0xff] }
 0x264   :  { %v1463_v23 = vld [vmem:[#allocation3 + $0x80] sm:$0xff]  ;;  %v11354_v24 = vpop.f32.mrf.mxu0  ;;  %v11410_v25 = vpop.f32.mrf.mxu1 }
 0x265   :  { %v1468_v27 = vadd.f32 %v1463_v23, %v1377_v10  ;;  %1256 = vst.msk [vmem:[#allocation3 + $0x98] sm:$0xff] %vm988_vm5, %v1251_v21  ;;  %1484 = vst.msk [vmem:[#allocation3 + $0x90] sm:$0xff] %vm988_vm5, %v1479_v22  ;;  %v13879_v18 = vld [vmem:[#allocation10 + $0x78] sm:$0xff]  }
 0x266   :  { %v1157_v28 = vpop.f32.mrf.mxu0  ;;  %v1385_v29 = vpop.f32.mrf.mxu1  ;;  %11684 = vmatprep.subr.bf16.mxu1 %v13879_v18 }
 0x267   :  { %1473 = vst.msk [vmem:[#allocation3 + $0x80] sm:$0xff] %vm988_vm5, %v1468_v27  ;;  %v1252_v31 = vadd.f32 %v1247_v26, %v1157_v28  ;;  %v1265_v26 = vld [vmem:[#allocation3 + $0xe8] sm:$0xff] }
 0x268   :  { %v11355_v32 = vpop.f32.mrf.mxu0  ;;  %v11411_v33 = vpop.f32.mrf.mxu1 }
 0x269   :  { %1257 = vst.msk [vmem:[#allocation3 + $0xa0] sm:$0xff] %vm988_vm5, %v1252_v31 }
 0x26a   :  { %v1162_v30 = vpop.f32.mrf.mxu0  ;;  %v1390_v35 = vpop.f32.mrf.mxu1 }
 0x26b   :  { %v1253_v36 = vadd.f32 %v1248_v34, %v1162_v30  ;;  %v1276_v30 = vld [vmem:[#allocation3 + $0xf8] sm:$0xff] }
 0x26c   :  { %v1475_v37 = vld [vmem:[#allocation3 + $0x98] sm:$0xff]  ;;  %v11358_v38 = vpop.f32.mrf.mxu0  ;;  %v11414_v17 = vpop.f32.mrf.mxu1 }
 0x26d   :  { %v1480_v40 = vadd.f32 %v1475_v37, %v1385_v29  ;;  %1258 = vst.msk [vmem:[#allocation3 + $0xa8] sm:$0xff] %vm988_vm5, %v1253_v36 }
 0x26e   :  { %v1165_v41 = vpop.f32.mrf.mxu0  ;;  %v1393_v42 = vpop.f32.mrf.mxu1 }
 0x26f   :  { %1485 = vst.msk [vmem:[#allocation3 + $0x98] sm:$0xff] %vm988_vm5, %v1480_v40  ;;  %v1254_v43 = vadd.f32 %v1249_v39, %v1165_v41 }
 0x270   :  { %v1476_v44 = vld [vmem:[#allocation3 + $0xa0] sm:$0xff]  ;;  %v11359_v45 = vpop.f32.mrf.mxu0  ;;  %v11415_v46 = vpop.f32.mrf.mxu1 }
 0x271   :  { %v1481_v48 = vadd.f32 %v1476_v44, %v1390_v35  ;;  %1259 = vst.msk [vmem:[#allocation3 + $0xb0] sm:$0xff] %vm988_vm5, %v1254_v43  ;;  %v1504_v35 = vld [vmem:[#allocation3 + $0xf0] sm:$0xff]  ;;  %v1277_v43 = vld [vmem:[#allocation3 + $0x100] sm:$0xff] }
 0x272   :  { %v1170_v49 = vpop.f32.mrf.mxu0  ;;  %v1398_v51 = vpop.f32.mrf.mxu1 }
 0x273   :  { %1486 = vst.msk [vmem:[#allocation3 + $0xa0] sm:$0xff] %vm988_vm5, %v1481_v48  ;;  %v1255_v52 = vadd.f32 %v1250_v47, %v1170_v49 }
 0x274   :  { %v1477_v53 = vld [vmem:[#allocation3 + $0xa8] sm:$0xff]  ;;  %v11362_v55 = vpop.f32.mrf.mxu0  ;;  %v11418_v56 = vpop.f32.mrf.mxu1 }
 0x275   :  { %v1482_v60 = vadd.f32 %v1477_v53, %v1393_v42  ;;  %1260 = vst.msk [vmem:[#allocation3 + $0xb8] sm:$0xff] %vm988_vm5, %v1255_v52 }
 0x276   :  { %v1173_v59 = vpop.f32.mrf.mxu0  ;;  %v1401_v61 = vpop.f32.mrf.mxu1 }
 0x277   :  { %1487 = vst.msk [vmem:[#allocation3 + $0xa8] sm:$0xff] %vm988_vm5, %v1482_v60  ;;  %v1266_v62 = vadd.f32 %v1261_v57, %v1173_v59  ;;  %v1494_v63 = vadd.f32 %v1489_v58, %v1401_v61  ;;  %v1279_v59 = vld [vmem:[#allocation3 + $0x110] sm:$0xff] }
 0x278   :  { %v1478_v0 = vld [vmem:[#allocation3 + $0xb0] sm:$0xff]  ;;  %v11363_v1 = vpop.f32.mrf.mxu0  ;;  %v11419_v2 = vpop.f32.mrf.mxu1 }
 0x279   :  { %v1483_v3 = vadd.f32 %v1478_v0, %v1398_v51  ;;  %1271 = vst.msk [vmem:[#allocation3 + $0xc8] sm:$0xff] %vm988_vm5, %v1266_v62  ;;  %1499 = vst.msk [vmem:[#allocation3 + $0xc0] sm:$0xff] %vm988_vm5, %v1494_v63  ;;  %v1278_v51 = vld [vmem:[#allocation3 + $0x108] sm:$0xff] }
 0x27a   :  { %v1178_v54 = vpop.f32.mrf.mxu0  ;;  %v1406_v4 = vpop.f32.mrf.mxu1 }
 0x27b   :  { %1488 = vst.msk [vmem:[#allocation3 + $0xb0] sm:$0xff] %vm988_vm5, %v1483_v3  ;;  %v1267_v6 = vadd.f32 %v1262_v50, %v1178_v54  ;;  %v1280_v54 = vld [vmem:[#allocation3 + $0x118] sm:$0xff] }
 0x27c   :  { %v11366_v7 = vpop.f32.mrf.mxu0  ;;  %v11422_v5 = vpop.f32.mrf.mxu1 }
 0x27d   :  { %1272 = vst.msk [vmem:[#allocation3 + $0xd0] sm:$0xff] %vm988_vm5, %v1267_v6 }
 0x27e   :  { %v1181_v10 = vpop.f32.mrf.mxu0  ;;  %v1409_v11 = vpop.f32.mrf.mxu1 }
 0x27f   :  { %v1268_v12 = vadd.f32 %v1263_v8, %v1181_v10 }
 0x280   :  { %v1490_v13 = vld [vmem:[#allocation3 + $0xc8] sm:$0xff]  ;;  %v11367_v14 = vpop.f32.mrf.mxu0  ;;  %v11423_v20 = vpop.f32.mrf.mxu1 }
 0x281   :  { %v1495_v16 = vadd.f32 %v1490_v13, %v1406_v4  ;;  %1273 = vst.msk [vmem:[#allocation3 + $0xd8] sm:$0xff] %vm988_vm5, %v1268_v12 }
 0x282   :  { %v1186_v19 = vpop.f32.mrf.mxu0  ;;  %v1414_v21 = vpop.f32.mrf.mxu1 }
 0x283   :  { %1500 = vst.msk [vmem:[#allocation3 + $0xc8] sm:$0xff] %vm988_vm5, %v1495_v16  ;;  %v1269_v22 = vadd.f32 %v1264_v15, %v1186_v19 }
 0x284   :  { %v1491_v23 = vld [vmem:[#allocation3 + $0xd0] sm:$0xff]  ;;  %v11370_v24 = vpop.f32.mrf.mxu0  ;;  %v11426_v25 = vpop.f32.mrf.mxu1 }
 0x285   :  { %v1496_v27 = vadd.f32 %v1491_v23, %v1409_v11  ;;  %1274 = vst.msk [vmem:[#allocation3 + $0xe0] sm:$0xff] %vm988_vm5, %v1269_v22  ;;  %v1672_v22 = vld [vmem:[#allocation3 + $0x8] sm:$0xff]  ;;  %v1900_v23 = vld [vmem:[#allocation3] sm:$0xff] }
 0x286   :  { %v1189_v28 = vpop.f32.mrf.mxu0  ;;  %v1417_v29 = vpop.f32.mrf.mxu1 }
 0x287   :  { %1501 = vst.msk [vmem:[#allocation3 + $0xd0] sm:$0xff] %vm988_vm5, %v1496_v27  ;;  %v1270_v31 = vadd.f32 %v1265_v26, %v1189_v28 }
 0x288   :  { %v1492_v32 = vld [vmem:[#allocation3 + $0xd8] sm:$0xff]  ;;  %v11371_v33 = vpop.f32.mrf.mxu0  ;;  %v11427_v34 = vpop.f32.mrf.mxu1 }
 0x289   :  { %v1497_v36 = vadd.f32 %v1492_v32, %v1414_v21  ;;  %1275 = vst.msk [vmem:[#allocation3 + $0xe8] sm:$0xff] %vm988_vm5, %v1270_v31 }
 0x28a   :  { %v1194_v37 = vpop.f32.mrf.mxu0  ;;  %v1422_v38 = vpop.f32.mrf.mxu1 }
 0x28b   :  { %1502 = vst.msk [vmem:[#allocation3 + $0xd8] sm:$0xff] %vm988_vm5, %v1497_v36  ;;  %v1281_v17 = vadd.f32 %v1276_v30, %v1194_v37  ;;  %v1509_v39 = vadd.f32 %v1504_v35, %v1422_v38  ;;  %v1673_v30 = vld [vmem:[#allocation3 + $0x10] sm:$0xff] }
 0x28c   :  { %v1493_v40 = vld [vmem:[#allocation3 + $0xe0] sm:$0xff]  ;;  %v11374_v41 = vpop.f32.mrf.mxu0  ;;  %v11430_v42 = vpop.f32.mrf.mxu1 }
 0x28d   :  { %v1498_v44 = vadd.f32 %v1493_v40, %v1417_v29  ;;  %1286 = vst.msk [vmem:[#allocation3 + $0xf8] sm:$0xff] %vm988_vm5, %v1281_v17  ;;  %1514 = vst.msk [vmem:[#allocation3 + $0xf0] sm:$0xff] %vm988_vm5, %v1509_v39  ;;  %v1674_v42 = vld [vmem:[#allocation3 + $0x18] sm:$0xff] }
 0x28e   :  { %v1197_v45 = vpop.f32.mrf.mxu0  ;;  %v1425_v46 = vpop.f32.mrf.mxu1 }
 0x28f   :  { %1503 = vst.msk [vmem:[#allocation3 + $0xe0] sm:$0xff] %vm988_vm5, %v1498_v44  ;;  %v1282_v47 = vadd.f32 %v1277_v43, %v1197_v45 }
 0x290   :  { %v11375_v48 = vpop.f32.mrf.mxu0  ;;  %v11431_v49 = vpop.f32.mrf.mxu1 }
 0x291   :  { %1287 = vst.msk [vmem:[#allocation3 + $0x100] sm:$0xff] %vm988_vm5, %v1282_v47 }
 0x292   :  { %v1202_v52 = vpop.f32.mrf.mxu0  ;;  %v1430_v53 = vpop.f32.mrf.mxu1 }
 0x293   :  { %v1283_v55 = vadd.f32 %v1278_v51, %v1202_v52 }
 0x294   :  { %v2005_v56 = vld [vmem:[#allocation3 + $0xf0] sm:$0xff]  ;;  %v1505_v57 = vld [vmem:[#allocation3 + $0xf8] sm:$0xff]  ;;  %v11378_v58 = vpop.f32.mrf.mxu0  ;;  %v11434_v60 = vpop.f32.mrf.mxu1 }
 0x295   :  { %v2041_v61 = vmax.f32 %v2005_v56, 0.0  ;;  %v1510_v62 = vadd.f32 %v1505_v57, %v1425_v46  ;;  %1288 = vst.msk [vmem:[#allocation3 + $0x108] sm:$0xff] %vm988_vm5, %v1283_v55 }
 0x296   :  { %v1205_v63 = vpop.f32.mrf.mxu0  ;;  %v1433_v0 = vpop.f32.mrf.mxu1 }
 0x297   :  { %2077 = vst.msk [vmem:[#allocation3 + $0xf0] sm:$0xff] %vm988_vm5, %v2041_v61  ;;  %1515 = vst.msk [vmem:[#allocation3 + $0xf8] sm:$0xff] %vm988_vm5, %v1510_v62  ;;  %v1284_v1 = vadd.f32 %v1279_v59, %v1205_v63  ;;  %v1676_v63 = vld [vmem:[#allocation3 + $0x28] sm:$0xff] }
 0x298   :  { %v1506_v2 = vld [vmem:[#allocation3 + $0x100] sm:$0xff]  ;;  %v11379_v50 = vpop.f32.mrf.mxu0  ;;  %v11435_v3 = vpop.f32.mrf.mxu1 }
 0x299   :  { %v1511_v4 = vadd.f32 %v1506_v2, %v1430_v53  ;;  %1289 = vst.msk [vmem:[#allocation3 + $0x110] sm:$0xff] %vm988_vm5, %v1284_v1  ;;  %v1675_v53 = vld [vmem:[#allocation3 + $0x20] sm:$0xff] }
 0x29a   :  { %v1210_v6 = vpop.f32.mrf.mxu0  ;;  %v1438_v7 = vpop.f32.mrf.mxu1 }
 0x29b   :  { %1516 = vst.msk [vmem:[#allocation3 + $0x100] sm:$0xff] %vm988_vm5, %v1511_v4  ;;  %v1285_v5 = vadd.f32 %v1280_v54, %v1210_v6 }
 0x29c   :  { %v1507_v8 = vld [vmem:[#allocation3 + $0x108] sm:$0xff]  ;;  %v11382_v10 = vpop.f32.mrf.mxu0  ;;  %v11438_v11 = vpop.f32.mrf.mxu1 }
 0x29d   :  { %v1512_v12 = vadd.f32 %v1507_v8, %v1433_v0  ;;  %1290 = vst.msk [vmem:[#allocation3 + $0x118] sm:$0xff] %vm988_vm5, %v1285_v5  ;;  %v1687_v8 = vld [vmem:[#allocation3 + $0x38] sm:$0xff]  ;;  %v1915_v11 = vld [vmem:[#allocation3 + $0x30] sm:$0xff] }
 0x29e   :  { %v2006_v13 = vld [vmem:[#allocation3 + $0xf8] sm:$0xff]  ;;  %v1213_v14 = vpop.f32.mrf.mxu0  ;;  %v1441_v20 = vpop.f32.mrf.mxu1 }
 0x29f   :  { %v2042_v15 = vmax.f32 %v2006_v13, 0.0  ;;  %1517 = vst.msk [vmem:[#allocation3 + $0x108] sm:$0xff] %vm988_vm5, %v1512_v12 }
 0x2a0   :  { %v1508_v16 = vld [vmem:[#allocation3 + $0x110] sm:$0xff]  ;;  %v11383_v19 = vpop.f32.mrf.mxu0  ;;  %v11439_v21 = vpop.f32.mrf.mxu1 }
 0x2a1   :  { %2078 = vst.msk [vmem:[#allocation3 + $0xf8] sm:$0xff] %vm988_vm5, %v2042_v15  ;;  %v1513_v24 = vadd.f32 %v1508_v16, %v1438_v7 }
 0x2a2   :  { %v2007_v25 = vld [vmem:[#allocation3 + $0x100] sm:$0xff]  ;;  %v1570_v26 = vpop.f32.mrf.mxu0  ;;  %v1798_v27 = vpop.f32.mrf.mxu1 }
 0x2a3   :  { %v2043_v28 = vmax.f32 %v2007_v25, 0.0  ;;  %1518 = vst.msk [vmem:[#allocation3 + $0x110] sm:$0xff] %vm988_vm5, %v1513_v24  ;;  %v1677_v29 = vadd.f32 %v1672_v22, %v1570_v26  ;;  %v1905_v31 = vadd.f32 %v1900_v23, %v1798_v27  ;;  %v1688_v23 = vld [vmem:[#allocation3 + $0x40] sm:$0xff] }
 0x2a4   :  { %v2010_v32 = vld [vmem:[#allocation3 + $0x118] sm:$0xff]  ;;  %v11446_v33 = vpop.f32.mrf.mxu0  ;;  %v11502_v34 = vpop.f32.mrf.mxu1 }
 0x2a5   :  { %2079 = vst.msk [vmem:[#allocation3 + $0x100] sm:$0xff] %vm988_vm5, %v2043_v28  ;;  %v2046_v35 = vmax.f32 %v2010_v32, 0.0  ;;  %1682 = vst.msk [vmem:[#allocation3 + $0x8] sm:$0xff] %vm988_vm5, %v1677_v29  ;;  %v1689_v34 = vld [vmem:[#allocation3 + $0x48] sm:$0xff] }
 0x2a6   :  { %1910 = vst.msk [vmem:[#allocation3] sm:$0xff] %vm988_vm5, %v1905_v31  ;;  %v2008_v36 = vld [vmem:[#allocation3 + $0x108] sm:$0xff]  ;;  %v1573_v37 = vpop.f32.mrf.mxu0  ;;  %v1801_v38 = vpop.f32.mrf.mxu1 }
 0x2a7   :  { %v2044_v17 = vmax.f32 %v2008_v36, 0.0  ;;  %2082 = vst.msk [vmem:[#allocation3 + $0x118] sm:$0xff] %vm988_vm5, %v2046_v35  ;;  %v1678_v39 = vadd.f32 %v1673_v30, %v1573_v37 }
 0x2a8   :  { %v11447_v40 = vpop.f32.mrf.mxu0  ;;  %v11503_v41 = vpop.f32.mrf.mxu1 }
 0x2a9   :  { %2080 = vst.msk [vmem:[#allocation3 + $0x108] sm:$0xff] %vm988_vm5, %v2044_v17  ;;  %1683 = vst.msk [vmem:[#allocation3 + $0x10] sm:$0xff] %vm988_vm5, %v1678_v39 }
 0x2aa   :  { %v2009_v43 = vld [vmem:[#allocation3 + $0x110] sm:$0xff]  ;;  %v1578_v44 = vpop.f32.mrf.mxu0  ;;  %v1806_v45 = vpop.f32.mrf.mxu1 }
 0x2ab   :  { %v2045_v46 = vmax.f32 %v2009_v43, 0.0  ;;  %v1679_v47 = vadd.f32 %v1674_v42, %v1578_v44 }
 0x2ac   :  { %v1901_v49 = vld [vmem:[#allocation3 + $0x8] sm:$0xff]  ;;  %v11450_v51 = vpop.f32.mrf.mxu0  ;;  %v11506_v52 = vpop.f32.mrf.mxu1 }
 0x2ad   :  { %v1975_v48 = vld [vmem:[#allocation3] sm:$0xff]  ;;  %2081 = vst.msk [vmem:[#allocation3 + $0x110] sm:$0xff] %vm988_vm5, %v2045_v46  ;;  %v1906_v56 = vadd.f32 %v1901_v49, %v1801_v38  ;;  %1684 = vst.msk [vmem:[#allocation3 + $0x18] sm:$0xff] %vm988_vm5, %v1679_v47  ;;  %v1690_v47 = vld [vmem:[#allocation3 + $0x50] sm:$0xff] }
 0x2ae   :  { %v2011_v55 = vmax.f32 %v1975_v48, 0.0  ;;  %v1581_v57 = vpop.f32.mrf.mxu0  ;;  %v1809_v58 = vpop.f32.mrf.mxu1 }
 0x2af   :  { %1911 = vst.msk [vmem:[#allocation3 + $0x8] sm:$0xff] %vm988_vm5, %v1906_v56  ;;  %v1680_v60 = vadd.f32 %v1675_v53, %v1581_v57 }
 0x2b0   :  { %2047 = vst.msk [vmem:[#allocation3] sm:$0xff] %vm988_vm5, %v2011_v55  ;;  %v1902_v59 = vld [vmem:[#allocation3 + $0x10] sm:$0xff]  ;;  %v11451_v61 = vpop.f32.mrf.mxu0  ;;  %v11507_v62 = vpop.f32.mrf.mxu1 }
 0x2b1   :  { %v1907_v0 = vadd.f32 %v1902_v59, %v1806_v45  ;;  %1685 = vst.msk [vmem:[#allocation3 + $0x20] sm:$0xff] %vm988_vm5, %v1680_v60 }
 0x2b2   :  { %v1586_v1 = vpop.f32.mrf.mxu0  ;;  %v1814_v2 = vpop.f32.mrf.mxu1 }
 0x2b3   :  { %1912 = vst.msk [vmem:[#allocation3 + $0x10] sm:$0xff] %vm988_vm5, %v1907_v0  ;;  %v1681_v50 = vadd.f32 %v1676_v63, %v1586_v1 }
 0x2b4   :  { %v1903_v3 = vld [vmem:[#allocation3 + $0x18] sm:$0xff]  ;;  %v11454_v54 = vpop.f32.mrf.mxu0  ;;  %v11510_v4 = vpop.f32.mrf.mxu1 }
 0x2b5   :  { %v1908_v6 = vadd.f32 %v1903_v3, %v1809_v58  ;;  %1686 = vst.msk [vmem:[#allocation3 + $0x28] sm:$0xff] %vm988_vm5, %v1681_v50  ;;  %v1691_v58 = vld [vmem:[#allocation3 + $0x58] sm:$0xff] }
 0x2b6   :  { %v1976_v7 = vld [vmem:[#allocation3 + $0x8] sm:$0xff]  ;;  %v1589_v5 = vpop.f32.mrf.mxu0  ;;  %v1817_v10 = vpop.f32.mrf.mxu1  ;;  %v11831_v3 = vld [vmem:[#allocation10 + $0x50] sm:$0xff]  }
 0x2b7   :  { %v2012_v12 = vmax.f32 %v1976_v7, 0.0  ;;  %1913 = vst.msk [vmem:[#allocation3 + $0x18] sm:$0xff] %vm988_vm5, %v1908_v6  ;;  %v1692_v13 = vadd.f32 %v1687_v8, %v1589_v5  ;;  %v1920_v14 = vadd.f32 %v1915_v11, %v1817_v10  ;;  %v2083_v37 = vld [vmem:[#allocation3] sm:$0xff]  ;;  %v1702_v7 = vld [vmem:[#allocation3 + $0x68] sm:$0xff] }
 0x2b8   :  { %v1904_v20 = vld [vmem:[#allocation3 + $0x20] sm:$0xff]  ;;  %v11455_v15 = vpop.f32.mrf.mxu0  ;;  %v11511_v16 = vpop.f32.mrf.mxu1 }
 0x2b9   :  { %2048 = vst.msk [vmem:[#allocation3 + $0x8] sm:$0xff] %vm988_vm5, %v2012_v12  ;;  %v1909_v19 = vadd.f32 %v1904_v20, %v1814_v2  ;;  %1697 = vst.msk [vmem:[#allocation3 + $0x38] sm:$0xff] %vm988_vm5, %v1692_v13  ;;  %v11832_v54 = vld [vmem:[#allocation10 + $0x70] sm:$0xff]  }
 0x2ba   :  { %1925 = vst.msk [vmem:[#allocation3 + $0x30] sm:$0xff] %vm988_vm5, %v1920_v14  ;;  %v1977_v21 = vld [vmem:[#allocation3 + $0x10] sm:$0xff]  ;;  %v1594_v22 = vpop.f32.mrf.mxu0  ;;  %v1822_v24 = vpop.f32.mrf.mxu1  ;;  %v1930_v8 = vld [vmem:[#allocation3 + $0x60] sm:$0xff] }
 0x2bb   :  { %v2013_v25 = vmax.f32 %v1977_v21, 0.0  ;;  %1914 = vst.msk [vmem:[#allocation3 + $0x20] sm:$0xff] %vm988_vm5, %v1909_v19  ;;  %v1693_v26 = vadd.f32 %v1688_v23, %v1594_v22  ;;  %v11833_v22 = vld [vmem:[#allocation10 + $0x48] sm:$0xff]  }
 0x2bc   :  { %v1980_v27 = vld [vmem:[#allocation3 + $0x28] sm:$0xff]  ;;  %v11458_v28 = vpop.f32.mrf.mxu0  ;;  %v11514_v29 = vpop.f32.mrf.mxu1  ;;  %v11834_v23 = vld [vmem:[#allocation10 + $0x68] sm:$0xff]  }
 0x2bd   :  { %2049 = vst.msk [vmem:[#allocation3 + $0x10] sm:$0xff] %vm988_vm5, %v2013_v25  ;;  %v2016_v31 = vmax.f32 %v1980_v27, 0.0  ;;  %1698 = vst.msk [vmem:[#allocation3 + $0x40] sm:$0xff] %vm988_vm5, %v1693_v26  ;;  %v1703_v26 = vld [vmem:[#allocation3 + $0x70] sm:$0xff] }
 0x2be   :  { %v1978_v32 = vld [vmem:[#allocation3 + $0x18] sm:$0xff]  ;;  %v1597_v33 = vpop.f32.mrf.mxu0  ;;  %v1825_v30 = vpop.f32.mrf.mxu1 }
 0x2bf   :  { %v2014_v35 = vmax.f32 %v1978_v32, 0.0  ;;  %2052 = vst.msk [vmem:[#allocation3 + $0x28] sm:$0xff] %vm988_vm5, %v2016_v31  ;;  %v1694_v36 = vadd.f32 %v1689_v34, %v1597_v33  ;;  %v11835_v33 = vld [vmem:[#allocation10 + $0x40] sm:$0xff]  }
 0x2c0   :  { %v1916_v17 = vld [vmem:[#allocation3 + $0x38] sm:$0xff]  ;;  %v11459_v39 = vpop.f32.mrf.mxu0  ;;  %v11515_v40 = vpop.f32.mrf.mxu1  ;;  %v2084_v41 = vld [vmem:[#allocation3 + $0x8] sm:$0xff] }
 0x2c1   :  { %v1981_v38 = vld [vmem:[#allocation3 + $0x30] sm:$0xff]  ;;  %2050 = vst.msk [vmem:[#allocation3 + $0x18] sm:$0xff] %vm988_vm5, %v2014_v35  ;;  %v1921_v43 = vadd.f32 %v1916_v17, %v1822_v24  ;;  %1699 = vst.msk [vmem:[#allocation3 + $0x48] sm:$0xff] %vm988_vm5, %v1694_v36  ;;  %v13923_v44 = vpack.c.bf16 %v2084_v41, %v2083_v37  ;;  %v1704_v36 = vld [vmem:[#allocation3 + $0x78] sm:$0xff] }
 0x2c2   :  { %v2017_v42 = vmax.f32 %v1981_v38, 0.0  ;;  %v1979_v45 = vld [vmem:[#allocation3 + $0x20] sm:$0xff]  ;;  %v1602_v46 = vpop.f32.mrf.mxu0  ;;  %v1830_v48 = vpop.f32.mrf.mxu1  ;;  %v11836_v34 = vld [vmem:[#allocation10 + $0x60] sm:$0xff]  }
 0x2c3   :  { %v2015_v49 = vmax.f32 %v1979_v45, 0.0  ;;  %1926 = vst.msk [vmem:[#allocation3 + $0x38] sm:$0xff] %vm988_vm5, %v1921_v43  ;;  %v1695_v51 = vadd.f32 %v1690_v47, %v1602_v46  ;;  %11560 = vmatprep.mubr.msk.bf16.mxu0 %vm988_vm5, %v13923_v44  ;;  %11604 = vmatprep.mubr.msk.bf16.mxu1 %vm988_vm5, %v13923_v44 }
 0x2c4   :  { %2053 = vst.msk [vmem:[#allocation3 + $0x30] sm:$0xff] %vm988_vm5, %v2017_v42  ;;  %v1917_v52 = vld [vmem:[#allocation3 + $0x40] sm:$0xff]  ;;  %v11462_v53 = vpop.f32.mrf.mxu0  ;;  %v11518_v55 = vpop.f32.mrf.mxu1  ;;  %v2085_v0 = vld [vmem:[#allocation3 + $0x10] sm:$0xff] }
 0x2c5   :  { %2051 = vst.msk [vmem:[#allocation3 + $0x20] sm:$0xff] %vm988_vm5, %v2015_v49  ;;  %v1922_v56 = vadd.f32 %v1917_v52, %v1825_v30  ;;  %1700 = vst.msk [vmem:[#allocation3 + $0x50] sm:$0xff] %vm988_vm5, %v1695_v51  ;;  %v1705_v52 = vld [vmem:[#allocation3 + $0x80] sm:$0xff] }
 0x2c6   :  { %v1605_v57 = vpop.f32.mrf.mxu0  ;;  %v1833_v60 = vpop.f32.mrf.mxu1  ;;  %v2088_v16 = vld [vmem:[#allocation3 + $0x28] sm:$0xff] }
 0x2c7   :  { %1927 = vst.msk [vmem:[#allocation3 + $0x40] sm:$0xff] %vm988_vm5, %v1922_v56  ;;  %v1696_v59 = vadd.f32 %v1691_v58, %v1605_v57 }
 0x2c8   :  { %v1918_v61 = vld [vmem:[#allocation3 + $0x48] sm:$0xff]  ;;  %v11463_v62 = vpop.f32.mrf.mxu0  ;;  %v11519_v63 = vpop.f32.mrf.mxu1  ;;  %v2086_v1 = vld [vmem:[#allocation3 + $0x18] sm:$0xff] }
 0x2c9   :  { %v1923_v2 = vadd.f32 %v1918_v61, %v1830_v48  ;;  %1701 = vst.msk [vmem:[#allocation3 + $0x58] sm:$0xff] %vm988_vm5, %v1696_v59  ;;  %v13935_v50 = vpack.c.bf16 %v2086_v1, %v2085_v0  ;;  %v1706_v62 = vld [vmem:[#allocation3 + $0x88] sm:$0xff] }
 0x2ca   :  { %v1982_v4 = vld [vmem:[#allocation3 + $0x38] sm:$0xff]  ;;  %v1610_v6 = vpop.f32.mrf.mxu0  ;;  %v1838_v5 = vpop.f32.mrf.mxu1 }
 0x2cb   :  { %v2018_v10 = vmax.f32 %v1982_v4, 0.0  ;;  %1928 = vst.msk [vmem:[#allocation3 + $0x48] sm:$0xff] %vm988_vm5, %v1923_v2  ;;  %v1707_v11 = vadd.f32 %v1702_v7, %v1610_v6  ;;  %v1935_v12 = vadd.f32 %v1930_v8, %v1838_v5  ;;  %11561 = vmatmul.mubr.msk.bf16.vlgmr.msra.gmra.mxu0 %vm988_vm5, %v13935_v50  ;;  %11605 = vmatmul.mubr.msk.bf16.vlgmr.msra.gmra.mxu1 %vm988_vm5, %v13935_v50  ;;  %v2089_v39 = vld [vmem:[#allocation3 + $0x30] sm:$0xff] }
 0x2cc   :  { %v1919_v13 = vld [vmem:[#allocation3 + $0x50] sm:$0xff]  ;;  %v11466_v14 = vpop.f32.mrf.mxu0  ;;  %v11522_v20 = vpop.f32.mrf.mxu1  ;;  %v2087_v15 = vld [vmem:[#allocation3 + $0x20] sm:$0xff]  ;;  %11641 = vmatpush3.bf16.msra.mxu0 %v13875_v9  ;;  %11685 = vmatpush3.bf16.msra.mxu1 %v13879_v18 }
 0x2cd   :  { %2054 = vst.msk [vmem:[#allocation3 + $0x38] sm:$0xff] %vm988_vm5, %v2018_v10  ;;  %v1924_v19 = vadd.f32 %v1919_v13, %v1833_v60  ;;  %1712 = vst.msk [vmem:[#allocation3 + $0x68] sm:$0xff] %vm988_vm5, %v1707_v11  ;;  %v13947_v21 = vpack.c.bf16 %v2088_v16, %v2087_v15  ;;  %11642 = vmatprep.subr.bf16.mxu0 %v11831_v3  ;;  %11686 = vmatprep.subr.bf16.mxu1 %v11832_v54  ;;  %v1717_v10 = vld [vmem:[#allocation3 + $0x98] sm:$0xff] }
 0x2ce   :  { %1940 = vst.msk [vmem:[#allocation3 + $0x60] sm:$0xff] %vm988_vm5, %v1935_v12  ;;  %v1983_v24 = vld [vmem:[#allocation3 + $0x40] sm:$0xff]  ;;  %v1613_v25 = vpop.f32.mrf.mxu0  ;;  %v1841_v27 = vpop.f32.mrf.mxu1  ;;  %v1945_v12 = vld [vmem:[#allocation3 + $0x90] sm:$0xff] }
 0x2cf   :  { %v2019_v9 = vmax.f32 %v1983_v24, 0.0  ;;  %1929 = vst.msk [vmem:[#allocation3 + $0x50] sm:$0xff] %vm988_vm5, %v1924_v19  ;;  %v1708_v18 = vadd.f32 %v1703_v26, %v1613_v25  ;;  %11564 = vmatprep.mubr.msk.bf16.mxu0 %vm988_vm5, %v13947_v21  ;;  %11608 = vmatprep.mubr.msk.bf16.mxu1 %vm988_vm5, %v13947_v21 }
 0x2d0   :  { %v1986_v28 = vld [vmem:[#allocation3 + $0x58] sm:$0xff]  ;;  %v11467_v29 = vpop.f32.mrf.mxu0  ;;  %v11523_v31 = vpop.f32.mrf.mxu1  ;;  %11643 = vmatpush3.bf16.msra.mxu0 %v11831_v3  ;;  %11687 = vmatpush3.bf16.msra.mxu1 %v11832_v54 }
 0x2d1   :  { %2055 = vst.msk [vmem:[#allocation3 + $0x40] sm:$0xff] %vm988_vm5, %v2019_v9  ;;  %v2022_v32 = vmax.f32 %v1986_v28, 0.0  ;;  %1713 = vst.msk [vmem:[#allocation3 + $0x70] sm:$0xff] %vm988_vm5, %v1708_v18  ;;  %11644 = vmatprep.subr.bf16.mxu0 %v11833_v22  ;;  %11688 = vmatprep.subr.bf16.mxu1 %v11834_v23  ;;  %v1718_v9 = vld [vmem:[#allocation3 + $0xa0] sm:$0xff] }
 0x2d2   :  { %v1984_v30 = vld [vmem:[#allocation3 + $0x48] sm:$0xff]  ;;  %v1618_v35 = vpop.f32.mrf.mxu0  ;;  %v1846_v37 = vpop.f32.mrf.mxu1 }
 0x2d3   :  { %v2020_v38 = vmax.f32 %v1984_v30, 0.0  ;;  %2058 = vst.msk [vmem:[#allocation3 + $0x58] sm:$0xff] %vm988_vm5, %v2022_v32  ;;  %v1709_v17 = vadd.f32 %v1704_v36, %v1618_v35  ;;  %v1719_v36 = vld [vmem:[#allocation3 + $0xa8] sm:$0xff] }
 0x2d4   :  { %v1931_v41 = vld [vmem:[#allocation3 + $0x68] sm:$0xff]  ;;  %v11470_v42 = vpop.f32.mrf.mxu0  ;;  %v11526_v43 = vpop.f32.mrf.mxu1  ;;  %v2090_v45 = vld [vmem:[#allocation3 + $0x38] sm:$0xff]  ;;  %11645 = vmatpush3.bf16.msra.mxu0 %v11833_v22  ;;  %11689 = vmatpush3.bf16.msra.mxu1 %v11834_v23 }
 0x2d5   :  { %v1987_v40 = vld [vmem:[#allocation3 + $0x60] sm:$0xff]  ;;  %2056 = vst.msk [vmem:[#allocation3 + $0x48] sm:$0xff] %vm988_vm5, %v2020_v38  ;;  %v1936_v47 = vadd.f32 %v1931_v41, %v1841_v27  ;;  %1714 = vst.msk [vmem:[#allocation3 + $0x78] sm:$0xff] %vm988_vm5, %v1709_v17  ;;  %v13959_v48 = vpack.c.bf16 %v2090_v45, %v2089_v39  ;;  %11646 = vmatprep.subr.bf16.mxu0 %v11835_v33  ;;  %11690 = vmatprep.subr.bf16.mxu1 %v11836_v34 }
 0x2d6   :  { %v2023_v46 = vmax.f32 %v1987_v40, 0.0  ;;  %v1985_v49 = vld [vmem:[#allocation3 + $0x50] sm:$0xff]  ;;  %v1621_v51 = vpop.f32.mrf.mxu0  ;;  %v1849_v53 = vpop.f32.mrf.mxu1 }
 0x2d7   :  { %v2021_v55 = vmax.f32 %v1985_v49, 0.0  ;;  %1941 = vst.msk [vmem:[#allocation3 + $0x68] sm:$0xff] %vm988_vm5, %v1936_v47  ;;  %v1710_v56 = vadd.f32 %v1705_v52, %v1621_v51  ;;  %11565 = vmatmul.mubr.msk.bf16.gmra.mxu0 %vm988_vm5, %v13959_v48  ;;  %11609 = vmatmul.mubr.msk.bf16.gmra.mxu1 %vm988_vm5, %v13959_v48 }
 0x2d8   :  { %2059 = vst.msk [vmem:[#allocation3 + $0x60] sm:$0xff] %vm988_vm5, %v2023_v46  ;;  %v1932_v57 = vld [vmem:[#allocation3 + $0x70] sm:$0xff]  ;;  %v11471_v58 = vpop.f32.mrf.mxu0  ;;  %v11527_v60 = vpop.f32.mrf.mxu1  ;;  %11647 = vmatpush3.bf16.msra.mxu0 %v11835_v33  ;;  %11691 = vmatpush3.bf16.msra.mxu1 %v11836_v34  ;;  %v2091_v54 = vld [vmem:[#allocation3 + $0x40] sm:$0xff] }
 0x2d9   :  { %2057 = vst.msk [vmem:[#allocation3 + $0x50] sm:$0xff] %vm988_vm5, %v2021_v55  ;;  %v1937_v59 = vadd.f32 %v1932_v57, %v1846_v37  ;;  %1715 = vst.msk [vmem:[#allocation3 + $0x80] sm:$0xff] %vm988_vm5, %v1710_v56 }
 0x2da   :  { %v1626_v61 = vpop.f32.mrf.mxu0  ;;  %v1854_v63 = vpop.f32.mrf.mxu1  ;;  %v2094_v23 = vld [vmem:[#allocation3 + $0x58] sm:$0xff] }
 0x2db   :  { %1942 = vst.msk [vmem:[#allocation3 + $0x70] sm:$0xff] %vm988_vm5, %v1937_v59  ;;  %v1711_v0 = vadd.f32 %v1706_v62, %v1626_v61 }
 0x2dc   :  { %v1933_v1 = vld [vmem:[#allocation3 + $0x78] sm:$0xff]  ;;  %v11474_v2 = vpop.f32.mrf.mxu0  ;;  %v11530_v3 = vpop.f32.mrf.mxu1  ;;  %v2092_v4 = vld [vmem:[#allocation3 + $0x48] sm:$0xff] }
 0x2dd   :  { %v1938_v6 = vadd.f32 %v1933_v1, %v1849_v53  ;;  %1716 = vst.msk [vmem:[#allocation3 + $0x88] sm:$0xff] %vm988_vm5, %v1711_v0  ;;  %v13971_v7 = vpack.c.bf16 %v2092_v4, %v2091_v54  ;;  %v1720_v53 = vld [vmem:[#allocation3 + $0xb0] sm:$0xff] }
 0x2de   :  { %v1988_v5 = vld [vmem:[#allocation3 + $0x68] sm:$0xff]  ;;  %v1629_v8 = vpop.f32.mrf.mxu0  ;;  %v1857_v11 = vpop.f32.mrf.mxu1 }
 0x2df   :  { %v2024_v13 = vmax.f32 %v1988_v5, 0.0  ;;  %1943 = vst.msk [vmem:[#allocation3 + $0x78] sm:$0xff] %vm988_vm5, %v1938_v6  ;;  %v1722_v14 = vadd.f32 %v1717_v10, %v1629_v8  ;;  %v1950_v20 = vadd.f32 %v1945_v12, %v1857_v11  ;;  %11568 = vmatprep.mubr.msk.bf16.mxu0 %vm988_vm5, %v13971_v7  ;;  %11612 = vmatprep.mubr.msk.bf16.mxu1 %vm988_vm5, %v13971_v7  ;;  %v2095_v39 = vld [vmem:[#allocation3 + $0x60] sm:$0xff]  ;;  %v1732_v12 = vld [vmem:[#allocation3 + $0xc8] sm:$0xff] }
 0x2e0   :  { %v1934_v15 = vld [vmem:[#allocation3 + $0x80] sm:$0xff]  ;;  %v11475_v16 = vpop.f32.mrf.mxu0  ;;  %v11531_v19 = vpop.f32.mrf.mxu1  ;;  %v2093_v22 = vld [vmem:[#allocation3 + $0x50] sm:$0xff] }
 0x2e1   :  { %2060 = vst.msk [vmem:[#allocation3 + $0x68] sm:$0xff] %vm988_vm5, %v2024_v13  ;;  %v1939_v24 = vadd.f32 %v1934_v15, %v1854_v63  ;;  %1727 = vst.msk [vmem:[#allocation3 + $0x98] sm:$0xff] %vm988_vm5, %v1722_v14  ;;  %v13981_v25 = vpack.c.bf16 %v2094_v23, %v2093_v22  ;;  %v1721_v63 = vld [vmem:[#allocation3 + $0xb8] sm:$0xff]  ;;  %v1960_v14 = vld [vmem:[#allocation3 + $0xc0] sm:$0xff] }
 0x2e2   :  { %1955 = vst.msk [vmem:[#allocation3 + $0x90] sm:$0xff] %vm988_vm5, %v1950_v20  ;;  %v1989_v26 = vld [vmem:[#allocation3 + $0x70] sm:$0xff]  ;;  %v1634_v27 = vpop.f32.mrf.mxu0  ;;  %v1862_v18 = vpop.f32.mrf.mxu1  ;;  %v10120_v19 = vld [vmem:[#allocation12] ss:$0 sm:$0xff] }
 0x2e3   :  { %v2025_v28 = vmax.f32 %v1989_v26, 0.0  ;;  %1944 = vst.msk [vmem:[#allocation3 + $0x80] sm:$0xff] %vm988_vm5, %v1939_v24  ;;  %v1723_v29 = vadd.f32 %v1718_v9, %v1634_v27  ;;  %11569 = vmatmul.mubr.msk.bf16.gmra.mxu0 %vm988_vm5, %v13981_v25  ;;  %11613 = vmatmul.mubr.msk.bf16.gmra.mxu1 %vm988_vm5, %v13981_v25  ;;  %2154 = vst.msk [vmem:[#allocation4 + $0x50] sm:$0xff] %vm988_vm5, %v10120_v19 }
 0x2e4   :  { %v1992_v31 = vld [vmem:[#allocation3 + $0x88] sm:$0xff]  ;;  %v11478_v32 = vpop.f32.mrf.mxu0  ;;  %v11534_v33 = vpop.f32.mrf.mxu1  ;;  %2144 = vst.msk [vmem:[#allocation4] sm:$0xff] %vm988_vm5, %v10120_v19  ;;  %2145 = vst.msk [vmem:[#allocation4 + $0x8] sm:$0xff] %vm988_vm5, %v10120_v19 }
 0x2e5   :  { %2061 = vst.msk [vmem:[#allocation3 + $0x70] sm:$0xff] %vm988_vm5, %v2025_v28  ;;  %v2028_v34 = vmax.f32 %v1992_v31, 0.0  ;;  %1728 = vst.msk [vmem:[#allocation3 + $0xa0] sm:$0xff] %vm988_vm5, %v1723_v29  ;;  %v1733_v31 = vld [vmem:[#allocation3 + $0xd0] sm:$0xff] }
 0x2e6   :  { %v1990_v30 = vld [vmem:[#allocation3 + $0x78] sm:$0xff]  ;;  %v1637_v35 = vpop.f32.mrf.mxu0  ;;  %v1865_v37 = vpop.f32.mrf.mxu1  ;;  %2146 = vst.msk [vmem:[#allocation4 + $0x10] sm:$0xff] %vm988_vm5, %v10120_v19  ;;  %2147 = vst.msk [vmem:[#allocation4 + $0x18] sm:$0xff] %vm988_vm5, %v10120_v19 }
 0x2e7   :  { %v2026_v38 = vmax.f32 %v1990_v30, 0.0  ;;  %2064 = vst.msk [vmem:[#allocation3 + $0x88] sm:$0xff] %vm988_vm5, %v2028_v34  ;;  %v1724_v17 = vadd.f32 %v1719_v36, %v1637_v35  ;;  %2148 = vst.msk [vmem:[#allocation4 + $0x20] sm:$0xff] %vm988_vm5, %v10120_v19 }
 0x2e8   :  { %v1946_v41 = vld [vmem:[#allocation3 + $0x98] sm:$0xff]  ;;  %v11479_v42 = vpop.f32.mrf.mxu0  ;;  %v11535_v43 = vpop.f32.mrf.mxu1  ;;  %v2096_v45 = vld [vmem:[#allocation3 + $0x68] sm:$0xff]  ;;  %2149 = vst.msk [vmem:[#allocation4 + $0x28] sm:$0xff] %vm988_vm5, %v10120_v19  ;;  %2150 = vst.msk [vmem:[#allocation4 + $0x30] sm:$0xff] %vm988_vm5, %v10120_v19 }
 0x2e9   :  { %v1993_v40 = vld [vmem:[#allocation3 + $0x90] sm:$0xff]  ;;  %2062 = vst.msk [vmem:[#allocation3 + $0x78] sm:$0xff] %vm988_vm5, %v2026_v38  ;;  %v1951_v47 = vadd.f32 %v1946_v41, %v1862_v18  ;;  %1729 = vst.msk [vmem:[#allocation3 + $0xa8] sm:$0xff] %vm988_vm5, %v1724_v17  ;;  %v13993_v49 = vpack.c.bf16 %v2096_v45, %v2095_v39  ;;  %v1734_v39 = vld [vmem:[#allocation3 + $0xd8] sm:$0xff] }
 0x2ea   :  { %v2029_v46 = vmax.f32 %v1993_v40, 0.0  ;;  %v1991_v51 = vld [vmem:[#allocation3 + $0x80] sm:$0xff]  ;;  %v1642_v52 = vpop.f32.mrf.mxu0  ;;  %v1870_v55 = vpop.f32.mrf.mxu1  ;;  %2151 = vst.msk [vmem:[#allocation4 + $0x38] sm:$0xff] %vm988_vm5, %v10120_v19  ;;  %2152 = vst.msk [vmem:[#allocation4 + $0x40] sm:$0xff] %vm988_vm5, %v10120_v19 }
 0x2eb   :  { %v2027_v56 = vmax.f32 %v1991_v51, 0.0  ;;  %1956 = vst.msk [vmem:[#allocation3 + $0x98] sm:$0xff] %vm988_vm5, %v1951_v47  ;;  %v1725_v57 = vadd.f32 %v1720_v53, %v1642_v52  ;;  %11572 = vmatprep.mubr.msk.bf16.mxu0 %vm988_vm5, %v13993_v49  ;;  %11616 = vmatprep.mubr.msk.bf16.mxu1 %vm988_vm5, %v13993_v49  ;;  %2153 = vst.msk [vmem:[#allocation4 + $0x48] sm:$0xff] %vm988_vm5, %v10120_v19 }
 0x2ec   :  { %2065 = vst.msk [vmem:[#allocation3 + $0x90] sm:$0xff] %vm988_vm5, %v2029_v46  ;;  %v1947_v58 = vld [vmem:[#allocation3 + $0xa0] sm:$0xff]  ;;  %v11482_v60 = vpop.f32.mrf.mxu0  ;;  %v11538_v59 = vpop.f32.mrf.mxu1  ;;  %v2097_v4 = vld [vmem:[#allocation3 + $0x70] sm:$0xff]  ;;  %2155 = vst.msk [vmem:[#allocation4 + $0x58] sm:$0xff] %vm988_vm5, %v10120_v19 }
 0x2ed   :  { %2063 = vst.msk [vmem:[#allocation3 + $0x80] sm:$0xff] %vm988_vm5, %v2027_v56  ;;  %v1952_v61 = vadd.f32 %v1947_v58, %v1865_v37  ;;  %1730 = vst.msk [vmem:[#allocation3 + $0xb0] sm:$0xff] %vm988_vm5, %v1725_v57  ;;  %v1735_v60 = vld [vmem:[#allocation3 + $0xe0] sm:$0xff] }
 0x2ee   :  { %v1645_v62 = vpop.f32.mrf.mxu0  ;;  %v14003_v0 = vpop.f32.mrf.mxu1  ;;  %v2100_v27 = vld [vmem:[#allocation3 + $0x88] sm:$0xff]  ;;  %2156 = vst.msk [vmem:[#allocation4 + $0x60] sm:$0xff] %vm988_vm5, %v10120_v19  ;;  %2157 = vst.msk [vmem:[#allocation4 + $0x68] sm:$0xff] %vm988_vm5, %v10120_v19 }
 0x2ef   :  { %1957 = vst.msk [vmem:[#allocation3 + $0xa0] sm:$0xff] %vm988_vm5, %v1952_v61  ;;  %v1726_v1 = vadd.f32 %v1721_v63, %v1645_v62  ;;  %2158 = vst.msk [vmem:[#allocation4 + $0x70] sm:$0xff] %vm988_vm5, %v10120_v19 }
 0x2f0   :  { %v1948_v2 = vld [vmem:[#allocation3 + $0xa8] sm:$0xff]  ;;  %v11483_v3 = vpop.f32.mrf.mxu0  ;;  %v11539_v54 = vpop.f32.mrf.mxu1  ;;  %v2098_v6 = vld [vmem:[#allocation3 + $0x78] sm:$0xff]  ;;  %2159 = vst.msk [vmem:[#allocation4 + $0x78] sm:$0xff] %vm988_vm5, %v10120_v19  ;;  %2160 = vst.msk [vmem:[#allocation4 + $0x80] sm:$0xff] %vm988_vm5, %v10120_v19 }
 0x2f1   :  { %v1953_v5 = vadd.f32 %v1948_v2, %v1870_v55  ;;  %1731 = vst.msk [vmem:[#allocation3 + $0xb8] sm:$0xff] %vm988_vm5, %v1726_v1  ;;  %v14007_v8 = vpack.c.bf16 %v2098_v6, %v2097_v4  ;;  %2161 = vst.msk [vmem:[#allocation4 + $0x88] sm:$0xff] %vm988_vm5, %v10120_v19  ;;  %v1736_v54 = vld [vmem:[#allocation3 + $0xe8] sm:$0xff] }
 0x2f2   :  { %v14009_v10 = vld [vmem:[#allocation3 + $0x98] sm:$0xff]  ;;  %v1650_v11 = vpop.f32.mrf.mxu0  ;;  %v1878_v13 = vpop.f32.mrf.mxu1  ;;  %2162 = vst.msk [vmem:[#allocation4 + $0x90] sm:$0xff] %vm988_vm5, %v10120_v19  ;;  %2163 = vst.msk [vmem:[#allocation4 + $0x98] sm:$0xff] %vm988_vm5, %v10120_v19 }
 0x2f3   :  { %v2030_v20 = vmax.f32 %v14009_v10, 0.0  ;;  %1958 = vst.msk [vmem:[#allocation3 + $0xa8] sm:$0xff] %vm988_vm5, %v1953_v5  ;;  %v1737_v15 = vadd.f32 %v1732_v12, %v1650_v11  ;;  %v1965_v16 = vadd.f32 %v1960_v14, %v1878_v13  ;;  %11573 = vmatmul.mubr.msk.bf16.gmra.mxu0 %vm988_vm5, %v14007_v8  ;;  %11617 = vmatmul.mubr.msk.bf16.gmra.mxu1 %vm988_vm5, %v14007_v8  ;;  %2164 = vst.msk [vmem:[#allocation4 + $0xa0] sm:$0xff] %vm988_vm5, %v10120_v19  ;;  %v2101_v43 = vld [vmem:[#allocation3 + $0x90] sm:$0xff] }
 0x2f4   :  { %v1949_v22 = vld [vmem:[#allocation3 + $0xb0] sm:$0xff]  ;;  %v11486_v23 = vpop.f32.mrf.mxu0  ;;  %v11542_v24 = vpop.f32.mrf.mxu1  ;;  %v2099_v26 = vld [vmem:[#allocation3 + $0x80] sm:$0xff]  ;;  %2165 = vst.msk [vmem:[#allocation4 + $0xa8] sm:$0xff] %vm988_vm5, %v10120_v19  ;;  %2166 = vst.msk [vmem:[#allocation4 + $0xb0] sm:$0xff] %vm988_vm5, %v10120_v19 }
 0x2f5   :  { %2167 = vst.msk [vmem:[#allocation4 + $0xb8] sm:$0xff] %vm988_vm5, %v10120_v19  ;;  %2168 = vst.msk [vmem:[#allocation4 + $0xc0] sm:$0xff] %vm988_vm5, %v10120_v19  ;;  %v1954_v9 = vadd.f32 %v1949_v22, %v14003_v0  ;;  %v14070_v18 = vpack.c.bf16 %v2100_v27, %v2099_v26 }
 0x2f6   :  { %2169 = vst.msk [vmem:[#allocation4 + $0xc8] sm:$0xff] %vm988_vm5, %v10120_v19  ;;  %2170 = vst.msk [vmem:[#allocation4 + $0xd0] sm:$0xff] %vm988_vm5, %v10120_v19  ;;  %v1995_v28 = vld [vmem:[#allocation3 + $0xa0] sm:$0xff]  ;;  %v1653_v29 = vpop.f32.mrf.mxu0  ;;  %v1881_v32 = vpop.f32.mrf.mxu1 }
 0x2f7   :  { %2171 = vst.msk [vmem:[#allocation4 + $0xd8] sm:$0xff] %vm988_vm5, %v10120_v19  ;;  %2172 = vst.msk [vmem:[#allocation4 + $0xe0] sm:$0xff] %vm988_vm5, %v10120_v19  ;;  %v2031_v33 = vmax.f32 %v1995_v28, 0.0  ;;  %v1738_v34 = vadd.f32 %v1733_v31, %v1653_v29  ;;  %11576 = vmatprep.mubr.msk.bf16.mxu0 %vm988_vm5, %v14070_v18  ;;  %11620 = vmatprep.mubr.msk.bf16.mxu1 %vm988_vm5, %v14070_v18 }
 0x2f8   :  { %2173 = vst.msk [vmem:[#allocation4 + $0xe8] sm:$0xff] %vm988_vm5, %v10120_v19  ;;  %2174 = vst.msk [vmem:[#allocation4 + $0xf0] sm:$0xff] %vm988_vm5, %v10120_v19  ;;  %v1998_v30 = vld [vmem:[#allocation3 + $0xb8] sm:$0xff]  ;;  %v11487_v35 = vpop.f32.mrf.mxu0  ;;  %v11543_v36 = vpop.f32.mrf.mxu1 }
 0x2f9   :  { %2175 = vst.msk [vmem:[#allocation4 + $0xf8] sm:$0xff] %vm988_vm5, %v10120_v19  ;;  %2176 = vst.msk [vmem:[#allocation4 + $0x100] sm:$0xff] %vm988_vm5, %v10120_v19  ;;  %v2034_v37 = vmax.f32 %v1998_v30, 0.0 }
 0x2fa   :  { %2177 = vst.msk [vmem:[#allocation4 + $0x108] sm:$0xff] %vm988_vm5, %v10120_v19  ;;  %2178 = vst.msk [vmem:[#allocation4 + $0x110] sm:$0xff] %vm988_vm5, %v10120_v19  ;;  %v1996_v38 = vld [vmem:[#allocation3 + $0xa8] sm:$0xff]  ;;  %v1658_v17 = vpop.f32.mrf.mxu0  ;;  %v1886_v40 = vpop.f32.mrf.mxu1 }
 0x2fb   :  { %2179 = vst.msk [vmem:[#allocation4 + $0x118] sm:$0xff] %vm988_vm5, %v10120_v19  ;;  %2180 = vst.msk [vmem:[#allocation4 + $0x120] sm:$0xff] %vm988_vm5, %v10120_v19  ;;  %v2032_v41 = vmax.f32 %v1996_v38, 0.0  ;;  %v1739_v42 = vadd.f32 %v1734_v39, %v1658_v17 }
 0x2fc   :  { %2181 = vst.msk [vmem:[#allocation4 + $0x128] sm:$0xff] %vm988_vm5, %v10120_v19  ;;  %2182 = vst.msk [vmem:[#allocation4 + $0x130] sm:$0xff] %vm988_vm5, %v10120_v19  ;;  %v11490_v47 = vpop.f32.mrf.mxu0  ;;  %v11546_v51 = vpop.f32.mrf.mxu1 }
 0x2fd   :  { %2183 = vst.msk [vmem:[#allocation4 + $0x138] sm:$0xff] %vm988_vm5, %v10120_v19  ;;  %2184 = vst.msk [vmem:[#allocation4 + $0x140] sm:$0xff] %vm988_vm5, %v10120_v19  ;;  %v2114_v47 = vld [vmem:[#allocation3 + $0xf8] sm:$0xff]  ;;  %v2116_v51 = vld [vmem:[#allocation3 + $0x108] sm:$0xff] }
 0x2fe   :  { %2185 = vst.msk [vmem:[#allocation4 + $0x148] sm:$0xff] %vm988_vm5, %v10120_v19  ;;  %2186 = vst.msk [vmem:[#allocation4 + $0x150] sm:$0xff] %vm988_vm5, %v10120_v19  ;;  %v1661_v58 = vpop.f32.mrf.mxu0  ;;  %v1889_v59 = vpop.f32.mrf.mxu1 }
 0x2ff   :  { %2187 = vst.msk [vmem:[#allocation4 + $0x158] sm:$0xff] %vm988_vm5, %v10120_v19  ;;  %2188 = vst.msk [vmem:[#allocation4 + $0x160] sm:$0xff] %vm988_vm5, %v10120_v19  ;;  %v1740_v62 = vadd.f32 %v1735_v60, %v1661_v58  ;;  %v2117_v58 = vld [vmem:[#allocation3 + $0x110] sm:$0xff]  ;;  %v2118_v60 = vld [vmem:[#allocation3 + $0x118] sm:$0xff] }
 0x300   :  { %2189 = vst.msk [vmem:[#allocation4 + $0x168] sm:$0xff] %vm988_vm5, %v10120_v19  ;;  %2190 = vst.msk [vmem:[#allocation4 + $0x170] sm:$0xff] %vm988_vm5, %v10120_v19  ;;  %v11491_v0 = vpop.f32.mrf.mxu0  ;;  %v11547_v1 = vpop.f32.mrf.mxu1 }
 0x301   :  { %2191 = vst.msk [vmem:[#allocation4 + $0x178] sm:$0xff] %vm988_vm5, %v10120_v19  ;;  %2192 = vst.msk [vmem:[#allocation4 + $0x180] sm:$0xff] %vm988_vm5, %v10120_v19 }
 0x302   :  { %2066 = vst.msk [vmem:[#allocation3 + $0x98] sm:$0xff] %vm988_vm5, %v2030_v20  ;;  %1742 = vst.msk [vmem:[#allocation3 + $0xc8] sm:$0xff] %vm988_vm5, %v1737_v15  ;;  %v1666_v3 = vpop.f32.mrf.mxu0  ;;  %v1894_v4 = vpop.f32.mrf.mxu1 }
 0x303   :  { %1970 = vst.msk [vmem:[#allocation3 + $0xc0] sm:$0xff] %vm988_vm5, %v1965_v16  ;;  %1959 = vst.msk [vmem:[#allocation3 + $0xb0] sm:$0xff] %vm988_vm5, %v1954_v9  ;;  %v1741_v6 = vadd.f32 %v1736_v54, %v1666_v3 }
 0x304   :  { %2067 = vst.msk [vmem:[#allocation3 + $0xa0] sm:$0xff] %vm988_vm5, %v2031_v33  ;;  %1743 = vst.msk [vmem:[#allocation3 + $0xd0] sm:$0xff] %vm988_vm5, %v1738_v34  ;;  %v11494_v10 = vpop.f32.mrf.mxu0  ;;  %v11550_v11 = vpop.f32.mrf.mxu1 }
 0x305   :  { %2070 = vst.msk [vmem:[#allocation3 + $0xb8] sm:$0xff] %vm988_vm5, %v2034_v37  ;;  %2068 = vst.msk [vmem:[#allocation3 + $0xa8] sm:$0xff] %vm988_vm5, %v2032_v41 }
 0x306   :  { %1744 = vst.msk [vmem:[#allocation3 + $0xd8] sm:$0xff] %vm988_vm5, %v1739_v42  ;;  %1745 = vst.msk [vmem:[#allocation3 + $0xe0] sm:$0xff] %vm988_vm5, %v1740_v62  ;;  %v1669_v16 = vpop.f32.mrf.mxu0  ;;  %v1897_v19 = vpop.f32.mrf.mxu1 }
 0x307   :  { %1746 = vst.msk [vmem:[#allocation3 + $0xe8] sm:$0xff] %vm988_vm5, %v1741_v6  ;;  %v2474_v6 = vld [vmem:[#allocation4 + $0x78] sm:$0xff] }
 0x308   :  { %v11495_v24 = vpop.f32.mrf.mxu0  ;;  %v11551_v26 = vpop.f32.mrf.mxu1 }
 0x309   :  { %v1961_v46 = vld [vmem:[#allocation3 + $0xc8] sm:$0xff]  ;;  %v2102_v52 = vld [vmem:[#allocation3 + $0x98] sm:$0xff]  ;;  %v2475_v24 = vld [vmem:[#allocation4 + $0x80] sm:$0xff] }
 0x30a   :  { %v1999_v45 = vld [vmem:[#allocation3 + $0xc0] sm:$0xff]  ;;  %v1966_v55 = vadd.f32 %v1961_v46, %v1881_v32  ;;  %v14082_v56 = vpack.c.bf16 %v2102_v52, %v2101_v43  ;;  %v1997_v57 = vld [vmem:[#allocation3 + $0xb0] sm:$0xff] }
 0x30b   :  { %v2035_v53 = vmax.f32 %v1999_v45, 0.0  ;;  %v2033_v61 = vmax.f32 %v1997_v57, 0.0  ;;  %v1962_v63 = vld [vmem:[#allocation3 + $0xd0] sm:$0xff]  ;;  %v2103_v12 = vld [vmem:[#allocation3 + $0xa0] sm:$0xff] }
 0x30c   :  { %1971 = vst.msk [vmem:[#allocation3 + $0xc8] sm:$0xff] %vm988_vm5, %v1966_v55  ;;  %11577 = vmatmul.mubr.msk.bf16.gmra.mxu0 %vm988_vm5, %v14082_v56  ;;  %11621 = vmatmul.mubr.msk.bf16.gmra.mxu1 %vm988_vm5, %v14082_v56  ;;  %v1967_v2 = vadd.f32 %v1962_v63, %v1886_v40  ;;  %v2104_v13 = vld [vmem:[#allocation3 + $0xa8] sm:$0xff]  ;;  %v2106_v9 = vld [vmem:[#allocation3 + $0xb8] sm:$0xff]  ;;  %v2113_v52 = vld [vmem:[#allocation3 + $0xf0] sm:$0xff] }
 0x30d   :  { %2071 = vst.msk [vmem:[#allocation3 + $0xc0] sm:$0xff] %vm988_vm5, %v2035_v53  ;;  %2069 = vst.msk [vmem:[#allocation3 + $0xb0] sm:$0xff] %vm988_vm5, %v2033_v61  ;;  %v1963_v5 = vld [vmem:[#allocation3 + $0xd8] sm:$0xff]  ;;  %v14094_v20 = vpack.c.bf16 %v2104_v13, %v2103_v12  ;;  %v1964_v23 = vld [vmem:[#allocation3 + $0xe0] sm:$0xff]  ;;  %v2134_v53 = vpack.c.bf16 %v2114_v47, %v2113_v52 }
 0x30e   :  { %1972 = vst.msk [vmem:[#allocation3 + $0xd0] sm:$0xff] %vm988_vm5, %v1967_v2  ;;  %v1968_v14 = vadd.f32 %v1963_v5, %v1889_v59  ;;  %v1969_v28 = vadd.f32 %v1964_v23, %v1894_v4  ;;  %v2004_v33 = vld [vmem:[#allocation3 + $0xe8] sm:$0xff]  ;;  %v2115_v55 = vld [vmem:[#allocation3 + $0x100] sm:$0xff]  ;;  %v2136_v59 = vpack.c.bf16 %v2118_v60, %v2117_v58  ;;  %v2792_v5 = vld [vmem:[#allocation4 + $0x70] sm:$0xff] }
 0x30f   :  { %11580 = vmatprep.mubr.msk.bf16.mxu0 %vm988_vm5, %v14094_v20  ;;  %11624 = vmatprep.mubr.msk.bf16.mxu1 %vm988_vm5, %v14094_v20  ;;  %v2040_v34 = vmax.f32 %v2004_v33, 0.0  ;;  %v2135_v57 = vpack.c.bf16 %v2116_v51, %v2115_v55  ;;  %v2457_v63 = vld [vmem:[#allocation4 + $0x48] sm:$0xff]  ;;  %v2479_v51 = vld [vmem:[#allocation4 + $0xa0] sm:$0xff] }
 0x310   :  { %1973 = vst.msk [vmem:[#allocation3 + $0xd8] sm:$0xff] %vm988_vm5, %v1968_v14  ;;  %1974 = vst.msk [vmem:[#allocation3 + $0xe0] sm:$0xff] %vm988_vm5, %v1969_v28  ;;  %v2460_v14 = vld [vmem:[#allocation4 + $0x60] sm:$0xff]  ;;  %v2461_v28 = vld [vmem:[#allocation4 + $0x68] sm:$0xff] }
 0x311   :  { %2076 = vst.msk [vmem:[#allocation3 + $0xe8] sm:$0xff] %vm988_vm5, %v2040_v34 }
 0x313   :  { %v2000_v15 = vld [vmem:[#allocation3 + $0xc8] sm:$0xff] }
 0x314   :  { %v2036_v22 = vmax.f32 %v2000_v15, 0.0  ;;  %v2105_v27 = vld [vmem:[#allocation3 + $0xb0] sm:$0xff]  ;;  %v2107_v36 = vld [vmem:[#allocation3 + $0xc0] sm:$0xff] }
 0x315   :  { %v14102_v29 = vpack.c.bf16 %v2106_v9, %v2105_v27  ;;  %v2001_v31 = vld [vmem:[#allocation3 + $0xd0] sm:$0xff] }
 0x316   :  { %2072 = vst.msk [vmem:[#allocation3 + $0xc8] sm:$0xff] %vm988_vm5, %v2036_v22  ;;  %v2037_v32 = vmax.f32 %v2001_v31, 0.0 }
 0x317   :  { %11581 = vmatmul.mubr.msk.bf16.gmra.mxu0 %vm988_vm5, %v14102_v29  ;;  %11625 = vmatmul.mubr.msk.bf16.gmra.mxu1 %vm988_vm5, %v14102_v29  ;;  %v2002_v30 = vld [vmem:[#allocation3 + $0xd8] sm:$0xff]  ;;  %v2003_v17 = vld [vmem:[#allocation3 + $0xe0] sm:$0xff] }
 0x318   :  { %2073 = vst.msk [vmem:[#allocation3 + $0xd0] sm:$0xff] %vm988_vm5, %v2037_v32  ;;  %v2038_v35 = vmax.f32 %v2002_v30, 0.0  ;;  %v2039_v39 = vmax.f32 %v2003_v17, 0.0  ;;  %v2112_v45 = vld [vmem:[#allocation3 + $0xe8] sm:$0xff] }
 0x31a   :  { %2074 = vst.msk [vmem:[#allocation3 + $0xd8] sm:$0xff] %vm988_vm5, %v2038_v35  ;;  %2075 = vst.msk [vmem:[#allocation3 + $0xe0] sm:$0xff] %vm988_vm5, %v2039_v39 }
 0x31d   :  { %v2108_v37 = vld [vmem:[#allocation3 + $0xc8] sm:$0xff] }
 0x31e   :  { %v2131_v38 = vpack.c.bf16 %v2108_v37, %v2107_v36  ;;  %v2478_v37 = vld [vmem:[#allocation4 + $0x98] sm:$0xff] }
 0x31f   :  { %v2109_v40 = vld [vmem:[#allocation3 + $0xd0] sm:$0xff] }
 0x320   :  { %11584 = vmatprep.mubr.msk.bf16.mxu0 %vm988_vm5, %v2131_v38  ;;  %11628 = vmatprep.mubr.msk.bf16.mxu1 %vm988_vm5, %v2131_v38 }
 0x321   :  { %v2110_v41 = vld [vmem:[#allocation3 + $0xd8] sm:$0xff]  ;;  %v2111_v43 = vld [vmem:[#allocation3 + $0xe0] sm:$0xff] }
 0x322   :  { %v2132_v42 = vpack.c.bf16 %v2110_v41, %v2109_v40  ;;  %v2133_v46 = vpack.c.bf16 %v2112_v45, %v2111_v43  ;;  %v2476_v41 = vld [vmem:[#allocation4 + $0x88] sm:$0xff] }
 0x324   :  { %11585 = vmatmul.mubr.msk.bf16.gmra.mxu0 %vm988_vm5, %v2132_v42  ;;  %11629 = vmatmul.mubr.msk.bf16.gmra.mxu1 %vm988_vm5, %v2132_v42 }
 0x325   :  { %11588 = vmatprep.mubr.msk.bf16.mxu0 %vm988_vm5, %v2133_v46  ;;  %11632 = vmatprep.mubr.msk.bf16.mxu1 %vm988_vm5, %v2133_v46 }
 0x32c   :  { %11589 = vmatmul.mubr.msk.bf16.gmra.mxu0 %vm988_vm5, %v2134_v53  ;;  %11633 = vmatmul.mubr.msk.bf16.gmra.mxu1 %vm988_vm5, %v2134_v53 }
 0x32d   :  { %11592 = vmatprep.mubr.msk.bf16.mxu0 %vm988_vm5, %v2135_v57  ;;  %11636 = vmatprep.mubr.msk.bf16.mxu1 %vm988_vm5, %v2135_v57 }
 0x334   :  { %11593 = vmatmul.mubr.msk.bf16.gmra.mxu0 %vm988_vm5, %v2136_v59  ;;  %11637 = vmatmul.mubr.msk.bf16.gmra.mxu1 %vm988_vm5, %v2136_v59 }
 0x335   :  { %11648 = vmatprep.mubr.msk.bf16.mxu0 %vm988_vm5, %v13923_v44  ;;  %11692 = vmatprep.mubr.msk.bf16.mxu1 %vm988_vm5, %v13923_v44  ;;  %v2458_v44 = vld [vmem:[#allocation4 + $0x50] sm:$0xff] }
 0x33c   :  { %11649 = vmatmul.mubr.msk.bf16.vlgmr.msra.gmra.mxu0 %vm988_vm5, %v13935_v50  ;;  %11693 = vmatmul.mubr.msk.bf16.vlgmr.msra.gmra.mxu1 %vm988_vm5, %v13935_v50 }
 0x33d   :  { %11652 = vmatprep.mubr.msk.bf16.mxu0 %vm988_vm5, %v13947_v21  ;;  %11696 = vmatprep.mubr.msk.bf16.mxu1 %vm988_vm5, %v13947_v21 }
 0x344   :  { %11653 = vmatmul.mubr.msk.bf16.gmra.mxu0 %vm988_vm5, %v13959_v48  ;;  %11697 = vmatmul.mubr.msk.bf16.gmra.mxu1 %vm988_vm5, %v13959_v48  ;;  %v2456_v48 = vld [vmem:[#allocation4 + $0x40] sm:$0xff] }
 0x345   :  { %11656 = vmatprep.mubr.msk.bf16.mxu0 %vm988_vm5, %v13971_v7  ;;  %11700 = vmatprep.mubr.msk.bf16.mxu1 %vm988_vm5, %v13971_v7  ;;  %v2774_v7 = vld [vmem:[#allocation4 + $0x38] sm:$0xff] }
 0x34c   :  { %11657 = vmatmul.mubr.msk.bf16.gmra.mxu0 %vm988_vm5, %v13981_v25  ;;  %11701 = vmatmul.mubr.msk.bf16.gmra.mxu1 %vm988_vm5, %v13981_v25 }
 0x34d   :  { %11660 = vmatprep.mubr.msk.bf16.mxu0 %vm988_vm5, %v13993_v49  ;;  %11704 = vmatprep.mubr.msk.bf16.mxu1 %vm988_vm5, %v13993_v49 }
 0x354   :  { %11661 = vmatmul.mubr.msk.bf16.gmra.mxu0 %vm988_vm5, %v14007_v8  ;;  %11705 = vmatmul.mubr.msk.bf16.gmra.mxu1 %vm988_vm5, %v14007_v8 }
 0x355   :  { %11664 = vmatprep.mubr.msk.bf16.mxu0 %vm988_vm5, %v14070_v18  ;;  %11708 = vmatprep.mubr.msk.bf16.mxu1 %vm988_vm5, %v14070_v18  ;;  %v2459_v18 = vld [vmem:[#allocation4 + $0x58] sm:$0xff] }
 0x35c   :  { %11665 = vmatmul.mubr.msk.bf16.gmra.mxu0 %vm988_vm5, %v14082_v56  ;;  %11709 = vmatmul.mubr.msk.bf16.gmra.mxu1 %vm988_vm5, %v14082_v56 }
 0x35d   :  { %11668 = vmatprep.mubr.msk.bf16.mxu0 %vm988_vm5, %v14094_v20  ;;  %11712 = vmatprep.mubr.msk.bf16.mxu1 %vm988_vm5, %v14094_v20 }
 0x364   :  { %11669 = vmatmul.mubr.msk.bf16.gmra.mxu0 %vm988_vm5, %v14102_v29  ;;  %11713 = vmatmul.mubr.msk.bf16.gmra.mxu1 %vm988_vm5, %v14102_v29 }
 0x365   :  { %11672 = vmatprep.mubr.msk.bf16.mxu0 %vm988_vm5, %v2131_v38  ;;  %11716 = vmatprep.mubr.msk.bf16.mxu1 %vm988_vm5, %v2131_v38 }
 0x36c   :  { %11673 = vmatmul.mubr.msk.bf16.gmra.mxu0 %vm988_vm5, %v2132_v42  ;;  %11717 = vmatmul.mubr.msk.bf16.gmra.mxu1 %vm988_vm5, %v2132_v42 }
 0x36d   :  { %11676 = vmatprep.mubr.msk.bf16.mxu0 %vm988_vm5, %v2133_v46  ;;  %11720 = vmatprep.mubr.msk.bf16.mxu1 %vm988_vm5, %v2133_v46 }
 0x374   :  { %11677 = vmatmul.mubr.msk.bf16.gmra.mxu0 %vm988_vm5, %v2134_v53  ;;  %11721 = vmatmul.mubr.msk.bf16.gmra.mxu1 %vm988_vm5, %v2134_v53 }
 0x375   :  { %11680 = vmatprep.mubr.msk.bf16.mxu0 %vm988_vm5, %v2135_v57  ;;  %11724 = vmatprep.mubr.msk.bf16.mxu1 %vm988_vm5, %v2135_v57  ;;  %v2477_v57 = vld [vmem:[#allocation4 + $0x90] sm:$0xff] }
 0x37c   :  { %11681 = vmatmul.mubr.msk.bf16.gmra.mxu0 %vm988_vm5, %v2136_v59  ;;  %11725 = vmatmul.mubr.msk.bf16.gmra.mxu1 %vm988_vm5, %v2136_v59 }
 0x38b   :  { %v11562_v50 = vpop.f32.mrf.mxu0  ;;  %v11606_v21 = vpop.f32.mrf.mxu1 }
 0x38c   :  { %v2464_v25 = vadd.f32 %v11562_v50, %v2458_v44 }
 0x38d   :  { %v2313_v49 = vpop.f32.mrf.mxu0  ;;  %v2631_v8 = vpop.f32.mrf.mxu1 }
 0x38e   :  { %2470 = vst.msk [vmem:[#allocation4 + $0x50] sm:$0xff] %vm988_vm5, %v2464_v25  ;;  %v2462_v56 = vadd.f32 %v2456_v48, %v2313_v49  ;;  %v2780_v61 = vadd.f32 %v2774_v7, %v2631_v8  ;;  %v2494_v49 = vld [vmem:[#allocation4 + $0xc0] sm:$0xff] }
 0x38f   :  { %v11563_v62 = vpop.f32.mrf.mxu0  ;;  %v11607_v1 = vpop.f32.mrf.mxu1 }
 0x390   :  { %2468 = vst.msk [vmem:[#allocation4 + $0x40] sm:$0xff] %vm988_vm5, %v2462_v56  ;;  %2786 = vst.msk [vmem:[#allocation4 + $0x38] sm:$0xff] %vm988_vm5, %v2780_v61  ;;  %v2465_v0 = vadd.f32 %v11563_v62, %v2459_v18  ;;  %v2492_v56 = vld [vmem:[#allocation4 + $0xb0] sm:$0xff]  ;;  %v2810_v61 = vld [vmem:[#allocation4 + $0xa8] sm:$0xff] }
 0x391   :  { %v2316_v2 = vpop.f32.mrf.mxu0  ;;  %v2634_v4 = vpop.f32.mrf.mxu1 }
 0x392   :  { %2471 = vst.msk [vmem:[#allocation4 + $0x58] sm:$0xff] %vm988_vm5, %v2465_v0  ;;  %v2463_v3 = vadd.f32 %v2457_v63, %v2316_v2 }
 0x394   :  { %2469 = vst.msk [vmem:[#allocation4 + $0x48] sm:$0xff] %vm988_vm5, %v2463_v3  ;;  %v2495_v3 = vld [vmem:[#allocation4 + $0xc8] sm:$0xff] }
 0x395   :  { %v2777_v54 = vld [vmem:[#allocation4 + $0x50] sm:$0xff] }
 0x396   :  { %v2783_v10 = vadd.f32 %v11607_v1, %v2777_v54 }
 0x397   :  { %v2775_v11 = vld [vmem:[#allocation4 + $0x40] sm:$0xff]  ;;  %v11566_v12 = vpop.f32.mrf.mxu0  ;;  %v11610_v13 = vpop.f32.mrf.mxu1 }
 0x398   :  { %2789 = vst.msk [vmem:[#allocation4 + $0x50] sm:$0xff] %vm988_vm5, %v2783_v10  ;;  %v2781_v20 = vadd.f32 %v2775_v11, %v2634_v4  ;;  %v2480_v15 = vadd.f32 %v11566_v12, %v2474_v6  ;;  %v2798_v16 = vadd.f32 %v11610_v13, %v2792_v5  ;;  %v2493_v5 = vld [vmem:[#allocation4 + $0xb8] sm:$0xff] }
 0x399   :  { %v2329_v19 = vpop.f32.mrf.mxu0  ;;  %v2647_v22 = vpop.f32.mrf.mxu1  ;;  %v2778_v23 = vld [vmem:[#allocation4 + $0x58] sm:$0xff] }
 0x39a   :  { %2787 = vst.msk [vmem:[#allocation4 + $0x40] sm:$0xff] %vm988_vm5, %v2781_v20  ;;  %2486 = vst.msk [vmem:[#allocation4 + $0x78] sm:$0xff] %vm988_vm5, %v2480_v15  ;;  %v2466_v26 = vadd.f32 %v2460_v14, %v2329_v19  ;;  %v2784_v27 = vadd.f32 %v2778_v23, %v2647_v22  ;;  %v2510_v15 = vld [vmem:[#allocation4 + $0xe8] sm:$0xff] }
 0x39b   :  { %2804 = vst.msk [vmem:[#allocation4 + $0x70] sm:$0xff] %vm988_vm5, %v2798_v16  ;;  %v11567_v9 = vpop.f32.mrf.mxu0  ;;  %v2776_v29 = vld [vmem:[#allocation4 + $0x48] sm:$0xff]  ;;  %v11611_v33 = vpop.f32.mrf.mxu1  ;;  %v2828_v16 = vld [vmem:[#allocation4 + $0xe0] sm:$0xff] }
 0x39c   :  { %2472 = vst.msk [vmem:[#allocation4 + $0x60] sm:$0xff] %vm988_vm5, %v2466_v26  ;;  %2790 = vst.msk [vmem:[#allocation4 + $0x58] sm:$0xff] %vm988_vm5, %v2784_v27  ;;  %v2481_v31 = vadd.f32 %v11567_v9, %v2475_v24  ;;  %v2782_v32 = vadd.f32 %v11606_v21, %v2776_v29  ;;  %v2496_v26 = vld [vmem:[#allocation4 + $0xd0] sm:$0xff] }
 0x39d   :  { %v2332_v34 = vpop.f32.mrf.mxu0  ;;  %v2650_v36 = vpop.f32.mrf.mxu1 }
 0x39e   :  { %2487 = vst.msk [vmem:[#allocation4 + $0x80] sm:$0xff] %vm988_vm5, %v2481_v31  ;;  %v2467_v30 = vadd.f32 %v2461_v28, %v2332_v34  ;;  %2788 = vst.msk [vmem:[#allocation4 + $0x48] sm:$0xff] %vm988_vm5, %v2782_v32 }
 0x3a0   :  { %2473 = vst.msk [vmem:[#allocation4 + $0x68] sm:$0xff] %vm988_vm5, %v2467_v30 }
 0x3a1   :  { %v2793_v35 = vld [vmem:[#allocation4 + $0x78] sm:$0xff] }
 0x3a2   :  { %v2799_v38 = vadd.f32 %v11611_v33, %v2793_v35  ;;  %v2511_v33 = vld [vmem:[#allocation4 + $0xf0] sm:$0xff] }
 0x3a3   :  { %v2779_v17 = vld [vmem:[#allocation4 + $0x60] sm:$0xff]  ;;  %v11570_v39 = vpop.f32.mrf.mxu0  ;;  %v11614_v40 = vpop.f32.mrf.mxu1 }
 0x3a4   :  { %2805 = vst.msk [vmem:[#allocation4 + $0x78] sm:$0xff] %vm988_vm5, %v2799_v38  ;;  %v2785_v42 = vadd.f32 %v2779_v17, %v2650_v36  ;;  %v2484_v43 = vadd.f32 %v11570_v39, %v2478_v37  ;;  %v2497_v36 = vld [vmem:[#allocation4 + $0xd8] sm:$0xff] }
 0x3a5   :  { %v2345_v45 = vpop.f32.mrf.mxu0  ;;  %v2663_v46 = vpop.f32.mrf.mxu1  ;;  %v2794_v47 = vld [vmem:[#allocation4 + $0x80] sm:$0xff] }
 0x3a6   :  { %2791 = vst.msk [vmem:[#allocation4 + $0x60] sm:$0xff] %vm988_vm5, %v2785_v42  ;;  %2490 = vst.msk [vmem:[#allocation4 + $0x98] sm:$0xff] %vm988_vm5, %v2484_v43  ;;  %v2482_v52 = vadd.f32 %v2476_v41, %v2345_v45  ;;  %v2800_v53 = vadd.f32 %v2794_v47, %v2663_v46  ;;  %v2514_v45 = vld [vmem:[#allocation4 + $0x108] sm:$0xff] }
 0x3a7   :  { %v11571_v55 = vpop.f32.mrf.mxu0  ;;  %v11615_v44 = vpop.f32.mrf.mxu1 }
 0x3a8   :  { %2488 = vst.msk [vmem:[#allocation4 + $0x88] sm:$0xff] %vm988_vm5, %v2482_v52  ;;  %2806 = vst.msk [vmem:[#allocation4 + $0x80] sm:$0xff] %vm988_vm5, %v2800_v53  ;;  %v2485_v58 = vadd.f32 %v11571_v55, %v2479_v51  ;;  %v2512_v53 = vld [vmem:[#allocation4 + $0xf8] sm:$0xff] }
 0x3a9   :  { %v2348_v60 = vpop.f32.mrf.mxu0  ;;  %v2666_v48 = vpop.f32.mrf.mxu1 }
 0x3aa   :  { %2491 = vst.msk [vmem:[#allocation4 + $0xa0] sm:$0xff] %vm988_vm5, %v2485_v58  ;;  %v2483_v59 = vadd.f32 %v2477_v57, %v2348_v60 }
 0x3ac   :  { %2489 = vst.msk [vmem:[#allocation4 + $0x90] sm:$0xff] %vm988_vm5, %v2483_v59 }
 0x3ad   :  { %v2797_v50 = vld [vmem:[#allocation4 + $0x98] sm:$0xff] }
 0x3ae   :  { %v2803_v21 = vadd.f32 %v11615_v44, %v2797_v50  ;;  %v2515_v44 = vld [vmem:[#allocation4 + $0x110] sm:$0xff] }
 0x3af   :  { %v2795_v7 = vld [vmem:[#allocation4 + $0x88] sm:$0xff]  ;;  %v11839_v50 = vld [vmem:[#allocation13 + $0xe4] ss:$16 sps:$4 sm:$0xff]  }
 0x3b0   :  { %2809 = vst.msk [vmem:[#allocation4 + $0x98] sm:$0xff] %vm988_vm5, %v2803_v21  ;;  %v2801_v25 = vadd.f32 %v2795_v7, %v2666_v48  ;;  %v11837_v7 = vld [vmem:[#allocation13 + $0xe0] ss:$16 sps:$4 sm:$0xff]   ;;  %8588 = vmatprep.subr.bf16.mxu0 %v11839_v50 }
 0x3b1   :  { %8589 = vmatpush1.bf16.msra.mxu0 %v11837_v7 }
 0x3b2   :  { %2807 = vst.msk [vmem:[#allocation4 + $0x88] sm:$0xff] %vm988_vm5, %v2801_v25 }
 0x3b3   :  { %v11574_v8 = vpop.f32.mrf.mxu0  ;;  %v11618_v18 = vpop.f32.mrf.mxu1  ;;  %v2796_v62 = vld [vmem:[#allocation4 + $0x90] sm:$0xff] }
 0x3b4   :  { %v2500_v63 = vadd.f32 %v11574_v8, %v2494_v49  ;;  %v2802_v0 = vadd.f32 %v11614_v40, %v2796_v62  ;;  %v2513_v49 = vld [vmem:[#allocation4 + $0x100] sm:$0xff] }
 0x3b5   :  { %v2361_v1 = vpop.f32.mrf.mxu0  ;;  %v2679_v2 = vpop.f32.mrf.mxu1 }
 0x3b6   :  { %2506 = vst.msk [vmem:[#allocation4 + $0xc0] sm:$0xff] %vm988_vm5, %v2500_v63  ;;  %v2498_v54 = vadd.f32 %v2492_v56, %v2361_v1  ;;  %v2816_v4 = vadd.f32 %v2810_v61, %v2679_v2  ;;  %2808 = vst.msk [vmem:[#allocation4 + $0x90] sm:$0xff] %vm988_vm5, %v2802_v0  ;;  %v11842_v56 = vld [vmem:[#allocation13 + $0x2e4] ss:$16 sps:$4 sm:$0xff]   ;;  %v11843_v61 = vld [vmem:[#allocation13 + $0xc0] ss:$16 sps:$4 sm:$0xff]  }
 0x3b7   :  { %v11575_v6 = vpop.f32.mrf.mxu0  ;;  %v11619_v11 = vpop.f32.mrf.mxu1  ;;  %v11845_v63 = vld [vmem:[#allocation13 + $0xc4] ss:$16 sps:$4 sm:$0xff]   ;;  %8629 = vmatprep.subr.bf16.mxu1 %v11842_v56 }
 0x3b8   :  { %2504 = vst.msk [vmem:[#allocation4 + $0xb0] sm:$0xff] %vm988_vm5, %v2498_v54  ;;  %2822 = vst.msk [vmem:[#allocation4 + $0xa8] sm:$0xff] %vm988_vm5, %v2816_v4  ;;  %v2501_v10 = vadd.f32 %v11575_v6, %v2495_v3  ;;  %v11848_v1 = vld [vmem:[#allocation13 + $0x2c4] ss:$16 sps:$4 sm:$0xff]   ;;  %8590 = vmatprep.subr.bf16.mxu0 %v11845_v63  ;;  %v11846_v3 = vld [vmem:[#allocation13 + $0x2c0] ss:$16 sps:$4 sm:$0xff]  }
 0x3b9   :  { %v2364_v12 = vpop.f32.mrf.mxu0  ;;  %v2682_v20 = vpop.f32.mrf.mxu1  ;;  %v11851_v54 = vld [vmem:[#allocation13 + $0xa4] ss:$16 sps:$4 sm:$0xff]   ;;  %8591 = vmatpush1.bf16.msra.mxu0 %v11843_v61  ;;  %v11849_v4 = vld [vmem:[#allocation13 + $0xa0] ss:$16 sps:$4 sm:$0xff]  }
 0x3ba   :  { %2507 = vst.msk [vmem:[#allocation4 + $0xc8] sm:$0xff] %vm988_vm5, %v2501_v10  ;;  %v2499_v13 = vadd.f32 %v2493_v5, %v2364_v12  ;;  %v11854_v6 = vld [vmem:[#allocation13 + $0x2a4] ss:$16 sps:$4 sm:$0xff]   ;;  %8592 = vmatprep.subr.bf16.mxu0 %v11851_v54 }
 0x3bb   :  { %v11857_v10 = vld [vmem:[#allocation13 + $0x84] ss:$16 sps:$4 sm:$0xff]  }
 0x3bc   :  { %2505 = vst.msk [vmem:[#allocation4 + $0xb8] sm:$0xff] %vm988_vm5, %v2499_v13 }
 0x3bd   :  { %v2813_v14 = vld [vmem:[#allocation4 + $0xc0] sm:$0xff]  ;;  %8593 = vmatpush1.bf16.msra.mxu0 %v11849_v4 }
 0x3be   :  { %v2819_v19 = vadd.f32 %v11619_v11, %v2813_v14  ;;  %v11852_v14 = vld [vmem:[#allocation13 + $0x2a0] ss:$16 sps:$4 sm:$0xff]   ;;  %8594 = vmatprep.subr.bf16.mxu0 %v11857_v10 }
 0x3bf   :  { %v2811_v22 = vld [vmem:[#allocation4 + $0xb0] sm:$0xff] }
 0x3c0   :  { %2825 = vst.msk [vmem:[#allocation4 + $0xc0] sm:$0xff] %vm988_vm5, %v2819_v19  ;;  %v2817_v27 = vadd.f32 %v2811_v22, %v2682_v20  ;;  %v2528_v19 = vld [vmem:[#allocation4 + $0x120] sm:$0xff]  ;;  %v2846_v22 = vld [vmem:[#allocation4 + $0x118] sm:$0xff] }
 0x3c1   :  { %v2814_v32 = vld [vmem:[#allocation4 + $0xc8] sm:$0xff] }
 0x3c2   :  { %2823 = vst.msk [vmem:[#allocation4 + $0xb0] sm:$0xff] %vm988_vm5, %v2817_v27  ;;  %v11876_v4 = vld [vmem:[#allocation13] ss:$16 sps:$4 sm:$0xff]  }
 0x3c3   :  { %v2812_v37 = vld [vmem:[#allocation4 + $0xb8] sm:$0xff] }
 0x3c4   :  { %v2818_v17 = vadd.f32 %v11618_v18, %v2812_v37  ;;  %v11840_v18 = vld [vmem:[#allocation13 + $0x2e0] ss:$16 sps:$4 sm:$0xff]   ;;  %v11866_v37 = vld [vmem:[#allocation13 + $0x264] ss:$16 sps:$4 sm:$0xff]  }
 0x3c5   :  { %8630 = vmatpush1.bf16.msra.mxu1 %v11840_v18  ;;  %v11878_v18 = vld [vmem:[#allocation13 + $0x4] ss:$16 sps:$4 sm:$0xff]  }
 0x3c6   :  { %2824 = vst.msk [vmem:[#allocation4 + $0xb8] sm:$0xff] %vm988_vm5, %v2818_v17  ;;  %8631 = vmatprep.subr.bf16.mxu1 %v11848_v1  ;;  %v2533_v1 = vld [vmem:[#allocation4 + $0x148] sm:$0xff] }
 0x3c9   :  { %8632 = vmatpush1.bf16.msra.mxu1 %v11846_v3 }
 0x3ca   :  { %8633 = vmatprep.subr.bf16.mxu1 %v11854_v6  ;;  %v11887_v6 = vld [vmem:[#allocation13 + $0x204] ss:$16 sps:$4 sm:$0xff]  }
 0x3cc   :  { %v11578_v23 = vpop.f32.mrf.mxu0  ;;  %v11622_v24 = vpop.f32.mrf.mxu1 }
 0x3cd   :  { %v2516_v9 = vadd.f32 %v11578_v23, %v2510_v15  ;;  %v2834_v28 = vadd.f32 %v11622_v24, %v2828_v16  ;;  %v11855_v15 = vld [vmem:[#allocation13 + $0x80] ss:$16 sps:$4 sm:$0xff]   ;;  %v11860_v23 = vld [vmem:[#allocation13 + $0x284] ss:$16 sps:$4 sm:$0xff]   ;;  %8634 = vmatpush1.bf16.msra.mxu1 %v11852_v14 }
 0x3ce   :  { %v2377_v29 = vpop.f32.mrf.mxu0  ;;  %v2695_v31 = vpop.f32.mrf.mxu1  ;;  %v2530_v16 = vld [vmem:[#allocation4 + $0x130] sm:$0xff]  ;;  %8595 = vmatpush1.bf16.msra.mxu0 %v11855_v15  ;;  %8635 = vmatprep.subr.bf16.mxu1 %v11860_v23 }
 0x3cf   :  { %2522 = vst.msk [vmem:[#allocation4 + $0xe8] sm:$0xff] %vm988_vm5, %v2516_v9  ;;  %2840 = vst.msk [vmem:[#allocation4 + $0xe0] sm:$0xff] %vm988_vm5, %v2834_v28  ;;  %v2502_v34 = vadd.f32 %v2496_v26, %v2377_v29  ;;  %v2820_v30 = vadd.f32 %v2814_v32, %v2695_v31  ;;  %v11858_v9 = vld [vmem:[#allocation13 + $0x280] ss:$16 sps:$4 sm:$0xff]   ;;  %v11863_v28 = vld [vmem:[#allocation13 + $0x64] ss:$16 sps:$4 sm:$0xff]  }
 0x3d0   :  { %v11579_v35 = vpop.f32.mrf.mxu0  ;;  %v11623_v39 = vpop.f32.mrf.mxu1  ;;  %v11861_v32 = vld [vmem:[#allocation13 + $0x60] ss:$16 sps:$4 sm:$0xff]   ;;  %8596 = vmatprep.subr.bf16.mxu0 %v11863_v28 }
 0x3d1   :  { %2508 = vst.msk [vmem:[#allocation4 + $0xd0] sm:$0xff] %vm988_vm5, %v2502_v34  ;;  %2826 = vst.msk [vmem:[#allocation4 + $0xc8] sm:$0xff] %vm988_vm5, %v2820_v30  ;;  %v2517_v38 = vadd.f32 %v11579_v35, %v2511_v33  ;;  %v2531_v30 = vld [vmem:[#allocation4 + $0x138] sm:$0xff]  ;;  %8636 = vmatpush1.bf16.msra.mxu1 %v11858_v9 }
 0x3d2   :  { %v2380_v40 = vpop.f32.mrf.mxu0  ;;  %v2698_v43 = vpop.f32.mrf.mxu1  ;;  %8597 = vmatpush1.bf16.msra.mxu0 %v11861_v32  ;;  %8637 = vmatprep.subr.bf16.mxu1 %v11866_v37  ;;  %v11885_v23 = vld [vmem:[#allocation13 + $0x200] ss:$16 sps:$4 sm:$0xff]  }
 0x3d3   :  { %2523 = vst.msk [vmem:[#allocation4 + $0xf0] sm:$0xff] %vm988_vm5, %v2517_v38  ;;  %v2503_v41 = vadd.f32 %v2497_v36, %v2380_v40  ;;  %v11864_v40 = vld [vmem:[#allocation13 + $0x260] ss:$16 sps:$4 sm:$0xff]  }
 0x3d4   :  { %v11882_v28 = vld [vmem:[#allocation13 + $0x1e0] ss:$16 sps:$4 sm:$0xff]  }
 0x3d5   :  { %2509 = vst.msk [vmem:[#allocation4 + $0xd8] sm:$0xff] %vm988_vm5, %v2503_v41  ;;  %v11869_v41 = vld [vmem:[#allocation13 + $0x44] ss:$16 sps:$4 sm:$0xff]   ;;  %8638 = vmatpush1.bf16.msra.mxu1 %v11864_v40  ;;  %v11891_v40 = vld [vmem:[#allocation13 + $0x3e0] ss:$16 sps:$4 sm:$0xff]  }
 0x3d6   :  { %v2829_v42 = vld [vmem:[#allocation4 + $0xe8] sm:$0xff]  ;;  %8598 = vmatprep.subr.bf16.mxu0 %v11869_v41 }
 0x3d7   :  { %v2835_v46 = vadd.f32 %v11623_v39, %v2829_v42  ;;  %v11582_v51 = vpop.f32.mrf.mxu0  ;;  %v14223_v52 = vpop.f32.mrf.mxu1  ;;  %v2529_v39 = vld [vmem:[#allocation4 + $0x128] sm:$0xff] }
 0x3d8   :  { %v2815_v47 = vld [vmem:[#allocation4 + $0xd0] sm:$0xff]  ;;  %v2520_v57 = vadd.f32 %v11582_v51, %v2514_v45  ;;  %v2546_v51 = vld [vmem:[#allocation4 + $0x158] sm:$0xff] }
 0x3d9   :  { %2841 = vst.msk [vmem:[#allocation4 + $0xe8] sm:$0xff] %vm988_vm5, %v2835_v46  ;;  %v2821_v55 = vadd.f32 %v2815_v47, %v2698_v43  ;;  %v2393_v58 = vpop.f32.mrf.mxu0  ;;  %v2711_v60 = vpop.f32.mrf.mxu1  ;;  %v11867_v43 = vld [vmem:[#allocation13 + $0x40] ss:$16 sps:$4 sm:$0xff]   ;;  %v11875_v45 = vld [vmem:[#allocation13 + $0x244] ss:$16 sps:$4 sm:$0xff]  }
 0x3da   :  { %v2830_v59 = vld [vmem:[#allocation4 + $0xf0] sm:$0xff]  ;;  %2526 = vst.msk [vmem:[#allocation4 + $0x108] sm:$0xff] %vm988_vm5, %v2520_v57  ;;  %v2518_v21 = vadd.f32 %v2512_v53, %v2393_v58  ;;  %8599 = vmatpush1.bf16.msra.mxu0 %v11867_v43  ;;  %8639 = vmatprep.subr.bf16.mxu1 %v11875_v45 }
 0x3db   :  { %2827 = vst.msk [vmem:[#allocation4 + $0xd0] sm:$0xff] %vm988_vm5, %v2821_v55  ;;  %v2836_v48 = vadd.f32 %v2830_v59, %v2711_v60  ;;  %v11583_v25 = vpop.f32.mrf.mxu0  ;;  %v11627_v2 = vpop.f32.mrf.mxu1  ;;  %v11872_v53 = vld [vmem:[#allocation13 + $0x24] ss:$16 sps:$4 sm:$0xff]   ;;  %v11873_v59 = vld [vmem:[#allocation13 + $0x240] ss:$16 sps:$4 sm:$0xff]  }
 0x3dc   :  { %2524 = vst.msk [vmem:[#allocation4 + $0xf8] sm:$0xff] %vm988_vm5, %v2518_v21  ;;  %v2521_v8 = vadd.f32 %v11583_v25, %v2515_v44  ;;  %v2532_v60 = vld [vmem:[#allocation4 + $0x140] sm:$0xff]  ;;  %8600 = vmatprep.subr.bf16.mxu0 %v11872_v53  ;;  %8640 = vmatpush1.bf16.msra.mxu1 %v11873_v59  ;;  %v3092_v59 = vld [vmem:[#allocation4 + $0x8] sm:$0xff] }
 0x3dd   :  { %2842 = vst.msk [vmem:[#allocation4 + $0xf0] sm:$0xff] %vm988_vm5, %v2836_v48  ;;  %v2396_v62 = vpop.f32.mrf.mxu0  ;;  %v2714_v12 = vpop.f32.mrf.mxu1  ;;  %v11870_v21 = vld [vmem:[#allocation13 + $0x20] ss:$16 sps:$4 sm:$0xff]   ;;  %v11881_v48 = vld [vmem:[#allocation13 + $0x224] ss:$16 sps:$4 sm:$0xff]  }
 0x3de   :  { %2527 = vst.msk [vmem:[#allocation4 + $0x110] sm:$0xff] %vm988_vm5, %v2521_v8  ;;  %v2519_v0 = vadd.f32 %v2513_v49, %v2396_v62  ;;  %v2547_v8 = vld [vmem:[#allocation4 + $0x160] sm:$0xff]  ;;  %8601 = vmatpush1.bf16.msra.mxu0 %v11870_v21  ;;  %8641 = vmatprep.subr.bf16.mxu1 %v11881_v48 }
 0x3df   :  { %8602 = vmatprep.subr.bf16.mxu0 %v11878_v18  ;;  %v11888_v43 = vld [vmem:[#allocation13 + $0x1c0] ss:$16 sps:$4 sm:$0xff]   ;;  %v11899_v45 = vld [vmem:[#allocation13 + $0x3c4] ss:$16 sps:$4 sm:$0xff]  }
 0x3e0   :  { %2525 = vst.msk [vmem:[#allocation4 + $0x100] sm:$0xff] %vm988_vm5, %v2519_v0  ;;  %v11896_v53 = vld [vmem:[#allocation13 + $0x1a4] ss:$16 sps:$4 sm:$0xff]   ;;  %v11894_v48 = vld [vmem:[#allocation13 + $0x1a0] ss:$16 sps:$4 sm:$0xff]  }
 0x3e1   :  { %v2833_v5 = vld [vmem:[#allocation4 + $0x108] sm:$0xff]  ;;  %v3095_v18 = vld [vmem:[#allocation4 + $0x20] sm:$0xff] }
 0x3e2   :  { %v2839_v11 = vadd.f32 %v11627_v2, %v2833_v5  ;;  %v11879_v2 = vld [vmem:[#allocation13 + $0x220] ss:$16 sps:$4 sm:$0xff]   ;;  %8603 = vmatpush1.bf16.msra.mxu0 %v11876_v4 }
 0x3e3   :  { %v2831_v13 = vld [vmem:[#allocation4 + $0xf8] sm:$0xff]  ;;  %8642 = vmatpush1.bf16.msra.mxu1 %v11879_v2 }
 0x3e4   :  { %2845 = vst.msk [vmem:[#allocation4 + $0x108] sm:$0xff] %vm988_vm5, %v2839_v11  ;;  %v2837_v20 = vadd.f32 %v2831_v13, %v2714_v12  ;;  %v11586_v24 = vpop.f32.mrf.mxu0  ;;  %v14234_v26 = vpop.f32.mrf.mxu1  ;;  %v2550_v12 = vld [vmem:[#allocation4 + $0x178] sm:$0xff]  ;;  %v11884_v13 = vld [vmem:[#allocation13 + $0x1e4] ss:$16 sps:$4 sm:$0xff]   ;;  %8643 = vmatprep.subr.bf16.mxu1 %v11887_v6 }
 0x3e5   :  { %v2536_v29 = vadd.f32 %v11586_v24, %v2530_v16  ;;  %8604 = vmatprep.subr.bf16.mxu0 %v11884_v13  ;;  %v11903_v4 = vld [vmem:[#allocation13 + $0x3a0] ss:$16 sps:$4 sm:$0xff]  }
 0x3e6   :  { %2843 = vst.msk [vmem:[#allocation4 + $0xf8] sm:$0xff] %vm988_vm5, %v2837_v20  ;;  %v2409_v33 = vpop.f32.mrf.mxu0  ;;  %v2727_v34 = vpop.f32.mrf.mxu1  ;;  %8605 = vmatpush2.bf16.msra.mxu0 %v11882_v28 }
 0x3e7   :  { %v2832_v27 = vld [vmem:[#allocation4 + $0x100] sm:$0xff]  ;;  %2542 = vst.msk [vmem:[#allocation4 + $0x130] sm:$0xff] %vm988_vm5, %v2536_v29  ;;  %v2534_v35 = vadd.f32 %v2528_v19, %v2409_v33  ;;  %v2852_v36 = vadd.f32 %v2846_v22, %v2727_v34  ;;  %v2548_v19 = vld [vmem:[#allocation4 + $0x168] sm:$0xff]  ;;  %8644 = vmatpush1.bf16.msra.mxu1 %v11885_v23 }
 0x3e8   :  { %v2838_v31 = vadd.f32 %v14223_v52, %v2832_v27  ;;  %v11587_v38 = vpop.f32.mrf.mxu0  ;;  %v11631_v17 = vpop.f32.mrf.mxu1  ;;  %v2864_v52 = vld [vmem:[#allocation4 + $0x150] sm:$0xff]  ;;  %v2551_v27 = vld [vmem:[#allocation4 + $0x180] sm:$0xff] }
 0x3e9   :  { %2540 = vst.msk [vmem:[#allocation4 + $0x120] sm:$0xff] %vm988_vm5, %v2534_v35  ;;  %2858 = vst.msk [vmem:[#allocation4 + $0x118] sm:$0xff] %vm988_vm5, %v2852_v36  ;;  %v2537_v42 = vadd.f32 %v11587_v38, %v2531_v30  ;;  %v11893_v29 = vld [vmem:[#allocation13 + $0x3e4] ss:$16 sps:$4 sm:$0xff]  }
 0x3ea   :  { %2844 = vst.msk [vmem:[#allocation4 + $0x100] sm:$0xff] %vm988_vm5, %v2838_v31  ;;  %v2412_v46 = vpop.f32.mrf.mxu0  ;;  %v2730_v47 = vpop.f32.mrf.mxu1  ;;  %v11890_v30 = vld [vmem:[#allocation13 + $0x1c4] ss:$16 sps:$4 sm:$0xff]   ;;  %8645 = vmatprep.subr.bf16.mxu1 %v11893_v29 }
 0x3eb   :  { %2543 = vst.msk [vmem:[#allocation4 + $0x138] sm:$0xff] %vm988_vm5, %v2537_v42  ;;  %v2535_v55 = vadd.f32 %v2529_v39, %v2412_v46  ;;  %v2549_v39 = vld [vmem:[#allocation4 + $0x170] sm:$0xff]  ;;  %8606 = vmatprep.subr.bf16.mxu0 %v11890_v30  ;;  %8646 = vmatpush2.bf16.msra.mxu1 %v11891_v40  ;;  %v3110_v23 = vld [vmem:[#allocation4 + $0x40] sm:$0xff] }
 0x3ec   :  { %v11590_v57 = vpop.f32.mrf.mxu0  ;;  %v11634_v58 = vpop.f32.mrf.mxu1  ;;  %8607 = vmatpush2.bf16.msra.mxu0 %v11888_v43  ;;  %8647 = vmatprep.subr.bf16.mxu1 %v11899_v45  ;;  %v11915_v43 = vld [vmem:[#allocation13 + $0x360] ss:$16 sps:$4 sm:$0xff]  }
 0x3ed   :  { %2541 = vst.msk [vmem:[#allocation4 + $0x128] sm:$0xff] %vm988_vm5, %v2535_v55  ;;  %v2552_v44 = vadd.f32 %v11590_v57, %v2546_v51  ;;  %v2870_v50 = vadd.f32 %v11634_v58, %v2864_v52  ;;  %v3094_v52 = vld [vmem:[#allocation4 + $0x18] sm:$0xff]  ;;  %8608 = vmatprep.subr.bf16.mxu0 %v11896_v53 }
 0x3ee   :  { %v2849_v7 = vld [vmem:[#allocation4 + $0x130] sm:$0xff]  ;;  %v2425_v25 = vpop.f32.mrf.mxu0  ;;  %v2743_v49 = vpop.f32.mrf.mxu1 }
 0x3ef   :  { %v2855_v56 = vadd.f32 %v11631_v17, %v2849_v7  ;;  %2558 = vst.msk [vmem:[#allocation4 + $0x158] sm:$0xff] %vm988_vm5, %v2552_v44  ;;  %2876 = vst.msk [vmem:[#allocation4 + $0x150] sm:$0xff] %vm988_vm5, %v2870_v50  ;;  %v2538_v61 = vadd.f32 %v2532_v60, %v2425_v25  ;;  %v3410_v44 = vld [vmem:[#allocation4] sm:$0xff] }
 0x3f0   :  { %v2847_v62 = vld [vmem:[#allocation4 + $0x120] sm:$0xff]  ;;  %v11591_v63 = vpop.f32.mrf.mxu0  ;;  %v11635_v0 = vpop.f32.mrf.mxu1  ;;  %8609 = vmatpush2.bf16.msra.mxu0 %v11894_v48 }
 0x3f1   :  { %2861 = vst.msk [vmem:[#allocation4 + $0x130] sm:$0xff] %vm988_vm5, %v2855_v56  ;;  %v2853_v3 = vadd.f32 %v2847_v62, %v2730_v47  ;;  %2544 = vst.msk [vmem:[#allocation4 + $0x140] sm:$0xff] %vm988_vm5, %v2538_v61  ;;  %v2553_v54 = vadd.f32 %v11591_v63, %v2547_v8  ;;  %v11897_v50 = vld [vmem:[#allocation13 + $0x3c0] ss:$16 sps:$4 sm:$0xff]   ;;  %v11905_v7 = vld [vmem:[#allocation13 + $0x3a4] ss:$16 sps:$4 sm:$0xff]  }
 0x3f2   :  { %v2850_v5 = vld [vmem:[#allocation4 + $0x138] sm:$0xff]  ;;  %v2428_v10 = vpop.f32.mrf.mxu0  ;;  %v2746_v11 = vpop.f32.mrf.mxu1  ;;  %v11902_v56 = vld [vmem:[#allocation13 + $0x184] ss:$16 sps:$4 sm:$0xff]   ;;  %8648 = vmatpush2.bf16.msra.mxu1 %v11897_v50 }
 0x3f3   :  { %2859 = vst.msk [vmem:[#allocation4 + $0x120] sm:$0xff] %vm988_vm5, %v2853_v3  ;;  %v2856_v14 = vadd.f32 %v2850_v5, %v2743_v49  ;;  %2559 = vst.msk [vmem:[#allocation4 + $0x160] sm:$0xff] %vm988_vm5, %v2553_v54  ;;  %v2539_v20 = vadd.f32 %v2533_v1, %v2428_v10  ;;  %8649 = vmatprep.subr.bf16.mxu1 %v11905_v7  ;;  %8610 = vmatprep.subr.bf16.mxu0 %v11902_v56  ;;  %v11920_v7 = vld [vmem:[#allocation13 + $0x124] ss:$16 sps:$4 sm:$0xff]  }
 0x3f4   :  { %v11594_v15 = vpop.f32.mrf.mxu0  ;;  %v14249_v16 = vpop.f32.mrf.mxu1  ;;  %v2848_v22 = vld [vmem:[#allocation4 + $0x128] sm:$0xff] }
 0x3f5   :  { %2862 = vst.msk [vmem:[#allocation4 + $0x138] sm:$0xff] %vm988_vm5, %v2856_v14  ;;  %2545 = vst.msk [vmem:[#allocation4 + $0x148] sm:$0xff] %vm988_vm5, %v2539_v20  ;;  %v2556_v24 = vadd.f32 %v11594_v15, %v2550_v12  ;;  %v2854_v9 = vadd.f32 %v14234_v26, %v2848_v22  ;;  %v11911_v12 = vld [vmem:[#allocation13 + $0x384] ss:$16 sps:$4 sm:$0xff]  }
 0x3f6   :  { %v3560_v31 = vld [vmem:[#allocation4 + $0x150] sm:$0xff]  ;;  %v2865_v32 = vld [vmem:[#allocation4 + $0x158] sm:$0xff]  ;;  %v2441_v33 = vpop.f32.mrf.mxu0  ;;  %v2759_v34 = vpop.f32.mrf.mxu1  ;;  %8650 = vmatpush2.bf16.msra.mxu1 %v11903_v4 }
 0x3f7   :  { %v3609_v35 = vmax.f32 %v3560_v31, 0.0  ;;  %v2871_v36 = vadd.f32 %v11635_v0, %v2865_v32  ;;  %2562 = vst.msk [vmem:[#allocation4 + $0x178] sm:$0xff] %vm988_vm5, %v2556_v24  ;;  %v2554_v37 = vadd.f32 %v2548_v19, %v2441_v33  ;;  %2860 = vst.msk [vmem:[#allocation4 + $0x128] sm:$0xff] %vm988_vm5, %v2854_v9  ;;  %v3093_v0 = vld [vmem:[#allocation4 + $0x10] sm:$0xff]  ;;  %v3428_v24 = vld [vmem:[#allocation4 + $0x38] sm:$0xff]  ;;  %8651 = vmatprep.subr.bf16.mxu1 %v11911_v12 }
 0x3f8   :  { %v2851_v38 = vld [vmem:[#allocation4 + $0x140] sm:$0xff]  ;;  %v11595_v17 = vpop.f32.mrf.mxu0  ;;  %v11639_v26 = vpop.f32.mrf.mxu1 }
 0x3f9   :  { %3658 = vst.msk [vmem:[#allocation4 + $0x150] sm:$0xff] %vm988_vm5, %v3609_v35  ;;  %2877 = vst.msk [vmem:[#allocation4 + $0x158] sm:$0xff] %vm988_vm5, %v2871_v36  ;;  %v2857_v41 = vadd.f32 %v2851_v38, %v2746_v11  ;;  %v2557_v42 = vadd.f32 %v11595_v17, %v2551_v27  ;;  %v11900_v11 = vld [vmem:[#allocation13 + $0x180] ss:$16 sps:$4 sm:$0xff]   ;;  %v11908_v15 = vld [vmem:[#allocation13 + $0x164] ss:$16 sps:$4 sm:$0xff]  }
 0x3fa   :  { %2560 = vst.msk [vmem:[#allocation4 + $0x168] sm:$0xff] %vm988_vm5, %v2554_v37  ;;  %v2866_v46 = vld [vmem:[#allocation4 + $0x160] sm:$0xff]  ;;  %v2444_v47 = vpop.f32.mrf.mxu0  ;;  %v2762_v51 = vpop.f32.mrf.mxu1  ;;  %v3096_v27 = vld [vmem:[#allocation4 + $0x28] sm:$0xff]  ;;  %8611 = vmatpush2.bf16.msra.mxu0 %v11900_v11 }
 0x3fb   :  { %2863 = vst.msk [vmem:[#allocation4 + $0x140] sm:$0xff] %vm988_vm5, %v2857_v41  ;;  %v2872_v55 = vadd.f32 %v2866_v46, %v2759_v34  ;;  %2563 = vst.msk [vmem:[#allocation4 + $0x180] sm:$0xff] %vm988_vm5, %v2557_v42  ;;  %v2555_v57 = vadd.f32 %v2549_v39, %v2444_v47  ;;  %v11909_v32 = vld [vmem:[#allocation13 + $0x380] ss:$16 sps:$4 sm:$0xff]   ;;  %v11917_v37 = vld [vmem:[#allocation13 + $0x364] ss:$16 sps:$4 sm:$0xff]   ;;  %8612 = vmatprep.subr.bf16.mxu0 %v11908_v15 }
 0x3fc   :  { %v11650_v58 = vpop.f32.mrf.mxu0  ;;  %v14261_v60 = vpop.f32.mrf.mxu1  ;;  %v11906_v36 = vld [vmem:[#allocation13 + $0x160] ss:$16 sps:$4 sm:$0xff]   ;;  %v11914_v39 = vld [vmem:[#allocation13 + $0x144] ss:$16 sps:$4 sm:$0xff]   ;;  %8652 = vmatpush2.bf16.msra.mxu1 %v11909_v32 }
 0x3fd   :  { %2878 = vst.msk [vmem:[#allocation4 + $0x160] sm:$0xff] %vm988_vm5, %v2872_v55  ;;  %2561 = vst.msk [vmem:[#allocation4 + $0x170] sm:$0xff] %vm988_vm5, %v2555_v57  ;;  %v3100_v21 = vadd.f32 %v11650_v58, %v3094_v52  ;;  %v3111_v41 = vld [vmem:[#allocation4 + $0x48] sm:$0xff]  ;;  %v3097_v42 = vld [vmem:[#allocation4 + $0x30] sm:$0xff]  ;;  %8653 = vmatprep.subr.bf16.mxu1 %v11917_v37 }
 0x3fe   :  { %v2869_v25 = vld [vmem:[#allocation4 + $0x178] sm:$0xff]  ;;  %v2949_v49 = vpop.f32.mrf.mxu0  ;;  %v3267_v8 = vpop.f32.mrf.mxu1  ;;  %8613 = vmatpush2.bf16.msra.mxu0 %v11906_v36  ;;  %v3115_v15 = vld [vmem:[#allocation4 + $0x68] sm:$0xff] }
 0x3ff   :  { %v2875_v61 = vadd.f32 %v11639_v26, %v2869_v25  ;;  %3106 = vst.msk [vmem:[#allocation4 + $0x18] sm:$0xff] %vm988_vm5, %v3100_v21  ;;  %v3098_v62 = vadd.f32 %v3092_v59, %v2949_v49  ;;  %v3416_v63 = vadd.f32 %v3410_v44, %v3267_v8  ;;  %v11912_v59 = vld [vmem:[#allocation13 + $0x140] ss:$16 sps:$4 sm:$0xff]   ;;  %8614 = vmatprep.subr.bf16.mxu0 %v11914_v39 }
 0x400   :  { %v3561_v1 = vld [vmem:[#allocation4 + $0x158] sm:$0xff]  ;;  %v11651_v3 = vpop.f32.mrf.mxu0  ;;  %v11695_v54 = vpop.f32.mrf.mxu1  ;;  %8654 = vmatpush2.bf16.msra.mxu1 %v11915_v43 }
 0x401   :  { %v2867_v2 = vld [vmem:[#allocation4 + $0x168] sm:$0xff]  ;;  %v3610_v6 = vmax.f32 %v3561_v1, 0.0  ;;  %2881 = vst.msk [vmem:[#allocation4 + $0x178] sm:$0xff] %vm988_vm5, %v2875_v61  ;;  %3104 = vst.msk [vmem:[#allocation4 + $0x8] sm:$0xff] %vm988_vm5, %v3098_v62  ;;  %v3101_v10 = vadd.f32 %v11651_v3, %v3095_v18  ;;  %v3114_v61 = vld [vmem:[#allocation4 + $0x60] sm:$0xff] }
 0x402   :  { %v2873_v5 = vadd.f32 %v2867_v2, %v2762_v51  ;;  %3422 = vst.msk [vmem:[#allocation4] sm:$0xff] %vm988_vm5, %v3416_v63  ;;  %v3566_v13 = vld [vmem:[#allocation4 + $0x180] sm:$0xff]  ;;  %v2952_v14 = vpop.f32.mrf.mxu0  ;;  %v3270_v20 = vpop.f32.mrf.mxu1  ;;  %v3112_v1 = vld [vmem:[#allocation4 + $0x50] sm:$0xff]  ;;  %8615 = vmatpush2.bf16.msra.mxu0 %v11912_v59  ;;  %v3128_v39 = vld [vmem:[#allocation4 + $0x78] sm:$0xff] }
 0x403   :  { %3659 = vst.msk [vmem:[#allocation4 + $0x158] sm:$0xff] %vm988_vm5, %v3610_v6  ;;  %v3615_v19 = vmax.f32 %v3566_v13, 0.0  ;;  %3107 = vst.msk [vmem:[#allocation4 + $0x20] sm:$0xff] %vm988_vm5, %v3101_v10  ;;  %v3099_v22 = vadd.f32 %v3093_v0, %v2952_v14  ;;  %v11918_v2 = vld [vmem:[#allocation13 + $0x120] ss:$16 sps:$4 sm:$0xff]   ;;  %8616 = vmatprep.subr.bf16.mxu0 %v11920_v7 }
 0x404   :  { %2879 = vst.msk [vmem:[#allocation4 + $0x168] sm:$0xff] %vm988_vm5, %v2873_v5  ;;  %v3562_v9 = vld [vmem:[#allocation4 + $0x160] sm:$0xff]  ;;  %v2868_v28 = vld [vmem:[#allocation4 + $0x170] sm:$0xff]  ;;  %v11654_v29 = vpop.f32.mrf.mxu0  ;;  %v11698_v31 = vpop.f32.mrf.mxu1 }
 0x405   :  { %v3611_v33 = vmax.f32 %v3562_v9, 0.0  ;;  %3664 = vst.msk [vmem:[#allocation4 + $0x180] sm:$0xff] %vm988_vm5, %v3615_v19  ;;  %v2874_v34 = vadd.f32 %v14249_v16, %v2868_v28  ;;  %3105 = vst.msk [vmem:[#allocation4 + $0x10] sm:$0xff] %vm988_vm5, %v3099_v22  ;;  %v3116_v30 = vadd.f32 %v11654_v29, %v3110_v23  ;;  %v3434_v35 = vadd.f32 %v11698_v31, %v3428_v24  ;;  %v3113_v29 = vld [vmem:[#allocation4 + $0x58] sm:$0xff] }
 0x406   :  { %v3413_v38 = vld [vmem:[#allocation4 + $0x18] sm:$0xff]  ;;  %v2965_v17 = vpop.f32.mrf.mxu0  ;;  %v3283_v26 = vpop.f32.mrf.mxu1  ;;  %8617 = vmatpush2.bf16.msra.mxu0 %v11918_v2 }
 0x407   :  { %3660 = vst.msk [vmem:[#allocation4 + $0x160] sm:$0xff] %vm988_vm5, %v3611_v33  ;;  %2880 = vst.msk [vmem:[#allocation4 + $0x170] sm:$0xff] %vm988_vm5, %v2874_v34  ;;  %v3419_v40 = vadd.f32 %v11695_v54, %v3413_v38  ;;  %v3102_v16 = vadd.f32 %v3096_v27, %v2965_v17  ;;  %v3130_v17 = vld [vmem:[#allocation4 + $0x88] sm:$0xff] }
 0x408   :  { %3122 = vst.msk [vmem:[#allocation4 + $0x40] sm:$0xff] %vm988_vm5, %v3116_v30  ;;  %3440 = vst.msk [vmem:[#allocation4 + $0x38] sm:$0xff] %vm988_vm5, %v3434_v35  ;;  %v3565_v45 = vld [vmem:[#allocation4 + $0x178] sm:$0xff]  ;;  %v3411_v47 = vld [vmem:[#allocation4 + $0x8] sm:$0xff]  ;;  %v11655_v51 = vpop.f32.mrf.mxu0  ;;  %v11699_v52 = vpop.f32.mrf.mxu1 }
 0x409   :  { %v3518_v46 = vld [vmem:[#allocation4] sm:$0xff]  ;;  %v3614_v53 = vmax.f32 %v3565_v45, 0.0  ;;  %3425 = vst.msk [vmem:[#allocation4 + $0x18] sm:$0xff] %vm988_vm5, %v3419_v40  ;;  %v3417_v57 = vadd.f32 %v3411_v47, %v3270_v20  ;;  %3108 = vst.msk [vmem:[#allocation4 + $0x28] sm:$0xff] %vm988_vm5, %v3102_v16  ;;  %v3117_v58 = vadd.f32 %v11655_v51, %v3111_v41  ;;  %v3446_v40 = vld [vmem:[#allocation4 + $0x70] sm:$0xff] }
 0x40a   :  { %v3567_v55 = vmax.f32 %v3518_v46, 0.0  ;;  %v3414_v50 = vld [vmem:[#allocation4 + $0x20] sm:$0xff]  ;;  %v2968_v21 = vpop.f32.mrf.mxu0  ;;  %v3286_v48 = vpop.f32.mrf.mxu1 }
 0x40b   :  { %v3563_v44 = vld [vmem:[#allocation4 + $0x168] sm:$0xff]  ;;  %3663 = vst.msk [vmem:[#allocation4 + $0x178] sm:$0xff] %vm988_vm5, %v3614_v53  ;;  %3423 = vst.msk [vmem:[#allocation4 + $0x8] sm:$0xff] %vm988_vm5, %v3417_v57  ;;  %v3420_v49 = vadd.f32 %v3414_v50, %v3283_v26  ;;  %v3103_v8 = vadd.f32 %v3097_v42, %v2968_v21  ;;  %v11923_v35 = vld [vmem:[#allocation13 + $0x104] ss:$16 sps:$4 sm:$0xff]  }
 0x40c   :  { %v3612_v25 = vmax.f32 %v3563_v44, 0.0  ;;  %3616 = vst.msk [vmem:[#allocation4] sm:$0xff] %vm988_vm5, %v3567_v55  ;;  %3123 = vst.msk [vmem:[#allocation4 + $0x48] sm:$0xff] %vm988_vm5, %v3117_v58  ;;  %v3412_v18 = vld [vmem:[#allocation4 + $0x10] sm:$0xff]  ;;  %v11658_v56 = vpop.f32.mrf.mxu0  ;;  %v14285_v62 = vpop.f32.mrf.mxu1  ;;  %8618 = vmatprep.subr.bf16.mxu0 %v11923_v35 }
 0x40d   :  { %v3418_v63 = vadd.f32 %v14261_v60, %v3412_v18  ;;  %3426 = vst.msk [vmem:[#allocation4 + $0x20] sm:$0xff] %vm988_vm5, %v3420_v49  ;;  %3109 = vst.msk [vmem:[#allocation4 + $0x30] sm:$0xff] %vm988_vm5, %v3103_v8  ;;  %v3120_v0 = vadd.f32 %v11658_v56, %v3114_v61  ;;  %v11921_v30 = vld [vmem:[#allocation13 + $0x100] ss:$16 sps:$4 sm:$0xff]   ;;  %v11926_v45 = vld [vmem:[#allocation13 + $0x344] ss:$16 sps:$4 sm:$0xff]  }
 0x40e   :  { %3661 = vst.msk [vmem:[#allocation4 + $0x168] sm:$0xff] %vm988_vm5, %v3612_v25  ;;  %v3564_v3 = vld [vmem:[#allocation4 + $0x170] sm:$0xff]  ;;  %v2981_v6 = vpop.f32.mrf.mxu0  ;;  %v3299_v5 = vpop.f32.mrf.mxu1  ;;  %8619 = vmatpush2.bf16.msra.mxu0 %v11921_v30  ;;  %8655 = vmatprep.subr.bf16.mxu1 %v11926_v45  ;;  %v3133_v45 = vld [vmem:[#allocation4 + $0xa0] sm:$0xff] }
 0x40f   :  { %v3525_v54 = vld [vmem:[#allocation4 + $0x38] sm:$0xff]  ;;  %v3429_v4 = vld [vmem:[#allocation4 + $0x40] sm:$0xff]  ;;  %v3613_v10 = vmax.f32 %v3564_v3, 0.0  ;;  %3424 = vst.msk [vmem:[#allocation4 + $0x10] sm:$0xff] %vm988_vm5, %v3418_v63  ;;  %3126 = vst.msk [vmem:[#allocation4 + $0x60] sm:$0xff] %vm988_vm5, %v3120_v0  ;;  %v3118_v60 = vadd.f32 %v3112_v1, %v2981_v6 }
 0x410   :  { %v3574_v11 = vmax.f32 %v3525_v54, 0.0  ;;  %v3435_v12 = vadd.f32 %v11699_v52, %v3429_v4  ;;  %v3521_v13 = vld [vmem:[#allocation4 + $0x18] sm:$0xff]  ;;  %v3415_v14 = vld [vmem:[#allocation4 + $0x28] sm:$0xff]  ;;  %v11659_v20 = vpop.f32.mrf.mxu0  ;;  %v11703_v19 = vpop.f32.mrf.mxu1  ;;  %v11929_v53 = vld [vmem:[#allocation13 + $0x324] ss:$16 sps:$4 sm:$0xff]  }
 0x411   :  { %3662 = vst.msk [vmem:[#allocation4 + $0x170] sm:$0xff] %vm988_vm5, %v3613_v10  ;;  %v3570_v22 = vmax.f32 %v3521_v13, 0.0  ;;  %v3421_v23 = vadd.f32 %v3415_v14, %v3286_v48  ;;  %3124 = vst.msk [vmem:[#allocation4 + $0x50] sm:$0xff] %vm988_vm5, %v3118_v60  ;;  %v3121_v24 = vadd.f32 %v11659_v20, %v3115_v15  ;;  %v11924_v43 = vld [vmem:[#allocation13 + $0x340] ss:$16 sps:$4 sm:$0xff]  }
 0x412   :  { %3623 = vst.msk [vmem:[#allocation4 + $0x38] sm:$0xff] %vm988_vm5, %v3574_v11  ;;  %3441 = vst.msk [vmem:[#allocation4 + $0x40] sm:$0xff] %vm988_vm5, %v3435_v12  ;;  %v3519_v27 = vld [vmem:[#allocation4 + $0x8] sm:$0xff]  ;;  %v2984_v28 = vpop.f32.mrf.mxu0  ;;  %v3302_v31 = vpop.f32.mrf.mxu1  ;;  %v3131_v44 = vld [vmem:[#allocation4 + $0x90] sm:$0xff]  ;;  %8656 = vmatpush2.bf16.msra.mxu1 %v11924_v43 }
 0x413   :  { %v3430_v9 = vld [vmem:[#allocation4 + $0x48] sm:$0xff]  ;;  %3619 = vst.msk [vmem:[#allocation4 + $0x18] sm:$0xff] %vm988_vm5, %v3570_v22  ;;  %v3568_v32 = vmax.f32 %v3519_v27, 0.0  ;;  %3427 = vst.msk [vmem:[#allocation4 + $0x28] sm:$0xff] %vm988_vm5, %v3421_v23  ;;  %v3119_v34 = vadd.f32 %v3113_v29, %v2984_v28  ;;  %8657 = vmatprep.subr.bf16.mxu1 %v11929_v53  ;;  %v11932_v56 = vld [vmem:[#allocation13 + $0x4e4] ss:$16 sps:$4 sm:$0xff]  }
 0x414   :  { %v3436_v33 = vadd.f32 %v3430_v9, %v3299_v5  ;;  %3127 = vst.msk [vmem:[#allocation4 + $0x68] sm:$0xff] %vm988_vm5, %v3121_v24  ;;  %v3522_v36 = vld [vmem:[#allocation4 + $0x20] sm:$0xff]  ;;  %v3524_v37 = vld [vmem:[#allocation4 + $0x30] sm:$0xff]  ;;  %v11662_v38 = vpop.f32.mrf.mxu0  ;;  %v14300_v26 = vpop.f32.mrf.mxu1  ;;  %v3464_v5 = vld [vmem:[#allocation4 + $0xa8] sm:$0xff]  ;;  %8670 = vmatprep.subr.bf16.mxu0 %v11932_v56 }
 0x415   :  { %3617 = vst.msk [vmem:[#allocation4 + $0x8] sm:$0xff] %vm988_vm5, %v3568_v32  ;;  %v3571_v16 = vmax.f32 %v3522_v36, 0.0  ;;  %v3573_v41 = vmax.f32 %v3524_v37, 0.0  ;;  %3125 = vst.msk [vmem:[#allocation4 + $0x58] sm:$0xff] %vm988_vm5, %v3119_v34  ;;  %v3136_v42 = vadd.f32 %v11662_v38, %v3130_v17  ;;  %v11927_v25 = vld [vmem:[#allocation13 + $0x320] ss:$16 sps:$4 sm:$0xff]  }
 0x416   :  { %3442 = vst.msk [vmem:[#allocation4 + $0x48] sm:$0xff] %vm988_vm5, %v3436_v33  ;;  %v3520_v46 = vld [vmem:[#allocation4 + $0x10] sm:$0xff]  ;;  %v3433_v47 = vld [vmem:[#allocation4 + $0x60] sm:$0xff]  ;;  %v2997_v51 = vpop.f32.mrf.mxu0  ;;  %v3315_v52 = vpop.f32.mrf.mxu1  ;;  %8658 = vmatpush2.bf16.msra.mxu1 %v11927_v25  ;;  %v3132_v28 = vld [vmem:[#allocation4 + $0x98] sm:$0xff] }
 0x417   :  { %v3569_v55 = vmax.f32 %v3520_v46, 0.0  ;;  %3620 = vst.msk [vmem:[#allocation4 + $0x20] sm:$0xff] %vm988_vm5, %v3571_v16  ;;  %3622 = vst.msk [vmem:[#allocation4 + $0x30] sm:$0xff] %vm988_vm5, %v3573_v41  ;;  %v3439_v57 = vadd.f32 %v11703_v19, %v3433_v47  ;;  %v3134_v58 = vadd.f32 %v3128_v39, %v2997_v51  ;;  %v3452_v59 = vadd.f32 %v3446_v40, %v3315_v52  ;;  %v3129_v1 = vld [vmem:[#allocation4 + $0x80] sm:$0xff]  ;;  %v3146_v6 = vld [vmem:[#allocation4 + $0xb0] sm:$0xff] }
 0x418   :  { %3142 = vst.msk [vmem:[#allocation4 + $0x88] sm:$0xff] %vm988_vm5, %v3136_v42  ;;  %v3431_v21 = vld [vmem:[#allocation4 + $0x50] sm:$0xff]  ;;  %v11663_v48 = vpop.f32.mrf.mxu0  ;;  %v11707_v7 = vpop.f32.mrf.mxu1  ;;  %v3147_v33 = vld [vmem:[#allocation4 + $0xb8] sm:$0xff] }
 0x419   :  { %v3526_v50 = vld [vmem:[#allocation4 + $0x40] sm:$0xff]  ;;  %3618 = vst.msk [vmem:[#allocation4 + $0x10] sm:$0xff] %vm988_vm5, %v3569_v55  ;;  %3445 = vst.msk [vmem:[#allocation4 + $0x60] sm:$0xff] %vm988_vm5, %v3439_v57  ;;  %v3437_v8 = vadd.f32 %v3431_v21, %v3302_v31  ;;  %v3137_v18 = vadd.f32 %v11663_v48, %v3131_v44  ;;  %v3150_v53 = vld [vmem:[#allocation4 + $0xd0] sm:$0xff] }
 0x41a   :  { %v3575_v49 = vmax.f32 %v3526_v50, 0.0  ;;  %3140 = vst.msk [vmem:[#allocation4 + $0x78] sm:$0xff] %vm988_vm5, %v3134_v58  ;;  %3458 = vst.msk [vmem:[#allocation4 + $0x70] sm:$0xff] %vm988_vm5, %v3452_v59  ;;  %v3523_v61 = vld [vmem:[#allocation4 + $0x28] sm:$0xff]  ;;  %v3000_v0 = vpop.f32.mrf.mxu0  ;;  %v3318_v2 = vpop.f32.mrf.mxu1  ;;  %v11935_v10 = vld [vmem:[#allocation13 + $0x304] ss:$16 sps:$4 sm:$0xff]  }
 0x41b   :  { %v3531_v63 = vld [vmem:[#allocation4 + $0x68] sm:$0xff]  ;;  %v3572_v3 = vmax.f32 %v3523_v61, 0.0  ;;  %3443 = vst.msk [vmem:[#allocation4 + $0x50] sm:$0xff] %vm988_vm5, %v3437_v8  ;;  %3143 = vst.msk [vmem:[#allocation4 + $0x90] sm:$0xff] %vm988_vm5, %v3137_v18  ;;  %v3135_v4 = vadd.f32 %v3129_v1, %v3000_v0  ;;  %v3668_v23 = vld [vmem:[#allocation4 + $0x18] sm:$0xff]  ;;  %8659 = vmatprep.subr.bf16.mxu1 %v11935_v10 }
 0x41c   :  { %3624 = vst.msk [vmem:[#allocation4 + $0x40] sm:$0xff] %vm988_vm5, %v3575_v49  ;;  %v3580_v54 = vmax.f32 %v3531_v63, 0.0  ;;  %v3432_v12 = vld [vmem:[#allocation4 + $0x58] sm:$0xff]  ;;  %v11666_v60 = vpop.f32.mrf.mxu0  ;;  %v11710_v13 = vpop.f32.mrf.mxu1  ;;  %v3666_v14 = vld [vmem:[#allocation4 + $0x8] sm:$0xff]  ;;  %v11944_v16 = vld [vmem:[#allocation13 + $0x6e4] ss:$16 sps:$4 sm:$0xff]  }
 0x41d   :  { %v3527_v11 = vld [vmem:[#allocation4 + $0x48] sm:$0xff]  ;;  %3621 = vst.msk [vmem:[#allocation4 + $0x28] sm:$0xff] %vm988_vm5, %v3572_v3  ;;  %v3438_v15 = vadd.f32 %v14285_v62, %v3432_v12  ;;  %3141 = vst.msk [vmem:[#allocation4 + $0x80] sm:$0xff] %vm988_vm5, %v3135_v4  ;;  %v3152_v19 = vadd.f32 %v11666_v60, %v3146_v6  ;;  %v3470_v22 = vadd.f32 %v11710_v13, %v3464_v5  ;;  %v3672_v44 = vld [vmem:[#allocation4 + $0x38] sm:$0xff] }
 0x41e   :  { %v3576_v20 = vmax.f32 %v3527_v11, 0.0  ;;  %3629 = vst.msk [vmem:[#allocation4 + $0x68] sm:$0xff] %vm988_vm5, %v3580_v54  ;;  %v11933_v24 = vld [vmem:[#allocation13 + $0x300] ss:$16 sps:$4 sm:$0xff]   ;;  %v3013_v9 = vpop.f32.mrf.mxu0  ;;  %v3331_v29 = vpop.f32.mrf.mxu1  ;;  %v11745_v31 = vpack.i.bf16 %v3666_v14, %v3668_v23 }
 0x41f   :  { %v3449_v27 = vld [vmem:[#allocation4 + $0x88] sm:$0xff]  ;;  %3444 = vst.msk [vmem:[#allocation4 + $0x58] sm:$0xff] %vm988_vm5, %v3438_v15  ;;  %3158 = vst.msk [vmem:[#allocation4 + $0xb0] sm:$0xff] %vm988_vm5, %v3152_v19  ;;  %v3138_v62 = vadd.f32 %v3132_v28, %v3013_v9  ;;  %8660 = vmatpush2.bf16.msra.mxu1 %v11933_v24  ;;  %v3148_v48 = vld [vmem:[#allocation4 + $0xc0] sm:$0xff] }
 0x420   :  { %3625 = vst.msk [vmem:[#allocation4 + $0x48] sm:$0xff] %vm988_vm5, %v3576_v20  ;;  %v3455_v32 = vadd.f32 %v11707_v7, %v3449_v27  ;;  %3476 = vst.msk [vmem:[#allocation4 + $0xa8] sm:$0xff] %vm988_vm5, %v3470_v22  ;;  %v3530_v34 = vld [vmem:[#allocation4 + $0x60] sm:$0xff]  ;;  %11746 = vrot.lane.b32.xlu0 %v11745_v31, %s13237_s20  ;;  %v11667_v36 = vpop.f32.mrf.mxu0  ;;  %v11711_v37 = vpop.f32.mrf.mxu1  ;;  %8711 = vmatprep.subr.bf16.mxu1 %v11944_v16  ;;  %v3151_v54 = vld [vmem:[#allocation4 + $0xd8] sm:$0xff] }
 0x421   :  { %v3532_v30 = vld [vmem:[#allocation4 + $0x70] sm:$0xff]  ;;  %v3447_v35 = vld [vmem:[#allocation4 + $0x78] sm:$0xff]  ;;  %v3579_v38 = vmax.f32 %v3530_v34, 0.0  ;;  %3144 = vst.msk [vmem:[#allocation4 + $0x98] sm:$0xff] %vm988_vm5, %v3138_v62  ;;  %v3153_v40 = vadd.f32 %v11667_v36, %v3147_v33  ;;  %v3149_v13 = vld [vmem:[#allocation4 + $0xc8] sm:$0xff] }
 0x422   :  { %v3581_v17 = vmax.f32 %v3532_v30, 0.0  ;;  %3461 = vst.msk [vmem:[#allocation4 + $0x88] sm:$0xff] %vm988_vm5, %v3455_v32  ;;  %v3453_v39 = vadd.f32 %v3447_v35, %v3318_v2  ;;  %v3528_v41 = vld [vmem:[#allocation4 + $0x50] sm:$0xff]  ;;  %v3016_v43 = vpop.f32.mrf.mxu0  ;;  %v3334_v46 = vpop.f32.mrf.mxu1  ;;  %v3166_v27 = vld [vmem:[#allocation4 + $0xf8] sm:$0xff]  ;;  %v3482_v32 = vld [vmem:[#allocation4 + $0xe0] sm:$0xff] }
 0x423   :  { %v3450_v42 = vld [vmem:[#allocation4 + $0x90] sm:$0xff]  ;;  %3628 = vst.msk [vmem:[#allocation4 + $0x60] sm:$0xff] %vm988_vm5, %v3579_v38  ;;  %v3577_v47 = vmax.f32 %v3528_v41, 0.0  ;;  %3159 = vst.msk [vmem:[#allocation4 + $0xb8] sm:$0xff] %vm988_vm5, %v3153_v40  ;;  %v3139_v52 = vadd.f32 %v3133_v45, %v3016_v43  ;;  %v3164_v30 = vld [vmem:[#allocation4 + $0xe8] sm:$0xff] }
 0x424   :  { %3630 = vst.msk [vmem:[#allocation4 + $0x70] sm:$0xff] %vm988_vm5, %v3581_v17  ;;  %3459 = vst.msk [vmem:[#allocation4 + $0x78] sm:$0xff] %vm988_vm5, %v3453_v39  ;;  %v3456_v51 = vadd.f32 %v3450_v42, %v3331_v29  ;;  %v3448_v55 = vld [vmem:[#allocation4 + $0x80] sm:$0xff]  ;;  %v11670_v57 = vpop.f32.mrf.mxu0  ;;  %v14330_v58 = vpop.f32.mrf.mxu1  ;;  %v3670_v59 = vld [vmem:[#allocation4 + $0x28] sm:$0xff] }
 0x425   :  { %3626 = vst.msk [vmem:[#allocation4 + $0x50] sm:$0xff] %vm988_vm5, %v3577_v47  ;;  %v3454_v50 = vadd.f32 %v14300_v26, %v3448_v55  ;;  %3145 = vst.msk [vmem:[#allocation4 + $0xa0] sm:$0xff] %vm988_vm5, %v3139_v52  ;;  %v3156_v21 = vadd.f32 %v11670_v57, %v3150_v53  ;;  %v11750_v7 = vpack.i.bf16 %v3670_v59, %v3672_v44  ;;  %v3167_v39 = vld [vmem:[#allocation4 + $0x100] sm:$0xff]  ;;  %v3165_v59 = vld [vmem:[#allocation4 + $0xf0] sm:$0xff] }
 0x426   :  { %3462 = vst.msk [vmem:[#allocation4 + $0x90] sm:$0xff] %vm988_vm5, %v3456_v51  ;;  %v3529_v25 = vld [vmem:[#allocation4 + $0x58] sm:$0xff]  ;;  %v3465_v8 = vld [vmem:[#allocation4 + $0xb0] sm:$0xff]  ;;  %v3029_v18 = vpop.f32.mrf.mxu0  ;;  %v3347_v56 = vpop.f32.mrf.mxu1 }
 0x427   :  { %v3539_v49 = vld [vmem:[#allocation4 + $0xa8] sm:$0xff]  ;;  %v3578_v61 = vmax.f32 %v3529_v25, 0.0  ;;  %3460 = vst.msk [vmem:[#allocation4 + $0x80] sm:$0xff] %vm988_vm5, %v3454_v50  ;;  %v3471_v0 = vadd.f32 %v11711_v37, %v3465_v8  ;;  %3162 = vst.msk [vmem:[#allocation4 + $0xd0] sm:$0xff] %vm988_vm5, %v3156_v21  ;;  %v3154_v26 = vadd.f32 %v3148_v48, %v3029_v18  ;;  %11751 = vrot.lane.b32.xlu0 %v11750_v7, %s13237_s20  ;;  %v3182_v7 = vld [vmem:[#allocation4 + $0x120] sm:$0xff] }
 0x428   :  { %v3588_v63 = vmax.f32 %v3539_v49, 0.0  ;;  %v3451_v2 = vld [vmem:[#allocation4 + $0x98] sm:$0xff]  ;;  %v11671_v3 = vpop.f32.mrf.mxu0  ;;  %v11715_v4 = vpop.f32.mrf.mxu1  ;;  %v3674_v40 = vld [vmem:[#allocation4 + $0x48] sm:$0xff] }
 0x429   :  { %v3535_v1 = vld [vmem:[#allocation4 + $0x88] sm:$0xff]  ;;  %3627 = vst.msk [vmem:[#allocation4 + $0x58] sm:$0xff] %vm988_vm5, %v3578_v61  ;;  %3477 = vst.msk [vmem:[#allocation4 + $0xb0] sm:$0xff] %vm988_vm5, %v3471_v0  ;;  %v3457_v5 = vadd.f32 %v3451_v2, %v3334_v46  ;;  %v3157_v10 = vadd.f32 %v11671_v3, %v3151_v54  ;;  %v3500_v25 = vld [vmem:[#allocation4 + $0x118] sm:$0xff] }
 0x42a   :  { %v3584_v6 = vmax.f32 %v3535_v1, 0.0  ;;  %3637 = vst.msk [vmem:[#allocation4 + $0xa8] sm:$0xff] %vm988_vm5, %v3588_v63  ;;  %3160 = vst.msk [vmem:[#allocation4 + $0xc0] sm:$0xff] %vm988_vm5, %v3154_v26  ;;  %v3466_v12 = vld [vmem:[#allocation4 + $0xb8] sm:$0xff]  ;;  %v3032_v60 = vpop.f32.mrf.mxu0  ;;  %v3350_v14 = vpop.f32.mrf.mxu1  ;;  %v3678_v2 = vld [vmem:[#allocation4 + $0x68] sm:$0xff] }
 0x42b   :  { %v3533_v11 = vld [vmem:[#allocation4 + $0x78] sm:$0xff]  ;;  %3463 = vst.msk [vmem:[#allocation4 + $0x98] sm:$0xff] %vm988_vm5, %v3457_v5  ;;  %v3472_v15 = vadd.f32 %v3466_v12, %v3347_v56  ;;  %3163 = vst.msk [vmem:[#allocation4 + $0xd8] sm:$0xff] %vm988_vm5, %v3157_v10  ;;  %v3155_v19 = vadd.f32 %v3149_v13, %v3032_v60 }
 0x42c   :  { %3633 = vst.msk [vmem:[#allocation4 + $0x88] sm:$0xff] %vm988_vm5, %v3584_v6  ;;  %v3582_v20 = vmax.f32 %v3533_v11, 0.0  ;;  %v3538_v23 = vld [vmem:[#allocation4 + $0xa0] sm:$0xff]  ;;  %v11674_v24 = vpop.f32.mrf.mxu0  ;;  %v14346_v9 = vpop.f32.mrf.mxu1  ;;  %v3183_v11 = vld [vmem:[#allocation4 + $0x128] sm:$0xff] }
 0x42d   :  { %v3536_v22 = vld [vmem:[#allocation4 + $0x90] sm:$0xff]  ;;  %v3587_v29 = vmax.f32 %v3538_v23, 0.0  ;;  %3478 = vst.msk [vmem:[#allocation4 + $0xb8] sm:$0xff] %vm988_vm5, %v3472_v15  ;;  %3161 = vst.msk [vmem:[#allocation4 + $0xc8] sm:$0xff] %vm988_vm5, %v3155_v19  ;;  %v3172_v31 = vadd.f32 %v11674_v24, %v3166_v27 }
 0x42e   :  { %3631 = vst.msk [vmem:[#allocation4 + $0x78] sm:$0xff] %vm988_vm5, %v3582_v20  ;;  %v3585_v28 = vmax.f32 %v3536_v22, 0.0  ;;  %v3534_v62 = vld [vmem:[#allocation4 + $0x80] sm:$0xff]  ;;  %v3469_v33 = vld [vmem:[#allocation4 + $0xd0] sm:$0xff]  ;;  %v3045_v34 = vpop.f32.mrf.mxu0  ;;  %v3363_v35 = vpop.f32.mrf.mxu1 }
 0x42f   :  { %v3583_v36 = vmax.f32 %v3534_v62, 0.0  ;;  %3636 = vst.msk [vmem:[#allocation4 + $0xa0] sm:$0xff] %vm988_vm5, %v3587_v29  ;;  %v3475_v37 = vadd.f32 %v11715_v4, %v3469_v33  ;;  %3178 = vst.msk [vmem:[#allocation4 + $0xf8] sm:$0xff] %vm988_vm5, %v3172_v31  ;;  %v3170_v38 = vadd.f32 %v3164_v30, %v3045_v34  ;;  %v3488_v17 = vadd.f32 %v3482_v32, %v3363_v35  ;;  %v3168_v4 = vld [vmem:[#allocation4 + $0x108] sm:$0xff]  ;;  %v3169_v29 = vld [vmem:[#allocation4 + $0x110] sm:$0xff] }
 0x430   :  { %3634 = vst.msk [vmem:[#allocation4 + $0x90] sm:$0xff] %vm988_vm5, %v3585_v28  ;;  %v3540_v16 = vld [vmem:[#allocation4 + $0xb0] sm:$0xff]  ;;  %v11675_v42 = vpop.f32.mrf.mxu0  ;;  %v11719_v43 = vpop.f32.mrf.mxu1  ;;  %v3676_v45 = vld [vmem:[#allocation4 + $0x58] sm:$0xff]  ;;  %v3186_v34 = vld [vmem:[#allocation4 + $0x140] sm:$0xff] }
 0x431   :  { %v3467_v41 = vld [vmem:[#allocation4 + $0xc0] sm:$0xff]  ;;  %3632 = vst.msk [vmem:[#allocation4 + $0x80] sm:$0xff] %vm988_vm5, %v3583_v36  ;;  %v3589_v46 = vmax.f32 %v3540_v16, 0.0  ;;  %3481 = vst.msk [vmem:[#allocation4 + $0xd0] sm:$0xff] %vm988_vm5, %v3475_v37  ;;  %v3173_v51 = vadd.f32 %v11675_v42, %v3167_v39  ;;  %v11755_v52 = vpack.i.bf16 %v3674_v40, %v3676_v45  ;;  %v3184_v40 = vld [vmem:[#allocation4 + $0x130] sm:$0xff] }
 0x432   :  { %v3473_v47 = vadd.f32 %v3467_v41, %v3350_v14  ;;  %3176 = vst.msk [vmem:[#allocation4 + $0xe8] sm:$0xff] %vm988_vm5, %v3170_v38  ;;  %3494 = vst.msk [vmem:[#allocation4 + $0xe0] sm:$0xff] %vm988_vm5, %v3488_v17  ;;  %v3537_v53 = vld [vmem:[#allocation4 + $0x98] sm:$0xff]  ;;  %v3048_v57 = vpop.f32.mrf.mxu0  ;;  %v3366_v44 = vpop.f32.mrf.mxu1 }
 0x433   :  { %v3545_v55 = vld [vmem:[#allocation4 + $0xd8] sm:$0xff]  ;;  %3638 = vst.msk [vmem:[#allocation4 + $0xb0] sm:$0xff] %vm988_vm5, %v3589_v46  ;;  %v3586_v50 = vmax.f32 %v3537_v53, 0.0  ;;  %3179 = vst.msk [vmem:[#allocation4 + $0x100] sm:$0xff] %vm988_vm5, %v3173_v51  ;;  %v3171_v48 = vadd.f32 %v3165_v59, %v3048_v57  ;;  %11756 = vrot.lane.b32.xlu1 %v11755_v52, %s13237_s20  ;;  %v3682_v37 = vld [vmem:[#allocation4 + $0x88] sm:$0xff] }
 0x434   :  { %v3594_v21 = vmax.f32 %v3545_v55, 0.0  ;;  %3479 = vst.msk [vmem:[#allocation4 + $0xc0] sm:$0xff] %vm988_vm5, %v3473_v47  ;;  %v3541_v49 = vld [vmem:[#allocation4 + $0xb8] sm:$0xff]  ;;  %v3468_v8 = vld [vmem:[#allocation4 + $0xc8] sm:$0xff]  ;;  %v11678_v18 = vpop.f32.mrf.mxu0  ;;  %v11722_v56 = vpop.f32.mrf.mxu1 }
 0x435   :  { %v3680_v61 = vld [vmem:[#allocation4 + $0x78] sm:$0xff]  ;;  %3635 = vst.msk [vmem:[#allocation4 + $0x98] sm:$0xff] %vm988_vm5, %v3586_v50  ;;  %v3590_v63 = vmax.f32 %v3541_v49, 0.0  ;;  %v3474_v0 = vadd.f32 %v14330_v58, %v3468_v8  ;;  %3177 = vst.msk [vmem:[#allocation4 + $0xf0] sm:$0xff] %vm988_vm5, %v3171_v48  ;;  %v3188_v26 = vadd.f32 %v11678_v18, %v3182_v7  ;;  %v3506_v1 = vadd.f32 %v11722_v56, %v3500_v25  ;;  %v3187_v50 = vld [vmem:[#allocation4 + $0x148] sm:$0xff] }
 0x436   :  { %3643 = vst.msk [vmem:[#allocation4 + $0xd8] sm:$0xff] %vm988_vm5, %v3594_v21  ;;  %v3485_v3 = vld [vmem:[#allocation4 + $0xf8] sm:$0xff]  ;;  %v3061_v54 = vpop.f32.mrf.mxu0  ;;  %v3379_v6 = vpop.f32.mrf.mxu1  ;;  %v11760_v5 = vpack.i.bf16 %v3678_v2, %v3680_v61 }
 0x437   :  { %3639 = vst.msk [vmem:[#allocation4 + $0xb8] sm:$0xff] %vm988_vm5, %v3590_v63  ;;  %3480 = vst.msk [vmem:[#allocation4 + $0xc8] sm:$0xff] %vm988_vm5, %v3474_v0  ;;  %v3491_v10 = vadd.f32 %v11719_v43, %v3485_v3  ;;  %v3174_v58 = vadd.f32 %v3168_v4, %v3061_v54  ;;  %v3185_v56 = vld [vmem:[#allocation4 + $0x138] sm:$0xff] }
 0x438   :  { %3194 = vst.msk [vmem:[#allocation4 + $0x120] sm:$0xff] %vm988_vm5, %v3188_v26  ;;  %3512 = vst.msk [vmem:[#allocation4 + $0x118] sm:$0xff] %vm988_vm5, %v3506_v1  ;;  %v3544_v12 = vld [vmem:[#allocation4 + $0xd0] sm:$0xff]  ;;  %11761 = vrot.lane.b32.xlu1 %v11760_v5, %s13237_s20  ;;  %v11679_v14 = vpop.f32.mrf.mxu0  ;;  %v11723_v20 = vpop.f32.mrf.mxu1 }
 0x439   :  { %v3546_v60 = vld [vmem:[#allocation4 + $0xe0] sm:$0xff]  ;;  %v3483_v13 = vld [vmem:[#allocation4 + $0xe8] sm:$0xff]  ;;  %v3593_v15 = vmax.f32 %v3544_v12, 0.0  ;;  %3497 = vst.msk [vmem:[#allocation4 + $0xf8] sm:$0xff] %vm988_vm5, %v3491_v10  ;;  %3180 = vst.msk [vmem:[#allocation4 + $0x108] sm:$0xff] %vm988_vm5, %v3174_v58  ;;  %v3189_v23 = vadd.f32 %v11679_v14, %v3183_v11 }
 0x43a   :  { %v3595_v19 = vmax.f32 %v3546_v60, 0.0  ;;  %v3489_v22 = vadd.f32 %v3483_v13, %v3366_v44  ;;  %v3486_v27 = vld [vmem:[#allocation4 + $0x100] sm:$0xff]  ;;  %v3064_v28 = vpop.f32.mrf.mxu0  ;;  %v3382_v31 = vpop.f32.mrf.mxu1 }
 0x43b   :  { %v3542_v24 = vld [vmem:[#allocation4 + $0xc0] sm:$0xff]  ;;  %3642 = vst.msk [vmem:[#allocation4 + $0xd0] sm:$0xff] %vm988_vm5, %v3593_v15  ;;  %v3492_v62 = vadd.f32 %v3486_v27, %v3379_v6  ;;  %3195 = vst.msk [vmem:[#allocation4 + $0x128] sm:$0xff] %vm988_vm5, %v3189_v23  ;;  %v3175_v33 = vadd.f32 %v3169_v29, %v3064_v28 }
 0x43c   :  { %v3591_v32 = vmax.f32 %v3542_v24, 0.0  ;;  %3644 = vst.msk [vmem:[#allocation4 + $0xe0] sm:$0xff] %vm988_vm5, %v3595_v19  ;;  %3495 = vst.msk [vmem:[#allocation4 + $0xe8] sm:$0xff] %vm988_vm5, %v3489_v22  ;;  %v3484_v30 = vld [vmem:[#allocation4 + $0xf0] sm:$0xff]  ;;  %v11682_v35 = vpop.f32.mrf.mxu0  ;;  %v14377_v36 = vpop.f32.mrf.mxu1  ;;  %v3684_v38 = vld [vmem:[#allocation4 + $0x98] sm:$0xff] }
 0x43d   :  { %v3490_v17 = vadd.f32 %v14346_v9, %v3484_v30  ;;  %3498 = vst.msk [vmem:[#allocation4 + $0x100] sm:$0xff] %vm988_vm5, %v3492_v62  ;;  %3181 = vst.msk [vmem:[#allocation4 + $0x110] sm:$0xff] %vm988_vm5, %v3175_v33  ;;  %v3192_v39 = vadd.f32 %v11682_v35, %v3186_v34  ;;  %v11765_v16 = vpack.i.bf16 %v3682_v37, %v3684_v38  ;;  %v3686_v9 = vld [vmem:[#allocation4 + $0xa8] sm:$0xff]  ;;  %v3692_v58 = vld [vmem:[#allocation4 + $0xd8] sm:$0xff] }
 0x43e   :  { %3640 = vst.msk [vmem:[#allocation4 + $0xc0] sm:$0xff] %vm988_vm5, %v3591_v32  ;;  %v3543_v41 = vld [vmem:[#allocation4 + $0xc8] sm:$0xff]  ;;  %v3077_v45 = vpop.f32.mrf.mxu0  ;;  %v3688_v53 = vld [vmem:[#allocation4 + $0xb8] sm:$0xff]  ;;  %v3395_v59 = vpop.f32.mrf.mxu1 }
 0x43f   :  { %v3553_v42 = vld [vmem:[#allocation4 + $0x118] sm:$0xff]  ;;  %v3501_v43 = vld [vmem:[#allocation4 + $0x120] sm:$0xff]  ;;  %v3592_v46 = vmax.f32 %v3543_v41, 0.0  ;;  %3496 = vst.msk [vmem:[#allocation4 + $0xf0] sm:$0xff] %vm988_vm5, %v3490_v17  ;;  %3198 = vst.msk [vmem:[#allocation4 + $0x140] sm:$0xff] %vm988_vm5, %v3192_v39  ;;  %v3190_v52 = vadd.f32 %v3184_v40, %v3077_v45  ;;  %11766 = vrot.lane.b32.xlu0 %v11765_v16, %s13237_s20  ;;  %v11770_v21 = vpack.i.bf16 %v3686_v9, %v3688_v53 }
 0x440   :  { %v3602_v47 = vmax.f32 %v3553_v42, 0.0  ;;  %v3507_v51 = vadd.f32 %v11723_v20, %v3501_v43  ;;  %v3549_v55 = vld [vmem:[#allocation4 + $0xf8] sm:$0xff]  ;;  %v3487_v57 = vld [vmem:[#allocation4 + $0x108] sm:$0xff]  ;;  %v11683_v44 = vpop.f32.mrf.mxu0  ;;  %v11727_v2 = vpop.f32.mrf.mxu1 }
 0x441   :  { %3641 = vst.msk [vmem:[#allocation4 + $0xc8] sm:$0xff] %vm988_vm5, %v3592_v46  ;;  %v3598_v48 = vmax.f32 %v3549_v55, 0.0  ;;  %v3493_v7 = vadd.f32 %v3487_v57, %v3382_v31  ;;  %3196 = vst.msk [vmem:[#allocation4 + $0x130] sm:$0xff] %vm988_vm5, %v3190_v52  ;;  %v3193_v25 = vadd.f32 %v11683_v44, %v3187_v50  ;;  %11771 = vrot.lane.b32.xlu1 %v11770_v21, %s13237_s20  ;;  %v3708_v41 = vld [vmem:[#allocation4 + $0x158] sm:$0xff]  ;;  %v3665_v57 = vld [vmem:[#allocation4] sm:$0xff] }
 0x442   :  { %3651 = vst.msk [vmem:[#allocation4 + $0x118] sm:$0xff] %vm988_vm5, %v3602_v47  ;;  %3513 = vst.msk [vmem:[#allocation4 + $0x120] sm:$0xff] %vm988_vm5, %v3507_v51  ;;  %v3502_v8 = vld [vmem:[#allocation4 + $0x128] sm:$0xff]  ;;  %v3080_v18 = vpop.f32.mrf.mxu0  ;;  %v3398_v12 = vpop.f32.mrf.mxu1  ;;  %v3712_v51 = vld [vmem:[#allocation4 + $0x178] sm:$0xff] }
 0x443   :  { %v3547_v49 = vld [vmem:[#allocation4 + $0xe8] sm:$0xff]  ;;  %3647 = vst.msk [vmem:[#allocation4 + $0xf8] sm:$0xff] %vm988_vm5, %v3598_v48  ;;  %3499 = vst.msk [vmem:[#allocation4 + $0x108] sm:$0xff] %vm988_vm5, %v3493_v7  ;;  %v3508_v63 = vadd.f32 %v3502_v8, %v3395_v59  ;;  %v3191_v0 = vadd.f32 %v3185_v56, %v3080_v18  ;;  %v3667_v59 = vld [vmem:[#allocation4 + $0x10] sm:$0xff] }
 0x444   :  { %v3596_v61 = vmax.f32 %v3547_v49, 0.0  ;;  %3199 = vst.msk [vmem:[#allocation4 + $0x148] sm:$0xff] %vm988_vm5, %v3193_v25  ;;  %v3550_v26 = vld [vmem:[#allocation4 + $0x100] sm:$0xff]  ;;  %v3552_v1 = vld [vmem:[#allocation4 + $0x110] sm:$0xff]  ;;  %v3710_v47 = vld [vmem:[#allocation4 + $0x168] sm:$0xff] }
 0x445   :  { %v3599_v3 = vmax.f32 %v3550_v26, 0.0  ;;  %v3601_v54 = vmax.f32 %v3552_v1, 0.0  ;;  %3514 = vst.msk [vmem:[#allocation4 + $0x128] sm:$0xff] %vm988_vm5, %v3508_v63  ;;  %3197 = vst.msk [vmem:[#allocation4 + $0x138] sm:$0xff] %vm988_vm5, %v3191_v0  ;;  %v11800_v52 = vpack.i.bf16 %v3710_v47, %v3712_v51  ;;  %v11930_v7 = vld [vmem:[#allocation13 + $0x4e0] ss:$16 sps:$4 sm:$0xff]  }
 0x446   :  { %3645 = vst.msk [vmem:[#allocation4 + $0xe8] sm:$0xff] %vm988_vm5, %v3596_v61  ;;  %v3548_v4 = vld [vmem:[#allocation4 + $0xf0] sm:$0xff]  ;;  %v3505_v6 = vld [vmem:[#allocation4 + $0x140] sm:$0xff] }
 0x447   :  { %v3597_v5 = vmax.f32 %v3548_v4, 0.0  ;;  %3648 = vst.msk [vmem:[#allocation4 + $0x100] sm:$0xff] %vm988_vm5, %v3599_v3  ;;  %3650 = vst.msk [vmem:[#allocation4 + $0x110] sm:$0xff] %vm988_vm5, %v3601_v54  ;;  %v3511_v10 = vadd.f32 %v11727_v2, %v3505_v6  ;;  %v11938_v25 = vld [vmem:[#allocation13 + $0x4c4] ss:$16 sps:$4 sm:$0xff]  }
 0x448   :  { %v3503_v60 = vld [vmem:[#allocation4 + $0x130] sm:$0xff]  ;;  %v3690_v13 = vld [vmem:[#allocation4 + $0xc8] sm:$0xff]  ;;  %v3669_v61 = vld [vmem:[#allocation4 + $0x20] sm:$0xff] }
 0x449   :  { %v3554_v11 = vld [vmem:[#allocation4 + $0x120] sm:$0xff]  ;;  %3646 = vst.msk [vmem:[#allocation4 + $0xf0] sm:$0xff] %vm988_vm5, %v3597_v5  ;;  %3517 = vst.msk [vmem:[#allocation4 + $0x140] sm:$0xff] %vm988_vm5, %v3511_v10  ;;  %v3509_v20 = vadd.f32 %v3503_v60, %v3398_v12  ;;  %v11775_v15 = vpack.i.bf16 %v3690_v13, %v3692_v58  ;;  %v3700_v17 = vld [vmem:[#allocation4 + $0x118] sm:$0xff] }
 0x44a   :  { %v3603_v14 = vmax.f32 %v3554_v11, 0.0  ;;  %v3551_v19 = vld [vmem:[#allocation4 + $0x108] sm:$0xff]  ;;  %v3696_v27 = vld [vmem:[#allocation4 + $0xf8] sm:$0xff]  ;;  %v3671_v63 = vld [vmem:[#allocation4 + $0x30] sm:$0xff] }
 0x44b   :  { %v3559_v22 = vld [vmem:[#allocation4 + $0x148] sm:$0xff]  ;;  %v3600_v23 = vmax.f32 %v3551_v19, 0.0  ;;  %3515 = vst.msk [vmem:[#allocation4 + $0x130] sm:$0xff] %vm988_vm5, %v3509_v20  ;;  %11776 = vrot.lane.b32.xlu0 %v11775_v15, %s13237_s20  ;;  %v11941_v0 = vld [vmem:[#allocation13 + $0x4a4] ss:$16 sps:$4 sm:$0xff]  }
 0x44c   :  { %3652 = vst.msk [vmem:[#allocation4 + $0x120] sm:$0xff] %vm988_vm5, %v3603_v14  ;;  %v3608_v24 = vmax.f32 %v3559_v22, 0.0  ;;  %v3555_v28 = vld [vmem:[#allocation4 + $0x128] sm:$0xff]  ;;  %v3504_v29 = vld [vmem:[#allocation4 + $0x138] sm:$0xff]  ;;  %v11950_v6 = vld [vmem:[#allocation13 + $0x6c4] ss:$16 sps:$4 sm:$0xff]  }
 0x44d   :  { %v3694_v31 = vld [vmem:[#allocation4 + $0xe8] sm:$0xff]  ;;  %3649 = vst.msk [vmem:[#allocation4 + $0x108] sm:$0xff] %vm988_vm5, %v3600_v23  ;;  %v3604_v32 = vmax.f32 %v3555_v28, 0.0  ;;  %v3510_v62 = vadd.f32 %v14377_v36, %v3504_v29  ;;  %v11947_v5 = vld [vmem:[#allocation13 + $0x484] ss:$16 sps:$4 sm:$0xff]  }
 0x44e   :  { %3657 = vst.msk [vmem:[#allocation4 + $0x148] sm:$0xff] %vm988_vm5, %v3608_v24  ;;  %v11780_v33 = vpack.i.bf16 %v3694_v31, %v3696_v27  ;;  %v11936_v56 = vld [vmem:[#allocation13 + $0x4c0] ss:$16 sps:$4 sm:$0xff]   ;;  %v11956_v11 = vld [vmem:[#allocation13 + $0x6a4] ss:$16 sps:$4 sm:$0xff]  }
 0x44f   :  { %3653 = vst.msk [vmem:[#allocation4 + $0x128] sm:$0xff] %vm988_vm5, %v3604_v32  ;;  %3516 = vst.msk [vmem:[#allocation4 + $0x138] sm:$0xff] %vm988_vm5, %v3510_v62  ;;  %v11942_v54 = vld [vmem:[#allocation13 + $0x6e0] ss:$16 sps:$4 sm:$0xff]   ;;  %v11953_v12 = vld [vmem:[#allocation13 + $0x464] ss:$16 sps:$4 sm:$0xff]  }
 0x450   :  { %11781 = vrot.lane.b32.xlu1 %v11780_v33, %s13237_s20  ;;  %v3558_v34 = vld [vmem:[#allocation4 + $0x140] sm:$0xff]  ;;  %v3675_v22 = vld [vmem:[#allocation4 + $0x50] sm:$0xff] }
 0x451   :  { %v3607_v30 = vmax.f32 %v3558_v34, 0.0  ;;  %v11939_v4 = vld [vmem:[#allocation13 + $0x4a0] ss:$16 sps:$4 sm:$0xff]   ;;  %v11962_v15 = vld [vmem:[#allocation13 + $0x684] ss:$16 sps:$4 sm:$0xff]  }
 0x452   :  { %v3556_v35 = vld [vmem:[#allocation4 + $0x130] sm:$0xff] }
 0x453   :  { %3656 = vst.msk [vmem:[#allocation4 + $0x140] sm:$0xff] %vm988_vm5, %v3607_v30  ;;  %v3605_v37 = vmax.f32 %v3556_v35, 0.0  ;;  %v11948_v10 = vld [vmem:[#allocation13 + $0x6c0] ss:$16 sps:$4 sm:$0xff]   ;;  %v11959_v19 = vld [vmem:[#allocation13 + $0x444] ss:$16 sps:$4 sm:$0xff]  }
 0x454   :  { %v3698_v38 = vld [vmem:[#allocation4 + $0x108] sm:$0xff]  ;;  %v11968_v31 = vld [vmem:[#allocation13 + $0x664] ss:$16 sps:$4 sm:$0xff]  }
 0x455   :  { %3654 = vst.msk [vmem:[#allocation4 + $0x130] sm:$0xff] %vm988_vm5, %v3605_v37  ;;  %v11785_v39 = vpack.i.bf16 %v3698_v38, %v3700_v17  ;;  %v3706_v36 = vld [vmem:[#allocation4 + $0x148] sm:$0xff]  ;;  %v11965_v62 = vld [vmem:[#allocation13 + $0x424] ss:$16 sps:$4 sm:$0xff]  }
 0x456   :  { %v3557_v40 = vld [vmem:[#allocation4 + $0x138] sm:$0xff]  ;;  %v11795_v42 = vpack.i.bf16 %v3706_v36, %v3708_v41  ;;  %v3702_v43 = vld [vmem:[#allocation4 + $0x128] sm:$0xff]  ;;  %v3679_v33 = vld [vmem:[#allocation4 + $0x70] sm:$0xff] }
 0x457   :  { %v3606_v16 = vmax.f32 %v3557_v40, 0.0  ;;  %11786 = vrot.lane.b32.xlu0 %v11785_v39, %s13237_s20  ;;  %v11945_v58 = vld [vmem:[#allocation13 + $0x480] ss:$16 sps:$4 sm:$0xff]   ;;  %v11974_v38 = vld [vmem:[#allocation13 + $0x644] ss:$16 sps:$4 sm:$0xff]  }
 0x458   :  { %v11954_v13 = vld [vmem:[#allocation13 + $0x6a0] ss:$16 sps:$4 sm:$0xff]   ;;  %v11971_v17 = vld [vmem:[#allocation13 + $0x404] ss:$16 sps:$4 sm:$0xff]  }
 0x459   :  { %3655 = vst.msk [vmem:[#allocation4 + $0x138] sm:$0xff] %vm988_vm5, %v3606_v16  ;;  %v11951_v20 = vld [vmem:[#allocation13 + $0x460] ss:$16 sps:$4 sm:$0xff]   ;;  %v11980_v36 = vld [vmem:[#allocation13 + $0x624] ss:$16 sps:$4 sm:$0xff]  }
 0x45a   :  { %v11960_v27 = vld [vmem:[#allocation13 + $0x680] ss:$16 sps:$4 sm:$0xff]   ;;  %v11977_v16 = vld [vmem:[#allocation13 + $0x5e4] ss:$16 sps:$4 sm:$0xff]  }
 0x45b   :  { %11796 = vrot.lane.b32.xlu0 %v11795_v42, %s13237_s20  ;;  %v11957_v29 = vld [vmem:[#allocation13 + $0x440] ss:$16 sps:$4 sm:$0xff]   ;;  %v11992_v51 = vld [vmem:[#allocation13 + $0x7e4] ss:$16 sps:$4 sm:$0xff]  }
 0x45c   :  { %v11966_v34 = vld [vmem:[#allocation13 + $0x660] ss:$16 sps:$4 sm:$0xff]  }
 0x45d   :  { %v11963_v35 = vld [vmem:[#allocation13 + $0x420] ss:$16 sps:$4 sm:$0xff]  }
 0x45e   :  { %v11972_v39 = vld [vmem:[#allocation13 + $0x640] ss:$16 sps:$4 sm:$0xff]  }
 0x45f   :  { %v11969_v40 = vld [vmem:[#allocation13 + $0x400] ss:$16 sps:$4 sm:$0xff]  }
 0x460   :  { %v3704_v45 = vld [vmem:[#allocation4 + $0x138] sm:$0xff] }
 0x461   :  { %v11790_v46 = vpack.i.bf16 %v3702_v43, %v3704_v45  ;;  %v11978_v41 = vld [vmem:[#allocation13 + $0x620] ss:$16 sps:$4 sm:$0xff]   ;;  %v11986_v43 = vld [vmem:[#allocation13 + $0x604] ss:$16 sps:$4 sm:$0xff]  }
 0x462   :  { %v11975_v42 = vld [vmem:[#allocation13 + $0x5e0] ss:$16 sps:$4 sm:$0xff]   ;;  %v11983_v45 = vld [vmem:[#allocation13 + $0x5c4] ss:$16 sps:$4 sm:$0xff]  }
 0x463   :  { %11791 = vrot.lane.b32.xlu1 %v11790_v46, %s13237_s20  ;;  %v11984_v46 = vld [vmem:[#allocation13 + $0x600] ss:$16 sps:$4 sm:$0xff]  }
 0x464   :  { %v11981_v47 = vld [vmem:[#allocation13 + $0x5c0] ss:$16 sps:$4 sm:$0xff]  }
 0x467   :  { %11801 = vrot.lane.b32.xlu1 %v11800_v52, %s13237_s20  ;;  %v11989_v52 = vld [vmem:[#allocation13 + $0x5a4] ss:$16 sps:$4 sm:$0xff]  }
 0x492   :  { %v11747_v9 = vpop.permute.xlu0 %11746 }
 0x493   :  { %v11749_v53 = vunpack.i.h.bf16 %v11747_v9  ;;  %v11748_v55 = vunpack.i.l.bf16 %v11747_v9  ;;  %v11990_v9 = vld [vmem:[#allocation13 + $0x7e0] ss:$16 sps:$4 sm:$0xff]  }
 0x495   :  { %v3746_v44 = vsel %vm988_vm5, %v3665_v57, %v11749_v53  ;;  %v3747_v50 = vsel %vm988_vm5, %v3667_v59, %v11748_v55  ;;  %v11987_v53 = vld [vmem:[#allocation13 + $0x5a0] ss:$16 sps:$4 sm:$0xff]   ;;  %v11998_v55 = vld [vmem:[#allocation13 + $0x7c4] ss:$16 sps:$4 sm:$0xff]  }
 0x496   :  { %v14419_v21 = vpack.c.bf16 %v3746_v44, %v3746_v44  ;;  %v14421_v48 = vpack.c.bf16 %v3747_v50, %v3747_v50  ;;  %v11995_v57 = vld [vmem:[#allocation13 + $0x584] ss:$16 sps:$4 sm:$0xff]   ;;  %v11996_v59 = vld [vmem:[#allocation13 + $0x7c0] ss:$16 sps:$4 sm:$0xff]  }
 0x497   :  { %v11993_v44 = vld [vmem:[#allocation13 + $0x580] ss:$16 sps:$4 sm:$0xff]   ;;  %v12004_v50 = vld [vmem:[#allocation13 + $0x7a4] ss:$16 sps:$4 sm:$0xff]  }
 0x498   :  { %8620 = vmatprep.mubr.bf16.mxu0 %v14421_v48 }
 0x499   :  { %8621 = vmatmul.mubr.bf16.vlgmr.msra.gmra.mxu0 %v14419_v21  ;;  %v11752_v49 = vpop.permute.xlu0 %11751 }
 0x49a   :  { %8671 = vmatpush1.bf16.msra.mxu0 %v11930_v7  ;;  %v11754_v8 = vunpack.i.h.bf16 %v11752_v49  ;;  %v11753_v18 = vunpack.i.l.bf16 %v11752_v49  ;;  %v12001_v7 = vld [vmem:[#allocation13 + $0x564] ss:$16 sps:$4 sm:$0xff]   ;;  %v11999_v49 = vld [vmem:[#allocation13 + $0x560] ss:$16 sps:$4 sm:$0xff]  }
 0x49b   :  { %8672 = vmatprep.subr.bf16.mxu0 %v11938_v25  ;;  %v12002_v25 = vld [vmem:[#allocation13 + $0x7a0] ss:$16 sps:$4 sm:$0xff]  }
 0x49c   :  { %v3748_v26 = vsel %vm988_vm5, %v3669_v61, %v11754_v8  ;;  %v3749_v1 = vsel %vm988_vm5, %v3671_v63, %v11753_v18  ;;  %v12010_v8 = vld [vmem:[#allocation13 + $0x784] ss:$16 sps:$4 sm:$0xff]   ;;  %v12005_v61 = vld [vmem:[#allocation13 + $0x540] ss:$16 sps:$4 sm:$0xff]  }
 0x49d   :  { %v14427_v2 = vpack.c.bf16 %v3748_v26, %v3748_v26  ;;  %v14429_v3 = vpack.c.bf16 %v3749_v1, %v3749_v1  ;;  %v12007_v18 = vld [vmem:[#allocation13 + $0x544] ss:$16 sps:$4 sm:$0xff]   ;;  %v12014_v26 = vld [vmem:[#allocation13 + $0x760] ss:$16 sps:$4 sm:$0xff]  }
 0x49e   :  { %8673 = vmatpush1.bf16.msra.mxu0 %v11936_v56  ;;  %v12008_v56 = vld [vmem:[#allocation13 + $0x780] ss:$16 sps:$4 sm:$0xff]   ;;  %v12016_v63 = vld [vmem:[#allocation13 + $0x764] ss:$16 sps:$4 sm:$0xff]  }
 0x49f   :  { %8661 = vmatprep.mubr.bf16.mxu1 %v14429_v3  ;;  %8674 = vmatprep.subr.bf16.mxu0 %v11941_v0  ;;  %v12013_v0 = vld [vmem:[#allocation13 + $0x524] ss:$16 sps:$4 sm:$0xff]  }
 0x4a0   :  { %8662 = vmatmul.mubr.bf16.vlgmr.msra.gmra.mxu1 %v14427_v2 }
 0x4a1   :  { %8712 = vmatpush1.bf16.msra.mxu1 %v11942_v54  ;;  %v12011_v54 = vld [vmem:[#allocation13 + $0x520] ss:$16 sps:$4 sm:$0xff]  }
 0x4a2   :  { %8675 = vmatpush1.bf16.msra.mxu0 %v11939_v4  ;;  %8713 = vmatprep.subr.bf16.mxu1 %v11950_v6  ;;  %v12022_v4 = vld [vmem:[#allocation13 + $0x744] ss:$16 sps:$4 sm:$0xff]  }
 0x4a3   :  { %8676 = vmatprep.subr.bf16.mxu0 %v11947_v5  ;;  %v12019_v6 = vld [vmem:[#allocation13 + $0x504] ss:$16 sps:$4 sm:$0xff]  }
 0x4a5   :  { %8714 = vmatpush1.bf16.msra.mxu1 %v11948_v10  ;;  %v14433_v60 = vpop.permute.xlu1 %11756 }
 0x4a6   :  { %8677 = vmatpush1.bf16.msra.mxu0 %v11945_v58  ;;  %v11758_v14 = vunpack.i.l.bf16 %v14433_v60  ;;  %8715 = vmatprep.subr.bf16.mxu1 %v11956_v11  ;;  %v11759_v5 = vunpack.i.h.bf16 %v14433_v60  ;;  %v12020_v58 = vld [vmem:[#allocation13 + $0x740] ss:$16 sps:$4 sm:$0xff]  }
 0x4a7   :  { %8678 = vmatprep.subr.bf16.mxu0 %v11953_v12  ;;  %v12017_v11 = vld [vmem:[#allocation13 + $0x500] ss:$16 sps:$4 sm:$0xff]   ;;  %v12025_v12 = vld [vmem:[#allocation13 + $0x724] ss:$16 sps:$4 sm:$0xff]  }
 0x4a8   :  { %v3751_v23 = vsel %vm988_vm5, %v3675_v22, %v11758_v14  ;;  %v12028_v14 = vld [vmem:[#allocation13 + $0x8e4] ss:$16 sps:$4 sm:$0xff]   ;;  %v12023_v22 = vld [vmem:[#allocation13 + $0x720] ss:$16 sps:$4 sm:$0xff]  }
 0x4a9   :  { %8716 = vmatpush1.bf16.msra.mxu1 %v11954_v13  ;;  %v14437_v24 = vpack.c.bf16 %v3751_v23, %v3751_v23  ;;  %v3673_v13 = vld [vmem:[#allocation4 + $0x40] sm:$0xff] }
 0x4aa   :  { %8679 = vmatpush1.bf16.msra.mxu0 %v11951_v20  ;;  %v14439_v28 = vpop.permute.xlu1 %11761  ;;  %8717 = vmatprep.subr.bf16.mxu1 %v11962_v15  ;;  %v3750_v20 = vsel %vm988_vm5, %v3673_v13, %v11759_v5  ;;  %v3683_v15 = vld [vmem:[#allocation4 + $0x90] sm:$0xff] }
 0x4ab   :  { %v11763_v32 = vunpack.i.l.bf16 %v14439_v28  ;;  %8680 = vmatprep.subr.bf16.mxu0 %v11959_v19  ;;  %8702 = vmatprep.mubr.bf16.mxu0 %v14437_v24  ;;  %v12026_v23 = vld [vmem:[#allocation13 + $0x8e0] ss:$16 sps:$4 sm:$0xff]  }
 0x4ac   :  { %v12080_v5 = vld [vmem:[#allocation13 + $0xa00] ss:$16 sps:$4 sm:$0xff]  }
 0x4ad   :  { %8718 = vmatpush1.bf16.msra.mxu1 %v11960_v27  ;;  %v3753_v30 = vsel %vm988_vm5, %v3679_v33, %v11763_v32  ;;  %v14455_v27 = vpack.c.bf16 %v3750_v20, %v3750_v20  ;;  %v12034_v32 = vld [vmem:[#allocation13 + $0x8c4] ss:$16 sps:$4 sm:$0xff]   ;;  %v12083_v13 = vld [vmem:[#allocation13 + $0x9a0] ss:$16 sps:$4 sm:$0xff]  }
 0x4ae   :  { %8681 = vmatpush1.bf16.msra.mxu0 %v11957_v29  ;;  %8719 = vmatprep.subr.bf16.mxu1 %v11968_v31  ;;  %v14444_v37 = vpack.c.bf16 %v3753_v30, %v3753_v30  ;;  %v11764_v29 = vunpack.i.h.bf16 %v14439_v28  ;;  %v12031_v31 = vld [vmem:[#allocation13 + $0x704] ss:$16 sps:$4 sm:$0xff]  }
 0x4af   :  { %8682 = vmatprep.subr.bf16.mxu0 %v11965_v62  ;;  %v3677_v30 = vld [vmem:[#allocation4 + $0x60] sm:$0xff] }
 0x4b0   :  { %8743 = vmatprep.mubr.bf16.mxu1 %v14444_v37  ;;  %v12037_v28 = vld [vmem:[#allocation13 + $0x8a4] ss:$16 sps:$4 sm:$0xff]  }
 0x4b1   :  { %8720 = vmatpush1.bf16.msra.mxu1 %v11966_v34  ;;  %v14447_v1 = vpop.permute.xlu0 %11766  ;;  %v12029_v34 = vld [vmem:[#allocation13 + $0x700] ss:$16 sps:$4 sm:$0xff]   ;;  %v12091_v20 = vld [vmem:[#allocation13 + $0x984] ss:$16 sps:$4 sm:$0xff]  }
 0x4b2   :  { %8683 = vmatpush1.bf16.msra.mxu0 %v11963_v35  ;;  %8721 = vmatprep.subr.bf16.mxu1 %v11974_v38  ;;  %v11768_v10 = vunpack.i.l.bf16 %v14447_v1  ;;  %v12032_v35 = vld [vmem:[#allocation13 + $0x8c0] ss:$16 sps:$4 sm:$0xff]   ;;  %v12040_v38 = vld [vmem:[#allocation13 + $0xae4] ss:$16 sps:$4 sm:$0xff]  }
 0x4b3   :  { %8684 = vmatprep.subr.bf16.mxu0 %v11971_v17  ;;  %v14452_v19 = vpop.permute.xlu1 %11771  ;;  %v3752_v17 = vsel %vm988_vm5, %v3677_v30, %v11764_v29  ;;  %v12098_v29 = vld [vmem:[#allocation13 + $0xba0] ss:$16 sps:$4 sm:$0xff]  }
 0x4b4   :  { %v3787_v60 = vsel %vm988_vm5, %v3683_v15, %v11768_v10  ;;  %v11773_v62 = vunpack.i.l.bf16 %v14452_v19  ;;  %v12077_v10 = vld [vmem:[#allocation13 + $0x9c0] ss:$16 sps:$4 sm:$0xff]  }
 0x4b5   :  { %8722 = vmatpush1.bf16.msra.mxu1 %v11972_v39  ;;  %v14459_v33 = vpack.c.bf16 %v3787_v60, %v3787_v60  ;;  %v3687_v39 = vld [vmem:[#allocation4 + $0xb0] sm:$0xff] }
 0x4b6   :  { %8685 = vmatpush1.bf16.msra.mxu0 %v11969_v40  ;;  %8723 = vmatprep.subr.bf16.mxu1 %v11980_v36  ;;  %v3789_v40 = vsel %vm988_vm5, %v3687_v39, %v11773_v62  ;;  %v12038_v36 = vld [vmem:[#allocation13 + $0xae0] ss:$16 sps:$4 sm:$0xff]   ;;  %v12100_v60 = vld [vmem:[#allocation13 + $0xba4] ss:$16 sps:$4 sm:$0xff]  }
 0x4b7   :  { %8686 = vmatprep.subr.bf16.mxu0 %v11977_v16  ;;  %v14465_v16 = vpack.c.bf16 %v3752_v17, %v3752_v17  ;;  %v12092_v15 = vld [vmem:[#allocation13 + $0xbc0] ss:$16 sps:$4 sm:$0xff]   ;;  %v12103_v62 = vld [vmem:[#allocation13 + $0x944] ss:$16 sps:$4 sm:$0xff]  }
 0x4b8   :  { %v12101_v30 = vld [vmem:[#allocation13 + $0x940] ss:$16 sps:$4 sm:$0xff]  }
 0x4b9   :  { %8724 = vmatpush1.bf16.msra.mxu1 %v11978_v41  ;;  %v12035_v41 = vld [vmem:[#allocation13 + $0x8a0] ss:$16 sps:$4 sm:$0xff]  }
 0x4ba   :  { %8687 = vmatpush2.bf16.msra.mxu0 %v11975_v42  ;;  %8725 = vmatprep.subr.bf16.mxu1 %v11986_v43  ;;  %v12046_v42 = vld [vmem:[#allocation13 + $0xac4] ss:$16 sps:$4 sm:$0xff]   ;;  %v14467_v43 = vpack.c.bf16 %v3789_v40, %v3789_v40  ;;  %v12110_v17 = vld [vmem:[#allocation13 + $0xb60] ss:$16 sps:$4 sm:$0xff]  }
 0x4bb   :  { %8688 = vmatprep.subr.bf16.mxu0 %v11983_v45  ;;  %v12043_v45 = vld [vmem:[#allocation13 + $0x884] ss:$16 sps:$4 sm:$0xff]   ;;  %v12107_v39 = vld [vmem:[#allocation13 + $0x920] ss:$16 sps:$4 sm:$0xff]  }
 0x4bc   :  { %v12118_v40 = vld [vmem:[#allocation13 + $0xb44] ss:$16 sps:$4 sm:$0xff]  }
 0x4bd   :  { %8726 = vmatpush1.bf16.msra.mxu1 %v11984_v46  ;;  %v12044_v46 = vld [vmem:[#allocation13 + $0xac0] ss:$16 sps:$4 sm:$0xff]  }
 0x4be   :  { %8689 = vmatpush2.bf16.msra.mxu0 %v11981_v47  ;;  %8727 = vmatprep.subr.bf16.mxu1 %v11992_v51  ;;  %v12041_v47 = vld [vmem:[#allocation13 + $0x880] ss:$16 sps:$4 sm:$0xff]   ;;  %v12052_v51 = vld [vmem:[#allocation13 + $0xaa4] ss:$16 sps:$4 sm:$0xff]  }
 0x4bf   :  { %8690 = vmatprep.subr.bf16.mxu0 %v11989_v52  ;;  %v12049_v52 = vld [vmem:[#allocation13 + $0x864] ss:$16 sps:$4 sm:$0xff]  }
 0x4c1   :  { %8728 = vmatpush2.bf16.msra.mxu1 %v11990_v9  ;;  %v12050_v9 = vld [vmem:[#allocation13 + $0xaa0] ss:$16 sps:$4 sm:$0xff]  }
 0x4c2   :  { %8691 = vmatpush2.bf16.msra.mxu0 %v11987_v53  ;;  %8729 = vmatprep.subr.bf16.mxu1 %v11998_v55  ;;  %v12047_v53 = vld [vmem:[#allocation13 + $0x860] ss:$16 sps:$4 sm:$0xff]   ;;  %v12058_v55 = vld [vmem:[#allocation13 + $0xa84] ss:$16 sps:$4 sm:$0xff]  }
 0x4c3   :  { %8692 = vmatprep.subr.bf16.mxu0 %v11995_v57  ;;  %v12055_v57 = vld [vmem:[#allocation13 + $0x844] ss:$16 sps:$4 sm:$0xff]  }
 0x4c5   :  { %8730 = vmatpush2.bf16.msra.mxu1 %v11996_v59  ;;  %v12056_v59 = vld [vmem:[#allocation13 + $0xa80] ss:$16 sps:$4 sm:$0xff]  }
 0x4c6   :  { %8693 = vmatpush2.bf16.msra.mxu0 %v11993_v44  ;;  %8731 = vmatprep.subr.bf16.mxu1 %v12004_v50  ;;  %v12053_v44 = vld [vmem:[#allocation13 + $0x840] ss:$16 sps:$4 sm:$0xff]   ;;  %v12064_v50 = vld [vmem:[#allocation13 + $0xa64] ss:$16 sps:$4 sm:$0xff]  }
 0x4c7   :  { %8694 = vmatprep.subr.bf16.mxu0 %v12001_v7  ;;  %v12061_v7 = vld [vmem:[#allocation13 + $0x824] ss:$16 sps:$4 sm:$0xff]  }
 0x4c9   :  { %8732 = vmatpush2.bf16.msra.mxu1 %v12002_v25  ;;  %v12062_v25 = vld [vmem:[#allocation13 + $0xa60] ss:$16 sps:$4 sm:$0xff]  }
 0x4ca   :  { %8695 = vmatpush2.bf16.msra.mxu0 %v11999_v49  ;;  %8733 = vmatprep.subr.bf16.mxu1 %v12010_v8  ;;  %v12059_v49 = vld [vmem:[#allocation13 + $0x820] ss:$16 sps:$4 sm:$0xff]   ;;  %v12070_v8 = vld [vmem:[#allocation13 + $0xa44] ss:$16 sps:$4 sm:$0xff]  }
 0x4cb   :  { %8696 = vmatprep.subr.bf16.mxu0 %v12007_v18  ;;  %v12067_v18 = vld [vmem:[#allocation13 + $0x804] ss:$16 sps:$4 sm:$0xff]  }
 0x4cd   :  { %8734 = vmatpush2.bf16.msra.mxu1 %v12008_v56  ;;  %v12068_v56 = vld [vmem:[#allocation13 + $0xa40] ss:$16 sps:$4 sm:$0xff]  }
 0x4ce   :  { %8697 = vmatpush2.bf16.msra.mxu0 %v12005_v61  ;;  %8735 = vmatprep.subr.bf16.mxu1 %v12016_v63  ;;  %v12065_v61 = vld [vmem:[#allocation13 + $0x800] ss:$16 sps:$4 sm:$0xff]   ;;  %v12076_v63 = vld [vmem:[#allocation13 + $0xa24] ss:$16 sps:$4 sm:$0xff]  }
 0x4cf   :  { %8698 = vmatprep.subr.bf16.mxu0 %v12013_v0  ;;  %v12073_v0 = vld [vmem:[#allocation13 + $0x9e4] ss:$16 sps:$4 sm:$0xff]  }
 0x4d1   :  { %8736 = vmatpush2.bf16.msra.mxu1 %v12014_v26  ;;  %v12074_v26 = vld [vmem:[#allocation13 + $0xa20] ss:$16 sps:$4 sm:$0xff]  }
 0x4d2   :  { %8699 = vmatpush2.bf16.msra.mxu0 %v12011_v54  ;;  %8737 = vmatprep.subr.bf16.mxu1 %v12022_v4  ;;  %v12071_v54 = vld [vmem:[#allocation13 + $0x9e0] ss:$16 sps:$4 sm:$0xff]   ;;  %v12082_v4 = vld [vmem:[#allocation13 + $0xa04] ss:$16 sps:$4 sm:$0xff]  }
 0x4d3   :  { %8700 = vmatprep.subr.bf16.mxu0 %v12019_v6  ;;  %v12079_v6 = vld [vmem:[#allocation13 + $0x9c4] ss:$16 sps:$4 sm:$0xff]  }
 0x4d5   :  { %8738 = vmatpush2.bf16.msra.mxu1 %v12020_v58  ;;  %v12088_v58 = vld [vmem:[#allocation13 + $0xbe4] ss:$16 sps:$4 sm:$0xff]  }
 0x4d6   :  { %8701 = vmatpush2.bf16.msra.mxu0 %v12017_v11  ;;  %8739 = vmatprep.subr.bf16.mxu1 %v12025_v12  ;;  %v12085_v11 = vld [vmem:[#allocation13 + $0x9a4] ss:$16 sps:$4 sm:$0xff]   ;;  %v12086_v12 = vld [vmem:[#allocation13 + $0xbe0] ss:$16 sps:$4 sm:$0xff]  }
 0x4d7   :  { %8752 = vmatprep.subr.bf16.mxu0 %v12028_v14  ;;  %v12094_v14 = vld [vmem:[#allocation13 + $0xbc4] ss:$16 sps:$4 sm:$0xff]  }
 0x4d9   :  { %8703 = vmatmul.mubr.bf16.vlgmr.msra.gmra.mxu0 %v14455_v27  ;;  %8740 = vmatpush2.bf16.msra.mxu1 %v12023_v22  ;;  %v12089_v22 = vld [vmem:[#allocation13 + $0x980] ss:$16 sps:$4 sm:$0xff]  }
 0x4da   :  { %8753 = vmatpush1.bf16.msra.mxu0 %v12026_v23  ;;  %8784 = vmatprep.mubr.bf16.mxu0 %v14459_v33  ;;  %v12097_v23 = vld [vmem:[#allocation13 + $0x964] ss:$16 sps:$4 sm:$0xff]  }
 0x4db   :  { %8741 = vmatprep.subr.bf16.mxu1 %v12031_v31  ;;  %8754 = vmatprep.subr.bf16.mxu0 %v12034_v32  ;;  %v12095_v31 = vld [vmem:[#allocation13 + $0x960] ss:$16 sps:$4 sm:$0xff]   ;;  %v12106_v32 = vld [vmem:[#allocation13 + $0xb84] ss:$16 sps:$4 sm:$0xff]  }
 0x4dd   :  { %8742 = vmatpush2.bf16.msra.mxu1 %v12029_v34  ;;  %v12104_v34 = vld [vmem:[#allocation13 + $0xb80] ss:$16 sps:$4 sm:$0xff]  }
 0x4de   :  { %8755 = vmatpush1.bf16.msra.mxu0 %v12032_v35  ;;  %8793 = vmatprep.subr.bf16.mxu1 %v12040_v38  ;;  %v12112_v35 = vld [vmem:[#allocation13 + $0xb64] ss:$16 sps:$4 sm:$0xff]  }
 0x4df   :  { %8756 = vmatprep.subr.bf16.mxu0 %v12037_v28  ;;  %v12109_v38 = vld [vmem:[#allocation13 + $0x924] ss:$16 sps:$4 sm:$0xff]   ;;  %v14471_v28 = vpop.permute.xlu0 %11776 }
 0x4e0   :  { %8744 = vmatmul.mubr.bf16.vlgmr.msra.gmra.mxu1 %v14465_v16 }
 0x4e1   :  { %8794 = vmatpush1.bf16.msra.mxu1 %v12038_v36  ;;  %8825 = vmatprep.mubr.bf16.mxu1 %v14467_v43  ;;  %v12115_v36 = vld [vmem:[#allocation13 + $0x904] ss:$16 sps:$4 sm:$0xff]  }
 0x4e2   :  { %8757 = vmatpush1.bf16.msra.mxu0 %v12035_v41  ;;  %8795 = vmatprep.subr.bf16.mxu1 %v12046_v42  ;;  %v11769_v41 = vunpack.i.h.bf16 %v14447_v1  ;;  %v11778_v42 = vunpack.i.l.bf16 %v14471_v28 }
 0x4e3   :  { %8758 = vmatprep.subr.bf16.mxu0 %v12043_v45  ;;  %v12116_v45 = vld [vmem:[#allocation13 + $0xb40] ss:$16 sps:$4 sm:$0xff]  }
 0x4e5   :  { %8796 = vmatpush1.bf16.msra.mxu1 %v12044_v46  ;;  %v12113_v46 = vld [vmem:[#allocation13 + $0x900] ss:$16 sps:$4 sm:$0xff]  }
 0x4e6   :  { %8759 = vmatpush1.bf16.msra.mxu0 %v12041_v47  ;;  %8797 = vmatprep.subr.bf16.mxu1 %v12052_v51  ;;  %v12121_v47 = vld [vmem:[#allocation13 + $0xb24] ss:$16 sps:$4 sm:$0xff]  }
 0x4e7   :  { %8760 = vmatprep.subr.bf16.mxu0 %v12049_v52  ;;  %v3681_v51 = vld [vmem:[#allocation4 + $0x80] sm:$0xff] }
 0x4e8   :  { %v12124_v52 = vld [vmem:[#allocation13 + $0xce4] ss:$16 sps:$4 sm:$0xff]  }
 0x4e9   :  { %8798 = vmatpush1.bf16.msra.mxu1 %v12050_v9  ;;  %v3786_v9 = vsel %vm988_vm5, %v3681_v51, %v11769_v41  ;;  %v12170_v41 = vld [vmem:[#allocation13 + $0xe20] ss:$16 sps:$4 sm:$0xff]  }
 0x4ea   :  { %8761 = vmatpush1.bf16.msra.mxu0 %v12047_v53  ;;  %8799 = vmatprep.subr.bf16.mxu1 %v12058_v55  ;;  %v3691_v53 = vld [vmem:[#allocation4 + $0xd0] sm:$0xff]  ;;  %v14476_v55 = vpop.permute.xlu1 %11781 }
 0x4eb   :  { %8762 = vmatprep.subr.bf16.mxu0 %v12055_v57  ;;  %v12119_v57 = vld [vmem:[#allocation13 + $0xb20] ss:$16 sps:$4 sm:$0xff]   ;;  %v3791_v1 = vsel %vm988_vm5, %v3691_v53, %v11778_v42 }
 0x4ec   :  { %v12167_v42 = vld [vmem:[#allocation13 + $0xde0] ss:$16 sps:$4 sm:$0xff]  }
 0x4ed   :  { %8800 = vmatpush1.bf16.msra.mxu1 %v12056_v59  ;;  %v12122_v59 = vld [vmem:[#allocation13 + $0xce0] ss:$16 sps:$4 sm:$0xff]  }
 0x4ee   :  { %8763 = vmatpush1.bf16.msra.mxu0 %v12053_v44  ;;  %8801 = vmatprep.subr.bf16.mxu1 %v12064_v50  ;;  %v14479_v44 = vpack.c.bf16 %v3786_v9, %v3786_v9  ;;  %v11774_v50 = vunpack.i.h.bf16 %v14452_v19  ;;  %v12133_v19 = vld [vmem:[#allocation13 + $0xca4] ss:$16 sps:$4 sm:$0xff]   ;;  %v12173_v51 = vld [vmem:[#allocation13 + $0xdc0] ss:$16 sps:$4 sm:$0xff]  }
 0x4ef   :  { %8764 = vmatprep.subr.bf16.mxu0 %v12061_v7  ;;  %v12127_v7 = vld [vmem:[#allocation13 + $0xb04] ss:$16 sps:$4 sm:$0xff]   ;;  %v12182_v53 = vld [vmem:[#allocation13 + $0xfe0] ss:$16 sps:$4 sm:$0xff]  }
 0x4f0   :  { %v12181_v9 = vld [vmem:[#allocation13 + $0xda4] ss:$16 sps:$4 sm:$0xff]  }
 0x4f1   :  { %8802 = vmatpush1.bf16.msra.mxu1 %v12062_v25  ;;  %v12130_v25 = vld [vmem:[#allocation13 + $0xcc4] ss:$16 sps:$4 sm:$0xff]  }
 0x4f2   :  { %8765 = vmatpush1.bf16.msra.mxu0 %v12059_v49  ;;  %8803 = vmatprep.subr.bf16.mxu1 %v12070_v8  ;;  %v11783_v49 = vunpack.i.l.bf16 %v14476_v55  ;;  %v14483_v8 = vpack.c.bf16 %v3791_v1, %v3791_v1  ;;  %v12190_v1 = vld [vmem:[#allocation13 + $0xfc4] ss:$16 sps:$4 sm:$0xff]  }
 0x4f3   :  { %8766 = vmatprep.subr.bf16.mxu0 %v12067_v18  ;;  %v12125_v18 = vld [vmem:[#allocation13 + $0xb00] ss:$16 sps:$4 sm:$0xff]  }
 0x4f5   :  { %8804 = vmatpush1.bf16.msra.mxu1 %v12068_v56  ;;  %v3685_v56 = vld [vmem:[#allocation4 + $0xa0] sm:$0xff] }
 0x4f6   :  { %8767 = vmatpush1.bf16.msra.mxu0 %v12065_v61  ;;  %8805 = vmatprep.subr.bf16.mxu1 %v12076_v63  ;;  %v12128_v61 = vld [vmem:[#allocation13 + $0xcc0] ss:$16 sps:$4 sm:$0xff]   ;;  %v12136_v63 = vld [vmem:[#allocation13 + $0xee4] ss:$16 sps:$4 sm:$0xff]  }
 0x4f7   :  { %8768 = vmatprep.subr.bf16.mxu0 %v12073_v0  ;;  %v3788_v0 = vsel %vm988_vm5, %v3685_v56, %v11774_v50  ;;  %v12188_v50 = vld [vmem:[#allocation13 + $0xfc0] ss:$16 sps:$4 sm:$0xff]  }
 0x4f8   :  { %v12191_v56 = vld [vmem:[#allocation13 + $0xd60] ss:$16 sps:$4 sm:$0xff]  }
 0x4f9   :  { %8806 = vmatpush1.bf16.msra.mxu1 %v12074_v26  ;;  %v3695_v26 = vld [vmem:[#allocation4 + $0xf0] sm:$0xff] }
 0x4fa   :  { %8769 = vmatpush2.bf16.msra.mxu0 %v12071_v54  ;;  %8807 = vmatprep.subr.bf16.mxu1 %v12082_v4  ;;  %v3793_v54 = vsel %vm988_vm5, %v3695_v26, %v11783_v49  ;;  %v12134_v4 = vld [vmem:[#allocation13 + $0xee0] ss:$16 sps:$4 sm:$0xff]   ;;  %v12193_v49 = vld [vmem:[#allocation13 + $0xd64] ss:$16 sps:$4 sm:$0xff]  }
 0x4fb   :  { %8770 = vmatprep.subr.bf16.mxu0 %v12079_v6  ;;  %v14489_v6 = vpack.c.bf16 %v3788_v0, %v3788_v0  ;;  %v12200_v0 = vld [vmem:[#allocation13 + $0xf80] ss:$16 sps:$4 sm:$0xff]   ;;  %v12208_v26 = vld [vmem:[#allocation13 + $0xf64] ss:$16 sps:$4 sm:$0xff]  }
 0x4fd   :  { %8808 = vmatpush1.bf16.msra.mxu1 %v12080_v5  ;;  %v12131_v5 = vld [vmem:[#allocation13 + $0xca0] ss:$16 sps:$4 sm:$0xff]  }
 0x4fe   :  { %8771 = vmatpush2.bf16.msra.mxu0 %v12077_v10  ;;  %8809 = vmatprep.subr.bf16.mxu1 %v12088_v58  ;;  %v12142_v10 = vld [vmem:[#allocation13 + $0xec4] ss:$16 sps:$4 sm:$0xff]   ;;  %v14491_v58 = vpack.c.bf16 %v3793_v54, %v3793_v54 }
 0x4ff   :  { %8772 = vmatprep.subr.bf16.mxu0 %v12085_v11  ;;  %v12139_v11 = vld [vmem:[#allocation13 + $0xc84] ss:$16 sps:$4 sm:$0xff]  }
 0x500   :  { %v12205_v54 = vld [vmem:[#allocation13 + $0xd24] ss:$16 sps:$4 sm:$0xff]  }
 0x501   :  { %8810 = vmatpush2.bf16.msra.mxu1 %v12086_v12  ;;  %v12140_v12 = vld [vmem:[#allocation13 + $0xec0] ss:$16 sps:$4 sm:$0xff]  }
 0x502   :  { %8773 = vmatpush2.bf16.msra.mxu0 %v12083_v13  ;;  %8811 = vmatprep.subr.bf16.mxu1 %v12094_v14  ;;  %v12137_v13 = vld [vmem:[#allocation13 + $0xc80] ss:$16 sps:$4 sm:$0xff]   ;;  %v12148_v14 = vld [vmem:[#allocation13 + $0xea4] ss:$16 sps:$4 sm:$0xff]  }
 0x503   :  { %8774 = vmatprep.subr.bf16.mxu0 %v12091_v20  ;;  %v12145_v20 = vld [vmem:[#allocation13 + $0xc64] ss:$16 sps:$4 sm:$0xff]  }
 0x505   :  { %8812 = vmatpush2.bf16.msra.mxu1 %v12092_v15  ;;  %v12146_v15 = vld [vmem:[#allocation13 + $0xea0] ss:$16 sps:$4 sm:$0xff]  }
 0x506   :  { %8775 = vmatpush2.bf16.msra.mxu0 %v12089_v22  ;;  %8813 = vmatprep.subr.bf16.mxu1 %v12100_v60  ;;  %v12143_v22 = vld [vmem:[#allocation13 + $0xc60] ss:$16 sps:$4 sm:$0xff]   ;;  %v12154_v60 = vld [vmem:[#allocation13 + $0xe84] ss:$16 sps:$4 sm:$0xff]  }
 0x507   :  { %8776 = vmatprep.subr.bf16.mxu0 %v12097_v23  ;;  %v12151_v23 = vld [vmem:[#allocation13 + $0xc44] ss:$16 sps:$4 sm:$0xff]  }
 0x509   :  { %8814 = vmatpush2.bf16.msra.mxu1 %v12098_v29  ;;  %v12152_v29 = vld [vmem:[#allocation13 + $0xe80] ss:$16 sps:$4 sm:$0xff]  }
 0x50a   :  { %8777 = vmatpush2.bf16.msra.mxu0 %v12095_v31  ;;  %8815 = vmatprep.subr.bf16.mxu1 %v12106_v32  ;;  %v12149_v31 = vld [vmem:[#allocation13 + $0xc40] ss:$16 sps:$4 sm:$0xff]   ;;  %v12160_v32 = vld [vmem:[#allocation13 + $0xe64] ss:$16 sps:$4 sm:$0xff]  }
 0x50b   :  { %8778 = vmatprep.subr.bf16.mxu0 %v12103_v62  ;;  %v12157_v62 = vld [vmem:[#allocation13 + $0xc24] ss:$16 sps:$4 sm:$0xff]  }
 0x50d   :  { %8816 = vmatpush2.bf16.msra.mxu1 %v12104_v34  ;;  %v12158_v34 = vld [vmem:[#allocation13 + $0xe60] ss:$16 sps:$4 sm:$0xff]  }
 0x50e   :  { %8779 = vmatpush2.bf16.msra.mxu0 %v12101_v30  ;;  %8817 = vmatprep.subr.bf16.mxu1 %v12112_v35  ;;  %v12155_v30 = vld [vmem:[#allocation13 + $0xc20] ss:$16 sps:$4 sm:$0xff]   ;;  %v12166_v35 = vld [vmem:[#allocation13 + $0xe44] ss:$16 sps:$4 sm:$0xff]  }
 0x50f   :  { %8780 = vmatprep.subr.bf16.mxu0 %v12109_v38  ;;  %v12163_v38 = vld [vmem:[#allocation13 + $0xc04] ss:$16 sps:$4 sm:$0xff]  }
 0x511   :  { %8818 = vmatpush2.bf16.msra.mxu1 %v12110_v17  ;;  %v12164_v17 = vld [vmem:[#allocation13 + $0xe40] ss:$16 sps:$4 sm:$0xff]  }
 0x512   :  { %8781 = vmatpush2.bf16.msra.mxu0 %v12107_v39  ;;  %8819 = vmatprep.subr.bf16.mxu1 %v12118_v40  ;;  %v12161_v39 = vld [vmem:[#allocation13 + $0xc00] ss:$16 sps:$4 sm:$0xff]   ;;  %v12172_v40 = vld [vmem:[#allocation13 + $0xe24] ss:$16 sps:$4 sm:$0xff]  }
 0x513   :  { %8782 = vmatprep.subr.bf16.mxu0 %v12115_v36  ;;  %v12169_v36 = vld [vmem:[#allocation13 + $0xde4] ss:$16 sps:$4 sm:$0xff]  }
 0x515   :  { %8820 = vmatpush2.bf16.msra.mxu1 %v12116_v45  ;;  %v12178_v45 = vld [vmem:[#allocation13 + $0xe04] ss:$16 sps:$4 sm:$0xff]  }
 0x516   :  { %8783 = vmatpush2.bf16.msra.mxu0 %v12113_v46  ;;  %8821 = vmatprep.subr.bf16.mxu1 %v12121_v47  ;;  %v12175_v46 = vld [vmem:[#allocation13 + $0xdc4] ss:$16 sps:$4 sm:$0xff]   ;;  %v12176_v47 = vld [vmem:[#allocation13 + $0xe00] ss:$16 sps:$4 sm:$0xff]  }
 0x517   :  { %8834 = vmatprep.subr.bf16.mxu0 %v12124_v52  ;;  %v12184_v52 = vld [vmem:[#allocation13 + $0xfe4] ss:$16 sps:$4 sm:$0xff]  }
 0x519   :  { %8785 = vmatmul.mubr.bf16.vlgmr.msra.gmra.mxu0 %v14479_v44  ;;  %8822 = vmatpush2.bf16.msra.mxu1 %v12119_v57  ;;  %v12179_v57 = vld [vmem:[#allocation13 + $0xda0] ss:$16 sps:$4 sm:$0xff]  }
 0x51a   :  { %8835 = vmatpush1.bf16.msra.mxu0 %v12122_v59  ;;  %8866 = vmatprep.mubr.bf16.mxu0 %v14483_v8  ;;  %v12187_v59 = vld [vmem:[#allocation13 + $0xd84] ss:$16 sps:$4 sm:$0xff]  }
 0x51b   :  { %8823 = vmatprep.subr.bf16.mxu1 %v12127_v7  ;;  %8836 = vmatprep.subr.bf16.mxu0 %v12130_v25  ;;  %v12185_v7 = vld [vmem:[#allocation13 + $0xd80] ss:$16 sps:$4 sm:$0xff]   ;;  %v12196_v25 = vld [vmem:[#allocation13 + $0xfa4] ss:$16 sps:$4 sm:$0xff]  }
 0x51d   :  { %8824 = vmatpush2.bf16.msra.mxu1 %v12125_v18  ;;  %v12194_v18 = vld [vmem:[#allocation13 + $0xfa0] ss:$16 sps:$4 sm:$0xff]  }
 0x51e   :  { %8837 = vmatpush1.bf16.msra.mxu0 %v12128_v61  ;;  %8875 = vmatprep.subr.bf16.mxu1 %v12136_v63  ;;  %v12202_v61 = vld [vmem:[#allocation13 + $0xf84] ss:$16 sps:$4 sm:$0xff]  }
 0x51f   :  { %8838 = vmatprep.subr.bf16.mxu0 %v12133_v19  ;;  %v12199_v63 = vld [vmem:[#allocation13 + $0xd44] ss:$16 sps:$4 sm:$0xff]   ;;  %v12197_v19 = vld [vmem:[#allocation13 + $0xd40] ss:$16 sps:$4 sm:$0xff]  }
 0x520   :  { %8826 = vmatmul.mubr.bf16.vlgmr.msra.gmra.mxu1 %v14489_v6 }
 0x521   :  { %8876 = vmatpush1.bf16.msra.mxu1 %v12134_v4  ;;  %8907 = vmatprep.mubr.bf16.mxu1 %v14491_v58  ;;  %v12206_v4 = vld [vmem:[#allocation13 + $0xf60] ss:$16 sps:$4 sm:$0xff]  }
 0x522   :  { %8839 = vmatpush1.bf16.msra.mxu0 %v12131_v5  ;;  %8877 = vmatprep.subr.bf16.mxu1 %v12142_v10  ;;  %v14495_v5 = vpop.permute.xlu0 %11786  ;;  %v12203_v10 = vld [vmem:[#allocation13 + $0xd20] ss:$16 sps:$4 sm:$0xff]  }
 0x523   :  { %8840 = vmatprep.subr.bf16.mxu0 %v12139_v11  ;;  %v12214_v11 = vld [vmem:[#allocation13 + $0xf44] ss:$16 sps:$4 sm:$0xff]  }
 0x525   :  { %8878 = vmatpush1.bf16.msra.mxu1 %v12140_v12  ;;  %v12211_v12 = vld [vmem:[#allocation13 + $0xd04] ss:$16 sps:$4 sm:$0xff]  }
 0x526   :  { %8841 = vmatpush1.bf16.msra.mxu0 %v12137_v13  ;;  %8879 = vmatprep.subr.bf16.mxu1 %v12148_v14  ;;  %v4645_v13 = vlaneseq  ;;  %v11779_v14 = vunpack.i.h.bf16 %v14471_v28  ;;  %v12215_v28 = vld [vmem:[#allocation13 + $0xf20] ss:$16 sps:$4 sm:$0xff]  }
 0x527   :  { %8842 = vmatprep.subr.bf16.mxu0 %v12145_v20  ;;  %v11788_v20 = vunpack.i.l.bf16 %v14495_v5 }
 0x529   :  { %8880 = vmatpush1.bf16.msra.mxu1 %v12146_v15  ;;  %v12212_v15 = vld [vmem:[#allocation13 + $0xf40] ss:$16 sps:$4 sm:$0xff]  }
 0x52a   :  { %8843 = vmatpush1.bf16.msra.mxu0 %v12143_v22  ;;  %8881 = vmatprep.subr.bf16.mxu1 %v12154_v60  ;;  %v12209_v22 = vld [vmem:[#allocation13 + $0xd00] ss:$16 sps:$4 sm:$0xff]   ;;  %v12217_v60 = vld [vmem:[#allocation13 + $0xf24] ss:$16 sps:$4 sm:$0xff]  }
 0x52b   :  { %8844 = vmatprep.subr.bf16.mxu0 %v12151_v23  ;;  %v3689_v23 = vld [vmem:[#allocation4 + $0xc0] sm:$0xff] }
 0x52d   :  { %8882 = vmatpush1.bf16.msra.mxu1 %v12152_v29  ;;  %v12220_v29 = vld [vmem:[#allocation13 + $0x10e4] ss:$16 sps:$4 sm:$0xff]  }
 0x52e   :  { %8845 = vmatpush1.bf16.msra.mxu0 %v12149_v31  ;;  %8883 = vmatprep.subr.bf16.mxu1 %v12160_v32  ;;  %v14499_v31 = vshrl.u32 %v4645_v13, 7  ;;  %v3790_v32 = vsel %vm988_vm5, %v3689_v23, %v11779_v14  ;;  %v12233_v14 = vld [vmem:[#allocation13 + $0x1080] ss:$16 sps:$4 sm:$0xff]  }
 0x52f   :  { %8846 = vmatprep.subr.bf16.mxu0 %v12157_v62  ;;  %v3699_v62 = vld [vmem:[#allocation4 + $0x110] sm:$0xff] }
 0x530   :  { %v12242_v23 = vld [vmem:[#allocation13 + $0x12a0] ss:$16 sps:$4 sm:$0xff]  }
 0x531   :  { %8884 = vmatpush1.bf16.msra.mxu1 %v12158_v34  ;;  %v14502_v34 = vpop.permute.xlu1 %11791 }
 0x532   :  { %8847 = vmatpush1.bf16.msra.mxu0 %v12155_v30  ;;  %8885 = vmatprep.subr.bf16.mxu1 %v12166_v35  ;;  %v3827_v30 = vsel %vm988_vm5, %v3699_v62, %v11788_v20  ;;  %v12218_v35 = vld [vmem:[#allocation13 + $0x10e0] ss:$16 sps:$4 sm:$0xff]   ;;  %v12244_v20 = vld [vmem:[#allocation13 + $0x12a4] ss:$16 sps:$4 sm:$0xff]  }
 0x533   :  { %8848 = vmatprep.subr.bf16.mxu0 %v12163_v38  ;;  %v14505_v38 = vpack.c.bf16 %v3790_v32, %v3790_v32  ;;  %v12239_v32 = vld [vmem:[#allocation13 + $0x1060] ss:$16 sps:$4 sm:$0xff]   ;;  %v12250_v62 = vld [vmem:[#allocation13 + $0x1284] ss:$16 sps:$4 sm:$0xff]  }
 0x535   :  { %8886 = vmatpush1.bf16.msra.mxu1 %v12164_v17  ;;  %v11784_v17 = vunpack.i.h.bf16 %v14476_v55  ;;  %v12224_v55 = vld [vmem:[#allocation13 + $0x10c0] ss:$16 sps:$4 sm:$0xff]  }
 0x536   :  { %8849 = vmatpush1.bf16.msra.mxu0 %v12161_v39  ;;  %8887 = vmatprep.subr.bf16.mxu1 %v12172_v40  ;;  %v4647_v39 = vsub.s32 0, %v14499_v31  ;;  %v12223_v40 = vld [vmem:[#allocation13 + $0xf04] ss:$16 sps:$4 sm:$0xff]  }
 0x537   :  { %8850 = vmatprep.subr.bf16.mxu0 %v12169_v36  ;;  %v12226_v36 = vld [vmem:[#allocation13 + $0x10c4] ss:$16 sps:$4 sm:$0xff]  }
 0x539   :  { %8888 = vmatpush1.bf16.msra.mxu1 %v12170_v41  ;;  %v11793_v41 = vunpack.i.l.bf16 %v14502_v34 }
 0x53a   :  { %8851 = vmatpush2.bf16.msra.mxu0 %v12167_v42  ;;  %8889 = vmatprep.subr.bf16.mxu1 %v12178_v45  ;;  %v4643_v42 = vld [vmem:[#allocation15] sm:$0xf]  ;;  %v14510_v45 = vpack.c.bf16 %v3827_v30, %v3827_v30 }
 0x53b   :  { %8852 = vmatprep.subr.bf16.mxu0 %v12175_v46  ;;  %v12248_v30 = vld [vmem:[#allocation13 + $0x1280] ss:$16 sps:$4 sm:$0xff]  }
 0x53d   :  { %8890 = vmatpush1.bf16.msra.mxu1 %v12176_v47  ;;  %v4651_v47 = vsub.s32 1, %v14499_v31 }
 0x53e   :  { %8853 = vmatpush2.bf16.msra.mxu0 %v12173_v51  ;;  %8891 = vmatprep.subr.bf16.mxu1 %v12184_v52  ;;  %v12221_v51 = vld [vmem:[#allocation13 + $0xf00] ss:$16 sps:$4 sm:$0xff]  }
 0x53f   :  { %8854 = vmatprep.subr.bf16.mxu0 %v12181_v9  ;;  %v3693_v52 = vld [vmem:[#allocation4 + $0xe0] sm:$0xff] }
 0x540   :  { %v12232_v9 = vld [vmem:[#allocation13 + $0x12e4] ss:$16 sps:$4 sm:$0xff]  }
 0x541   :  { %8892 = vmatpush2.bf16.msra.mxu1 %v12182_v53  ;;  %v3792_v53 = vsel %vm988_vm5, %v3693_v52, %v11784_v17  ;;  %v12256_v17 = vld [vmem:[#allocation13 + $0x1264] ss:$16 sps:$4 sm:$0xff]  }
 0x542   :  { %8855 = vmatpush2.bf16.msra.mxu0 %v12179_v57  ;;  %8893 = vmatprep.subr.bf16.mxu1 %v12190_v1  ;;  %v4648_v57 = vrot.slane %v4643_v42, %v4647_v39  ;;  %v12253_v39 = vld [vmem:[#allocation13 + $0x1024] ss:$16 sps:$4 sm:$0xff]  }
 0x543   :  { %8856 = vmatprep.subr.bf16.mxu0 %v12187_v59  ;;  %v12229_v59 = vld [vmem:[#allocation13 + $0x10a4] ss:$16 sps:$4 sm:$0xff]  }
 0x544   :  { %v12265_v52 = vld [vmem:[#allocation13 + $0x11e4] ss:$16 sps:$4 sm:$0xff]  }
 0x545   :  { %8894 = vmatpush2.bf16.msra.mxu1 %v12188_v50  ;;  %v3703_v50 = vld [vmem:[#allocation4 + $0x130] sm:$0xff] }
 0x546   :  { %8857 = vmatpush2.bf16.msra.mxu0 %v12185_v7  ;;  %8895 = vmatprep.subr.bf16.mxu1 %v12196_v25  ;;  %v3829_v7 = vsel %vm988_vm5, %v3703_v50, %v11793_v41  ;;  %v4652_v25 = vrot.slane %v4643_v42, %v4651_v47  ;;  %v12262_v41 = vld [vmem:[#allocation13 + $0x1244] ss:$16 sps:$4 sm:$0xff]   ;;  %v12257_v47 = vld [vmem:[#allocation13 + $0x1000] ss:$16 sps:$4 sm:$0xff]  }
 0x547   :  { %8858 = vmatprep.subr.bf16.mxu0 %v12193_v49  ;;  %v12259_v42 = vld [vmem:[#allocation13 + $0x1004] ss:$16 sps:$4 sm:$0xff]  }
 0x548   :  { %v12280_v50 = vld [vmem:[#allocation13 + $0x13e4] ss:$16 sps:$4 sm:$0xff]  }
 0x549   :  { %8896 = vmatpush2.bf16.msra.mxu1 %v12194_v18  ;;  %v12230_v18 = vld [vmem:[#allocation13 + $0x12e0] ss:$16 sps:$4 sm:$0xff]  }
 0x54a   :  { %8859 = vmatpush2.bf16.msra.mxu0 %v12191_v56  ;;  %8897 = vmatprep.subr.bf16.mxu1 %v12202_v61  ;;  %v14517_v56 = vpack.c.bf16 %v3792_v53, %v3792_v53  ;;  %v12227_v61 = vld [vmem:[#allocation13 + $0x10a0] ss:$16 sps:$4 sm:$0xff]   ;;  %v12274_v53 = vld [vmem:[#allocation13 + $0x1204] ss:$16 sps:$4 sm:$0xff]  }
 0x54b   :  { %8860 = vmatprep.subr.bf16.mxu0 %v12199_v63  ;;  %v12238_v63 = vld [vmem:[#allocation13 + $0x12c4] ss:$16 sps:$4 sm:$0xff]  }
 0x54d   :  { %8898 = vmatpush2.bf16.msra.mxu1 %v12200_v0 }
 0x54e   :  { %8861 = vmatpush2.bf16.msra.mxu0 %v12197_v19  ;;  %8899 = vmatprep.subr.bf16.mxu1 %v12208_v26  ;;  %v14519_v26 = vpack.c.bf16 %v3829_v7, %v3829_v7  ;;  %v12277_v7 = vld [vmem:[#allocation13 + $0x11a4] ss:$16 sps:$4 sm:$0xff]  }
 0x54f   :  { %8862 = vmatprep.subr.bf16.mxu0 %v12205_v54  ;;  %v12235_v54 = vld [vmem:[#allocation13 + $0x1084] ss:$16 sps:$4 sm:$0xff]  }
 0x551   :  { %8900 = vmatpush2.bf16.msra.mxu1 %v12206_v4 }
 0x552   :  { %8863 = vmatpush2.bf16.msra.mxu0 %v12203_v10  ;;  %8901 = vmatprep.subr.bf16.mxu1 %v12214_v11 }
 0x553   :  { %8864 = vmatprep.subr.bf16.mxu0 %v12211_v12  ;;  %v12236_v12 = vld [vmem:[#allocation13 + $0x12c0] ss:$16 sps:$4 sm:$0xff]  }
 0x555   :  { %8902 = vmatpush2.bf16.msra.mxu1 %v12212_v15 }
 0x556   :  { %8865 = vmatpush2.bf16.msra.mxu0 %v12209_v22  ;;  %8903 = vmatprep.subr.bf16.mxu1 %v12217_v60  ;;  %v12241_v22 = vld [vmem:[#allocation13 + $0x1064] ss:$16 sps:$4 sm:$0xff]  }
 0x557   :  { %8916 = vmatprep.subr.bf16.mxu0 %v12220_v29 }
 0x559   :  { %8867 = vmatmul.mubr.bf16.vlgmr.msra.gmra.mxu0 %v14505_v38  ;;  %v8622_v46 = vpop.f32.mrf.mxu0  ;;  %8904 = vmatpush2.bf16.msra.mxu1 %v12215_v28  ;;  %v12247_v28 = vld [vmem:[#allocation13 + $0x1044] ss:$16 sps:$4 sm:$0xff]  }
 0x55a   :  { %8917 = vmatpush1.bf16.msra.mxu0 %v12218_v35  ;;  %8948 = vmatprep.mubr.bf16.mxu0 %v14510_v45  ;;  %v8623_v0 = vadd.f32 %v8622_v46, %v4648_v57  ;;  %v12245_v35 = vld [vmem:[#allocation13 + $0x1040] ss:$16 sps:$4 sm:$0xff]   ;;  %v12271_v57 = vld [vmem:[#allocation13 + $0x11c4] ss:$16 sps:$4 sm:$0xff]  }
 0x55b   :  { %v8624_v1 = vpop.f32.mrf.mxu0  ;;  %8905 = vmatprep.subr.bf16.mxu1 %v12223_v40  ;;  %8918 = vmatprep.subr.bf16.mxu0 %v12226_v36  ;;  %v12254_v40 = vld [vmem:[#allocation13 + $0x1260] ss:$16 sps:$4 sm:$0xff]  }
 0x55c   :  { %v8625_v10 = vadd.f32 %v8624_v1, %v4652_v25  ;;  %v12251_v36 = vld [vmem:[#allocation13 + $0x1020] ss:$16 sps:$4 sm:$0xff]  }
 0x55d   :  { %v8626_v49 = vpop.f32.mrf.mxu0  ;;  %8906 = vmatpush2.bf16.msra.mxu1 %v12221_v51  ;;  %v12260_v46 = vld [vmem:[#allocation13 + $0x1240] ss:$16 sps:$4 sm:$0xff]   ;;  %v12268_v51 = vld [vmem:[#allocation13 + $0x1224] ss:$16 sps:$4 sm:$0xff]  }
 0x55e   :  { %8919 = vmatpush1.bf16.msra.mxu0 %v12224_v55  ;;  %8957 = vmatprep.subr.bf16.mxu1 %v12232_v9  ;;  %v12266_v55 = vld [vmem:[#allocation13 + $0x1220] ss:$16 sps:$4 sm:$0xff]  }
 0x55f   :  { %v8627_v19 = vpop.f32.mrf.mxu0  ;;  %8920 = vmatprep.subr.bf16.mxu0 %v12229_v59  ;;  %v12263_v9 = vld [vmem:[#allocation13 + $0x11e0] ss:$16 sps:$4 sm:$0xff]  }
 0x560   :  { %8908 = vmatmul.mubr.bf16.vlgmr.msra.gmra.mxu1 %v14517_v56  ;;  %v8663_v4 = vpop.f32.mrf.mxu1  ;;  %v12272_v1 = vld [vmem:[#allocation13 + $0x1200] ss:$16 sps:$4 sm:$0xff]   ;;  %v12292_v19 = vld [vmem:[#allocation13 + $0x13a4] ss:$16 sps:$4 sm:$0xff]  }
 0x561   :  { %v14522_v11 = vadd.f32 %v8663_v4, %v8623_v0  ;;  %8958 = vmatpush1.bf16.msra.mxu1 %v12230_v18  ;;  %8989 = vmatprep.mubr.bf16.mxu1 %v14519_v26  ;;  %v12269_v59 = vld [vmem:[#allocation13 + $0x11c0] ss:$16 sps:$4 sm:$0xff]   ;;  %v12286_v18 = vld [vmem:[#allocation13 + $0x13c4] ss:$16 sps:$4 sm:$0xff]  }
 0x562   :  { %8921 = vmatpush1.bf16.msra.mxu0 %v12227_v61  ;;  %v8665_v13 = vpop.f32.mrf.mxu1  ;;  %8959 = vmatprep.subr.bf16.mxu1 %v12238_v63  ;;  %v12278_v25 = vld [vmem:[#allocation13 + $0x13e0] ss:$16 sps:$4 sm:$0xff]   ;;  %v12283_v61 = vld [vmem:[#allocation13 + $0x1184] ss:$16 sps:$4 sm:$0xff]  }
 0x563   :  { %v14525_v15 = vadd.f32 %v8665_v13, %v8625_v10  ;;  %8922 = vmatprep.subr.bf16.mxu0 %v12235_v54  ;;  %v12275_v49 = vld [vmem:[#allocation13 + $0x11a0] ss:$16 sps:$4 sm:$0xff]   ;;  %v12289_v54 = vld [vmem:[#allocation13 + $0x1164] ss:$16 sps:$4 sm:$0xff]  }
 0x564   :  { %v8667_v60 = vpop.f32.mrf.mxu1  ;;  %v12284_v63 = vld [vmem:[#allocation13 + $0x13c0] ss:$16 sps:$4 sm:$0xff]   ;;  %v12295_v13 = vld [vmem:[#allocation13 + $0x1144] ss:$16 sps:$4 sm:$0xff]  }
 0x565   :  { %8960 = vmatpush1.bf16.msra.mxu1 %v12236_v12  ;;  %v12281_v0 = vld [vmem:[#allocation13 + $0x1180] ss:$16 sps:$4 sm:$0xff]   ;;  %v12298_v12 = vld [vmem:[#allocation13 + $0x1384] ss:$16 sps:$4 sm:$0xff]  }
 0x566   :  { %8923 = vmatpush1.bf16.msra.mxu0 %v12233_v14  ;;  %v8668_v29 = vpop.f32.mrf.mxu1  ;;  %8961 = vmatprep.subr.bf16.mxu1 %v12244_v20  ;;  %v12290_v4 = vld [vmem:[#allocation13 + $0x13a0] ss:$16 sps:$4 sm:$0xff]   ;;  %v12301_v60 = vld [vmem:[#allocation13 + $0x1124] ss:$16 sps:$4 sm:$0xff]  }
 0x567   :  { %8924 = vmatprep.subr.bf16.mxu0 %v12241_v22  ;;  %v12287_v10 = vld [vmem:[#allocation13 + $0x1160] ss:$16 sps:$4 sm:$0xff]   ;;  %v12304_v22 = vld [vmem:[#allocation13 + $0x1364] ss:$16 sps:$4 sm:$0xff]   ;;  %v14527_v29 = vpop.permute.xlu0 %11796 }
 0x568   :  { %v12296_v14 = vld [vmem:[#allocation13 + $0x1380] ss:$16 sps:$4 sm:$0xff]  }
 0x569   :  { %8962 = vmatpush1.bf16.msra.mxu1 %v12242_v23  ;;  %v12293_v20 = vld [vmem:[#allocation13 + $0x1140] ss:$16 sps:$4 sm:$0xff]  }
 0x56a   :  { %8925 = vmatpush1.bf16.msra.mxu0 %v12239_v32  ;;  %8963 = vmatprep.subr.bf16.mxu1 %v12250_v62  ;;  %v12302_v23 = vld [vmem:[#allocation13 + $0x1360] ss:$16 sps:$4 sm:$0xff]   ;;  %v12310_v62 = vld [vmem:[#allocation13 + $0x1344] ss:$16 sps:$4 sm:$0xff]  }
 0x56b   :  { %8926 = vmatprep.subr.bf16.mxu0 %v12247_v28  ;;  %v12299_v32 = vld [vmem:[#allocation13 + $0x1120] ss:$16 sps:$4 sm:$0xff]   ;;  %v12307_v28 = vld [vmem:[#allocation13 + $0x1104] ss:$16 sps:$4 sm:$0xff]  }
 0x56d   :  { %8964 = vmatpush1.bf16.msra.mxu1 %v12248_v30  ;;  %v11789_v30 = vunpack.i.h.bf16 %v14495_v5 }
 0x56e   :  { %8927 = vmatpush1.bf16.msra.mxu0 %v12245_v35  ;;  %8965 = vmatprep.subr.bf16.mxu1 %v12256_v17  ;;  %v11798_v35 = vunpack.i.l.bf16 %v14527_v29  ;;  %v12308_v17 = vld [vmem:[#allocation13 + $0x1340] ss:$16 sps:$4 sm:$0xff]  }
 0x56f   :  { %8928 = vmatprep.subr.bf16.mxu0 %v12253_v39  ;;  %v12305_v39 = vld [vmem:[#allocation13 + $0x1100] ss:$16 sps:$4 sm:$0xff]  }
 0x571   :  { %8966 = vmatpush1.bf16.msra.mxu1 %v12254_v40  ;;  %v12313_v40 = vld [vmem:[#allocation13 + $0x1324] ss:$16 sps:$4 sm:$0xff]  }
 0x572   :  { %8929 = vmatpush1.bf16.msra.mxu0 %v12251_v36  ;;  %8967 = vmatprep.subr.bf16.mxu1 %v12262_v41  ;;  %v3697_v36 = vld [vmem:[#allocation4 + $0x100] sm:$0xff] }
 0x573   :  { %8930 = vmatprep.subr.bf16.mxu0 %v12259_v42  ;;  %v12316_v41 = vld [vmem:[#allocation13 + $0x14e4] ss:$16 sps:$4 sm:$0xff]   ;;  %v3826_v42 = vsel %vm988_vm5, %v3697_v36, %v11789_v30 }
 0x574   :  { %v12340_v30 = vld [vmem:[#allocation13 + $0x16a4] ss:$16 sps:$4 sm:$0xff]  }
 0x575   :  { %8968 = vmatpush1.bf16.msra.mxu1 %v12260_v46  ;;  %v3707_v46 = vld [vmem:[#allocation4 + $0x150] sm:$0xff] }
 0x576   :  { %8931 = vmatpush1.bf16.msra.mxu0 %v12257_v47  ;;  %8969 = vmatprep.subr.bf16.mxu1 %v12268_v51  ;;  %v14532_v47 = vpop.permute.xlu1 %11801  ;;  %v12311_v51 = vld [vmem:[#allocation13 + $0x1320] ss:$16 sps:$4 sm:$0xff]   ;;  %v3831_v5 = vsel %vm988_vm5, %v3707_v46, %v11798_v35  ;;  %v12343_v46 = vld [vmem:[#allocation13 + $0x1444] ss:$16 sps:$4 sm:$0xff]  }
 0x577   :  { %8932 = vmatprep.subr.bf16.mxu0 %v12265_v52  ;;  %v12314_v52 = vld [vmem:[#allocation13 + $0x14e0] ss:$16 sps:$4 sm:$0xff]  }
 0x579   :  { %8970 = vmatpush1.bf16.msra.mxu1 %v12266_v55  ;;  %v14535_v55 = vpack.c.bf16 %v3826_v42, %v3826_v42  ;;  %v12346_v42 = vld [vmem:[#allocation13 + $0x1684] ss:$16 sps:$4 sm:$0xff]  }
 0x57a   :  { %8933 = vmatpush2.bf16.msra.mxu0 %v12263_v9  ;;  %8971 = vmatprep.subr.bf16.mxu1 %v12274_v53  ;;  %v11794_v9 = vunpack.i.h.bf16 %v14502_v34  ;;  %v12319_v53 = vld [vmem:[#allocation13 + $0x1304] ss:$16 sps:$4 sm:$0xff]  }
 0x57b   :  { %8934 = vmatprep.subr.bf16.mxu0 %v12271_v57  ;;  %v12322_v57 = vld [vmem:[#allocation13 + $0x14c4] ss:$16 sps:$4 sm:$0xff]  }
 0x57c   :  { %v12328_v34 = vld [vmem:[#allocation13 + $0x16e4] ss:$16 sps:$4 sm:$0xff]  }
 0x57d   :  { %8972 = vmatpush1.bf16.msra.mxu1 %v12272_v1  ;;  %v11803_v1 = vunpack.i.l.bf16 %v14532_v47 }
 0x57e   :  { %8935 = vmatpush2.bf16.msra.mxu0 %v12269_v59  ;;  %8973 = vmatprep.subr.bf16.mxu1 %v12280_v50  ;;  %v14539_v59 = vpack.c.bf16 %v3831_v5, %v3831_v5  ;;  %v12341_v5 = vld [vmem:[#allocation13 + $0x1440] ss:$16 sps:$4 sm:$0xff]  }
 0x57f   :  { %8936 = vmatprep.subr.bf16.mxu0 %v12277_v7  ;;  %v12317_v7 = vld [vmem:[#allocation13 + $0x1300] ss:$16 sps:$4 sm:$0xff]  }
 0x581   :  { %8974 = vmatpush2.bf16.msra.mxu1 %v12278_v25  ;;  %v3701_v25 = vld [vmem:[#allocation4 + $0x120] sm:$0xff] }
 0x582   :  { %8937 = vmatpush2.bf16.msra.mxu0 %v12275_v49  ;;  %8975 = vmatprep.subr.bf16.mxu1 %v12286_v18  ;;  %v12320_v18 = vld [vmem:[#allocation13 + $0x14c0] ss:$16 sps:$4 sm:$0xff]  }
 0x583   :  { %8938 = vmatprep.subr.bf16.mxu0 %v12283_v61  ;;  %v3828_v61 = vsel %vm988_vm5, %v3701_v25, %v11794_v9  ;;  %v12349_v9 = vld [vmem:[#allocation13 + $0x1424] ss:$16 sps:$4 sm:$0xff]   ;;  %v12353_v25 = vld [vmem:[#allocation13 + $0x1400] ss:$16 sps:$4 sm:$0xff]  }
 0x585   :  { %8976 = vmatpush2.bf16.msra.mxu1 %v12284_v63 }
 0x586   :  { %8939 = vmatpush2.bf16.msra.mxu0 %v12281_v0  ;;  %8977 = vmatprep.subr.bf16.mxu1 %v12292_v19  ;;  %v12325_v0 = vld [vmem:[#allocation13 + $0x14a4] ss:$16 sps:$4 sm:$0xff]  }
 0x587   :  { %8940 = vmatprep.subr.bf16.mxu0 %v12289_v54  ;;  %v3711_v19 = vld [vmem:[#allocation4 + $0x170] sm:$0xff] }
 0x589   :  { %8978 = vmatpush2.bf16.msra.mxu1 %v12290_v4  ;;  %v3833_v4 = vsel %vm988_vm5, %v3711_v19, %v11803_v1  ;;  %v12358_v1 = vld [vmem:[#allocation13 + $0x1644] ss:$16 sps:$4 sm:$0xff]   ;;  %v12368_v19 = vld [vmem:[#allocation13 + $0x1600] ss:$16 sps:$4 sm:$0xff]  }
 0x58a   :  { %8941 = vmatpush2.bf16.msra.mxu0 %v12287_v10  ;;  %8979 = vmatprep.subr.bf16.mxu1 %v12298_v12  ;;  %v12326_v12 = vld [vmem:[#allocation13 + $0x16e0] ss:$16 sps:$4 sm:$0xff]  }
 0x58b   :  { %8942 = vmatprep.subr.bf16.mxu0 %v12295_v13  ;;  %v12323_v13 = vld [vmem:[#allocation13 + $0x14a0] ss:$16 sps:$4 sm:$0xff]  }
 0x58d   :  { %8980 = vmatpush2.bf16.msra.mxu1 %v12296_v14  ;;  %v12334_v14 = vld [vmem:[#allocation13 + $0x16c4] ss:$16 sps:$4 sm:$0xff]  }
 0x58e   :  { %8943 = vmatpush2.bf16.msra.mxu0 %v12293_v20  ;;  %8981 = vmatprep.subr.bf16.mxu1 %v12304_v22  ;;  %v14549_v22 = vpack.c.bf16 %v3833_v4, %v3833_v4  ;;  %v12376_v4 = vld [vmem:[#allocation13 + $0x17e4] ss:$16 sps:$4 sm:$0xff]  }
 0x58f   :  { %8944 = vmatprep.subr.bf16.mxu0 %v12301_v60  ;;  %v12331_v60 = vld [vmem:[#allocation13 + $0x1484] ss:$16 sps:$4 sm:$0xff]  }
 0x591   :  { %8982 = vmatpush2.bf16.msra.mxu1 %v12302_v23 }
 0x592   :  { %8945 = vmatpush2.bf16.msra.mxu0 %v12299_v32  ;;  %8983 = vmatprep.subr.bf16.mxu1 %v12310_v62  ;;  %v12332_v32 = vld [vmem:[#allocation13 + $0x16c0] ss:$16 sps:$4 sm:$0xff]  }
 0x593   :  { %8946 = vmatprep.subr.bf16.mxu0 %v12307_v28  ;;  %v12329_v28 = vld [vmem:[#allocation13 + $0x1480] ss:$16 sps:$4 sm:$0xff]  }
 0x595   :  { %8984 = vmatpush2.bf16.msra.mxu1 %v12308_v17  ;;  %v12337_v17 = vld [vmem:[#allocation13 + $0x1464] ss:$16 sps:$4 sm:$0xff]  }
 0x596   :  { %8947 = vmatpush2.bf16.msra.mxu0 %v12305_v39  ;;  %8985 = vmatprep.subr.bf16.mxu1 %v12313_v40  ;;  %v12338_v40 = vld [vmem:[#allocation13 + $0x16a0] ss:$16 sps:$4 sm:$0xff]  }
 0x597   :  { %8998 = vmatprep.subr.bf16.mxu0 %v12316_v41  ;;  %v12335_v41 = vld [vmem:[#allocation13 + $0x1460] ss:$16 sps:$4 sm:$0xff]  }
 0x599   :  { %v8704_v50 = vpop.f32.mrf.mxu0  ;;  %8949 = vmatmul.mubr.bf16.vlgmr.msra.gmra.mxu0 %v14535_v55  ;;  %8986 = vmatpush2.bf16.msra.mxu1 %v12311_v51  ;;  %v12344_v51 = vld [vmem:[#allocation13 + $0x1680] ss:$16 sps:$4 sm:$0xff]  }
 0x59a   :  { %v8705_v49 = vadd.f32 %v8704_v50, %v14522_v11  ;;  %8999 = vmatpush1.bf16.msra.mxu0 %v12314_v52  ;;  %9030 = vmatprep.mubr.bf16.mxu0 %v14539_v59  ;;  %v14547_v11 = vpack.c.bf16 %v3828_v61, %v3828_v61  ;;  %v12352_v52 = vld [vmem:[#allocation13 + $0x1664] ss:$16 sps:$4 sm:$0xff]   ;;  %v12359_v61 = vld [vmem:[#allocation13 + $0x15e0] ss:$16 sps:$4 sm:$0xff]  }
 0x59b   :  { %v8706_v63 = vpop.f32.mrf.mxu0  ;;  %8987 = vmatprep.subr.bf16.mxu1 %v12319_v53  ;;  %9000 = vmatprep.subr.bf16.mxu0 %v12322_v57  ;;  %v12350_v53 = vld [vmem:[#allocation13 + $0x1660] ss:$16 sps:$4 sm:$0xff]   ;;  %v12355_v50 = vld [vmem:[#allocation13 + $0x1404] ss:$16 sps:$4 sm:$0xff]  }
 0x59c   :  { %v8707_v54 = vadd.f32 %v8706_v63, %v14525_v15  ;;  %v12347_v57 = vld [vmem:[#allocation13 + $0x1420] ss:$16 sps:$4 sm:$0xff]   ;;  %v12370_v63 = vld [vmem:[#allocation13 + $0x1604] ss:$16 sps:$4 sm:$0xff]  }
 0x59d   :  { %v8708_v10 = vpop.f32.mrf.mxu0  ;;  %8988 = vmatpush2.bf16.msra.mxu1 %v12317_v7  ;;  %v12356_v7 = vld [vmem:[#allocation13 + $0x1640] ss:$16 sps:$4 sm:$0xff]  }
 0x59e   :  { %9001 = vmatpush1.bf16.msra.mxu0 %v12320_v18  ;;  %9039 = vmatprep.subr.bf16.mxu1 %v12328_v34  ;;  %v12361_v18 = vld [vmem:[#allocation13 + $0x15e4] ss:$16 sps:$4 sm:$0xff]   ;;  %v12362_v34 = vld [vmem:[#allocation13 + $0x1620] ss:$16 sps:$4 sm:$0xff]  }
 0x59f   :  { %v8709_v20 = vpop.f32.mrf.mxu0  ;;  %9002 = vmatprep.subr.bf16.mxu0 %v12325_v0  ;;  %v12367_v0 = vld [vmem:[#allocation13 + $0x15c4] ss:$16 sps:$4 sm:$0xff]  }
 0x5a0   :  { %v8745_v23 = vpop.f32.mrf.mxu1  ;;  %8990 = vmatmul.mubr.bf16.vlgmr.msra.gmra.mxu1 %v14547_v11  ;;  %v12373_v10 = vld [vmem:[#allocation13 + $0x15a4] ss:$16 sps:$4 sm:$0xff]  }
 0x5a1   :  { %v14552_v15 = vadd.f32 %v8745_v23, %v8705_v49  ;;  %9040 = vmatpush1.bf16.msra.mxu1 %v12326_v12  ;;  %9071 = vmatprep.mubr.bf16.mxu1 %v14549_v22  ;;  %v12364_v49 = vld [vmem:[#allocation13 + $0x1624] ss:$16 sps:$4 sm:$0xff]   ;;  %v12374_v12 = vld [vmem:[#allocation13 + $0x17e0] ss:$16 sps:$4 sm:$0xff]  }
 0x5a2   :  { %9003 = vmatpush1.bf16.msra.mxu0 %v12323_v13  ;;  %v8747_v62 = vpop.f32.mrf.mxu1  ;;  %9041 = vmatprep.subr.bf16.mxu1 %v12334_v14  ;;  %v12371_v13 = vld [vmem:[#allocation13 + $0x15a0] ss:$16 sps:$4 sm:$0xff]   ;;  %v12382_v14 = vld [vmem:[#allocation13 + $0x17c4] ss:$16 sps:$4 sm:$0xff]  }
 0x5a3   :  { %v14555_v35 = vadd.f32 %v8747_v62, %v8707_v54  ;;  %9004 = vmatprep.subr.bf16.mxu0 %v12331_v60  ;;  %v12365_v54 = vld [vmem:[#allocation13 + $0x15c0] ss:$16 sps:$4 sm:$0xff]   ;;  %v12379_v20 = vld [vmem:[#allocation13 + $0x1584] ss:$16 sps:$4 sm:$0xff]  }
 0x5a4   :  { %v8749_v39 = vpop.f32.mrf.mxu1  ;;  %v12380_v60 = vld [vmem:[#allocation13 + $0x17c0] ss:$16 sps:$4 sm:$0xff]   ;;  %v12385_v62 = vld [vmem:[#allocation13 + $0x1564] ss:$16 sps:$4 sm:$0xff]  }
 0x5a5   :  { %9042 = vmatpush1.bf16.msra.mxu1 %v12332_v32  ;;  %v12377_v23 = vld [vmem:[#allocation13 + $0x1580] ss:$16 sps:$4 sm:$0xff]   ;;  %v12388_v32 = vld [vmem:[#allocation13 + $0x17a4] ss:$16 sps:$4 sm:$0xff]  }
 0x5a6   :  { %9005 = vmatpush1.bf16.msra.mxu0 %v12329_v28  ;;  %v8750_v36 = vpop.f32.mrf.mxu1  ;;  %9043 = vmatprep.subr.bf16.mxu1 %v12340_v30  ;;  %v12386_v28 = vld [vmem:[#allocation13 + $0x17a0] ss:$16 sps:$4 sm:$0xff]   ;;  %v12391_v39 = vld [vmem:[#allocation13 + $0x1544] ss:$16 sps:$4 sm:$0xff]  }
 0x5a7   :  { %9006 = vmatprep.subr.bf16.mxu0 %v12337_v17  ;;  %v12383_v30 = vld [vmem:[#allocation13 + $0x1560] ss:$16 sps:$4 sm:$0xff]   ;;  %v12394_v17 = vld [vmem:[#allocation13 + $0x1784] ss:$16 sps:$4 sm:$0xff]  }
 0x5a8   :  { %v12389_v36 = vld [vmem:[#allocation13 + $0x1540] ss:$16 sps:$4 sm:$0xff]  }
 0x5a9   :  { %9044 = vmatpush1.bf16.msra.mxu1 %v12338_v40  ;;  %v12392_v40 = vld [vmem:[#allocation13 + $0x1780] ss:$16 sps:$4 sm:$0xff]  }
 0x5aa   :  { %9007 = vmatpush1.bf16.msra.mxu0 %v12335_v41  ;;  %9045 = vmatprep.subr.bf16.mxu1 %v12346_v42  ;;  %v12400_v41 = vld [vmem:[#allocation13 + $0x1764] ss:$16 sps:$4 sm:$0xff]  }
 0x5ab   :  { %9008 = vmatprep.subr.bf16.mxu0 %v12343_v46  ;;  %v12397_v42 = vld [vmem:[#allocation13 + $0x1524] ss:$16 sps:$4 sm:$0xff]   ;;  %v12398_v46 = vld [vmem:[#allocation13 + $0x1760] ss:$16 sps:$4 sm:$0xff]  }
 0x5ad   :  { %9046 = vmatpush1.bf16.msra.mxu1 %v12344_v51  ;;  %v12395_v51 = vld [vmem:[#allocation13 + $0x1520] ss:$16 sps:$4 sm:$0xff]  }
 0x5ae   :  { %9009 = vmatpush1.bf16.msra.mxu0 %v12341_v5  ;;  %9047 = vmatprep.subr.bf16.mxu1 %v12352_v52  ;;  %v12406_v5 = vld [vmem:[#allocation13 + $0x1744] ss:$16 sps:$4 sm:$0xff]  }
 0x5af   :  { %9010 = vmatprep.subr.bf16.mxu0 %v12349_v9  ;;  %v12403_v52 = vld [vmem:[#allocation13 + $0x1504] ss:$16 sps:$4 sm:$0xff]   ;;  %v11799_v9 = vunpack.i.h.bf16 %v14527_v29  ;;  %v11804_v29 = vunpack.i.h.bf16 %v14532_v47  ;;  %v13252_v47 = vmov 0  }
 0x5b1   :  { %9048 = vmatpush1.bf16.msra.mxu1 %v12350_v53  ;;  %v12404_v53 = vld [vmem:[#allocation13 + $0x1740] ss:$16 sps:$4 sm:$0xff]  }
 0x5b2   :  { %9011 = vmatpush1.bf16.msra.mxu0 %v12347_v57  ;;  %9049 = vmatprep.subr.bf16.mxu1 %v12358_v1  ;;  %v12401_v57 = vld [vmem:[#allocation13 + $0x1500] ss:$16 sps:$4 sm:$0xff]   ;;  %v12409_v1 = vld [vmem:[#allocation13 + $0x1724] ss:$16 sps:$4 sm:$0xff]  }
 0x5b3   :  { %9012 = vmatprep.subr.bf16.mxu0 %v12355_v50  ;;  %v3705_v50 = vld [vmem:[#allocation4 + $0x140] sm:$0xff] }
 0x5b5   :  { %9050 = vmatpush1.bf16.msra.mxu1 %v12356_v7  ;;  %v12412_v7 = vld [vmem:[#allocation13 + $0x1864] ss:$16 sps:$4 sm:$0xff]  }
 0x5b6   :  { %9013 = vmatpush1.bf16.msra.mxu0 %v12353_v25  ;;  %9051 = vmatprep.subr.bf16.mxu1 %v12364_v49  ;;  %v3830_v25 = vsel %vm988_vm5, %v3705_v50, %v11799_v9  ;;  %v12407_v49 = vld [vmem:[#allocation13 + $0x1720] ss:$16 sps:$4 sm:$0xff]   ;;  %v12431_v9 = vld [vmem:[#allocation13 + $0xa8] ss:$16 sps:$4 sm:$0xff]   ;;  %v12442_v50 = vld [vmem:[#allocation13 + $0x2cc] ss:$16 sps:$4 sm:$0xff]  }
 0x5b7   :  { %9014 = vmatprep.subr.bf16.mxu0 %v12361_v18  ;;  %v12410_v18 = vld [vmem:[#allocation13 + $0x1860] ss:$16 sps:$4 sm:$0xff]  }
 0x5b9   :  { %9052 = vmatpush1.bf16.msra.mxu1 %v12362_v34  ;;  %v12415_v34 = vld [vmem:[#allocation13 + $0x1704] ss:$16 sps:$4 sm:$0xff]  }
 0x5ba   :  { %9015 = vmatpush2.bf16.msra.mxu0 %v12359_v61  ;;  %9053 = vmatprep.subr.bf16.mxu1 %v12370_v63  ;;  %v14559_v61 = vpack.c.bf16 %v3830_v25, %v3830_v25  ;;  %v12418_v63 = vld [vmem:[#allocation13 + $0x1844] ss:$16 sps:$4 sm:$0xff]   ;;  %v12440_v25 = vld [vmem:[#allocation13 + $0x2c8] ss:$16 sps:$4 sm:$0xff]  }
 0x5bb   :  { %9016 = vmatprep.subr.bf16.mxu0 %v12367_v0 }
 0x5bd   :  { %9054 = vmatpush1.bf16.msra.mxu1 %v12368_v19  ;;  %v12413_v19 = vld [vmem:[#allocation13 + $0x1700] ss:$16 sps:$4 sm:$0xff]  }
 0x5be   :  { %9017 = vmatpush2.bf16.msra.mxu0 %v12365_v54  ;;  %9055 = vmatprep.subr.bf16.mxu1 %v12376_v4  ;;  %v3709_v54 = vld [vmem:[#allocation4 + $0x160] sm:$0xff] }
 0x5bf   :  { %9018 = vmatprep.subr.bf16.mxu0 %v12373_v10  ;;  %v12416_v10 = vld [vmem:[#allocation13 + $0x1840] ss:$16 sps:$4 sm:$0xff]  }
 0x5c1   :  { %9056 = vmatpush2.bf16.msra.mxu1 %v12374_v12  ;;  %v12424_v12 = vld [vmem:[#allocation13 + $0xec] ss:$16 sps:$4 sm:$0xff]  }
 0x5c2   :  { %9019 = vmatpush2.bf16.msra.mxu0 %v12371_v13  ;;  %9057 = vmatprep.subr.bf16.mxu1 %v12382_v14  ;;  %v3832_v13 = vsel %vm988_vm5, %v3709_v54, %v11804_v29  ;;  %v12446_v29 = vld [vmem:[#allocation13 + $0x2a8] ss:$16 sps:$4 sm:$0xff]  }
 0x5c3   :  { %9020 = vmatprep.subr.bf16.mxu0 %v12379_v20  ;;  %v12421_v20 = vld [vmem:[#allocation13 + $0x1824] ss:$16 sps:$4 sm:$0xff]   ;;  %v12452_v54 = vld [vmem:[#allocation13 + $0x288] ss:$16 sps:$4 sm:$0xff]  }
 0x5c5   :  { %9058 = vmatpush2.bf16.msra.mxu1 %v12380_v60 }
 0x5c6   :  { %9021 = vmatpush2.bf16.msra.mxu0 %v12377_v23  ;;  %9059 = vmatprep.subr.bf16.mxu1 %v12388_v32  ;;  %v12422_v32 = vld [vmem:[#allocation13 + $0xe8] ss:$16 sps:$4 sm:$0xff]  }
 0x5c7   :  { %9022 = vmatprep.subr.bf16.mxu0 %v12385_v62  ;;  %v14567_v62 = vpack.c.bf16 %v3832_v13, %v3832_v13  ;;  %v12463_v13 = vld [vmem:[#allocation13 + $0xc] ss:$16 sps:$4 sm:$0xff]  }
 0x5c9   :  { %9060 = vmatpush2.bf16.msra.mxu1 %v12386_v28  ;;  %v12430_v28 = vld [vmem:[#allocation13 + $0xcc] ss:$16 sps:$4 sm:$0xff]  }
 0x5ca   :  { %9023 = vmatpush2.bf16.msra.mxu0 %v12383_v30  ;;  %9061 = vmatprep.subr.bf16.mxu1 %v12394_v17  ;;  %v12427_v17 = vld [vmem:[#allocation13 + $0x1804] ss:$16 sps:$4 sm:$0xff]  }
 0x5cb   :  { %9024 = vmatprep.subr.bf16.mxu0 %v12391_v39 }
 0x5cd   :  { %9062 = vmatpush2.bf16.msra.mxu1 %v12392_v40 }
 0x5ce   :  { %9025 = vmatpush2.bf16.msra.mxu0 %v12389_v36  ;;  %9063 = vmatprep.subr.bf16.mxu1 %v12400_v41  ;;  %v12425_v41 = vld [vmem:[#allocation13 + $0x1800] ss:$16 sps:$4 sm:$0xff]  }
 0x5cf   :  { %9026 = vmatprep.subr.bf16.mxu0 %v12397_v42  ;;  %v12433_v42 = vld [vmem:[#allocation13 + $0xac] ss:$16 sps:$4 sm:$0xff]  }
 0x5d1   :  { %9064 = vmatpush2.bf16.msra.mxu1 %v12398_v46 }
 0x5d2   :  { %9027 = vmatpush2.bf16.msra.mxu0 %v12395_v51  ;;  %9065 = vmatprep.subr.bf16.mxu1 %v12406_v5  ;;  %v12436_v51 = vld [vmem:[#allocation13 + $0x2ec] ss:$16 sps:$4 sm:$0xff]  }
 0x5d3   :  { %9028 = vmatprep.subr.bf16.mxu0 %v12403_v52  ;;  %v3713_v52 = vld [vmem:[#allocation4 + $0x180] sm:$0xff] }
 0x5d5   :  { %9066 = vmatpush2.bf16.msra.mxu1 %v12404_v53 }
 0x5d6   :  { %9029 = vmatpush2.bf16.msra.mxu0 %v12401_v57  ;;  %9067 = vmatprep.subr.bf16.mxu1 %v12409_v1  ;;  %v12434_v57 = vld [vmem:[#allocation13 + $0x2e8] ss:$16 sps:$4 sm:$0xff]   ;;  %v14575_v1 = vpack.c.bf16 %v3713_v52, %v3713_v52  ;;  %v12490_v52 = vld [vmem:[#allocation13 + $0x3cc] ss:$16 sps:$4 sm:$0xff]  }
 0x5d7   :  { %9088 = vmatprep.subr.bf16.mxu0 %v12412_v7  ;;  %v12437_v7 = vld [vmem:[#allocation13 + $0x88] ss:$16 sps:$4 sm:$0xff]  }
 0x5d9   :  { %v8786_v0 = vpop.f32.mrf.mxu0  ;;  %9031 = vmatmul.mubr.bf16.vlgmr.msra.gmra.mxu0 %v14559_v61  ;;  %9068 = vmatpush2.bf16.msra.mxu1 %v12407_v49  ;;  %v12445_v49 = vld [vmem:[#allocation13 + $0x6c] ss:$16 sps:$4 sm:$0xff]  }
 0x5da   :  { %v8787_v4 = vadd.f32 %v8786_v0, %v14552_v15  ;;  %9089 = vmatpush1.bf16.msra.mxu0 %v12410_v18  ;;  %9069 = vmatprep.subr.bf16.mxu1 %v12415_v34  ;;  %v12419_v15 = vld [vmem:[#allocation13 + $0x1820] ss:$16 sps:$4 sm:$0xff]   ;;  %v12448_v18 = vld [vmem:[#allocation13 + $0x2ac] ss:$16 sps:$4 sm:$0xff]   ;;  %v12443_v34 = vld [vmem:[#allocation13 + $0x68] ss:$16 sps:$4 sm:$0xff]  }
 0x5db   :  { %v8788_v14 = vpop.f32.mrf.mxu0  ;;  %9090 = vmatprep.subr.bf16.mxu0 %v12418_v63  ;;  %9112 = vmatprep.mubr.bf16.mxu0 %v13252_v47  ;;  %v12451_v63 = vld [vmem:[#allocation13 + $0x4c] ss:$16 sps:$4 sm:$0xff]  }
 0x5dc   :  { %v8789_v60 = vadd.f32 %v8788_v14, %v14555_v35  ;;  %v12428_v35 = vld [vmem:[#allocation13 + $0xc8] ss:$16 sps:$4 sm:$0xff]   ;;  %v12454_v0 = vld [vmem:[#allocation13 + $0x28c] ss:$16 sps:$4 sm:$0xff]  }
 0x5dd   :  { %v8790_v23 = vpop.f32.mrf.mxu0  ;;  %9070 = vmatpush2.bf16.msra.mxu1 %v12413_v19  ;;  %v12449_v19 = vld [vmem:[#allocation13 + $0x48] ss:$16 sps:$4 sm:$0xff]   ;;  %v12466_v14 = vld [vmem:[#allocation13 + $0x24c] ss:$16 sps:$4 sm:$0xff]  }
 0x5de   :  { %9091 = vmatpush1.bf16.msra.mxu0 %v12416_v10  ;;  %9121 = vmatprep.subr.bf16.mxu1 %v12424_v12  ;;  %v12455_v10 = vld [vmem:[#allocation13 + $0x28] ss:$16 sps:$4 sm:$0xff]   ;;  %v12469_v23 = vld [vmem:[#allocation13 + $0x1ec] ss:$16 sps:$4 sm:$0xff]  }
 0x5df   :  { %v8791_v30 = vpop.f32.mrf.mxu0  ;;  %9092 = vmatprep.subr.bf16.mxu0 %v12421_v20  ;;  %v12458_v12 = vld [vmem:[#allocation13 + $0x268] ss:$16 sps:$4 sm:$0xff]  }
 0x5e0   :  { %v8827_v39 = vpop.f32.mrf.mxu1  ;;  %9072 = vmatmul.mubr.bf16.vlgmr.msra.gmra.mxu1 %v14567_v62  ;;  %v12461_v20 = vld [vmem:[#allocation13 + $0x8] ss:$16 sps:$4 sm:$0xff]   ;;  %v12475_v30 = vld [vmem:[#allocation13 + $0x1cc] ss:$16 sps:$4 sm:$0xff]  }
 0x5e1   :  { %v14570_v40 = vadd.f32 %v8827_v39, %v8787_v4  ;;  %9122 = vmatpush1.bf16.msra.mxu1 %v12422_v32  ;;  %9153 = vmatprep.mubr.bf16.mxu1 %v14421_v48  ;;  %v12439_v48 = vld [vmem:[#allocation13 + $0x8c] ss:$16 sps:$4 sm:$0xff]   ;;  %v12473_v39 = vld [vmem:[#allocation13 + $0x1c8] ss:$16 sps:$4 sm:$0xff]  }
 0x5e2   :  { %9093 = vmatpush1.bf16.msra.mxu0 %v12419_v15  ;;  %v8829_v36 = vpop.f32.mrf.mxu1  ;;  %9123 = vmatprep.subr.bf16.mxu1 %v12430_v28  ;;  %v12457_v4 = vld [vmem:[#allocation13 + $0x2c] ss:$16 sps:$4 sm:$0xff]   ;;  %v12467_v15 = vld [vmem:[#allocation13 + $0x1e8] ss:$16 sps:$4 sm:$0xff]  }
 0x5e3   :  { %v14573_v46 = vadd.f32 %v8829_v36, %v8789_v60  ;;  %9094 = vmatprep.subr.bf16.mxu0 %v12427_v17  ;;  %v12464_v60 = vld [vmem:[#allocation13 + $0x248] ss:$16 sps:$4 sm:$0xff]   ;;  %v12472_v32 = vld [vmem:[#allocation13 + $0x22c] ss:$16 sps:$4 sm:$0xff]  }
 0x5e4   :  { %v8831_v5 = vpop.f32.mrf.mxu1  ;;  %v12470_v28 = vld [vmem:[#allocation13 + $0x228] ss:$16 sps:$4 sm:$0xff]   ;;  %v12478_v17 = vld [vmem:[#allocation13 + $0x20c] ss:$16 sps:$4 sm:$0xff]  }
 0x5e5   :  { %9124 = vmatpush1.bf16.msra.mxu1 %v12428_v35  ;;  %v12476_v35 = vld [vmem:[#allocation13 + $0x208] ss:$16 sps:$4 sm:$0xff]   ;;  %v12481_v36 = vld [vmem:[#allocation13 + $0x1ac] ss:$16 sps:$4 sm:$0xff]  }
 0x5e6   :  { %9095 = vmatpush1.bf16.msra.mxu0 %v12425_v41  ;;  %v8832_v53 = vpop.f32.mrf.mxu1  ;;  %9125 = vmatprep.subr.bf16.mxu1 %v12433_v42  ;;  %v12484_v41 = vld [vmem:[#allocation13 + $0x3ec] ss:$16 sps:$4 sm:$0xff]   ;;  %v12479_v42 = vld [vmem:[#allocation13 + $0x1a8] ss:$16 sps:$4 sm:$0xff]  }
 0x5e7   :  { %9162 = vmatprep.subr.bf16.mxu0 %v12436_v51  ;;  %v12482_v51 = vld [vmem:[#allocation13 + $0x3e8] ss:$16 sps:$4 sm:$0xff]   ;;  %v12487_v5 = vld [vmem:[#allocation13 + $0x18c] ss:$16 sps:$4 sm:$0xff]  }
 0x5e8   :  { %v12488_v53 = vld [vmem:[#allocation13 + $0x3c8] ss:$16 sps:$4 sm:$0xff]  }
 0x5e9   :  { %10993 = vmatmul.mubr.msk.bf16.vlgmr.msra.gmra.mxu0 %vm988_vm5, %v14575_v1  ;;  %9126 = vmatpush1.bf16.msra.mxu1 %v12431_v9  ;;  %v12485_v9 = vld [vmem:[#allocation13 + $0x188] ss:$16 sps:$4 sm:$0xff]  }
 0x5ea   :  { %9163 = vmatpush1.bf16.msra.mxu0 %v12434_v57  ;;  %9194 = vmatprep.mubr.bf16.mxu0 %v14429_v3  ;;  %v12460_v3 = vld [vmem:[#allocation13 + $0x26c] ss:$16 sps:$4 sm:$0xff]  }
 0x5eb   :  { %9127 = vmatprep.subr.bf16.mxu1 %v12439_v48  ;;  %9164 = vmatprep.subr.bf16.mxu0 %v12442_v50  ;;  %v12493_v57 = vld [vmem:[#allocation13 + $0x16c] ss:$16 sps:$4 sm:$0xff]   ;;  %v12491_v50 = vld [vmem:[#allocation13 + $0x168] ss:$16 sps:$4 sm:$0xff]  }
 0x5ec   :  { %v12496_v48 = vld [vmem:[#allocation13 + $0x3ac] ss:$16 sps:$4 sm:$0xff]  }
 0x5ed   :  { %9128 = vmatpush1.bf16.msra.mxu1 %v12437_v7  ;;  %v12494_v7 = vld [vmem:[#allocation13 + $0x3a8] ss:$16 sps:$4 sm:$0xff]  }
 0x5ee   :  { %9165 = vmatpush1.bf16.msra.mxu0 %v12440_v25  ;;  %9129 = vmatprep.subr.bf16.mxu1 %v12445_v49  ;;  %v12499_v25 = vld [vmem:[#allocation13 + $0x14c] ss:$16 sps:$4 sm:$0xff]  }
 0x5ef   :  { %9166 = vmatprep.subr.bf16.mxu0 %v12448_v18  ;;  %v12502_v49 = vld [vmem:[#allocation13 + $0x38c] ss:$16 sps:$4 sm:$0xff]   ;;  %v12497_v18 = vld [vmem:[#allocation13 + $0x148] ss:$16 sps:$4 sm:$0xff]  }
 0x5f1   :  { %9130 = vmatpush1.bf16.msra.mxu1 %v12443_v34  ;;  %v12500_v34 = vld [vmem:[#allocation13 + $0x388] ss:$16 sps:$4 sm:$0xff]  }
 0x5f2   :  { %9167 = vmatpush1.bf16.msra.mxu0 %v12446_v29  ;;  %9131 = vmatprep.subr.bf16.mxu1 %v12451_v63  ;;  %v12505_v29 = vld [vmem:[#allocation13 + $0x12c] ss:$16 sps:$4 sm:$0xff]  }
 0x5f3   :  { %9168 = vmatprep.subr.bf16.mxu0 %v12454_v0  ;;  %v12508_v63 = vld [vmem:[#allocation13 + $0x36c] ss:$16 sps:$4 sm:$0xff]   ;;  %v12503_v0 = vld [vmem:[#allocation13 + $0x128] ss:$16 sps:$4 sm:$0xff]  }
 0x5f5   :  { %9132 = vmatpush1.bf16.msra.mxu1 %v12449_v19  ;;  %v12506_v19 = vld [vmem:[#allocation13 + $0x368] ss:$16 sps:$4 sm:$0xff]  }
 0x5f6   :  { %9169 = vmatpush1.bf16.msra.mxu0 %v12452_v54  ;;  %9133 = vmatprep.subr.bf16.mxu1 %v12457_v4  ;;  %v12511_v54 = vld [vmem:[#allocation13 + $0x10c] ss:$16 sps:$4 sm:$0xff]  }
 0x5f7   :  { %9170 = vmatprep.subr.bf16.mxu0 %v12460_v3  ;;  %v12514_v4 = vld [vmem:[#allocation13 + $0x34c] ss:$16 sps:$4 sm:$0xff]  }
 0x5f9   :  { %9134 = vmatpush1.bf16.msra.mxu1 %v12455_v10  ;;  %v12509_v10 = vld [vmem:[#allocation13 + $0x108] ss:$16 sps:$4 sm:$0xff]  }
 0x5fa   :  { %9171 = vmatpush1.bf16.msra.mxu0 %v12458_v12  ;;  %9135 = vmatprep.subr.bf16.mxu1 %v12463_v13  ;;  %v12512_v13 = vld [vmem:[#allocation13 + $0x348] ss:$16 sps:$4 sm:$0xff]  }
 0x5fb   :  { %9172 = vmatprep.subr.bf16.mxu0 %v12466_v14  ;;  %v12520_v14 = vld [vmem:[#allocation13 + $0x4ec] ss:$16 sps:$4 sm:$0xff]  }
 0x5fd   :  { %9136 = vmatpush1.bf16.msra.mxu1 %v12461_v20 }
 0x5fe   :  { %9173 = vmatpush1.bf16.msra.mxu0 %v12464_v60  ;;  %9137 = vmatprep.subr.bf16.mxu1 %v12469_v23  ;;  %v12517_v60 = vld [vmem:[#allocation13 + $0x32c] ss:$16 sps:$4 sm:$0xff]  }
 0x5ff   :  { %9174 = vmatprep.subr.bf16.mxu0 %v12472_v32 }
 0x601   :  { %9138 = vmatpush2.bf16.msra.mxu1 %v12467_v15  ;;  %v12518_v15 = vld [vmem:[#allocation13 + $0x4e8] ss:$16 sps:$4 sm:$0xff]  }
 0x602   :  { %9175 = vmatpush1.bf16.msra.mxu0 %v12470_v28  ;;  %9139 = vmatprep.subr.bf16.mxu1 %v12475_v30  ;;  %v12515_v28 = vld [vmem:[#allocation13 + $0x328] ss:$16 sps:$4 sm:$0xff]   ;;  %v12526_v30 = vld [vmem:[#allocation13 + $0x4cc] ss:$16 sps:$4 sm:$0xff]  }
 0x603   :  { %9176 = vmatprep.subr.bf16.mxu0 %v12478_v17 }
 0x605   :  { %9140 = vmatpush2.bf16.msra.mxu1 %v12473_v39  ;;  %v12523_v39 = vld [vmem:[#allocation13 + $0x30c] ss:$16 sps:$4 sm:$0xff]  }
 0x606   :  { %9177 = vmatpush1.bf16.msra.mxu0 %v12476_v35  ;;  %9141 = vmatprep.subr.bf16.mxu1 %v12481_v36  ;;  %v12524_v36 = vld [vmem:[#allocation13 + $0x4c8] ss:$16 sps:$4 sm:$0xff]  }
 0x607   :  { %9178 = vmatprep.subr.bf16.mxu0 %v12484_v41  ;;  %v12521_v41 = vld [vmem:[#allocation13 + $0x308] ss:$16 sps:$4 sm:$0xff]  }
 0x609   :  { %9142 = vmatpush2.bf16.msra.mxu1 %v12479_v42  ;;  %v12529_v42 = vld [vmem:[#allocation13 + $0x4ac] ss:$16 sps:$4 sm:$0xff]  }
 0x60a   :  { %9179 = vmatpush2.bf16.msra.mxu0 %v12482_v51  ;;  %9143 = vmatprep.subr.bf16.mxu1 %v12487_v5  ;;  %v12532_v5 = vld [vmem:[#allocation13 + $0x6ec] ss:$16 sps:$4 sm:$0xff]  }
 0x60b   :  { %9180 = vmatprep.subr.bf16.mxu0 %v12490_v52 }
 0x60d   :  { %9144 = vmatpush2.bf16.msra.mxu1 %v12485_v9  ;;  %v12527_v9 = vld [vmem:[#allocation13 + $0x4a8] ss:$16 sps:$4 sm:$0xff]  }
 0x60e   :  { %9181 = vmatpush2.bf16.msra.mxu0 %v12488_v53  ;;  %9145 = vmatprep.subr.bf16.mxu1 %v12493_v57  ;;  %v12530_v53 = vld [vmem:[#allocation13 + $0x6e8] ss:$16 sps:$4 sm:$0xff]   ;;  %v12535_v57 = vld [vmem:[#allocation13 + $0x48c] ss:$16 sps:$4 sm:$0xff]  }
 0x60f   :  { %9182 = vmatprep.subr.bf16.mxu0 %v12496_v48  ;;  %v12533_v48 = vld [vmem:[#allocation13 + $0x488] ss:$16 sps:$4 sm:$0xff]  }
 0x611   :  { %9146 = vmatpush2.bf16.msra.mxu1 %v12491_v50  ;;  %v12536_v50 = vld [vmem:[#allocation13 + $0x6c8] ss:$16 sps:$4 sm:$0xff]  }
 0x612   :  { %9183 = vmatpush2.bf16.msra.mxu0 %v12494_v7  ;;  %9147 = vmatprep.subr.bf16.mxu1 %v12499_v25  ;;  %v12541_v7 = vld [vmem:[#allocation13 + $0x46c] ss:$16 sps:$4 sm:$0xff]  }
 0x613   :  { %9184 = vmatprep.subr.bf16.mxu0 %v12502_v49  ;;  %v12544_v25 = vld [vmem:[#allocation13 + $0x6ac] ss:$16 sps:$4 sm:$0xff]   ;;  %v12539_v49 = vld [vmem:[#allocation13 + $0x468] ss:$16 sps:$4 sm:$0xff]  }
 0x615   :  { %9148 = vmatpush2.bf16.msra.mxu1 %v12497_v18  ;;  %v12542_v18 = vld [vmem:[#allocation13 + $0x6a8] ss:$16 sps:$4 sm:$0xff]  }
 0x616   :  { %9185 = vmatpush2.bf16.msra.mxu0 %v12500_v34  ;;  %9149 = vmatprep.subr.bf16.mxu1 %v12505_v29  ;;  %v12547_v34 = vld [vmem:[#allocation13 + $0x44c] ss:$16 sps:$4 sm:$0xff]  }
 0x617   :  { %9186 = vmatprep.subr.bf16.mxu0 %v12508_v63  ;;  %v12550_v29 = vld [vmem:[#allocation13 + $0x68c] ss:$16 sps:$4 sm:$0xff]   ;;  %v12548_v63 = vld [vmem:[#allocation13 + $0x688] ss:$16 sps:$4 sm:$0xff]  }
 0x619   :  { %v8868_v3 = vpop.f32.mrf.mxu0  ;;  %9150 = vmatpush2.bf16.msra.mxu1 %v12503_v0  ;;  %v12553_v0 = vld [vmem:[#allocation13 + $0x42c] ss:$16 sps:$4 sm:$0xff]  }
 0x61a   :  { %v8869_v12 = vadd.f32 %v8868_v3, %v14570_v40  ;;  %9187 = vmatpush2.bf16.msra.mxu0 %v12506_v19  ;;  %9151 = vmatprep.subr.bf16.mxu1 %v12511_v54  ;;  %v12551_v19 = vld [vmem:[#allocation13 + $0x428] ss:$16 sps:$4 sm:$0xff]   ;;  %v12562_v3 = vld [vmem:[#allocation13 + $0x64c] ss:$16 sps:$4 sm:$0xff]  }
 0x61b   :  { %v8870_v20 = vpop.f32.mrf.mxu0  ;;  %9188 = vmatprep.subr.bf16.mxu0 %v12514_v4  ;;  %v12554_v54 = vld [vmem:[#allocation13 + $0x668] ss:$16 sps:$4 sm:$0xff]   ;;  %v12559_v4 = vld [vmem:[#allocation13 + $0x40c] ss:$16 sps:$4 sm:$0xff]  }
 0x61c   :  { %v8871_v23 = vadd.f32 %v8870_v20, %v14573_v46  ;;  %v12563_v20 = vld [vmem:[#allocation13 + $0x5e8] ss:$16 sps:$4 sm:$0xff]  }
 0x61d   :  { %v8872_v32 = vpop.f32.mrf.mxu0  ;;  %9152 = vmatpush2.bf16.msra.mxu1 %v12509_v10  ;;  %v12557_v10 = vld [vmem:[#allocation13 + $0x408] ss:$16 sps:$4 sm:$0xff]  }
 0x61e   :  { %9189 = vmatpush2.bf16.msra.mxu0 %v12512_v13  ;;  %9203 = vmatprep.subr.bf16.mxu1 %v12520_v14  ;;  %v12565_v13 = vld [vmem:[#allocation13 + $0x5ec] ss:$16 sps:$4 sm:$0xff]  }
 0x61f   :  { %v8873_v17 = vpop.f32.mrf.mxu0  ;;  %9190 = vmatprep.subr.bf16.mxu0 %v12517_v60  ;;  %v12568_v14 = vld [vmem:[#allocation13 + $0x62c] ss:$16 sps:$4 sm:$0xff]   ;;  %v12566_v60 = vld [vmem:[#allocation13 + $0x628] ss:$16 sps:$4 sm:$0xff]  }
 0x620   :  { %v8909_v40 = vpop.f32.mrf.mxu1  ;;  %9154 = vmatmul.mubr.bf16.vlgmr.msra.gmra.mxu1 %v14419_v21  ;;  %v12574_v32 = vld [vmem:[#allocation13 + $0x60c] ss:$16 sps:$4 sm:$0xff]  }
 0x621   :  { %v14583_v35 = vadd.f32 %v8909_v40, %v8869_v12  ;;  %9204 = vmatpush1.bf16.msra.mxu1 %v12518_v15  ;;  %9235 = vmatprep.mubr.bf16.mxu1 %v14437_v24  ;;  %v12538_v24 = vld [vmem:[#allocation13 + $0x6cc] ss:$16 sps:$4 sm:$0xff]   ;;  %v12560_v12 = vld [vmem:[#allocation13 + $0x648] ss:$16 sps:$4 sm:$0xff]  }
 0x622   :  { %9191 = vmatpush2.bf16.msra.mxu0 %v12515_v28  ;;  %v8911_v46 = vpop.f32.mrf.mxu1  ;;  %9205 = vmatprep.subr.bf16.mxu1 %v12526_v30  ;;  %v12569_v15 = vld [vmem:[#allocation13 + $0x5c8] ss:$16 sps:$4 sm:$0xff]   ;;  %v12577_v30 = vld [vmem:[#allocation13 + $0x5ac] ss:$16 sps:$4 sm:$0xff]  }
 0x623   :  { %v14586_v51 = vadd.f32 %v8911_v46, %v8871_v23  ;;  %9192 = vmatprep.subr.bf16.mxu0 %v12523_v39  ;;  %v12571_v23 = vld [vmem:[#allocation13 + $0x5cc] ss:$16 sps:$4 sm:$0xff]   ;;  %v12572_v28 = vld [vmem:[#allocation13 + $0x608] ss:$16 sps:$4 sm:$0xff]  }
 0x624   :  { %v8913_v52 = vpop.f32.mrf.mxu1  ;;  %v12580_v17 = vld [vmem:[#allocation13 + $0x7ec] ss:$16 sps:$4 sm:$0xff]   ;;  %v12575_v39 = vld [vmem:[#allocation13 + $0x5a8] ss:$16 sps:$4 sm:$0xff]  }
 0x625   :  { %9206 = vmatpush1.bf16.msra.mxu1 %v12524_v36  ;;  %v12578_v40 = vld [vmem:[#allocation13 + $0x7e8] ss:$16 sps:$4 sm:$0xff]   ;;  %v12583_v36 = vld [vmem:[#allocation13 + $0x58c] ss:$16 sps:$4 sm:$0xff]  }
 0x626   :  { %9193 = vmatpush2.bf16.msra.mxu0 %v12521_v41  ;;  %v8914_v21 = vpop.f32.mrf.mxu1  ;;  %9207 = vmatprep.subr.bf16.mxu1 %v12529_v42  ;;  %v12586_v46 = vld [vmem:[#allocation13 + $0x7cc] ss:$16 sps:$4 sm:$0xff]   ;;  %v12581_v41 = vld [vmem:[#allocation13 + $0x588] ss:$16 sps:$4 sm:$0xff]  }
 0x627   :  { %9244 = vmatprep.subr.bf16.mxu0 %v12532_v5  ;;  %v12584_v42 = vld [vmem:[#allocation13 + $0x7c8] ss:$16 sps:$4 sm:$0xff]   ;;  %v12589_v5 = vld [vmem:[#allocation13 + $0x56c] ss:$16 sps:$4 sm:$0xff]  }
 0x628   :  { %v12592_v52 = vld [vmem:[#allocation13 + $0x7ac] ss:$16 sps:$4 sm:$0xff]   ;;  %v12590_v21 = vld [vmem:[#allocation13 + $0x7a8] ss:$16 sps:$4 sm:$0xff]  }
 0x629   :  { %9195 = vmatmul.mubr.bf16.vlgmr.msra.gmra.mxu0 %v14427_v2  ;;  %9208 = vmatpush1.bf16.msra.mxu1 %v12527_v9  ;;  %v12545_v2 = vld [vmem:[#allocation13 + $0x448] ss:$16 sps:$4 sm:$0xff]  }
 0x62a   :  { %9245 = vmatpush1.bf16.msra.mxu0 %v12530_v53  ;;  %9276 = vmatprep.mubr.bf16.mxu0 %v14444_v37  ;;  %v12556_v37 = vld [vmem:[#allocation13 + $0x66c] ss:$16 sps:$4 sm:$0xff]   ;;  %v12587_v9 = vld [vmem:[#allocation13 + $0x568] ss:$16 sps:$4 sm:$0xff]  }
 0x62b   :  { %9209 = vmatprep.subr.bf16.mxu1 %v12535_v57  ;;  %9246 = vmatprep.subr.bf16.mxu0 %v12538_v24  ;;  %v12595_v53 = vld [vmem:[#allocation13 + $0x54c] ss:$16 sps:$4 sm:$0xff]   ;;  %v12593_v24 = vld [vmem:[#allocation13 + $0x548] ss:$16 sps:$4 sm:$0xff]  }
 0x62c   :  { %v12598_v57 = vld [vmem:[#allocation13 + $0x78c] ss:$16 sps:$4 sm:$0xff]  }
 0x62d   :  { %9210 = vmatpush1.bf16.msra.mxu1 %v12533_v48  ;;  %v12596_v48 = vld [vmem:[#allocation13 + $0x788] ss:$16 sps:$4 sm:$0xff]  }
 0x62e   :  { %9247 = vmatpush1.bf16.msra.mxu0 %v12536_v50  ;;  %9211 = vmatprep.subr.bf16.mxu1 %v12541_v7  ;;  %v12601_v50 = vld [vmem:[#allocation13 + $0x52c] ss:$16 sps:$4 sm:$0xff]  }
 0x62f   :  { %9248 = vmatprep.subr.bf16.mxu0 %v12544_v25  ;;  %v12604_v7 = vld [vmem:[#allocation13 + $0x76c] ss:$16 sps:$4 sm:$0xff]   ;;  %v12599_v25 = vld [vmem:[#allocation13 + $0x528] ss:$16 sps:$4 sm:$0xff]  }
 0x631   :  { %9212 = vmatpush1.bf16.msra.mxu1 %v12539_v49  ;;  %v12602_v49 = vld [vmem:[#allocation13 + $0x768] ss:$16 sps:$4 sm:$0xff]  }
 0x632   :  { %9249 = vmatpush1.bf16.msra.mxu0 %v12542_v18  ;;  %9213 = vmatprep.subr.bf16.mxu1 %v12547_v34  ;;  %v12607_v18 = vld [vmem:[#allocation13 + $0x50c] ss:$16 sps:$4 sm:$0xff]  }
 0x633   :  { %9250 = vmatprep.subr.bf16.mxu0 %v12550_v29  ;;  %v12610_v34 = vld [vmem:[#allocation13 + $0x74c] ss:$16 sps:$4 sm:$0xff]  }
 0x635   :  { %9214 = vmatpush1.bf16.msra.mxu1 %v12545_v2  ;;  %v12605_v2 = vld [vmem:[#allocation13 + $0x508] ss:$16 sps:$4 sm:$0xff]  }
 0x636   :  { %9251 = vmatpush1.bf16.msra.mxu0 %v12548_v63  ;;  %9215 = vmatprep.subr.bf16.mxu1 %v12553_v0  ;;  %v12608_v0 = vld [vmem:[#allocation13 + $0x748] ss:$16 sps:$4 sm:$0xff]  }
 0x637   :  { %9252 = vmatprep.subr.bf16.mxu0 %v12556_v37  ;;  %v12616_v37 = vld [vmem:[#allocation13 + $0x8ec] ss:$16 sps:$4 sm:$0xff]  }
 0x639   :  { %9216 = vmatpush1.bf16.msra.mxu1 %v12551_v19 }
 0x63a   :  { %9253 = vmatpush1.bf16.msra.mxu0 %v12554_v54  ;;  %9217 = vmatprep.subr.bf16.mxu1 %v12559_v4  ;;  %v12613_v54 = vld [vmem:[#allocation13 + $0x72c] ss:$16 sps:$4 sm:$0xff]  }
 0x63b   :  { %9254 = vmatprep.subr.bf16.mxu0 %v12562_v3 }
 0x63d   :  { %9218 = vmatpush1.bf16.msra.mxu1 %v12557_v10  ;;  %v12614_v10 = vld [vmem:[#allocation13 + $0x8e8] ss:$16 sps:$4 sm:$0xff]  }
 0x63e   :  { %9255 = vmatpush1.bf16.msra.mxu0 %v12560_v12  ;;  %9219 = vmatprep.subr.bf16.mxu1 %v12565_v13  ;;  %v12611_v12 = vld [vmem:[#allocation13 + $0x728] ss:$16 sps:$4 sm:$0xff]   ;;  %v12622_v13 = vld [vmem:[#allocation13 + $0x8cc] ss:$16 sps:$4 sm:$0xff]  }
 0x63f   :  { %9256 = vmatprep.subr.bf16.mxu0 %v12568_v14 }
 0x641   :  { %9220 = vmatpush2.bf16.msra.mxu1 %v12563_v20  ;;  %v12619_v20 = vld [vmem:[#allocation13 + $0x70c] ss:$16 sps:$4 sm:$0xff]  }
 0x642   :  { %9257 = vmatpush1.bf16.msra.mxu0 %v12566_v60  ;;  %9221 = vmatprep.subr.bf16.mxu1 %v12571_v23  ;;  %v12620_v23 = vld [vmem:[#allocation13 + $0x8c8] ss:$16 sps:$4 sm:$0xff]  }
 0x643   :  { %9258 = vmatprep.subr.bf16.mxu0 %v12574_v32  ;;  %v12617_v32 = vld [vmem:[#allocation13 + $0x708] ss:$16 sps:$4 sm:$0xff]  }
 0x645   :  { %9222 = vmatpush2.bf16.msra.mxu1 %v12569_v15  ;;  %v12625_v15 = vld [vmem:[#allocation13 + $0x8ac] ss:$16 sps:$4 sm:$0xff]  }
 0x646   :  { %9259 = vmatpush1.bf16.msra.mxu0 %v12572_v28  ;;  %9223 = vmatprep.subr.bf16.mxu1 %v12577_v30  ;;  %v12628_v30 = vld [vmem:[#allocation13 + $0xaec] ss:$16 sps:$4 sm:$0xff]  }
 0x647   :  { %9260 = vmatprep.subr.bf16.mxu0 %v12580_v17 }
 0x649   :  { %9224 = vmatpush2.bf16.msra.mxu1 %v12575_v39  ;;  %v12623_v39 = vld [vmem:[#allocation13 + $0x8a8] ss:$16 sps:$4 sm:$0xff]  }
 0x64a   :  { %9261 = vmatpush2.bf16.msra.mxu0 %v12578_v40  ;;  %9225 = vmatprep.subr.bf16.mxu1 %v12583_v36  ;;  %v12626_v40 = vld [vmem:[#allocation13 + $0xae8] ss:$16 sps:$4 sm:$0xff]   ;;  %v12631_v36 = vld [vmem:[#allocation13 + $0x88c] ss:$16 sps:$4 sm:$0xff]  }
 0x64b   :  { %9262 = vmatprep.subr.bf16.mxu0 %v12586_v46  ;;  %v12629_v46 = vld [vmem:[#allocation13 + $0x888] ss:$16 sps:$4 sm:$0xff]  }
 0x64d   :  { %9226 = vmatpush2.bf16.msra.mxu1 %v12581_v41  ;;  %v12632_v41 = vld [vmem:[#allocation13 + $0xac8] ss:$16 sps:$4 sm:$0xff]  }
 0x64e   :  { %9263 = vmatpush2.bf16.msra.mxu0 %v12584_v42  ;;  %9227 = vmatprep.subr.bf16.mxu1 %v12589_v5  ;;  %v12637_v42 = vld [vmem:[#allocation13 + $0x86c] ss:$16 sps:$4 sm:$0xff]  }
 0x64f   :  { %9264 = vmatprep.subr.bf16.mxu0 %v12592_v52  ;;  %v12640_v5 = vld [vmem:[#allocation13 + $0xaac] ss:$16 sps:$4 sm:$0xff]   ;;  %v12635_v52 = vld [vmem:[#allocation13 + $0x868] ss:$16 sps:$4 sm:$0xff]  }
 0x651   :  { %9228 = vmatpush2.bf16.msra.mxu1 %v12587_v9  ;;  %v12638_v9 = vld [vmem:[#allocation13 + $0xaa8] ss:$16 sps:$4 sm:$0xff]  }
 0x652   :  { %9265 = vmatpush2.bf16.msra.mxu0 %v12590_v21  ;;  %9229 = vmatprep.subr.bf16.mxu1 %v12595_v53  ;;  %v12643_v21 = vld [vmem:[#allocation13 + $0x84c] ss:$16 sps:$4 sm:$0xff]  }
 0x653   :  { %9266 = vmatprep.subr.bf16.mxu0 %v12598_v57  ;;  %v12646_v53 = vld [vmem:[#allocation13 + $0xa8c] ss:$16 sps:$4 sm:$0xff]   ;;  %v12644_v57 = vld [vmem:[#allocation13 + $0xa88] ss:$16 sps:$4 sm:$0xff]  }
 0x655   :  { %9230 = vmatpush2.bf16.msra.mxu1 %v12593_v24  ;;  %v12649_v24 = vld [vmem:[#allocation13 + $0x82c] ss:$16 sps:$4 sm:$0xff]  }
 0x656   :  { %9267 = vmatpush2.bf16.msra.mxu0 %v12596_v48  ;;  %9231 = vmatprep.subr.bf16.mxu1 %v12601_v50  ;;  %v12647_v48 = vld [vmem:[#allocation13 + $0x828] ss:$16 sps:$4 sm:$0xff]  }
 0x657   :  { %9268 = vmatprep.subr.bf16.mxu0 %v12604_v7  ;;  %v12650_v50 = vld [vmem:[#allocation13 + $0xa68] ss:$16 sps:$4 sm:$0xff]   ;;  %v12655_v7 = vld [vmem:[#allocation13 + $0x80c] ss:$16 sps:$4 sm:$0xff]  }
 0x659   :  { %v8950_v29 = vpop.f32.mrf.mxu0  ;;  %9232 = vmatpush2.bf16.msra.mxu1 %v12599_v25  ;;  %v12658_v25 = vld [vmem:[#allocation13 + $0xa4c] ss:$16 sps:$4 sm:$0xff]  }
 0x65a   :  { %v8951_v63 = vadd.f32 %v8950_v29, %v14583_v35  ;;  %9269 = vmatpush2.bf16.msra.mxu0 %v12602_v49  ;;  %9233 = vmatprep.subr.bf16.mxu1 %v12607_v18  ;;  %v12653_v49 = vld [vmem:[#allocation13 + $0x808] ss:$16 sps:$4 sm:$0xff]   ;;  %v12664_v29 = vld [vmem:[#allocation13 + $0xa2c] ss:$16 sps:$4 sm:$0xff]  }
 0x65b   :  { %v8952_v19 = vpop.f32.mrf.mxu0  ;;  %9270 = vmatprep.subr.bf16.mxu0 %v12610_v34  ;;  %v12656_v18 = vld [vmem:[#allocation13 + $0xa48] ss:$16 sps:$4 sm:$0xff]   ;;  %v12661_v34 = vld [vmem:[#allocation13 + $0x9ec] ss:$16 sps:$4 sm:$0xff]  }
 0x65c   :  { %v8953_v4 = vadd.f32 %v8952_v19, %v14586_v51  ;;  %v12665_v19 = vld [vmem:[#allocation13 + $0x9c8] ss:$16 sps:$4 sm:$0xff]  }
 0x65d   :  { %v8954_v3 = vpop.f32.mrf.mxu0  ;;  %9234 = vmatpush2.bf16.msra.mxu1 %v12605_v2  ;;  %v12659_v2 = vld [vmem:[#allocation13 + $0x9e8] ss:$16 sps:$4 sm:$0xff]  }
 0x65e   :  { %9271 = vmatpush2.bf16.msra.mxu0 %v12608_v0  ;;  %9285 = vmatprep.subr.bf16.mxu1 %v12616_v37  ;;  %v12667_v0 = vld [vmem:[#allocation13 + $0x9cc] ss:$16 sps:$4 sm:$0xff]  }
 0x65f   :  { %v8955_v14 = vpop.f32.mrf.mxu0  ;;  %9272 = vmatprep.subr.bf16.mxu0 %v12613_v54  ;;  %v12670_v37 = vld [vmem:[#allocation13 + $0xa0c] ss:$16 sps:$4 sm:$0xff]   ;;  %v12668_v54 = vld [vmem:[#allocation13 + $0xa08] ss:$16 sps:$4 sm:$0xff]  }
 0x660   :  { %v8991_v35 = vpop.f32.mrf.mxu1  ;;  %9236 = vmatmul.mubr.bf16.vlgmr.msra.gmra.mxu1 %v14455_v27  ;;  %v12676_v3 = vld [vmem:[#allocation13 + $0xbec] ss:$16 sps:$4 sm:$0xff]  }
 0x661   :  { %v14593_v60 = vadd.f32 %v8991_v35, %v8951_v63  ;;  %9286 = vmatpush1.bf16.msra.mxu1 %v12614_v10  ;;  %9317 = vmatprep.mubr.bf16.mxu1 %v14459_v33  ;;  %v12634_v33 = vld [vmem:[#allocation13 + $0xacc] ss:$16 sps:$4 sm:$0xff]   ;;  %v12662_v63 = vld [vmem:[#allocation13 + $0xa28] ss:$16 sps:$4 sm:$0xff]  }
 0x662   :  { %9273 = vmatpush2.bf16.msra.mxu0 %v12611_v12  ;;  %v8993_v51 = vpop.f32.mrf.mxu1  ;;  %9287 = vmatprep.subr.bf16.mxu1 %v12622_v13  ;;  %v12671_v10 = vld [vmem:[#allocation13 + $0x9a8] ss:$16 sps:$4 sm:$0xff]   ;;  %v12679_v13 = vld [vmem:[#allocation13 + $0x98c] ss:$16 sps:$4 sm:$0xff]  }
 0x663   :  { %v14596_v28 = vadd.f32 %v8993_v51, %v8953_v4  ;;  %9274 = vmatprep.subr.bf16.mxu0 %v12619_v20  ;;  %v12673_v4 = vld [vmem:[#allocation13 + $0x9ac] ss:$16 sps:$4 sm:$0xff]   ;;  %v12674_v12 = vld [vmem:[#allocation13 + $0xbe8] ss:$16 sps:$4 sm:$0xff]  }
 0x664   :  { %v8995_v17 = vpop.f32.mrf.mxu1  ;;  %v12682_v14 = vld [vmem:[#allocation13 + $0xbcc] ss:$16 sps:$4 sm:$0xff]   ;;  %v12677_v20 = vld [vmem:[#allocation13 + $0x988] ss:$16 sps:$4 sm:$0xff]  }
 0x665   :  { %9288 = vmatpush1.bf16.msra.mxu1 %v12620_v23  ;;  %v12680_v35 = vld [vmem:[#allocation13 + $0xbc8] ss:$16 sps:$4 sm:$0xff]   ;;  %v12685_v23 = vld [vmem:[#allocation13 + $0x96c] ss:$16 sps:$4 sm:$0xff]  }
 0x666   :  { %9275 = vmatpush2.bf16.msra.mxu0 %v12617_v32  ;;  %v8996_v27 = vpop.f32.mrf.mxu1  ;;  %9289 = vmatprep.subr.bf16.mxu1 %v12625_v15  ;;  %v12688_v51 = vld [vmem:[#allocation13 + $0xbac] ss:$16 sps:$4 sm:$0xff]   ;;  %v12683_v32 = vld [vmem:[#allocation13 + $0x968] ss:$16 sps:$4 sm:$0xff]  }
 0x667   :  { %9326 = vmatprep.subr.bf16.mxu0 %v12628_v30  ;;  %v12686_v15 = vld [vmem:[#allocation13 + $0xba8] ss:$16 sps:$4 sm:$0xff]   ;;  %v12691_v30 = vld [vmem:[#allocation13 + $0x94c] ss:$16 sps:$4 sm:$0xff]  }
 0x668   :  { %v12694_v17 = vld [vmem:[#allocation13 + $0xb8c] ss:$16 sps:$4 sm:$0xff]   ;;  %v12692_v27 = vld [vmem:[#allocation13 + $0xb88] ss:$16 sps:$4 sm:$0xff]  }
 0x669   :  { %9277 = vmatmul.mubr.bf16.vlgmr.msra.gmra.mxu0 %v14465_v16  ;;  %9290 = vmatpush1.bf16.msra.mxu1 %v12623_v39  ;;  %v12641_v16 = vld [vmem:[#allocation13 + $0x848] ss:$16 sps:$4 sm:$0xff]  }
 0x66a   :  { %9327 = vmatpush1.bf16.msra.mxu0 %v12626_v40  ;;  %9358 = vmatprep.mubr.bf16.mxu0 %v14467_v43  ;;  %v12652_v43 = vld [vmem:[#allocation13 + $0xa6c] ss:$16 sps:$4 sm:$0xff]   ;;  %v12689_v39 = vld [vmem:[#allocation13 + $0x948] ss:$16 sps:$4 sm:$0xff]  }
 0x66b   :  { %9291 = vmatprep.subr.bf16.mxu1 %v12631_v36  ;;  %9328 = vmatprep.subr.bf16.mxu0 %v12634_v33  ;;  %v12697_v40 = vld [vmem:[#allocation13 + $0x92c] ss:$16 sps:$4 sm:$0xff]   ;;  %v12695_v33 = vld [vmem:[#allocation13 + $0x928] ss:$16 sps:$4 sm:$0xff]  }
 0x66c   :  { %v12700_v36 = vld [vmem:[#allocation13 + $0xb6c] ss:$16 sps:$4 sm:$0xff]  }
 0x66d   :  { %9292 = vmatpush1.bf16.msra.mxu1 %v12629_v46  ;;  %v12698_v46 = vld [vmem:[#allocation13 + $0xb68] ss:$16 sps:$4 sm:$0xff]  }
 0x66e   :  { %9329 = vmatpush1.bf16.msra.mxu0 %v12632_v41  ;;  %9293 = vmatprep.subr.bf16.mxu1 %v12637_v42  ;;  %v12703_v41 = vld [vmem:[#allocation13 + $0x90c] ss:$16 sps:$4 sm:$0xff]  }
 0x66f   :  { %9330 = vmatprep.subr.bf16.mxu0 %v12640_v5  ;;  %v12706_v42 = vld [vmem:[#allocation13 + $0xb4c] ss:$16 sps:$4 sm:$0xff]  }
 0x671   :  { %9294 = vmatpush1.bf16.msra.mxu1 %v12635_v52  ;;  %v12701_v52 = vld [vmem:[#allocation13 + $0x908] ss:$16 sps:$4 sm:$0xff]  }
 0x672   :  { %9331 = vmatpush1.bf16.msra.mxu0 %v12638_v9  ;;  %9295 = vmatprep.subr.bf16.mxu1 %v12643_v21  ;;  %v12704_v21 = vld [vmem:[#allocation13 + $0xb48] ss:$16 sps:$4 sm:$0xff]  }
 0x673   :  { %9332 = vmatprep.subr.bf16.mxu0 %v12646_v53  ;;  %v12712_v53 = vld [vmem:[#allocation13 + $0xcec] ss:$16 sps:$4 sm:$0xff]  }
 0x675   :  { %9296 = vmatpush1.bf16.msra.mxu1 %v12641_v16 }
 0x676   :  { %9333 = vmatpush1.bf16.msra.mxu0 %v12644_v57  ;;  %9297 = vmatprep.subr.bf16.mxu1 %v12649_v24  ;;  %v12709_v57 = vld [vmem:[#allocation13 + $0xb2c] ss:$16 sps:$4 sm:$0xff]  }
 0x677   :  { %9334 = vmatprep.subr.bf16.mxu0 %v12652_v43 }
 0x679   :  { %9298 = vmatpush1.bf16.msra.mxu1 %v12647_v48  ;;  %v12710_v48 = vld [vmem:[#allocation13 + $0xce8] ss:$16 sps:$4 sm:$0xff]  }
 0x67a   :  { %9335 = vmatpush1.bf16.msra.mxu0 %v12650_v50  ;;  %9299 = vmatprep.subr.bf16.mxu1 %v12655_v7  ;;  %v12707_v50 = vld [vmem:[#allocation13 + $0xb28] ss:$16 sps:$4 sm:$0xff]   ;;  %v12718_v7 = vld [vmem:[#allocation13 + $0xccc] ss:$16 sps:$4 sm:$0xff]  }
 0x67b   :  { %9336 = vmatprep.subr.bf16.mxu0 %v12658_v25 }
 0x67d   :  { %9300 = vmatpush1.bf16.msra.mxu1 %v12653_v49  ;;  %v12715_v49 = vld [vmem:[#allocation13 + $0xb0c] ss:$16 sps:$4 sm:$0xff]  }
 0x67e   :  { %9337 = vmatpush1.bf16.msra.mxu0 %v12656_v18  ;;  %9301 = vmatprep.subr.bf16.mxu1 %v12661_v34  ;;  %v12716_v34 = vld [vmem:[#allocation13 + $0xcc8] ss:$16 sps:$4 sm:$0xff]  }
 0x67f   :  { %9338 = vmatprep.subr.bf16.mxu0 %v12664_v29  ;;  %v12713_v29 = vld [vmem:[#allocation13 + $0xb08] ss:$16 sps:$4 sm:$0xff]  }
 0x681   :  { %9302 = vmatpush2.bf16.msra.mxu1 %v12659_v2  ;;  %v12721_v2 = vld [vmem:[#allocation13 + $0xcac] ss:$16 sps:$4 sm:$0xff]  }
 0x682   :  { %9339 = vmatpush1.bf16.msra.mxu0 %v12662_v63  ;;  %9303 = vmatprep.subr.bf16.mxu1 %v12667_v0  ;;  %v12724_v0 = vld [vmem:[#allocation13 + $0xeec] ss:$16 sps:$4 sm:$0xff]  }
 0x683   :  { %9340 = vmatprep.subr.bf16.mxu0 %v12670_v37 }
 0x685   :  { %9304 = vmatpush2.bf16.msra.mxu1 %v12665_v19  ;;  %v12719_v19 = vld [vmem:[#allocation13 + $0xca8] ss:$16 sps:$4 sm:$0xff]  }
 0x686   :  { %9341 = vmatpush1.bf16.msra.mxu0 %v12668_v54  ;;  %9305 = vmatprep.subr.bf16.mxu1 %v12673_v4  ;;  %v12727_v4 = vld [vmem:[#allocation13 + $0xc8c] ss:$16 sps:$4 sm:$0xff]  }
 0x687   :  { %9342 = vmatprep.subr.bf16.mxu0 %v12676_v3  ;;  %v12730_v3 = vld [vmem:[#allocation13 + $0xecc] ss:$16 sps:$4 sm:$0xff]  }
 0x689   :  { %9306 = vmatpush2.bf16.msra.mxu1 %v12671_v10  ;;  %v12725_v10 = vld [vmem:[#allocation13 + $0xc88] ss:$16 sps:$4 sm:$0xff]  }
 0x68a   :  { %9343 = vmatpush2.bf16.msra.mxu0 %v12674_v12  ;;  %9307 = vmatprep.subr.bf16.mxu1 %v12679_v13  ;;  %v12728_v13 = vld [vmem:[#allocation13 + $0xec8] ss:$16 sps:$4 sm:$0xff]  }
 0x68b   :  { %9344 = vmatprep.subr.bf16.mxu0 %v12682_v14  ;;  %v12733_v14 = vld [vmem:[#allocation13 + $0xc6c] ss:$16 sps:$4 sm:$0xff]  }
 0x68d   :  { %9308 = vmatpush2.bf16.msra.mxu1 %v12677_v20 }
 0x68e   :  { %9345 = vmatpush2.bf16.msra.mxu0 %v12680_v35  ;;  %9309 = vmatprep.subr.bf16.mxu1 %v12685_v23  ;;  %v12736_v35 = vld [vmem:[#allocation13 + $0xeac] ss:$16 sps:$4 sm:$0xff]  }
 0x68f   :  { %9346 = vmatprep.subr.bf16.mxu0 %v12688_v51 }
 0x691   :  { %9310 = vmatpush2.bf16.msra.mxu1 %v12683_v32  ;;  %v12731_v32 = vld [vmem:[#allocation13 + $0xc68] ss:$16 sps:$4 sm:$0xff]  }
 0x692   :  { %9347 = vmatpush2.bf16.msra.mxu0 %v12686_v15  ;;  %9311 = vmatprep.subr.bf16.mxu1 %v12691_v30  ;;  %v12739_v15 = vld [vmem:[#allocation13 + $0xc4c] ss:$16 sps:$4 sm:$0xff]  }
 0x693   :  { %9348 = vmatprep.subr.bf16.mxu0 %v12694_v17  ;;  %v12742_v17 = vld [vmem:[#allocation13 + $0xe8c] ss:$16 sps:$4 sm:$0xff]  }
 0x695   :  { %9312 = vmatpush2.bf16.msra.mxu1 %v12689_v39  ;;  %v12740_v39 = vld [vmem:[#allocation13 + $0xe88] ss:$16 sps:$4 sm:$0xff]  }
 0x696   :  { %9349 = vmatpush2.bf16.msra.mxu0 %v12692_v27  ;;  %9313 = vmatprep.subr.bf16.mxu1 %v12697_v40  ;;  %v12745_v27 = vld [vmem:[#allocation13 + $0xc2c] ss:$16 sps:$4 sm:$0xff]  }
 0x697   :  { %9350 = vmatprep.subr.bf16.mxu0 %v12700_v36  ;;  %v12748_v40 = vld [vmem:[#allocation13 + $0xe6c] ss:$16 sps:$4 sm:$0xff]   ;;  %v12743_v36 = vld [vmem:[#allocation13 + $0xc28] ss:$16 sps:$4 sm:$0xff]  }
 0x699   :  { %v9032_v5 = vpop.f32.mrf.mxu0  ;;  %9314 = vmatpush2.bf16.msra.mxu1 %v12695_v33  ;;  %v12746_v33 = vld [vmem:[#allocation13 + $0xe68] ss:$16 sps:$4 sm:$0xff]  }
 0x69a   :  { %v9033_v9 = vadd.f32 %v9032_v5, %v14593_v60  ;;  %9351 = vmatpush2.bf16.msra.mxu0 %v12698_v46  ;;  %9315 = vmatprep.subr.bf16.mxu1 %v12703_v41  ;;  %v12751_v46 = vld [vmem:[#allocation13 + $0xc0c] ss:$16 sps:$4 sm:$0xff]   ;;  %v12752_v5 = vld [vmem:[#allocation13 + $0xe48] ss:$16 sps:$4 sm:$0xff]  }
 0x69b   :  { %v9034_v16 = vpop.f32.mrf.mxu0  ;;  %9352 = vmatprep.subr.bf16.mxu0 %v12706_v42  ;;  %v12754_v41 = vld [vmem:[#allocation13 + $0xe4c] ss:$16 sps:$4 sm:$0xff]   ;;  %v12749_v42 = vld [vmem:[#allocation13 + $0xc08] ss:$16 sps:$4 sm:$0xff]  }
 0x69c   :  { %v9035_v24 = vadd.f32 %v9034_v16, %v14596_v28  ;;  %v12763_v16 = vld [vmem:[#allocation13 + $0xdcc] ss:$16 sps:$4 sm:$0xff]  }
 0x69d   :  { %v9036_v43 = vpop.f32.mrf.mxu0  ;;  %9316 = vmatpush2.bf16.msra.mxu1 %v12701_v52  ;;  %v12757_v52 = vld [vmem:[#allocation13 + $0xdec] ss:$16 sps:$4 sm:$0xff]  }
 0x69e   :  { %9353 = vmatpush2.bf16.msra.mxu0 %v12704_v21  ;;  %9367 = vmatprep.subr.bf16.mxu1 %v12712_v53  ;;  %v12755_v21 = vld [vmem:[#allocation13 + $0xde8] ss:$16 sps:$4 sm:$0xff]  }
 0x69f   :  { %v9037_v25 = vpop.f32.mrf.mxu0  ;;  %9354 = vmatprep.subr.bf16.mxu0 %v12709_v57  ;;  %v12758_v53 = vld [vmem:[#allocation13 + $0xe28] ss:$16 sps:$4 sm:$0xff]   ;;  %v12766_v57 = vld [vmem:[#allocation13 + $0xe0c] ss:$16 sps:$4 sm:$0xff]  }
 0x6a0   :  { %v9073_v60 = vpop.f32.mrf.mxu1  ;;  %9318 = vmatmul.mubr.bf16.vlgmr.msra.gmra.mxu1 %v14479_v44  ;;  %v12722_v44 = vld [vmem:[#allocation13 + $0xee8] ss:$16 sps:$4 sm:$0xff]  }
 0x6a1   :  { %v9074_v18 = vadd.f32 %v9073_v60, %v9033_v9  ;;  %9368 = vmatpush1.bf16.msra.mxu1 %v12710_v48  ;;  %9399 = vmatprep.mubr.bf16.mxu1 %v14483_v8  ;;  %v12760_v9 = vld [vmem:[#allocation13 + $0xe2c] ss:$16 sps:$4 sm:$0xff]   ;;  %v12764_v43 = vld [vmem:[#allocation13 + $0xe08] ss:$16 sps:$4 sm:$0xff]  }
 0x6a2   :  { %9355 = vmatpush2.bf16.msra.mxu0 %v12707_v50  ;;  %v9075_v28 = vpop.f32.mrf.mxu1  ;;  %9369 = vmatprep.subr.bf16.mxu1 %v12718_v7  ;;  %v12769_v48 = vld [vmem:[#allocation13 + $0xdac] ss:$16 sps:$4 sm:$0xff]   ;;  %v12767_v7 = vld [vmem:[#allocation13 + $0xda8] ss:$16 sps:$4 sm:$0xff]  }
 0x6a3   :  { %v9076_v63 = vadd.f32 %v9075_v28, %v9035_v24  ;;  %9356 = vmatprep.subr.bf16.mxu0 %v12715_v49  ;;  %v12761_v24 = vld [vmem:[#allocation13 + $0xdc8] ss:$16 sps:$4 sm:$0xff]   ;;  %v12772_v50 = vld [vmem:[#allocation13 + $0xfec] ss:$16 sps:$4 sm:$0xff]  }
 0x6a4   :  { %v9077_v37 = vpop.f32.mrf.mxu1  ;;  %v12770_v25 = vld [vmem:[#allocation13 + $0xfe8] ss:$16 sps:$4 sm:$0xff]   ;;  %v12775_v49 = vld [vmem:[#allocation13 + $0xd8c] ss:$16 sps:$4 sm:$0xff]  }
 0x6a5   :  { %9370 = vmatpush1.bf16.msra.mxu1 %v12716_v34  ;;  %v12778_v60 = vld [vmem:[#allocation13 + $0xfcc] ss:$16 sps:$4 sm:$0xff]   ;;  %v12776_v34 = vld [vmem:[#allocation13 + $0xfc8] ss:$16 sps:$4 sm:$0xff]  }
 0x6a6   :  { %9357 = vmatpush2.bf16.msra.mxu0 %v12713_v29  ;;  %v9078_v54 = vpop.f32.mrf.mxu1  ;;  %9371 = vmatprep.subr.bf16.mxu1 %v12721_v2  ;;  %v12781_v28 = vld [vmem:[#allocation13 + $0xd6c] ss:$16 sps:$4 sm:$0xff]   ;;  %v12779_v2 = vld [vmem:[#allocation13 + $0xd68] ss:$16 sps:$4 sm:$0xff]  }
 0x6a7   :  { %9408 = vmatprep.subr.bf16.mxu0 %v12724_v0  ;;  %v12784_v29 = vld [vmem:[#allocation13 + $0xfac] ss:$16 sps:$4 sm:$0xff]   ;;  %v12788_v54 = vld [vmem:[#allocation13 + $0xf88] ss:$16 sps:$4 sm:$0xff]  }
 0x6a8   :  { %v12787_v0 = vld [vmem:[#allocation13 + $0xd4c] ss:$16 sps:$4 sm:$0xff]  }
 0x6a9   :  { %v9114_v8 = vpop.f32.mrf.mxu0  ;;  %9359 = vmatmul.mubr.bf16.vlgmr.msra.gmra.mxu0 %v14489_v6  ;;  %9372 = vmatpush1.bf16.msra.mxu1 %v12719_v19  ;;  %v12734_v6 = vld [vmem:[#allocation13 + $0xea8] ss:$16 sps:$4 sm:$0xff]   ;;  %v12790_v37 = vld [vmem:[#allocation13 + $0xf8c] ss:$16 sps:$4 sm:$0xff]  }
 0x6aa   :  { %v14605_v12 = vadd.f32 %v9114_v8, %v9074_v18  ;;  %9409 = vmatpush1.bf16.msra.mxu0 %v12722_v44  ;;  %9440 = vmatprep.mubr.bf16.mxu0 %v14491_v58  ;;  %v12737_v58 = vld [vmem:[#allocation13 + $0xc48] ss:$16 sps:$4 sm:$0xff]   ;;  %v12793_v44 = vld [vmem:[#allocation13 + $0xd2c] ss:$16 sps:$4 sm:$0xff]  }
 0x6ab   :  { %v9116_v20 = vpop.f32.mrf.mxu0  ;;  %9373 = vmatprep.subr.bf16.mxu1 %v12727_v4  ;;  %9410 = vmatprep.subr.bf16.mxu0 %v12730_v3  ;;  %v12773_v18 = vld [vmem:[#allocation13 + $0xd88] ss:$16 sps:$4 sm:$0xff]   ;;  %v12796_v4 = vld [vmem:[#allocation13 + $0xf6c] ss:$16 sps:$4 sm:$0xff]  }
 0x6ac   :  { %v14608_v23 = vadd.f32 %v9116_v20, %v9076_v63  ;;  %v12782_v63 = vld [vmem:[#allocation13 + $0xfa8] ss:$16 sps:$4 sm:$0xff]  }
 0x6ad   :  { %v9118_v51 = vpop.f32.mrf.mxu0  ;;  %9374 = vmatpush1.bf16.msra.mxu1 %v12725_v10  ;;  %v12785_v19 = vld [vmem:[#allocation13 + $0xd48] ss:$16 sps:$4 sm:$0xff]   ;;  %v12799_v10 = vld [vmem:[#allocation13 + $0xd0c] ss:$16 sps:$4 sm:$0xff]  }
 0x6ae   :  { %9411 = vmatpush1.bf16.msra.mxu0 %v12728_v13  ;;  %9375 = vmatprep.subr.bf16.mxu1 %v12733_v14  ;;  %v12791_v3 = vld [vmem:[#allocation13 + $0xd28] ss:$16 sps:$4 sm:$0xff]   ;;  %v12802_v13 = vld [vmem:[#allocation13 + $0xf4c] ss:$16 sps:$4 sm:$0xff]  }
 0x6af   :  { %v9119_v30 = vpop.f32.mrf.mxu0  ;;  %9412 = vmatprep.subr.bf16.mxu0 %v12736_v35  ;;  %v12794_v8 = vld [vmem:[#allocation13 + $0xf68] ss:$16 sps:$4 sm:$0xff]   ;;  %v12808_v35 = vld [vmem:[#allocation13 + $0x10ec] ss:$16 sps:$4 sm:$0xff]  }
 0x6b0   :  { %v12797_v14 = vld [vmem:[#allocation13 + $0xd08] ss:$16 sps:$4 sm:$0xff]   ;;  %v12805_v51 = vld [vmem:[#allocation13 + $0xf2c] ss:$16 sps:$4 sm:$0xff]  }
 0x6b1   :  { %9376 = vmatpush1.bf16.msra.mxu1 %v12731_v32  ;;  %v12800_v20 = vld [vmem:[#allocation13 + $0xf48] ss:$16 sps:$4 sm:$0xff]   ;;  %v12811_v30 = vld [vmem:[#allocation13 + $0xf0c] ss:$16 sps:$4 sm:$0xff]  }
 0x6b2   :  { %9413 = vmatpush1.bf16.msra.mxu0 %v12734_v6  ;;  %9377 = vmatprep.subr.bf16.mxu1 %v12739_v15  ;;  %v12806_v32 = vld [vmem:[#allocation13 + $0x10e8] ss:$16 sps:$4 sm:$0xff]   ;;  %v12814_v15 = vld [vmem:[#allocation13 + $0x10cc] ss:$16 sps:$4 sm:$0xff]  }
 0x6b3   :  { %9414 = vmatprep.subr.bf16.mxu0 %v12742_v17  ;;  %v12803_v6 = vld [vmem:[#allocation13 + $0xf28] ss:$16 sps:$4 sm:$0xff]   ;;  %v4655_v17 = vsub.s32 2, %v14499_v31 }
 0x6b5   :  { %9378 = vmatpush1.bf16.msra.mxu1 %v12737_v58 }
 0x6b6   :  { %9415 = vmatpush1.bf16.msra.mxu0 %v12740_v39  ;;  %9379 = vmatprep.subr.bf16.mxu1 %v12745_v27  ;;  %v12812_v39 = vld [vmem:[#allocation13 + $0x10c8] ss:$16 sps:$4 sm:$0xff]   ;;  %v4659_v27 = vsub.s32 3, %v14499_v31 }
 0x6b7   :  { %9416 = vmatprep.subr.bf16.mxu0 %v12748_v40 }
 0x6b9   :  { %9380 = vmatpush1.bf16.msra.mxu1 %v12743_v36  ;;  %v12809_v36 = vld [vmem:[#allocation13 + $0xf08] ss:$16 sps:$4 sm:$0xff]  }
 0x6ba   :  { %9417 = vmatpush1.bf16.msra.mxu0 %v12746_v33  ;;  %9381 = vmatprep.subr.bf16.mxu1 %v12751_v46  ;;  %v12817_v33 = vld [vmem:[#allocation13 + $0x10ac] ss:$16 sps:$4 sm:$0xff]  }
 0x6bb   :  { %9418 = vmatprep.subr.bf16.mxu0 %v12754_v41  ;;  %v12820_v46 = vld [vmem:[#allocation13 + $0x12ec] ss:$16 sps:$4 sm:$0xff]   ;;  %v13045_v41 = vld [vmem:[#allocation15] sm:$0xf] }
 0x6bd   :  { %9382 = vmatpush1.bf16.msra.mxu1 %v12749_v42  ;;  %v4656_v42 = vrot.slane %v13045_v41, %v4655_v17  ;;  %v12866_v17 = vld [vmem:[#allocation13 + $0x13e8] ss:$16 sps:$4 sm:$0xff]  }
 0x6be   :  { %9419 = vmatpush1.bf16.msra.mxu0 %v12752_v5  ;;  %9383 = vmatprep.subr.bf16.mxu1 %v12757_v52  ;;  %v12815_v52 = vld [vmem:[#allocation13 + $0x10a8] ss:$16 sps:$4 sm:$0xff]  }
 0x6bf   :  { %9420 = vmatprep.subr.bf16.mxu0 %v12760_v9  ;;  %v4660_v9 = vrot.slane %v13045_v41, %v4659_v27  ;;  %v12869_v27 = vld [vmem:[#allocation13 + $0x1188] ss:$16 sps:$4 sm:$0xff]  }
 0x6c0   :  { %v12878_v41 = vld [vmem:[#allocation13 + $0x13a8] ss:$16 sps:$4 sm:$0xff]  }
 0x6c1   :  { %9384 = vmatpush2.bf16.msra.mxu1 %v12755_v21  ;;  %v12823_v21 = vld [vmem:[#allocation13 + $0x108c] ss:$16 sps:$4 sm:$0xff]  }
 0x6c2   :  { %9421 = vmatpush1.bf16.msra.mxu0 %v12758_v53  ;;  %9385 = vmatprep.subr.bf16.mxu1 %v12763_v16  ;;  %v12826_v53 = vld [vmem:[#allocation13 + $0x12cc] ss:$16 sps:$4 sm:$0xff]  }
 0x6c3   :  { %9422 = vmatprep.subr.bf16.mxu0 %v12766_v57  ;;  %v12821_v57 = vld [vmem:[#allocation13 + $0x1088] ss:$16 sps:$4 sm:$0xff]  }
 0x6c5   :  { %9386 = vmatpush2.bf16.msra.mxu1 %v12761_v24 }
 0x6c6   :  { %9423 = vmatpush1.bf16.msra.mxu0 %v12764_v43  ;;  %9387 = vmatprep.subr.bf16.mxu1 %v12769_v48  ;;  %v12824_v48 = vld [vmem:[#allocation13 + $0x12c8] ss:$16 sps:$4 sm:$0xff]  }
 0x6c7   :  { %9424 = vmatprep.subr.bf16.mxu0 %v12772_v50  ;;  %v12829_v50 = vld [vmem:[#allocation13 + $0x106c] ss:$16 sps:$4 sm:$0xff]  }
 0x6c9   :  { %9388 = vmatpush2.bf16.msra.mxu1 %v12767_v7 }
 0x6ca   :  { %9425 = vmatpush2.bf16.msra.mxu0 %v12770_v25  ;;  %9389 = vmatprep.subr.bf16.mxu1 %v12775_v49  ;;  %v12832_v25 = vld [vmem:[#allocation13 + $0x12ac] ss:$16 sps:$4 sm:$0xff]  }
 0x6cb   :  { %9426 = vmatprep.subr.bf16.mxu0 %v12778_v60 }
 0x6cd   :  { %9390 = vmatpush2.bf16.msra.mxu1 %v12773_v18  ;;  %v12827_v18 = vld [vmem:[#allocation13 + $0x1068] ss:$16 sps:$4 sm:$0xff]  }
 0x6ce   :  { %9427 = vmatpush2.bf16.msra.mxu0 %v12776_v34  ;;  %9391 = vmatprep.subr.bf16.mxu1 %v12781_v28  ;;  %v12835_v34 = vld [vmem:[#allocation13 + $0x104c] ss:$16 sps:$4 sm:$0xff]  }
 0x6cf   :  { %9428 = vmatprep.subr.bf16.mxu0 %v12784_v29  ;;  %v12838_v29 = vld [vmem:[#allocation13 + $0x128c] ss:$16 sps:$4 sm:$0xff]  }
 0x6d1   :  { %9392 = vmatpush2.bf16.msra.mxu1 %v12779_v2  ;;  %v12836_v2 = vld [vmem:[#allocation13 + $0x1288] ss:$16 sps:$4 sm:$0xff]  }
 0x6d2   :  { %9429 = vmatpush2.bf16.msra.mxu0 %v12782_v63  ;;  %9393 = vmatprep.subr.bf16.mxu1 %v12787_v0  ;;  %v12841_v63 = vld [vmem:[#allocation13 + $0x102c] ss:$16 sps:$4 sm:$0xff]  }
 0x6d3   :  { %9430 = vmatprep.subr.bf16.mxu0 %v12790_v37  ;;  %v12844_v0 = vld [vmem:[#allocation13 + $0x126c] ss:$16 sps:$4 sm:$0xff]   ;;  %v12839_v37 = vld [vmem:[#allocation13 + $0x1028] ss:$16 sps:$4 sm:$0xff]  }
 0x6d5   :  { %9394 = vmatpush2.bf16.msra.mxu1 %v12785_v19  ;;  %v12842_v19 = vld [vmem:[#allocation13 + $0x1268] ss:$16 sps:$4 sm:$0xff]  }
 0x6d6   :  { %9431 = vmatpush2.bf16.msra.mxu0 %v12788_v54  ;;  %9395 = vmatprep.subr.bf16.mxu1 %v12793_v44  ;;  %v12847_v54 = vld [vmem:[#allocation13 + $0x100c] ss:$16 sps:$4 sm:$0xff]  }
 0x6d7   :  { %9432 = vmatprep.subr.bf16.mxu0 %v12796_v4  ;;  %v12850_v44 = vld [vmem:[#allocation13 + $0x124c] ss:$16 sps:$4 sm:$0xff]   ;;  %v12845_v4 = vld [vmem:[#allocation13 + $0x1008] ss:$16 sps:$4 sm:$0xff]  }
 0x6d9   :  { %9396 = vmatpush2.bf16.msra.mxu1 %v12791_v3  ;;  %v12848_v3 = vld [vmem:[#allocation13 + $0x1248] ss:$16 sps:$4 sm:$0xff]  }
 0x6da   :  { %9433 = vmatpush2.bf16.msra.mxu0 %v12794_v8  ;;  %9397 = vmatprep.subr.bf16.mxu1 %v12799_v10  ;;  %v12853_v8 = vld [vmem:[#allocation13 + $0x11ec] ss:$16 sps:$4 sm:$0xff]  }
 0x6db   :  { %9434 = vmatprep.subr.bf16.mxu0 %v12802_v13  ;;  %v12856_v10 = vld [vmem:[#allocation13 + $0x122c] ss:$16 sps:$4 sm:$0xff]   ;;  %v12851_v13 = vld [vmem:[#allocation13 + $0x11e8] ss:$16 sps:$4 sm:$0xff]  }
 0x6dd   :  { %9398 = vmatpush2.bf16.msra.mxu1 %v12797_v14  ;;  %v12854_v14 = vld [vmem:[#allocation13 + $0x1228] ss:$16 sps:$4 sm:$0xff]  }
 0x6de   :  { %9435 = vmatpush2.bf16.msra.mxu0 %v12800_v20  ;;  %9449 = vmatprep.subr.bf16.mxu1 %v12808_v35  ;;  %v12859_v20 = vld [vmem:[#allocation13 + $0x11cc] ss:$16 sps:$4 sm:$0xff]  }
 0x6df   :  { %9436 = vmatprep.subr.bf16.mxu0 %v12805_v51  ;;  %v12862_v35 = vld [vmem:[#allocation13 + $0x120c] ss:$16 sps:$4 sm:$0xff]   ;;  %v12857_v51 = vld [vmem:[#allocation13 + $0x11c8] ss:$16 sps:$4 sm:$0xff]  }
 0x6e0   :  { %v9155_v58 = vpop.f32.mrf.mxu1  ;;  %9400 = vmatmul.mubr.bf16.vlgmr.msra.gmra.mxu1 %v14505_v38 }
 0x6e1   :  { %9450 = vmatpush1.bf16.msra.mxu1 %v12806_v32  ;;  %9481 = vmatprep.mubr.bf16.mxu1 %v14510_v45  ;;  %v12818_v45 = vld [vmem:[#allocation13 + $0x12e8] ss:$16 sps:$4 sm:$0xff]   ;;  %v9156_v31 = vadd.f32 %v9155_v58, %v4656_v42  ;;  %v12871_v58 = vld [vmem:[#allocation13 + $0x118c] ss:$16 sps:$4 sm:$0xff]  }
 0x6e2   :  { %9437 = vmatpush2.bf16.msra.mxu0 %v12803_v6  ;;  %v9157_v40 = vpop.f32.mrf.mxu1  ;;  %9451 = vmatprep.subr.bf16.mxu1 %v12814_v15  ;;  %v12860_v32 = vld [vmem:[#allocation13 + $0x1208] ss:$16 sps:$4 sm:$0xff]   ;;  %v12865_v6 = vld [vmem:[#allocation13 + $0x11ac] ss:$16 sps:$4 sm:$0xff]  }
 0x6e3   :  { %9438 = vmatprep.subr.bf16.mxu0 %v12811_v30  ;;  %v9158_v24 = vadd.f32 %v9157_v40, %v4660_v9  ;;  %v12868_v15 = vld [vmem:[#allocation13 + $0x13ec] ss:$16 sps:$4 sm:$0xff]   ;;  %v12863_v30 = vld [vmem:[#allocation13 + $0x11a8] ss:$16 sps:$4 sm:$0xff]  }
 0x6e4   :  { %v9159_v5 = vpop.f32.mrf.mxu1  ;;  %v12872_v40 = vld [vmem:[#allocation13 + $0x13c8] ss:$16 sps:$4 sm:$0xff]   ;;  %v12883_v42 = vld [vmem:[#allocation13 + $0x114c] ss:$16 sps:$4 sm:$0xff]  }
 0x6e5   :  { %9452 = vmatpush1.bf16.msra.mxu1 %v12812_v39  ;;  %v12874_v39 = vld [vmem:[#allocation13 + $0x13cc] ss:$16 sps:$4 sm:$0xff]   ;;  %v12884_v9 = vld [vmem:[#allocation13 + $0x1388] ss:$16 sps:$4 sm:$0xff]  }
 0x6e6   :  { %9439 = vmatpush2.bf16.msra.mxu0 %v12809_v36  ;;  %v9160_v38 = vpop.f32.mrf.mxu1  ;;  %9453 = vmatprep.subr.bf16.mxu1 %v12817_v33  ;;  %v12877_v36 = vld [vmem:[#allocation13 + $0x116c] ss:$16 sps:$4 sm:$0xff]  }
 0x6e7   :  { %9490 = vmatprep.subr.bf16.mxu0 %v12820_v46  ;;  %v12880_v33 = vld [vmem:[#allocation13 + $0x13ac] ss:$16 sps:$4 sm:$0xff]   ;;  %v12875_v46 = vld [vmem:[#allocation13 + $0x1168] ss:$16 sps:$4 sm:$0xff]  }
 0x6e8   :  { %v12886_v5 = vld [vmem:[#allocation13 + $0x138c] ss:$16 sps:$4 sm:$0xff]  }
 0x6e9   :  { %v9196_v16 = vpop.f32.mrf.mxu0  ;;  %9441 = vmatmul.mubr.bf16.vlgmr.msra.gmra.mxu0 %v14517_v56  ;;  %9454 = vmatpush1.bf16.msra.mxu1 %v12815_v52  ;;  %v12830_v56 = vld [vmem:[#allocation13 + $0x12a8] ss:$16 sps:$4 sm:$0xff]   ;;  %v12889_v38 = vld [vmem:[#allocation13 + $0x112c] ss:$16 sps:$4 sm:$0xff]  }
 0x6ea   :  { %v14615_v43 = vadd.f32 %v9196_v16, %v9156_v31  ;;  %9491 = vmatpush1.bf16.msra.mxu0 %v12818_v45  ;;  %9522 = vmatprep.mubr.bf16.mxu0 %v14519_v26  ;;  %v12833_v26 = vld [vmem:[#allocation13 + $0x1048] ss:$16 sps:$4 sm:$0xff]   ;;  %v12892_v45 = vld [vmem:[#allocation13 + $0x136c] ss:$16 sps:$4 sm:$0xff]  }
 0x6eb   :  { %v9198_v7 = vpop.f32.mrf.mxu0  ;;  %9455 = vmatprep.subr.bf16.mxu1 %v12823_v21  ;;  %9492 = vmatprep.subr.bf16.mxu0 %v12826_v53  ;;  %v12881_v52 = vld [vmem:[#allocation13 + $0x1148] ss:$16 sps:$4 sm:$0xff]   ;;  %v12895_v31 = vld [vmem:[#allocation13 + $0x110c] ss:$16 sps:$4 sm:$0xff]  }
 0x6ec   :  { %v14618_v49 = vadd.f32 %v9198_v7, %v9158_v24  ;;  %v12887_v21 = vld [vmem:[#allocation13 + $0x1128] ss:$16 sps:$4 sm:$0xff]   ;;  %v12898_v16 = vld [vmem:[#allocation13 + $0x134c] ss:$16 sps:$4 sm:$0xff]  }
 0x6ed   :  { %v9200_v60 = vpop.f32.mrf.mxu0  ;;  %9456 = vmatpush1.bf16.msra.mxu1 %v12821_v57  ;;  %v12890_v53 = vld [vmem:[#allocation13 + $0x1368] ss:$16 sps:$4 sm:$0xff]  }
 0x6ee   :  { %9493 = vmatpush1.bf16.msra.mxu0 %v12824_v48  ;;  %9457 = vmatprep.subr.bf16.mxu1 %v12829_v50  ;;  %v12893_v57 = vld [vmem:[#allocation13 + $0x1108] ss:$16 sps:$4 sm:$0xff]   ;;  %v12904_v48 = vld [vmem:[#allocation13 + $0x14ec] ss:$16 sps:$4 sm:$0xff]  }
 0x6ef   :  { %v9201_v28 = vpop.f32.mrf.mxu0  ;;  %9494 = vmatprep.subr.bf16.mxu0 %v12832_v25  ;;  %v12896_v24 = vld [vmem:[#allocation13 + $0x1348] ss:$16 sps:$4 sm:$0xff]   ;;  %v12901_v50 = vld [vmem:[#allocation13 + $0x132c] ss:$16 sps:$4 sm:$0xff]  }
 0x6f0   :  { %v12902_v7 = vld [vmem:[#allocation13 + $0x14e8] ss:$16 sps:$4 sm:$0xff]   ;;  %v12910_v60 = vld [vmem:[#allocation13 + $0x14cc] ss:$16 sps:$4 sm:$0xff]  }
 0x6f1   :  { %9458 = vmatpush1.bf16.msra.mxu1 %v12827_v18  ;;  %v12899_v25 = vld [vmem:[#allocation13 + $0x1328] ss:$16 sps:$4 sm:$0xff]   ;;  %v12907_v18 = vld [vmem:[#allocation13 + $0x130c] ss:$16 sps:$4 sm:$0xff]  }
 0x6f2   :  { %9495 = vmatpush1.bf16.msra.mxu0 %v12830_v56  ;;  %9459 = vmatprep.subr.bf16.mxu1 %v12835_v34  ;;  %v12908_v28 = vld [vmem:[#allocation13 + $0x14c8] ss:$16 sps:$4 sm:$0xff]  }
 0x6f3   :  { %9496 = vmatprep.subr.bf16.mxu0 %v12838_v29 }
 0x6f5   :  { %9460 = vmatpush1.bf16.msra.mxu1 %v12833_v26  ;;  %v12905_v26 = vld [vmem:[#allocation13 + $0x1308] ss:$16 sps:$4 sm:$0xff]  }
 0x6f6   :  { %9497 = vmatpush1.bf16.msra.mxu0 %v12836_v2  ;;  %9461 = vmatprep.subr.bf16.mxu1 %v12841_v63  ;;  %v12913_v2 = vld [vmem:[#allocation13 + $0x14ac] ss:$16 sps:$4 sm:$0xff]  }
 0x6f7   :  { %9498 = vmatprep.subr.bf16.mxu0 %v12844_v0  ;;  %v12916_v0 = vld [vmem:[#allocation13 + $0x16ec] ss:$16 sps:$4 sm:$0xff]  }
 0x6f9   :  { %9462 = vmatpush1.bf16.msra.mxu1 %v12839_v37 }
 0x6fa   :  { %9499 = vmatpush1.bf16.msra.mxu0 %v12842_v19  ;;  %9463 = vmatprep.subr.bf16.mxu1 %v12847_v54  ;;  %v12911_v19 = vld [vmem:[#allocation13 + $0x14a8] ss:$16 sps:$4 sm:$0xff]   ;;  %v12919_v54 = vld [vmem:[#allocation13 + $0x148c] ss:$16 sps:$4 sm:$0xff]  }
 0x6fb   :  { %9500 = vmatprep.subr.bf16.mxu0 %v12850_v44 }
 0x6fd   :  { %9464 = vmatpush1.bf16.msra.mxu1 %v12845_v4  ;;  %v12917_v4 = vld [vmem:[#allocation13 + $0x1488] ss:$16 sps:$4 sm:$0xff]  }
 0x6fe   :  { %9501 = vmatpush1.bf16.msra.mxu0 %v12848_v3  ;;  %9465 = vmatprep.subr.bf16.mxu1 %v12853_v8  ;;  %v12925_v8 = vld [vmem:[#allocation13 + $0x146c] ss:$16 sps:$4 sm:$0xff]  }
 0x6ff   :  { %9502 = vmatprep.subr.bf16.mxu0 %v12856_v10 }
 0x701   :  { %9466 = vmatpush2.bf16.msra.mxu1 %v12851_v13  ;;  %v12928_v13 = vld [vmem:[#allocation13 + $0x16ac] ss:$16 sps:$4 sm:$0xff]  }
 0x702   :  { %9503 = vmatpush1.bf16.msra.mxu0 %v12854_v14  ;;  %9467 = vmatprep.subr.bf16.mxu1 %v12859_v20 }
 0x703   :  { %9504 = vmatprep.subr.bf16.mxu0 %v12862_v35  ;;  %v12923_v35 = vld [vmem:[#allocation13 + $0x1468] ss:$16 sps:$4 sm:$0xff]  }
 0x705   :  { %9468 = vmatpush2.bf16.msra.mxu1 %v12857_v51  ;;  %v12931_v51 = vld [vmem:[#allocation13 + $0x144c] ss:$16 sps:$4 sm:$0xff]  }
 0x706   :  { %9505 = vmatpush1.bf16.msra.mxu0 %v12860_v32  ;;  %9469 = vmatprep.subr.bf16.mxu1 %v12865_v6  ;;  %v12934_v6 = vld [vmem:[#allocation13 + $0x168c] ss:$16 sps:$4 sm:$0xff]  }
 0x707   :  { %9506 = vmatprep.subr.bf16.mxu0 %v12868_v15  ;;  %v12932_v15 = vld [vmem:[#allocation13 + $0x1688] ss:$16 sps:$4 sm:$0xff]  }
 0x709   :  { %9470 = vmatpush2.bf16.msra.mxu1 %v12863_v30  ;;  %v12937_v30 = vld [vmem:[#allocation13 + $0x142c] ss:$16 sps:$4 sm:$0xff]  }
 0x70a   :  { %9507 = vmatpush2.bf16.msra.mxu0 %v12866_v17  ;;  %9471 = vmatprep.subr.bf16.mxu1 %v12871_v58  ;;  %v12940_v17 = vld [vmem:[#allocation13 + $0x166c] ss:$16 sps:$4 sm:$0xff]   ;;  %v12935_v58 = vld [vmem:[#allocation13 + $0x1428] ss:$16 sps:$4 sm:$0xff]  }
 0x70b   :  { %9508 = vmatprep.subr.bf16.mxu0 %v12874_v39  ;;  %v12938_v39 = vld [vmem:[#allocation13 + $0x1668] ss:$16 sps:$4 sm:$0xff]  }
 0x70d   :  { %9472 = vmatpush2.bf16.msra.mxu1 %v12869_v27  ;;  %v12943_v27 = vld [vmem:[#allocation13 + $0x140c] ss:$16 sps:$4 sm:$0xff]  }
 0x70e   :  { %9509 = vmatpush2.bf16.msra.mxu0 %v12872_v40  ;;  %9473 = vmatprep.subr.bf16.mxu1 %v12877_v36  ;;  %v12946_v40 = vld [vmem:[#allocation13 + $0x164c] ss:$16 sps:$4 sm:$0xff]   ;;  %v12941_v36 = vld [vmem:[#allocation13 + $0x1408] ss:$16 sps:$4 sm:$0xff]  }
 0x70f   :  { %9510 = vmatprep.subr.bf16.mxu0 %v12880_v33  ;;  %v12944_v33 = vld [vmem:[#allocation13 + $0x1648] ss:$16 sps:$4 sm:$0xff]  }
 0x711   :  { %9474 = vmatpush2.bf16.msra.mxu1 %v12875_v46  ;;  %v12949_v46 = vld [vmem:[#allocation13 + $0x15ec] ss:$16 sps:$4 sm:$0xff]  }
 0x712   :  { %9511 = vmatpush2.bf16.msra.mxu0 %v12878_v41  ;;  %9475 = vmatprep.subr.bf16.mxu1 %v12883_v42  ;;  %v12952_v41 = vld [vmem:[#allocation13 + $0x162c] ss:$16 sps:$4 sm:$0xff]   ;;  %v12947_v42 = vld [vmem:[#allocation13 + $0x15e8] ss:$16 sps:$4 sm:$0xff]  }
 0x713   :  { %9512 = vmatprep.subr.bf16.mxu0 %v12886_v5  ;;  %v12950_v5 = vld [vmem:[#allocation13 + $0x1628] ss:$16 sps:$4 sm:$0xff]  }
 0x715   :  { %9476 = vmatpush2.bf16.msra.mxu1 %v12881_v52  ;;  %v12955_v52 = vld [vmem:[#allocation13 + $0x15cc] ss:$16 sps:$4 sm:$0xff]  }
 0x716   :  { %9513 = vmatpush2.bf16.msra.mxu0 %v12884_v9  ;;  %9477 = vmatprep.subr.bf16.mxu1 %v12889_v38  ;;  %v12958_v9 = vld [vmem:[#allocation13 + $0x160c] ss:$16 sps:$4 sm:$0xff]   ;;  %v12953_v38 = vld [vmem:[#allocation13 + $0x15c8] ss:$16 sps:$4 sm:$0xff]  }
 0x717   :  { %9514 = vmatprep.subr.bf16.mxu0 %v12892_v45  ;;  %v12956_v45 = vld [vmem:[#allocation13 + $0x1608] ss:$16 sps:$4 sm:$0xff]  }
 0x719   :  { %9478 = vmatpush2.bf16.msra.mxu1 %v12887_v21  ;;  %v12961_v21 = vld [vmem:[#allocation13 + $0x15ac] ss:$16 sps:$4 sm:$0xff]  }
 0x71a   :  { %9515 = vmatpush2.bf16.msra.mxu0 %v12890_v53  ;;  %9479 = vmatprep.subr.bf16.mxu1 %v12895_v31  ;;  %v12964_v53 = vld [vmem:[#allocation13 + $0x17ec] ss:$16 sps:$4 sm:$0xff]   ;;  %v12959_v31 = vld [vmem:[#allocation13 + $0x15a8] ss:$16 sps:$4 sm:$0xff]  }
 0x71b   :  { %9516 = vmatprep.subr.bf16.mxu0 %v12898_v16  ;;  %v12962_v16 = vld [vmem:[#allocation13 + $0x17e8] ss:$16 sps:$4 sm:$0xff]  }
 0x71d   :  { %9480 = vmatpush2.bf16.msra.mxu1 %v12893_v57  ;;  %v12967_v57 = vld [vmem:[#allocation13 + $0x158c] ss:$16 sps:$4 sm:$0xff]  }
 0x71e   :  { %9517 = vmatpush2.bf16.msra.mxu0 %v12896_v24  ;;  %9531 = vmatprep.subr.bf16.mxu1 %v12904_v48  ;;  %v12970_v24 = vld [vmem:[#allocation13 + $0x17cc] ss:$16 sps:$4 sm:$0xff]   ;;  %v12965_v48 = vld [vmem:[#allocation13 + $0x1588] ss:$16 sps:$4 sm:$0xff]  }
 0x71f   :  { %9518 = vmatprep.subr.bf16.mxu0 %v12901_v50  ;;  %v12968_v50 = vld [vmem:[#allocation13 + $0x17c8] ss:$16 sps:$4 sm:$0xff]  }
 0x720   :  { %v9237_v56 = vpop.f32.mrf.mxu1  ;;  %9482 = vmatmul.mubr.bf16.vlgmr.msra.gmra.mxu1 %v14535_v55 }
 0x721   :  { %v9238_v34 = vadd.f32 %v9237_v56, %v14615_v43  ;;  %9532 = vmatpush1.bf16.msra.mxu1 %v12902_v7  ;;  %9563 = vmatprep.mubr.bf16.mxu1 %v14539_v59  ;;  %v12914_v43 = vld [vmem:[#allocation13 + $0x16e8] ss:$16 sps:$4 sm:$0xff]   ;;  %v12922_v59 = vld [vmem:[#allocation13 + $0x16cc] ss:$16 sps:$4 sm:$0xff]  }
 0x722   :  { %9519 = vmatpush2.bf16.msra.mxu0 %v12899_v25  ;;  %v9239_v29 = vpop.f32.mrf.mxu1  ;;  %9533 = vmatprep.subr.bf16.mxu1 %v12910_v60  ;;  %v12973_v7 = vld [vmem:[#allocation13 + $0x156c] ss:$16 sps:$4 sm:$0xff]   ;;  %v12971_v60 = vld [vmem:[#allocation13 + $0x1568] ss:$16 sps:$4 sm:$0xff]  }
 0x723   :  { %v9240_v63 = vadd.f32 %v9239_v29, %v14618_v49  ;;  %9520 = vmatprep.subr.bf16.mxu0 %v12907_v18  ;;  %v12920_v49 = vld [vmem:[#allocation13 + $0x16c8] ss:$16 sps:$4 sm:$0xff]   ;;  %v12976_v25 = vld [vmem:[#allocation13 + $0x17ac] ss:$16 sps:$4 sm:$0xff]  }
 0x724   :  { %v9241_v37 = vpop.f32.mrf.mxu1  ;;  %v12974_v18 = vld [vmem:[#allocation13 + $0x17a8] ss:$16 sps:$4 sm:$0xff]   ;;  %v12979_v56 = vld [vmem:[#allocation13 + $0x154c] ss:$16 sps:$4 sm:$0xff]  }
 0x725   :  { %9534 = vmatpush1.bf16.msra.mxu1 %v12908_v28  ;;  %v12977_v28 = vld [vmem:[#allocation13 + $0x1548] ss:$16 sps:$4 sm:$0xff]   ;;  %v12991_v37 = vld [vmem:[#allocation13 + $0x150c] ss:$16 sps:$4 sm:$0xff]  }
 0x726   :  { %9521 = vmatpush2.bf16.msra.mxu0 %v12905_v26  ;;  %v9242_v55 = vpop.f32.mrf.mxu1  ;;  %9535 = vmatprep.subr.bf16.mxu1 %v12913_v2  ;;  %v12980_v29 = vld [vmem:[#allocation13 + $0x1788] ss:$16 sps:$4 sm:$0xff]   ;;  %v12985_v26 = vld [vmem:[#allocation13 + $0x152c] ss:$16 sps:$4 sm:$0xff]  }
 0x727   :  { %9572 = vmatprep.subr.bf16.mxu0 %v12916_v0  ;;  %v12988_v2 = vld [vmem:[#allocation13 + $0x176c] ss:$16 sps:$4 sm:$0xff]   ;;  %v12986_v0 = vld [vmem:[#allocation13 + $0x1768] ss:$16 sps:$4 sm:$0xff]  }
 0x728   :  { %v12989_v55 = vld [vmem:[#allocation13 + $0x1508] ss:$16 sps:$4 sm:$0xff]  }
 0x729   :  { %v9278_v44 = vpop.f32.mrf.mxu0  ;;  %9523 = vmatmul.mubr.bf16.vlgmr.msra.gmra.mxu0 %v14547_v11  ;;  %9536 = vmatpush1.bf16.msra.mxu1 %v12911_v19  ;;  %v12926_v11 = vld [vmem:[#allocation13 + $0x16a8] ss:$16 sps:$4 sm:$0xff]   ;;  %v12994_v19 = vld [vmem:[#allocation13 + $0x174c] ss:$16 sps:$4 sm:$0xff]  }
 0x72a   :  { %v14625_v3 = vadd.f32 %v9278_v44, %v9238_v34  ;;  %9573 = vmatpush1.bf16.msra.mxu0 %v12914_v43  ;;  %9604 = vmatprep.mubr.bf16.mxu0 %v14549_v22  ;;  %v12929_v22 = vld [vmem:[#allocation13 + $0x1448] ss:$16 sps:$4 sm:$0xff]   ;;  %v12982_v34 = vld [vmem:[#allocation13 + $0x178c] ss:$16 sps:$4 sm:$0xff]  }
 0x72b   :  { %v9280_v10 = vpop.f32.mrf.mxu0  ;;  %9537 = vmatprep.subr.bf16.mxu1 %v12919_v54  ;;  %9574 = vmatprep.subr.bf16.mxu0 %v12922_v59  ;;  %v12992_v43 = vld [vmem:[#allocation13 + $0x1748] ss:$16 sps:$4 sm:$0xff]   ;;  %v13000_v54 = vld [vmem:[#allocation13 + $0x186c] ss:$16 sps:$4 sm:$0xff]  }
 0x72c   :  { %v14628_v14 = vadd.f32 %v9280_v10, %v9240_v63  ;;  %v12983_v63 = vld [vmem:[#allocation13 + $0x1528] ss:$16 sps:$4 sm:$0xff]   ;;  %v12997_v59 = vld [vmem:[#allocation13 + $0x172c] ss:$16 sps:$4 sm:$0xff]  }
 0x72d   :  { %v9282_v20 = vpop.f32.mrf.mxu0  ;;  %9538 = vmatpush1.bf16.msra.mxu1 %v12917_v4  ;;  %v12998_v44 = vld [vmem:[#allocation13 + $0x1868] ss:$16 sps:$4 sm:$0xff]  }
 0x72e   :  { %9575 = vmatpush1.bf16.msra.mxu0 %v12920_v49  ;;  %9539 = vmatprep.subr.bf16.mxu1 %v12925_v8  ;;  %v12995_v4 = vld [vmem:[#allocation13 + $0x1728] ss:$16 sps:$4 sm:$0xff]   ;;  %v13006_v49 = vld [vmem:[#allocation13 + $0x184c] ss:$16 sps:$4 sm:$0xff]  }
 0x72f   :  { %v9283_v32 = vpop.f32.mrf.mxu0  ;;  %9576 = vmatprep.subr.bf16.mxu0 %v12928_v13  ;;  %v13003_v8 = vld [vmem:[#allocation13 + $0x170c] ss:$16 sps:$4 sm:$0xff]   ;;  %v13004_v20 = vld [vmem:[#allocation13 + $0x1848] ss:$16 sps:$4 sm:$0xff]  }
 0x731   :  { %9540 = vmatpush1.bf16.msra.mxu1 %v12923_v35 }
 0x732   :  { %9577 = vmatpush1.bf16.msra.mxu0 %v12926_v11  ;;  %9541 = vmatprep.subr.bf16.mxu1 %v12931_v51  ;;  %v13001_v11 = vld [vmem:[#allocation13 + $0x1708] ss:$16 sps:$4 sm:$0xff]   ;;  %v13009_v51 = vld [vmem:[#allocation13 + $0x182c] ss:$16 sps:$4 sm:$0xff]  }
 0x733   :  { %9578 = vmatprep.subr.bf16.mxu0 %v12934_v6  ;;  %v13010_v6 = vld [vmem:[#allocation16 + $0x78] sm:$0xff]  }
 0x735   :  { %9542 = vmatpush1.bf16.msra.mxu1 %v12929_v22  ;;  %v9655_v22 = vmax.f32 %v14608_v23, 0.0  ;;  %v13016_v23 = vld [vmem:[#allocation16 + $0x30] sm:$0xff]  }
 0x736   :  { %9579 = vmatpush1.bf16.msra.mxu0 %v12932_v15  ;;  %9543 = vmatprep.subr.bf16.mxu1 %v12937_v30  ;;  %v13011_v30 = vld [vmem:[#allocation16 + $0x38] sm:$0xff]  }
 0x737   :  { %9580 = vmatprep.subr.bf16.mxu0 %v12940_v17  ;;  %v13015_v17 = vld [vmem:[#allocation16 + $0x70] sm:$0xff]  }
 0x739   :  { %9544 = vmatpush1.bf16.msra.mxu1 %v12935_v58  ;;  %v9659_v58 = vpack.c.bf16 %v9655_v22, %v9655_v22 }
 0x73a   :  { %9581 = vmatpush1.bf16.msra.mxu0 %v12938_v39  ;;  %9545 = vmatprep.subr.bf16.mxu1 %v12943_v27 }
 0x73b   :  { %9582 = vmatprep.subr.bf16.mxu0 %v12946_v40 }
 0x73d   :  { %9546 = vmatpush1.bf16.msra.mxu1 %v12941_v36  ;;  %v13017_v36 = vld [vmem:[#allocation16 + $0x68] sm:$0xff]  }
 0x73e   :  { %9583 = vmatpush1.bf16.msra.mxu0 %v12944_v33  ;;  %9547 = vmatprep.subr.bf16.mxu1 %v12949_v46 }
 0x73f   :  { %9584 = vmatprep.subr.bf16.mxu0 %v12952_v41  ;;  %v13018_v41 = vld [vmem:[#allocation16 + $0x28] sm:$0xff]  }
 0x741   :  { %9548 = vmatpush2.bf16.msra.mxu1 %v12947_v42  ;;  %v13019_v42 = vld [vmem:[#allocation16 + $0x60] sm:$0xff]  }
 0x742   :  { %9585 = vmatpush1.bf16.msra.mxu0 %v12950_v5  ;;  %9549 = vmatprep.subr.bf16.mxu1 %v12955_v52  ;;  %v13029_v52 = vld [vmem:[#allocation16 + $0xf8] sm:$0xff]  }
 0x743   :  { %9586 = vmatprep.subr.bf16.mxu0 %v12958_v9  ;;  %v13031_v9 = vld [vmem:[#allocation16 + $0xf0] sm:$0xff]  }
 0x745   :  { %9550 = vmatpush2.bf16.msra.mxu1 %v12953_v38  ;;  %v13020_v38 = vld [vmem:[#allocation16 + $0x20] sm:$0xff]  }
 0x746   :  { %9587 = vmatpush1.bf16.msra.mxu0 %v12956_v45  ;;  %9551 = vmatprep.subr.bf16.mxu1 %v12961_v21  ;;  %v13032_v45 = vld [vmem:[#allocation16 + $0xb0] sm:$0xff]   ;;  %v13021_v21 = vld [vmem:[#allocation16 + $0x58] sm:$0xff]  }
 0x747   :  { %9588 = vmatprep.subr.bf16.mxu0 %v12964_v53  ;;  %v13022_v53 = vld [vmem:[#allocation16 + $0x18] sm:$0xff]  }
 0x749   :  { %9552 = vmatpush2.bf16.msra.mxu1 %v12959_v31  ;;  %v13023_v31 = vld [vmem:[#allocation16 + $0x50] sm:$0xff]  }
 0x74a   :  { %9589 = vmatpush2.bf16.msra.mxu0 %v12962_v16  ;;  %9553 = vmatprep.subr.bf16.mxu1 %v12967_v57  ;;  %v13024_v16 = vld [vmem:[#allocation16 + $0x10] sm:$0xff]   ;;  %v13025_v57 = vld [vmem:[#allocation16 + $0x48] sm:$0xff]  }
 0x74b   :  { %9590 = vmatprep.subr.bf16.mxu0 %v12970_v24  ;;  %v13026_v24 = vld [vmem:[#allocation16 + $0x8] sm:$0xff]  }
 0x74d   :  { %9554 = vmatpush2.bf16.msra.mxu1 %v12965_v48  ;;  %v13028_v48 = vld [vmem:[#allocation16] sm:$0xff]  }
 0x74e   :  { %9591 = vmatpush2.bf16.msra.mxu0 %v12968_v50  ;;  %9555 = vmatprep.subr.bf16.mxu1 %v12973_v7  ;;  %v9654_v50 = vmax.f32 %v14605_v12, 0.0  ;;  %v13037_v12 = vld [vmem:[#allocation16 + $0xd8] sm:$0xff]  }
 0x74f   :  { %9592 = vmatprep.subr.bf16.mxu0 %v12976_v25 }
 0x750   :  { %v9658_v7 = vpack.c.bf16 %v9654_v50, %v9654_v50 }
 0x751   :  { %9556 = vmatpush2.bf16.msra.mxu1 %v12971_v60 }
 0x752   :  { %9593 = vmatpush2.bf16.msra.mxu0 %v12974_v18  ;;  %9557 = vmatprep.subr.bf16.mxu1 %v12979_v56  ;;  %v13033_v18 = vld [vmem:[#allocation16 + $0xe8] sm:$0xff]  }
 0x753   :  { %9594 = vmatprep.subr.bf16.mxu0 %v12982_v34  ;;  %v13034_v34 = vld [vmem:[#allocation16 + $0xa8] sm:$0xff]  }
 0x755   :  { %9558 = vmatpush2.bf16.msra.mxu1 %v12977_v28 }
 0x756   :  { %9595 = vmatpush2.bf16.msra.mxu0 %v12980_v29  ;;  %9559 = vmatprep.subr.bf16.mxu1 %v12985_v26  ;;  %v13035_v26 = vld [vmem:[#allocation16 + $0xe0] sm:$0xff]  }
 0x757   :  { %9596 = vmatprep.subr.bf16.mxu0 %v12988_v2 }
 0x759   :  { %9560 = vmatpush2.bf16.msra.mxu1 %v12983_v63  ;;  %v13036_v63 = vld [vmem:[#allocation16 + $0xa0] sm:$0xff]  }
 0x75a   :  { %9597 = vmatpush2.bf16.msra.mxu0 %v12986_v0  ;;  %9561 = vmatprep.subr.bf16.mxu1 %v12991_v37 }
 0x75b   :  { %9598 = vmatprep.subr.bf16.mxu0 %v12994_v19  ;;  %v13038_v19 = vld [vmem:[#allocation16 + $0x98] sm:$0xff]  }
 0x75d   :  { %9562 = vmatpush2.bf16.msra.mxu1 %v12989_v55 }
 0x75e   :  { %9599 = vmatpush2.bf16.msra.mxu0 %v12992_v43  ;;  %9621 = vmatprep.subr.bf16.mxu1 %v13000_v54 }
 0x75f   :  { %9600 = vmatprep.subr.bf16.mxu0 %v12997_v59  ;;  %v13039_v59 = vld [vmem:[#allocation16 + $0xd0] sm:$0xff]  }
 0x760   :  { %v9319_v10 = vpop.f32.mrf.mxu1  ;;  %9564 = vmatmul.mubr.bf16.vlgmr.msra.gmra.mxu1 %v14559_v61  ;;  %v13007_v61 = vld [vmem:[#allocation13 + $0x1828] ss:$16 sps:$4 sm:$0xff]  }
 0x761   :  { %v9320_v13 = vadd.f32 %v9319_v10, %v14625_v3  ;;  %9622 = vmatpush1.bf16.msra.mxu1 %v12998_v44  ;;  %9645 = vmatprep.mubr.bf16.mxu1 %v13252_v47  ;;  %v13014_v47 = vld [vmem:[#allocation13 + $0x180c] ss:$16 sps:$4 sm:$0xff]   ;;  %v13040_v44 = vld [vmem:[#allocation16 + $0x90] sm:$0xff]   ;;  %v13043_v10 = vld [vmem:[#allocation16 + $0xc0] sm:$0xff]  }
 0x762   :  { %9601 = vmatpush2.bf16.msra.mxu0 %v12995_v4  ;;  %v9321_v35 = vpop.f32.mrf.mxu1  ;;  %9623 = vmatprep.subr.bf16.mxu1 %v13006_v49  ;;  %v13041_v49 = vld [vmem:[#allocation16 + $0xc8] sm:$0xff]  }
 0x763   :  { %v9322_v32 = vadd.f32 %v9321_v35, %v14628_v14  ;;  %9602 = vmatprep.subr.bf16.mxu0 %v13003_v8  ;;  %v13012_v14 = vld [vmem:[#allocation13 + $0x1808] ss:$16 sps:$4 sm:$0xff]   ;;  %v13042_v8 = vld [vmem:[#allocation16 + $0x88] sm:$0xff]  }
 0x764   :  { %v9323_v15 = vpop.f32.mrf.mxu1 }
 0x765   :  { %9624 = vmatpush1.bf16.msra.mxu1 %v13004_v20 }
 0x766   :  { %9603 = vmatpush2.bf16.msra.mxu0 %v13001_v11  ;;  %v9324_v3 = vpop.f32.mrf.mxu1  ;;  %9625 = vmatprep.subr.bf16.mxu1 %v13009_v51 }
 0x767   :  { %11212 = vmatprep.subr.bf16.mxu0 %v13010_v6 }
 0x769   :  { %v9360_v39 = vpop.f32.mrf.mxu0  ;;  %9605 = vmatmul.mubr.bf16.vlgmr.msra.gmra.mxu0 %v14567_v62  ;;  %9626 = vmatpush1.bf16.msra.mxu1 %v13007_v61  ;;  %v13030_v62 = vld [vmem:[#allocation16 + $0xb8] sm:$0xff]  }
 0x76a   :  { %v9361_v27 = vadd.f32 %v9360_v39, %v9320_v13  ;;  %11213 = vmatpush3.bf16.msra.mxu0 %v13011_v30  ;;  %9957 = vmatprep.mubr.bf16.mxu0 %v9659_v58  ;;  %v13044_v13 = vld [vmem:[#allocation16 + $0x80] sm:$0xff]  }
 0x76b   :  { %v9362_v40 = vpop.f32.mrf.mxu0  ;;  %9627 = vmatprep.subr.bf16.mxu1 %v13014_v47  ;;  %11214 = vmatprep.subr.bf16.mxu0 %v13015_v17 }
 0x76c   :  { %v9363_v33 = vadd.f32 %v9362_v40, %v9322_v32 }
 0x76d   :  { %v9364_v46 = vpop.f32.mrf.mxu0  ;;  %9628 = vmatpush1.bf16.msra.mxu1 %v13012_v14 }
 0x76e   :  { %11215 = vmatpush3.bf16.msra.mxu0 %v13016_v23  ;;  %11234 = vmatprep.subr.bf16.mxu1 %v13029_v52 }
 0x76f   :  { %v9365_v5 = vpop.f32.mrf.mxu0  ;;  %11216 = vmatprep.subr.bf16.mxu0 %v13017_v36 }
 0x770   :  { %10994 = vmatmul.mubr.msk.bf16.vlgmr.msra.gmra.mxu1 %vm988_vm5, %v14575_v1  ;;  %v13027_v1 = vld [vmem:[#allocation16 + $0x40] sm:$0xff]  }
 0x771   :  { %11235 = vmatpush3.bf16.msra.mxu1 %v13030_v62 }
 0x772   :  { %11217 = vmatpush3.bf16.msra.mxu0 %v13018_v41  ;;  %11236 = vmatprep.subr.bf16.mxu1 %v13031_v9 }
 0x773   :  { %11218 = vmatprep.subr.bf16.mxu0 %v13019_v42 }
 0x775   :  { %11237 = vmatpush3.bf16.msra.mxu1 %v13032_v45 }
 0x776   :  { %11219 = vmatpush3.bf16.msra.mxu0 %v13020_v38  ;;  %11238 = vmatprep.subr.bf16.mxu1 %v13033_v18 }
 0x777   :  { %11220 = vmatprep.subr.bf16.mxu0 %v13021_v21 }
 0x779   :  { %11239 = vmatpush3.bf16.msra.mxu1 %v13034_v34 }
 0x77a   :  { %11221 = vmatpush3.bf16.msra.mxu0 %v13022_v53  ;;  %11240 = vmatprep.subr.bf16.mxu1 %v13035_v26 }
 0x77b   :  { %11222 = vmatprep.subr.bf16.mxu0 %v13023_v31 }
 0x77d   :  { %11241 = vmatpush3.bf16.msra.mxu1 %v13036_v63 }
 0x77e   :  { %11223 = vmatpush3.bf16.msra.mxu0 %v13024_v16  ;;  %11242 = vmatprep.subr.bf16.mxu1 %v13037_v12 }
 0x77f   :  { %11224 = vmatprep.subr.bf16.mxu0 %v13025_v57 }
 0x781   :  { %11243 = vmatpush3.bf16.msra.mxu1 %v13038_v19 }
 0x782   :  { %11225 = vmatpush3.bf16.msra.mxu0 %v13026_v24  ;;  %11244 = vmatprep.subr.bf16.mxu1 %v13039_v59 }
 0x783   :  { %11226 = vmatprep.subr.bf16.mxu0 %v13027_v1 }
 0x785   :  { %11245 = vmatpush3.bf16.msra.mxu1 %v13040_v44 }
 0x786   :  { %11227 = vmatpush3.bf16.msra.mxu0 %v13028_v48  ;;  %11246 = vmatprep.subr.bf16.mxu1 %v13041_v49 }
 0x789   :  { %9958 = vmatmul.mubr.bf16.vlgmr.msra.gmra.mxu0 %v9658_v7  ;;  %11247 = vmatpush3.bf16.msra.mxu1 %v13042_v8  ;;  %v10995_v7 = vld [vmem:[#allocation18] ss:$0 sm:$0xff] }
 0x78a   :  { %11248 = vmatprep.subr.bf16.mxu1 %v13043_v10 }
 0x78d   :  { %11249 = vmatpush3.bf16.msra.mxu1 %v13044_v13 }
 0x7a0   :  { %v9401_v25 = vpop.f32.mrf.mxu1 }
 0x7a1   :  { %v9402_v60 = vadd.f32 %v9401_v25, %v9361_v27 }
 0x7a2   :  { %v9403_v56 = vpop.f32.mrf.mxu1 }
 0x7a3   :  { %v9404_v28 = vadd.f32 %v9403_v56, %v9363_v33 }
 0x7a4   :  { %v9405_v29 = vpop.f32.mrf.mxu1 }
 0x7a6   :  { %v9406_v2 = vpop.f32.mrf.mxu1 }
 0x7a9   :  { %v9442_v0 = vpop.f32.mrf.mxu0 }
 0x7aa   :  { %v9443_v37 = vadd.f32 %v9442_v0, %v9402_v60 }
 0x7ab   :  { %v9444_v55 = vpop.f32.mrf.mxu0 }
 0x7ac   :  { %v9445_v43 = vadd.f32 %v9444_v55, %v9404_v28 }
 0x7ad   :  { %v9446_v54 = vpop.f32.mrf.mxu0 }
 0x7af   :  { %v9447_v4 = vpop.f32.mrf.mxu0 }
 0x7e0   :  { %v9483_v20 = vpop.f32.mrf.mxu1 }
 0x7e1   :  { %v9484_v35 = vadd.f32 %v9483_v20, %v9443_v37 }
 0x7e2   :  { %v9485_v11 = vpop.f32.mrf.mxu1 }
 0x7e3   :  { %v9486_v51 = vadd.f32 %v9485_v11, %v9445_v43 }
 0x7e4   :  { %v9487_v32 = vpop.f32.mrf.mxu1 }
 0x7e6   :  { %v9488_v6 = vpop.f32.mrf.mxu1 }
 0x7e9   :  { %v9524_v22 = vpop.f32.mrf.mxu0 }
 0x7ea   :  { %v9525_v15 = vadd.f32 %v9524_v22, %v9484_v35 }
 0x7eb   :  { %v9526_v61 = vpop.f32.mrf.mxu0 }
 0x7ec   :  { %v9527_v3 = vadd.f32 %v9526_v61, %v9486_v51 }
 0x7ed   :  { %v9528_v30 = vpop.f32.mrf.mxu0 }
 0x7ef   :  { %v9529_v47 = vpop.f32.mrf.mxu0 }
 0x820   :  { %v9565_v17 = vpop.f32.mrf.mxu1 }
 0x821   :  { %v9566_v40 = vadd.f32 %v9565_v17, %v9525_v15 }
 0x822   :  { %v9567_v58 = vpop.f32.mrf.mxu1 }
 0x823   :  { %v9568_v33 = vadd.f32 %v9567_v58, %v9527_v3 }
 0x824   :  { %v9569_v39 = vpop.f32.mrf.mxu1 }
 0x826   :  { %v9570_v14 = vpop.f32.mrf.mxu1 }
 0x829   :  { %v9606_v27 = vpop.f32.mrf.mxu0 }
 0x82a   :  { %v9607_v46 = vadd.f32 %v9606_v27, %v9566_v40 }
 0x82b   :  { %v9608_v23 = vpop.f32.mrf.mxu0 }
 0x82c   :  { %v9609_v5 = vadd.f32 %v9608_v23, %v9568_v33 }
 0x82d   :  { %v9610_v36 = vpop.f32.mrf.mxu0 }
 0x82f   :  { %v9611_v41 = vpop.f32.mrf.mxu0 }
 0x830   :  { %v9647_v42 = vpop.f32.mrf.mxu1 }
 0x831   :  { %v9648_v52 = vadd.f32 %v9647_v42, %v9607_v46 }
 0x832   :  { %v9649_v62 = vpop.f32.mrf.mxu1 }
 0x833   :  { %v9650_v9 = vadd.f32 %v9649_v62, %v9609_v5  ;;  %v9656_v38 = vmax.f32 %v9648_v52, 0.0 }
 0x834   :  { %v9651_v45 = vpop.f32.mrf.mxu1 }
 0x835   :  { %v9657_v21 = vmax.f32 %v9650_v9, 0.0  ;;  %v9660_v16 = vpack.c.bf16 %v9656_v38, %v9656_v38 }
 0x836   :  { %v9652_v53 = vpop.f32.mrf.mxu1 }
 0x837   :  { %v9661_v31 = vpack.c.bf16 %v9657_v21, %v9657_v21 }
 0x839   :  { %9997 = vmatprep.mubr.bf16.mxu1 %v9661_v31 }
 0x83a   :  { %9998 = vmatmul.mubr.bf16.vlgmr.msra.gmra.mxu1 %v9660_v16 }
 0x849   :  { %v11228_v57 = vpop.f32.mrf.mxu0 }
 0x84b   :  { %v11229_v24 = vpop.f32.mrf.mxu0 }
 0x84c   :  { %v11230_v1 = vadd.f32 %v11229_v24, %v11228_v57 }
 0x84d   :  { %v11231_v48 = vpop.f32.mrf.mxu0 }
 0x84e   :  { %v9960_v18 = vadd.f32 %v11230_v1, %v10995_v7 }
 0x84f   :  { %v11232_v50 = vpop.f32.mrf.mxu0 }
 0x8fa   :  { %v11250_v25 = vpop.f32.mrf.mxu1 }
 0x8fc   :  { %v11251_v60 = vpop.f32.mrf.mxu1 }
 0x8fd   :  { %v11252_v56 = vadd.f32 %v11251_v60, %v11250_v25 }
 0x8fe   :  { %v11253_v34 = vpop.f32.mrf.mxu1 }
 0x8ff   :  { %v10000_v28 = vadd.f32 %v11252_v56, %v9960_v18 }
 0x900   :  { %v11254_v29 = vpop.f32.mrf.mxu1 }
 0x901   :  { %10005 = vst [vmem:[%s14653_s11] sm:$0xff] %v10000_v28 }
 0x902   :  { %10010 = vsyncpa [#allocation6], 1 }
 0x903   :  { %10011 = vsyncpa [#allocation8], 1 }
 0x904   :  { %10012 = vsyncpa [#allocation11], 1 }
 0x905   :  { %10013 = vsyncpa [#allocation14], 1 }
 0x906   :  { %10014 = vsyncpa [#allocation17], 1 }

</bundles_post_ra>
